<compile_context>
chip_gen: v7x
topology: tpu7x:2x2x1
jax: 0.10.0
libtpu: 0.0.40
codegen_flags: <defaults>
</compile_context>

<pallas_src>
import numpy as np
import jax
import jax.numpy as jnp
from jax.experimental import pallas as pl
from jax.experimental.pallas import tpu as pltpu

# ---- scaled-down CLIP ViT-B/32 config (real: 224 / 32 / 768 / 12 heads / 12 layers / 512) ----
IMG_IN = 32       # raw input spatial size
POOLED = 16       # adaptive-pool target (stands in for 224)
PATCH = 8         # patch size (stands in for 32)
WIDTH = 32        # transformer width (stands in for 768)
HEADS = 4         # (stands in for 12)
LAYERS = 2        # (stands in for 12)
EMBED = 16        # output embedding dim (stands in for 512)
NGRID = POOLED // PATCH
NP = NGRID * NGRID
NTOK = NP + 1
SPS = IMG_IN // NGRID          # raw-input pixels per patch side
LN_EPS = 1e-5

# Pool bins must be patch-local for the host-side pool/patchify fold used below.
# (General non-divisible sizes would instead use the full (S*S, R*R) pooling matrix.)
assert IMG_IN % POOLED == 0 and POOLED % PATCH == 0

_VMEM = pl.BlockSpec(memory_space=pltpu.MemorySpace.VMEM)


# ----------------------------- in-kernel helpers -----------------------------
def _layernorm(x, g, b, eps=LN_EPS):
    mu = jnp.mean(x, axis=-1, keepdims=True)
    var = jnp.mean((x - mu) ** 2, axis=-1, keepdims=True)
    return (x - mu) * jax.lax.rsqrt(var + eps) * g + b


def _mm(x3, w):
    """(B, N, D1) @ (D1, D2) -> (B, N, D2) as a 2-D MXU matmul (leading-dim reshapes are free)."""
    B, N, D1 = x3.shape
    y = jnp.dot(x3.reshape(B * N, D1), w, preferred_element_type=jnp.float32)
    return y.reshape(B, N, w.shape[1])


# ------------------------------ the fused kernel ------------------------------
def _clip_loss_kernel(xp_ref, pool_ref, wpatch_ref, addtok_ref,
                      lnpre_g_ref, lnpre_b_ref,
                      ln1g_ref, ln1b_ref, wqkv_ref, bqkv_ref, wo_ref, bo_ref,
                      ln2g_ref, ln2b_ref, wfc_ref, bfc_ref, wpr_ref, bpr_ref,
                      lnpost_g_ref, lnpost_b_ref, proj_ref, o_ref):
    xp = xp_ref[...]                        # (3, 2B*NTOK, SPS*SPS)  rows = (image, token)
    pool = pool_ref[...]                    # (SPS*SPS, PATCH*PATCH) patch-local avg-pool matrix
    rows = xp.shape[1]
    bt = rows // NTOK                       # 2B (both images batched together)

    # ---- AdaptiveAvgPool2d per patch, per channel; concat channels -> (c, ph, pw) features ----
    pooled = [jnp.dot(xp[c], pool, preferred_element_type=jnp.float32) for c in range(3)]
    patches = jnp.concatenate(pooled, axis=-1)                 # (2B*NTOK, 3*P*P)

    # ---- patch embedding (conv1-as-matmul; CLIP renorm affine folded into the weight),
    #      cls token + positional embedding + renorm bias folded into add_tok, then ln_pre ----
    emb = jnp.dot(patches, wpatch_ref[...], preferred_element_type=jnp.float32)  # (2B*NTOK, D)
    tok = emb.reshape(bt, NTOK, WIDTH) + addtok_ref[...][None, :, :]
    tok = _layernorm(tok, lnpre_g_ref[...], lnpre_b_ref[...])                    # (2B, NTOK, D)

    # ---- residual attention blocks (all weights VMEM-resident, static unroll) ----
    hd = WIDTH // HEADS
    scale = 1.0 / float(np.sqrt(hd))
    for l in range(LAYERS):
        h = _layernorm(tok, ln1g_ref[l], ln1b_ref[l])
        qkv = _mm(h, wqkv_ref[l]) + bqkv_ref[l]                # (2B, N, 3D)
        q = qkv[:, :, 0:WIDTH]
        k = qkv[:, :, WIDTH:2 * WIDTH]
        v = qkv[:, :, 2 * WIDTH:3 * WIDTH]
        # Per-head scores/softmax/values as single-batch 3-D einsums (Mosaic-safe dot form);
        # head outputs are concatenated so the out-proj is ONE (B*N, D) @ (D, D) matmul.
        # TODO(synk): a fully head-batched formulation needs rank-4 multi-batch dot_general /
        # middle-dim transposes, which Mosaic lowering does not reliably support.
        heads = []
        for i in range(HEADS):
            lo = i * hd
            qh, kh, vh = q[:, :, lo:lo + hd], k[:, :, lo:lo + hd], v[:, :, lo:lo + hd]
            s = jnp.einsum('bqd,bkd->bqk', qh, kh,
                           preferred_element_type=jnp.float32) * scale
            pa = jax.nn.softmax(s, axis=-1)
            heads.append(jnp.einsum('bqk,bkd->bqd', pa, vh,
                                    preferred_element_type=jnp.float32))
        attn = jnp.concatenate(heads, axis=-1)                 # (2B, N, D)
        tok = tok + _mm(attn, wo_ref[l]) + bo_ref[l]

        h2 = _layernorm(tok, ln2g_ref[l], ln2b_ref[l])
        m = _mm(h2, wfc_ref[l]) + bfc_ref[l]
        m = m * jax.nn.sigmoid(1.702 * m)                      # QuickGELU
        tok = tok + _mm(m, wpr_ref[l]) + bpr_ref[l]

    # ---- ln_post on cls token, projection, CosineEmbeddingLoss with target = 1 ----
    clsf = _layernorm(tok[:, 0:1, :], lnpost_g_ref[...], lnpost_b_ref[...])   # (2B, 1, D)
    feats = _mm(clsf, proj_ref[...])                                          # (2B, 1, E)
    half = bt // 2
    fa, fb = feats[0:half], feats[half:]
    eps = 1e-8
    num = jnp.sum(fa * fb, axis=-1)                                           # (B, 1)
    na = jnp.maximum(jnp.sqrt(jnp.sum(fa * fa, axis=-1)), eps)
    nb = jnp.maximum(jnp.sqrt(jnp.sum(fb * fb, axis=-1)), eps)
    cos = num * pl.reciprocal(na * nb, approx=True)
    o_ref[...] = jnp.mean(1.0 - cos).reshape(1, 1)


# ------------------------------ host-side helpers ------------------------------
def adaptive_avg_pool_matrix(in_size, out_size):
    """Row-averaging matrix implementing torch AdaptiveAvgPool1d bins exactly."""
    m = np.zeros((out_size, in_size), np.float32)
    for i in range(out_size):
        start = (i * in_size) // out_size
        end = -((-(i + 1) * in_size) // out_size)    # ceil
        m[i, start:end] = 1.0 / (end - start)
    return m


def local_pool_patch_matrix():
    """(SPS*SPS, P*P): AdaptiveAvgPool2d restricted to one patch (bins are patch-local here)."""
    pm = adaptive_avg_pool_matrix(SPS, PATCH)                  # (PATCH, SPS)
    m = np.zeros((SPS * SPS, PATCH * PATCH), np.float32)
    for r in range(PATCH * PATCH):
        ph, pw = r // PATCH, r % PATCH
        m[:, r] = np.outer(pm[ph], pm[pw]).reshape(-1)
    return m


def init_params(key):
    ks = iter(jax.random.split(key, 8 + 12 * LAYERS))

    def nrm(shape, scale=0.02):
        return scale * jax.random.normal(next(ks), shape, dtype=jnp.float32)

    # CLIP renormalization ((x*0.5+0.5) - mean)/std == x * a_c + b_c (per channel),
    # folded host-side into the patch-embed weight (a_c) and the additive token term (b_c).
    mean = np.array([0.48145466, 0.4578275, 0.40821073], np.float32)
    std = np.array([0.26862954, 0.26130258, 0.27577711], np.float32)
    a_c = 0.5 / std
    b_c = (0.5 - mean) / std

    pp = PATCH * PATCH
    cpp = 3 * pp
    conv_w = nrm((WIDTH, 3, PATCH, PATCH))                     # CLIP conv1 weight (no bias)
    w_patch = conv_w.reshape(WIDTH, cpp).T                     # (C*P*P, D), rows in (c,ph,pw) order
    row_scale = jnp.asarray(np.repeat(a_c, pp))                # (cpp,)
    row_shift = jnp.asarray(np.repeat(b_c, pp))
    w_patch_eff = w_patch * row_scale[:, None]                 # multiplicative renorm fold
    bias_eff = row_shift[None, :] @ w_patch                    # (1, D) additive renorm fold

    cls = nrm((1, WIDTH))
    pos = nrm((NTOK, WIDTH))
    # per-token additive term: cls + pos[0] for the class token; pos[t] + renorm bias for patches
    add_tok = jnp.concatenate([cls + pos[0:1, :], pos[1:, :] + bias_eff], axis=0)   # (NTOK, D)

    ln1g, ln1b, wqkv, bqkv, wo, bo = [], [], [], [], [], []
    ln2g, ln2b, wfc, bfc, wpr, bpr = [], [], [], [], [], []
    for _ in range(LAYERS):
        ln1g.append(jnp.ones((1, WIDTH), jnp.float32))
        ln1b.append(jnp.zeros((1, WIDTH), jnp.float32))
        wqkv.append(nrm((WIDTH, 3 * WIDTH)))
        bqkv.append(nrm((1, 3 * WIDTH)))
        wo.append(nrm((WIDTH, WIDTH)))
        bo.append(nrm((1, WIDTH)))
        ln2g.append(jnp.ones((1, WIDTH), jnp.float32))
        ln2b.append(jnp.zeros((1, WIDTH), jnp.float32))
        wfc.append(nrm((WIDTH, 4 * WIDTH)))
        bfc.append(nrm((1, 4 * WIDTH)))
        wpr.append(nrm((4 * WIDTH, WIDTH)))
        bpr.append(nrm((1, WIDTH)))
    stk = lambda xs: jnp.stack(xs, axis=0)

    return {
        "pool": jnp.asarray(local_pool_patch_matrix()),
        "w_patch": w_patch_eff,
        "add_tok": add_tok,
        "ln_pre_g": jnp.ones((1, WIDTH), jnp.float32),
        "ln_pre_b": jnp.zeros((1, WIDTH), jnp.float32),
        "blk_ln1g": stk(ln1g), "blk_ln1b": stk(ln1b),
        "blk_wqkv": stk(wqkv), "blk_bqkv": stk(bqkv),
        "blk_wo": stk(wo), "blk_bo": stk(bo),
        "blk_ln2g": stk(ln2g), "blk_ln2b": stk(ln2b),
        "blk_wfc": stk(wfc), "blk_bfc": stk(bfc),
        "blk_wpr": stk(wpr), "blk_bpr": stk(bpr),
        "ln_post_g": jnp.ones((1, WIDTH), jnp.float32),
        "ln_post_b": jnp.zeros((1, WIDTH), jnp.float32),
        "proj": nrm((WIDTH, EMBED)),
    }


def _prep_inputs(masked_generated, masked_img_tensor):
    """Concat both images along batch and patchify the RAW input into per-patch pixel rows
    (plus a zero 'cls' row per image) so the kernel never needs lane->sublane relayouts."""
    x = jnp.concatenate([masked_generated, masked_img_tensor], axis=0)   # (2B, 3, S, S)
    b2 = x.shape[0]
    x = x.reshape(b2, 3, NGRID, SPS, NGRID, SPS)
    x = x.transpose(1, 0, 2, 4, 3, 5)                                    # (3, 2B, gh, gw, hi, wi)
    x = x.reshape(3, b2, NP, SPS * SPS)
    cls_rows = jnp.zeros((3, b2, 1, SPS * SPS), x.dtype)
    return jnp.concatenate([cls_rows, x], axis=2).reshape(3, b2 * NTOK, SPS * SPS)


@jax.jit
def image_embedding_loss(masked_generated, masked_img_tensor, params):
    xp = _prep_inputs(masked_generated, masked_img_tensor)
    args = (xp, params["pool"], params["w_patch"], params["add_tok"],
            params["ln_pre_g"], params["ln_pre_b"],
            params["blk_ln1g"], params["blk_ln1b"], params["blk_wqkv"], params["blk_bqkv"],
            params["blk_wo"], params["blk_bo"], params["blk_ln2g"], params["blk_ln2b"],
            params["blk_wfc"], params["blk_bfc"], params["blk_wpr"], params["blk_bpr"],
            params["ln_post_g"], params["ln_post_b"], params["proj"])
    out = pl.pallas_call(
        _clip_loss_kernel,
        out_shape=jax.ShapeDtypeStruct((1, 1), jnp.float32),
        in_specs=[_VMEM] * len(args),
        out_specs=_VMEM,
    )(*args)
    return out[0, 0]


if __name__ == "__main__":
    key = jax.random.PRNGKey(0)
    k_params, k_a, k_b = jax.random.split(key, 3)
    params = init_params(k_params)
    masked_generated = jax.random.normal(k_a, (2, 3, IMG_IN, IMG_IN), jnp.float32)
    masked_img_tensor = jax.random.normal(k_b, (2, 3, IMG_IN, IMG_IN), jnp.float32)
    loss = image_embedding_loss(masked_generated, masked_img_tensor, params)
    jax.block_until_ready(loss)
    print("KERNEL_OK")
</pallas_src>

<mosaic_0001>
module attributes {stable_mosaic.version = 11 : i64} {
  func.func @_clip_loss_kernel(%arg0: memref<3x20x256xf32, #tpu.memory_space<vmem>>, %arg1: memref<256x64xf32, #tpu.memory_space<vmem>>, %arg2: memref<192x32xf32, #tpu.memory_space<vmem>>, %arg3: memref<5x32xf32, #tpu.memory_space<vmem>>, %arg4: memref<1x32xf32, #tpu.memory_space<vmem>>, %arg5: memref<1x32xf32, #tpu.memory_space<vmem>>, %arg6: memref<2x1x32xf32, #tpu.memory_space<vmem>>, %arg7: memref<2x1x32xf32, #tpu.memory_space<vmem>>, %arg8: memref<2x32x96xf32, #tpu.memory_space<vmem>>, %arg9: memref<2x1x96xf32, #tpu.memory_space<vmem>>, %arg10: memref<2x32x32xf32, #tpu.memory_space<vmem>>, %arg11: memref<2x1x32xf32, #tpu.memory_space<vmem>>, %arg12: memref<2x1x32xf32, #tpu.memory_space<vmem>>, %arg13: memref<2x1x32xf32, #tpu.memory_space<vmem>>, %arg14: memref<2x32x128xf32, #tpu.memory_space<vmem>>, %arg15: memref<2x1x128xf32, #tpu.memory_space<vmem>>, %arg16: memref<2x128x32xf32, #tpu.memory_space<vmem>>, %arg17: memref<2x1x32xf32, #tpu.memory_space<vmem>>, %arg18: memref<1x32xf32, #tpu.memory_space<vmem>>, %arg19: memref<1x32xf32, #tpu.memory_space<vmem>>, %arg20: memref<32x16xf32, #tpu.memory_space<vmem>>, %arg21: memref<1x1xf32, #tpu.memory_space<vmem>>) attributes {dimension_semantics = [], scalar_prefetch = 0 : i64, scratch_operands = 0 : i64, tpu.core_type = #tpu.core_type<tc>} {
    %c0 = arith.constant 0 : index
    %c0_0 = arith.constant 0 : index
    %c0_1 = arith.constant 0 : index
    %0 = vector.load %arg0[%c0, %c0_0, %c0_1] : memref<3x20x256xf32, #tpu.memory_space<vmem>>, vector<3x20x256xf32>
    %c0_2 = arith.constant 0 : index
    %c0_3 = arith.constant 0 : index
    %1 = vector.load %arg1[%c0_2, %c0_3] : memref<256x64xf32, #tpu.memory_space<vmem>>, vector<256x64xf32>
    %2 = vector.extract_strided_slice %0 {offsets = [0, 0, 0], sizes = [1, 20, 256], strides = [1, 1, 1]} : vector<3x20x256xf32> to vector<1x20x256xf32>
    %3 = vector.shape_cast %2 : vector<1x20x256xf32> to vector<20x256xf32>
    %cst = arith.constant dense<0.000000e+00> : vector<20x64xf32>
    %4 = tpu.matmul %3, %1, %cst {dimension_numbers = #tpu.dot_dimension_numbers<[1], [0], [0], [1], [0, 0, 1, 1], [], []>} : vector<20x256xf32>, vector<256x64xf32>, vector<20x64xf32> -> vector<20x64xf32>
    %5 = vector.extract_strided_slice %0 {offsets = [1, 0, 0], sizes = [1, 20, 256], strides = [1, 1, 1]} : vector<3x20x256xf32> to vector<1x20x256xf32>
    %6 = vector.shape_cast %5 : vector<1x20x256xf32> to vector<20x256xf32>
    %cst_4 = arith.constant dense<0.000000e+00> : vector<20x64xf32>
    %7 = tpu.matmul %6, %1, %cst_4 {dimension_numbers = #tpu.dot_dimension_numbers<[1], [0], [0], [1], [0, 0, 1, 1], [], []>} : vector<20x256xf32>, vector<256x64xf32>, vector<20x64xf32> -> vector<20x64xf32>
    %8 = vector.extract_strided_slice %0 {offsets = [2, 0, 0], sizes = [1, 20, 256], strides = [1, 1, 1]} : vector<3x20x256xf32> to vector<1x20x256xf32>
    %9 = vector.shape_cast %8 : vector<1x20x256xf32> to vector<20x256xf32>
    %cst_5 = arith.constant dense<0.000000e+00> : vector<20x64xf32>
    %10 = tpu.matmul %9, %1, %cst_5 {dimension_numbers = #tpu.dot_dimension_numbers<[1], [0], [0], [1], [0, 0, 1, 1], [], []>} : vector<20x256xf32>, vector<256x64xf32>, vector<20x64xf32> -> vector<20x64xf32>
    %11 = tpu.concatenate %4, %7, %10 in 1 : vector<20x64xf32>, vector<20x64xf32>, vector<20x64xf32> -> vector<20x192xf32>
    %c0_6 = arith.constant 0 : index
    %c0_7 = arith.constant 0 : index
    %12 = vector.load %arg2[%c0_6, %c0_7] : memref<192x32xf32, #tpu.memory_space<vmem>>, vector<192x32xf32>
    %cst_8 = arith.constant dense<0.000000e+00> : vector<20x32xf32>
    %13 = tpu.matmul %11, %12, %cst_8 {dimension_numbers = #tpu.dot_dimension_numbers<[1], [0], [0], [1], [0, 0, 1, 1], [], []>} : vector<20x192xf32>, vector<192x32xf32>, vector<20x32xf32> -> vector<20x32xf32>
    %14 = vector.shape_cast %13 : vector<20x32xf32> to vector<4x5x32xf32>
    %c0_9 = arith.constant 0 : index
    %c0_10 = arith.constant 0 : index
    %15 = vector.load %arg3[%c0_9, %c0_10] : memref<5x32xf32, #tpu.memory_space<vmem>>, vector<5x32xf32>
    %16 = vector.shape_cast %15 : vector<5x32xf32> to vector<1x5x32xf32>
    %17 = vector.broadcast %16 : vector<1x5x32xf32> to vector<4x5x32xf32>
    %18 = arith.addf %14, %17 : vector<4x5x32xf32>
    %c0_11 = arith.constant 0 : index
    %c0_12 = arith.constant 0 : index
    %19 = vector.load %arg4[%c0_11, %c0_12] : memref<1x32xf32, #tpu.memory_space<vmem>>, vector<1x32xf32>
    %c0_13 = arith.constant 0 : index
    %c0_14 = arith.constant 0 : index
    %20 = vector.load %arg5[%c0_13, %c0_14] : memref<1x32xf32, #tpu.memory_space<vmem>>, vector<1x32xf32>
    %cst_15 = arith.constant dense<0.000000e+00> : vector<4x5xf32>
    %21 = vector.multi_reduction <add>, %18, %cst_15 [2] : vector<4x5x32xf32> to vector<4x5xf32>
    %22 = vector.shape_cast %21 : vector<4x5xf32> to vector<4x5x1xf32>
    %cst_16 = arith.constant 3.200000e+01 : f32
    %23 = vector.broadcast %cst_16 : f32 to vector<4x5x1xf32>
    %24 = arith.divf %22, %23 : vector<4x5x1xf32>
    %25 = vector.broadcast %24 : vector<4x5x1xf32> to vector<4x5x32xf32>
    %26 = arith.subf %18, %25 : vector<4x5x32xf32>
    %27 = arith.mulf %26, %26 : vector<4x5x32xf32>
    %cst_17 = arith.constant dense<0.000000e+00> : vector<4x5xf32>
    %28 = vector.multi_reduction <add>, %27, %cst_17 [2] : vector<4x5x32xf32> to vector<4x5xf32>
    %29 = vector.shape_cast %28 : vector<4x5xf32> to vector<4x5x1xf32>
    %cst_18 = arith.constant 3.200000e+01 : f32
    %30 = vector.broadcast %cst_18 : f32 to vector<4x5x1xf32>
    %31 = arith.divf %29, %30 : vector<4x5x1xf32>
    %32 = vector.broadcast %24 : vector<4x5x1xf32> to vector<4x5x32xf32>
    %33 = arith.subf %18, %32 : vector<4x5x32xf32>
    %cst_19 = arith.constant 9.99999974E-6 : f32
    %34 = vector.broadcast %cst_19 : f32 to vector<4x5x1xf32>
    %35 = arith.addf %31, %34 : vector<4x5x1xf32>
    %36 = math.rsqrt %35 : vector<4x5x1xf32>
    %37 = vector.broadcast %36 : vector<4x5x1xf32> to vector<4x5x32xf32>
    %38 = arith.mulf %33, %37 : vector<4x5x32xf32>
    %39 = vector.shape_cast %19 : vector<1x32xf32> to vector<1x1x32xf32>
    %40 = vector.broadcast %39 : vector<1x1x32xf32> to vector<4x5x32xf32>
    %41 = arith.mulf %38, %40 : vector<4x5x32xf32>
    %42 = vector.shape_cast %20 : vector<1x32xf32> to vector<1x1x32xf32>
    %43 = vector.broadcast %42 : vector<1x1x32xf32> to vector<4x5x32xf32>
    %44 = arith.addf %41, %43 : vector<4x5x32xf32>
    %c0_20 = arith.constant 0 : index
    %c0_21 = arith.constant 0 : index
    %c0_22 = arith.constant 0 : index
    %45 = vector.load %arg6[%c0_20, %c0_21, %c0_22] : memref<2x1x32xf32, #tpu.memory_space<vmem>>, vector<1x1x32xf32>
    %46 = vector.shape_cast %45 : vector<1x1x32xf32> to vector<1x32xf32>
    %c0_23 = arith.constant 0 : index
    %c0_24 = arith.constant 0 : index
    %c0_25 = arith.constant 0 : index
    %47 = vector.load %arg7[%c0_23, %c0_24, %c0_25] : memref<2x1x32xf32, #tpu.memory_space<vmem>>, vector<1x1x32xf32>
    %48 = vector.shape_cast %47 : vector<1x1x32xf32> to vector<1x32xf32>
    %cst_26 = arith.constant dense<0.000000e+00> : vector<4x5xf32>
    %49 = vector.multi_reduction <add>, %44, %cst_26 [2] : vector<4x5x32xf32> to vector<4x5xf32>
    %50 = vector.shape_cast %49 : vector<4x5xf32> to vector<4x5x1xf32>
    %cst_27 = arith.constant 3.200000e+01 : f32
    %51 = vector.broadcast %cst_27 : f32 to vector<4x5x1xf32>
    %52 = arith.divf %50, %51 : vector<4x5x1xf32>
    %53 = vector.broadcast %52 : vector<4x5x1xf32> to vector<4x5x32xf32>
    %54 = arith.subf %44, %53 : vector<4x5x32xf32>
    %55 = arith.mulf %54, %54 : vector<4x5x32xf32>
    %cst_28 = arith.constant dense<0.000000e+00> : vector<4x5xf32>
    %56 = vector.multi_reduction <add>, %55, %cst_28 [2] : vector<4x5x32xf32> to vector<4x5xf32>
    %57 = vector.shape_cast %56 : vector<4x5xf32> to vector<4x5x1xf32>
    %cst_29 = arith.constant 3.200000e+01 : f32
    %58 = vector.broadcast %cst_29 : f32 to vector<4x5x1xf32>
    %59 = arith.divf %57, %58 : vector<4x5x1xf32>
    %60 = vector.broadcast %52 : vector<4x5x1xf32> to vector<4x5x32xf32>
    %61 = arith.subf %44, %60 : vector<4x5x32xf32>
    %cst_30 = arith.constant 9.99999974E-6 : f32
    %62 = vector.broadcast %cst_30 : f32 to vector<4x5x1xf32>
    %63 = arith.addf %59, %62 : vector<4x5x1xf32>
    %64 = math.rsqrt %63 : vector<4x5x1xf32>
    %65 = vector.broadcast %64 : vector<4x5x1xf32> to vector<4x5x32xf32>
    %66 = arith.mulf %61, %65 : vector<4x5x32xf32>
    %67 = vector.shape_cast %46 : vector<1x32xf32> to vector<1x1x32xf32>
    %68 = vector.broadcast %67 : vector<1x1x32xf32> to vector<4x5x32xf32>
    %69 = arith.mulf %66, %68 : vector<4x5x32xf32>
    %70 = vector.shape_cast %48 : vector<1x32xf32> to vector<1x1x32xf32>
    %71 = vector.broadcast %70 : vector<1x1x32xf32> to vector<4x5x32xf32>
    %72 = arith.addf %69, %71 : vector<4x5x32xf32>
    %c0_31 = arith.constant 0 : index
    %c0_32 = arith.constant 0 : index
    %c0_33 = arith.constant 0 : index
    %73 = vector.load %arg8[%c0_31, %c0_32, %c0_33] : memref<2x32x96xf32, #tpu.memory_space<vmem>>, vector<1x32x96xf32>
    %74 = vector.shape_cast %73 : vector<1x32x96xf32> to vector<32x96xf32>
    %75 = vector.shape_cast %72 : vector<4x5x32xf32> to vector<20x32xf32>
    %cst_34 = arith.constant dense<0.000000e+00> : vector<20x96xf32>
    %76 = tpu.matmul %75, %74, %cst_34 {dimension_numbers = #tpu.dot_dimension_numbers<[1], [0], [0], [1], [0, 0, 1, 1], [], []>} : vector<20x32xf32>, vector<32x96xf32>, vector<20x96xf32> -> vector<20x96xf32>
    %77 = vector.shape_cast %76 : vector<20x96xf32> to vector<4x5x96xf32>
    %c0_35 = arith.constant 0 : index
    %c0_36 = arith.constant 0 : index
    %c0_37 = arith.constant 0 : index
    %78 = vector.load %arg9[%c0_35, %c0_36, %c0_37] : memref<2x1x96xf32, #tpu.memory_space<vmem>>, vector<1x1x96xf32>
    %79 = vector.shape_cast %78 : vector<1x1x96xf32> to vector<1x96xf32>
    %80 = vector.shape_cast %79 : vector<1x96xf32> to vector<1x1x96xf32>
    %81 = vector.broadcast %80 : vector<1x1x96xf32> to vector<4x5x96xf32>
    %82 = arith.addf %77, %81 : vector<4x5x96xf32>
    %83 = vector.extract_strided_slice %82 {offsets = [0, 0, 0], sizes = [4, 5, 32], strides = [1, 1, 1]} : vector<4x5x96xf32> to vector<4x5x32xf32>
    %84 = vector.extract_strided_slice %82 {offsets = [0, 0, 32], sizes = [4, 5, 32], strides = [1, 1, 1]} : vector<4x5x96xf32> to vector<4x5x32xf32>
    %85 = vector.extract_strided_slice %82 {offsets = [0, 0, 64], sizes = [4, 5, 32], strides = [1, 1, 1]} : vector<4x5x96xf32> to vector<4x5x32xf32>
    %86 = vector.extract_strided_slice %83 {offsets = [0, 0, 0], sizes = [4, 5, 8], strides = [1, 1, 1]} : vector<4x5x32xf32> to vector<4x5x8xf32>
    %87 = vector.extract_strided_slice %84 {offsets = [0, 0, 0], sizes = [4, 5, 8], strides = [1, 1, 1]} : vector<4x5x32xf32> to vector<4x5x8xf32>
    %88 = vector.extract_strided_slice %85 {offsets = [0, 0, 0], sizes = [4, 5, 8], strides = [1, 1, 1]} : vector<4x5x32xf32> to vector<4x5x8xf32>
    "tpu.trace_start"() <{level = 10 : i32, message = "bqd,bkd->bqk"}> : () -> ()
    %cst_38 = arith.constant dense<0.000000e+00> : vector<4x5x5xf32>
    %89 = tpu.matmul %86, %87, %cst_38 {dimension_numbers = #tpu.dot_dimension_numbers<[2], [2], [1], [1], [0, 0, 0, 1, 1, 1], [0], [0]>} : vector<4x5x8xf32>, vector<4x5x8xf32>, vector<4x5x5xf32> -> vector<4x5x5xf32>
    "tpu.trace_stop"() : () -> ()
    %cst_39 = arith.constant 0.353553385 : f32
    %90 = vector.broadcast %cst_39 : f32 to vector<4x5x5xf32>
    %91 = arith.mulf %89, %90 : vector<4x5x5xf32>
    %cst_40 = arith.constant dense<0xFF800000> : vector<4x5xf32>
    %92 = vector.multi_reduction <maximumf>, %91, %cst_40 [2] : vector<4x5x5xf32> to vector<4x5xf32>
    %cst_41 = arith.constant 0xFF800000 : f32
    %93 = vector.broadcast %cst_41 : f32 to vector<4x5xf32>
    %94 = arith.maximumf %93, %92 : vector<4x5xf32>
    %95 = vector.shape_cast %94 : vector<4x5xf32> to vector<4x5x1xf32>
    %96 = vector.broadcast %95 : vector<4x5x1xf32> to vector<4x5x5xf32>
    %97 = arith.subf %91, %96 : vector<4x5x5xf32>
    %98 = math.exp %97 : vector<4x5x5xf32>
    %cst_42 = arith.constant dense<0.000000e+00> : vector<4x5xf32>
    %99 = vector.multi_reduction <add>, %98, %cst_42 [2] : vector<4x5x5xf32> to vector<4x5xf32>
    %100 = vector.shape_cast %99 : vector<4x5xf32> to vector<4x5x1xf32>
    %101 = vector.broadcast %100 : vector<4x5x1xf32> to vector<4x5x5xf32>
    %102 = arith.divf %98, %101 : vector<4x5x5xf32>
    "tpu.trace_start"() <{level = 10 : i32, message = "bqk,bkd->bqd"}> : () -> ()
    %cst_43 = arith.constant dense<0.000000e+00> : vector<4x5x8xf32>
    %103 = tpu.matmul %102, %88, %cst_43 {dimension_numbers = #tpu.dot_dimension_numbers<[2], [1], [1], [2], [0, 0, 0, 1, 1, 2], [0], [0]>} : vector<4x5x5xf32>, vector<4x5x8xf32>, vector<4x5x8xf32> -> vector<4x5x8xf32>
    "tpu.trace_stop"() : () -> ()
    %104 = vector.extract_strided_slice %83 {offsets = [0, 0, 8], sizes = [4, 5, 8], strides = [1, 1, 1]} : vector<4x5x32xf32> to vector<4x5x8xf32>
    %105 = vector.extract_strided_slice %84 {offsets = [0, 0, 8], sizes = [4, 5, 8], strides = [1, 1, 1]} : vector<4x5x32xf32> to vector<4x5x8xf32>
    %106 = vector.extract_strided_slice %85 {offsets = [0, 0, 8], sizes = [4, 5, 8], strides = [1, 1, 1]} : vector<4x5x32xf32> to vector<4x5x8xf32>
    "tpu.trace_start"() <{level = 10 : i32, message = "bqd,bkd->bqk"}> : () -> ()
    %cst_44 = arith.constant dense<0.000000e+00> : vector<4x5x5xf32>
    %107 = tpu.matmul %104, %105, %cst_44 {dimension_numbers = #tpu.dot_dimension_numbers<[2], [2], [1], [1], [0, 0, 0, 1, 1, 1], [0], [0]>} : vector<4x5x8xf32>, vector<4x5x8xf32>, vector<4x5x5xf32> -> vector<4x5x5xf32>
    "tpu.trace_stop"() : () -> ()
    %cst_45 = arith.constant 0.353553385 : f32
    %108 = vector.broadcast %cst_45 : f32 to vector<4x5x5xf32>
    %109 = arith.mulf %107, %108 : vector<4x5x5xf32>
    %cst_46 = arith.constant dense<0xFF800000> : vector<4x5xf32>
    %110 = vector.multi_reduction <maximumf>, %109, %cst_46 [2] : vector<4x5x5xf32> to vector<4x5xf32>
    %cst_47 = arith.constant 0xFF800000 : f32
    %111 = vector.broadcast %cst_47 : f32 to vector<4x5xf32>
    %112 = arith.maximumf %111, %110 : vector<4x5xf32>
    %113 = vector.shape_cast %112 : vector<4x5xf32> to vector<4x5x1xf32>
    %114 = vector.broadcast %113 : vector<4x5x1xf32> to vector<4x5x5xf32>
    %115 = arith.subf %109, %114 : vector<4x5x5xf32>
    %116 = math.exp %115 : vector<4x5x5xf32>
    %cst_48 = arith.constant dense<0.000000e+00> : vector<4x5xf32>
    %117 = vector.multi_reduction <add>, %116, %cst_48 [2] : vector<4x5x5xf32> to vector<4x5xf32>
    %118 = vector.shape_cast %117 : vector<4x5xf32> to vector<4x5x1xf32>
    %119 = vector.broadcast %118 : vector<4x5x1xf32> to vector<4x5x5xf32>
    %120 = arith.divf %116, %119 : vector<4x5x5xf32>
    "tpu.trace_start"() <{level = 10 : i32, message = "bqk,bkd->bqd"}> : () -> ()
    %cst_49 = arith.constant dense<0.000000e+00> : vector<4x5x8xf32>
    %121 = tpu.matmul %120, %106, %cst_49 {dimension_numbers = #tpu.dot_dimension_numbers<[2], [1], [1], [2], [0, 0, 0, 1, 1, 2], [0], [0]>} : vector<4x5x5xf32>, vector<4x5x8xf32>, vector<4x5x8xf32> -> vector<4x5x8xf32>
    "tpu.trace_stop"() : () -> ()
    %122 = vector.extract_strided_slice %83 {offsets = [0, 0, 16], sizes = [4, 5, 8], strides = [1, 1, 1]} : vector<4x5x32xf32> to vector<4x5x8xf32>
    %123 = vector.extract_strided_slice %84 {offsets = [0, 0, 16], sizes = [4, 5, 8], strides = [1, 1, 1]} : vector<4x5x32xf32> to vector<4x5x8xf32>
    %124 = vector.extract_strided_slice %85 {offsets = [0, 0, 16], sizes = [4, 5, 8], strides = [1, 1, 1]} : vector<4x5x32xf32> to vector<4x5x8xf32>
    "tpu.trace_start"() <{level = 10 : i32, message = "bqd,bkd->bqk"}> : () -> ()
    %cst_50 = arith.constant dense<0.000000e+00> : vector<4x5x5xf32>
    %125 = tpu.matmul %122, %123, %cst_50 {dimension_numbers = #tpu.dot_dimension_numbers<[2], [2], [1], [1], [0, 0, 0, 1, 1, 1], [0], [0]>} : vector<4x5x8xf32>, vector<4x5x8xf32>, vector<4x5x5xf32> -> vector<4x5x5xf32>
    "tpu.trace_stop"() : () -> ()
    %cst_51 = arith.constant 0.353553385 : f32
    %126 = vector.broadcast %cst_51 : f32 to vector<4x5x5xf32>
    %127 = arith.mulf %125, %126 : vector<4x5x5xf32>
    %cst_52 = arith.constant dense<0xFF800000> : vector<4x5xf32>
    %128 = vector.multi_reduction <maximumf>, %127, %cst_52 [2] : vector<4x5x5xf32> to vector<4x5xf32>
    %cst_53 = arith.constant 0xFF800000 : f32
    %129 = vector.broadcast %cst_53 : f32 to vector<4x5xf32>
    %130 = arith.maximumf %129, %128 : vector<4x5xf32>
    %131 = vector.shape_cast %130 : vector<4x5xf32> to vector<4x5x1xf32>
    %132 = vector.broadcast %131 : vector<4x5x1xf32> to vector<4x5x5xf32>
    %133 = arith.subf %127, %132 : vector<4x5x5xf32>
    %134 = math.exp %133 : vector<4x5x5xf32>
    %cst_54 = arith.constant dense<0.000000e+00> : vector<4x5xf32>
    %135 = vector.multi_reduction <add>, %134, %cst_54 [2] : vector<4x5x5xf32> to vector<4x5xf32>
    %136 = vector.shape_cast %135 : vector<4x5xf32> to vector<4x5x1xf32>
    %137 = vector.broadcast %136 : vector<4x5x1xf32> to vector<4x5x5xf32>
    %138 = arith.divf %134, %137 : vector<4x5x5xf32>
    "tpu.trace_start"() <{level = 10 : i32, message = "bqk,bkd->bqd"}> : () -> ()
    %cst_55 = arith.constant dense<0.000000e+00> : vector<4x5x8xf32>
    %139 = tpu.matmul %138, %124, %cst_55 {dimension_numbers = #tpu.dot_dimension_numbers<[2], [1], [1], [2], [0, 0, 0, 1, 1, 2], [0], [0]>} : vector<4x5x5xf32>, vector<4x5x8xf32>, vector<4x5x8xf32> -> vector<4x5x8xf32>
    "tpu.trace_stop"() : () -> ()
    %140 = vector.extract_strided_slice %83 {offsets = [0, 0, 24], sizes = [4, 5, 8], strides = [1, 1, 1]} : vector<4x5x32xf32> to vector<4x5x8xf32>
    %141 = vector.extract_strided_slice %84 {offsets = [0, 0, 24], sizes = [4, 5, 8], strides = [1, 1, 1]} : vector<4x5x32xf32> to vector<4x5x8xf32>
    %142 = vector.extract_strided_slice %85 {offsets = [0, 0, 24], sizes = [4, 5, 8], strides = [1, 1, 1]} : vector<4x5x32xf32> to vector<4x5x8xf32>
    "tpu.trace_start"() <{level = 10 : i32, message = "bqd,bkd->bqk"}> : () -> ()
    %cst_56 = arith.constant dense<0.000000e+00> : vector<4x5x5xf32>
    %143 = tpu.matmul %140, %141, %cst_56 {dimension_numbers = #tpu.dot_dimension_numbers<[2], [2], [1], [1], [0, 0, 0, 1, 1, 1], [0], [0]>} : vector<4x5x8xf32>, vector<4x5x8xf32>, vector<4x5x5xf32> -> vector<4x5x5xf32>
    "tpu.trace_stop"() : () -> ()
    %cst_57 = arith.constant 0.353553385 : f32
    %144 = vector.broadcast %cst_57 : f32 to vector<4x5x5xf32>
    %145 = arith.mulf %143, %144 : vector<4x5x5xf32>
    %cst_58 = arith.constant dense<0xFF800000> : vector<4x5xf32>
    %146 = vector.multi_reduction <maximumf>, %145, %cst_58 [2] : vector<4x5x5xf32> to vector<4x5xf32>
    %cst_59 = arith.constant 0xFF800000 : f32
    %147 = vector.broadcast %cst_59 : f32 to vector<4x5xf32>
    %148 = arith.maximumf %147, %146 : vector<4x5xf32>
    %149 = vector.shape_cast %148 : vector<4x5xf32> to vector<4x5x1xf32>
    %150 = vector.broadcast %149 : vector<4x5x1xf32> to vector<4x5x5xf32>
    %151 = arith.subf %145, %150 : vector<4x5x5xf32>
    %152 = math.exp %151 : vector<4x5x5xf32>
    %cst_60 = arith.constant dense<0.000000e+00> : vector<4x5xf32>
    %153 = vector.multi_reduction <add>, %152, %cst_60 [2] : vector<4x5x5xf32> to vector<4x5xf32>
    %154 = vector.shape_cast %153 : vector<4x5xf32> to vector<4x5x1xf32>
    %155 = vector.broadcast %154 : vector<4x5x1xf32> to vector<4x5x5xf32>
    %156 = arith.divf %152, %155 : vector<4x5x5xf32>
    "tpu.trace_start"() <{level = 10 : i32, message = "bqk,bkd->bqd"}> : () -> ()
    %cst_61 = arith.constant dense<0.000000e+00> : vector<4x5x8xf32>
    %157 = tpu.matmul %156, %142, %cst_61 {dimension_numbers = #tpu.dot_dimension_numbers<[2], [1], [1], [2], [0, 0, 0, 1, 1, 2], [0], [0]>} : vector<4x5x5xf32>, vector<4x5x8xf32>, vector<4x5x8xf32> -> vector<4x5x8xf32>
    "tpu.trace_stop"() : () -> ()
    %158 = tpu.concatenate %103, %121, %139, %157 in 2 : vector<4x5x8xf32>, vector<4x5x8xf32>, vector<4x5x8xf32>, vector<4x5x8xf32> -> vector<4x5x32xf32>
    %c0_62 = arith.constant 0 : index
    %c0_63 = arith.constant 0 : index
    %c0_64 = arith.constant 0 : index
    %159 = vector.load %arg10[%c0_62, %c0_63, %c0_64] : memref<2x32x32xf32, #tpu.memory_space<vmem>>, vector<1x32x32xf32>
    %160 = vector.shape_cast %159 : vector<1x32x32xf32> to vector<32x32xf32>
    %161 = vector.shape_cast %158 : vector<4x5x32xf32> to vector<20x32xf32>
    %cst_65 = arith.constant dense<0.000000e+00> : vector<20x32xf32>
    %162 = tpu.matmul %161, %160, %cst_65 {dimension_numbers = #tpu.dot_dimension_numbers<[1], [0], [0], [1], [0, 0, 1, 1], [], []>} : vector<20x32xf32>, vector<32x32xf32>, vector<20x32xf32> -> vector<20x32xf32>
    %163 = vector.shape_cast %162 : vector<20x32xf32> to vector<4x5x32xf32>
    %164 = arith.addf %44, %163 : vector<4x5x32xf32>
    %c0_66 = arith.constant 0 : index
    %c0_67 = arith.constant 0 : index
    %c0_68 = arith.constant 0 : index
    %165 = vector.load %arg11[%c0_66, %c0_67, %c0_68] : memref<2x1x32xf32, #tpu.memory_space<vmem>>, vector<1x1x32xf32>
    %166 = vector.shape_cast %165 : vector<1x1x32xf32> to vector<1x32xf32>
    %167 = vector.shape_cast %166 : vector<1x32xf32> to vector<1x1x32xf32>
    %168 = vector.broadcast %167 : vector<1x1x32xf32> to vector<4x5x32xf32>
    %169 = arith.addf %164, %168 : vector<4x5x32xf32>
    %c0_69 = arith.constant 0 : index
    %c0_70 = arith.constant 0 : index
    %c0_71 = arith.constant 0 : index
    %170 = vector.load %arg12[%c0_69, %c0_70, %c0_71] : memref<2x1x32xf32, #tpu.memory_space<vmem>>, vector<1x1x32xf32>
    %171 = vector.shape_cast %170 : vector<1x1x32xf32> to vector<1x32xf32>
    %c0_72 = arith.constant 0 : index
    %c0_73 = arith.constant 0 : index
    %c0_74 = arith.constant 0 : index
    %172 = vector.load %arg13[%c0_72, %c0_73, %c0_74] : memref<2x1x32xf32, #tpu.memory_space<vmem>>, vector<1x1x32xf32>
    %173 = vector.shape_cast %172 : vector<1x1x32xf32> to vector<1x32xf32>
    %cst_75 = arith.constant dense<0.000000e+00> : vector<4x5xf32>
    %174 = vector.multi_reduction <add>, %169, %cst_75 [2] : vector<4x5x32xf32> to vector<4x5xf32>
    %175 = vector.shape_cast %174 : vector<4x5xf32> to vector<4x5x1xf32>
    %cst_76 = arith.constant 3.200000e+01 : f32
    %176 = vector.broadcast %cst_76 : f32 to vector<4x5x1xf32>
    %177 = arith.divf %175, %176 : vector<4x5x1xf32>
    %178 = vector.broadcast %177 : vector<4x5x1xf32> to vector<4x5x32xf32>
    %179 = arith.subf %169, %178 : vector<4x5x32xf32>
    %180 = arith.mulf %179, %179 : vector<4x5x32xf32>
    %cst_77 = arith.constant dense<0.000000e+00> : vector<4x5xf32>
    %181 = vector.multi_reduction <add>, %180, %cst_77 [2] : vector<4x5x32xf32> to vector<4x5xf32>
    %182 = vector.shape_cast %181 : vector<4x5xf32> to vector<4x5x1xf32>
    %cst_78 = arith.constant 3.200000e+01 : f32
    %183 = vector.broadcast %cst_78 : f32 to vector<4x5x1xf32>
    %184 = arith.divf %182, %183 : vector<4x5x1xf32>
    %185 = vector.broadcast %177 : vector<4x5x1xf32> to vector<4x5x32xf32>
    %186 = arith.subf %169, %185 : vector<4x5x32xf32>
    %cst_79 = arith.constant 9.99999974E-6 : f32
    %187 = vector.broadcast %cst_79 : f32 to vector<4x5x1xf32>
    %188 = arith.addf %184, %187 : vector<4x5x1xf32>
    %189 = math.rsqrt %188 : vector<4x5x1xf32>
    %190 = vector.broadcast %189 : vector<4x5x1xf32> to vector<4x5x32xf32>
    %191 = arith.mulf %186, %190 : vector<4x5x32xf32>
    %192 = vector.shape_cast %171 : vector<1x32xf32> to vector<1x1x32xf32>
    %193 = vector.broadcast %192 : vector<1x1x32xf32> to vector<4x5x32xf32>
    %194 = arith.mulf %191, %193 : vector<4x5x32xf32>
    %195 = vector.shape_cast %173 : vector<1x32xf32> to vector<1x1x32xf32>
    %196 = vector.broadcast %195 : vector<1x1x32xf32> to vector<4x5x32xf32>
    %197 = arith.addf %194, %196 : vector<4x5x32xf32>
    %c0_80 = arith.constant 0 : index
    %c0_81 = arith.constant 0 : index
    %c0_82 = arith.constant 0 : index
    %198 = vector.load %arg14[%c0_80, %c0_81, %c0_82] : memref<2x32x128xf32, #tpu.memory_space<vmem>>, vector<1x32x128xf32>
    %199 = vector.shape_cast %198 : vector<1x32x128xf32> to vector<32x128xf32>
    %200 = vector.shape_cast %197 : vector<4x5x32xf32> to vector<20x32xf32>
    %cst_83 = arith.constant dense<0.000000e+00> : vector<20x128xf32>
    %201 = tpu.matmul %200, %199, %cst_83 {dimension_numbers = #tpu.dot_dimension_numbers<[1], [0], [0], [1], [0, 0, 1, 1], [], []>} : vector<20x32xf32>, vector<32x128xf32>, vector<20x128xf32> -> vector<20x128xf32>
    %202 = vector.shape_cast %201 : vector<20x128xf32> to vector<4x5x128xf32>
    %c0_84 = arith.constant 0 : index
    %c0_85 = arith.constant 0 : index
    %c0_86 = arith.constant 0 : index
    %203 = vector.load %arg15[%c0_84, %c0_85, %c0_86] : memref<2x1x128xf32, #tpu.memory_space<vmem>>, vector<1x1x128xf32>
    %204 = vector.shape_cast %203 : vector<1x1x128xf32> to vector<1x128xf32>
    %205 = vector.shape_cast %204 : vector<1x128xf32> to vector<1x1x128xf32>
    %206 = vector.broadcast %205 : vector<1x1x128xf32> to vector<4x5x128xf32>
    %207 = arith.addf %202, %206 : vector<4x5x128xf32>
    %cst_87 = arith.constant 1.702000e+00 : f32
    %208 = vector.broadcast %cst_87 : f32 to vector<4x5x128xf32>
    %209 = arith.mulf %208, %207 : vector<4x5x128xf32>
    %210 = arith.negf %209 : vector<4x5x128xf32>
    %211 = math.exp %210 : vector<4x5x128xf32>
    %cst_88 = arith.constant 1.000000e+00 : f32
    %212 = vector.broadcast %cst_88 : f32 to vector<4x5x128xf32>
    %213 = arith.addf %212, %211 : vector<4x5x128xf32>
    %214 = arith.divf %212, %213 : vector<4x5x128xf32>
    %215 = arith.mulf %207, %214 : vector<4x5x128xf32>
    %c0_89 = arith.constant 0 : index
    %c0_90 = arith.constant 0 : index
    %c0_91 = arith.constant 0 : index
    %216 = vector.load %arg16[%c0_89, %c0_90, %c0_91] : memref<2x128x32xf32, #tpu.memory_space<vmem>>, vector<1x128x32xf32>
    %217 = vector.shape_cast %216 : vector<1x128x32xf32> to vector<128x32xf32>
    %218 = vector.shape_cast %215 : vector<4x5x128xf32> to vector<20x128xf32>
    %cst_92 = arith.constant dense<0.000000e+00> : vector<20x32xf32>
    %219 = tpu.matmul %218, %217, %cst_92 {dimension_numbers = #tpu.dot_dimension_numbers<[1], [0], [0], [1], [0, 0, 1, 1], [], []>} : vector<20x128xf32>, vector<128x32xf32>, vector<20x32xf32> -> vector<20x32xf32>
    %220 = vector.shape_cast %219 : vector<20x32xf32> to vector<4x5x32xf32>
    %221 = arith.addf %169, %220 : vector<4x5x32xf32>
    %c0_93 = arith.constant 0 : index
    %c0_94 = arith.constant 0 : index
    %c0_95 = arith.constant 0 : index
    %222 = vector.load %arg17[%c0_93, %c0_94, %c0_95] : memref<2x1x32xf32, #tpu.memory_space<vmem>>, vector<1x1x32xf32>
    %223 = vector.shape_cast %222 : vector<1x1x32xf32> to vector<1x32xf32>
    %224 = vector.shape_cast %223 : vector<1x32xf32> to vector<1x1x32xf32>
    %225 = vector.broadcast %224 : vector<1x1x32xf32> to vector<4x5x32xf32>
    %226 = arith.addf %221, %225 : vector<4x5x32xf32>
    %c1 = arith.constant 1 : index
    %c0_96 = arith.constant 0 : index
    %c0_97 = arith.constant 0 : index
    %227 = vector.load %arg6[%c1, %c0_96, %c0_97] : memref<2x1x32xf32, #tpu.memory_space<vmem>>, vector<1x1x32xf32>
    %228 = vector.shape_cast %227 : vector<1x1x32xf32> to vector<1x32xf32>
    %c1_98 = arith.constant 1 : index
    %c0_99 = arith.constant 0 : index
    %c0_100 = arith.constant 0 : index
    %229 = vector.load %arg7[%c1_98, %c0_99, %c0_100] : memref<2x1x32xf32, #tpu.memory_space<vmem>>, vector<1x1x32xf32>
    %230 = vector.shape_cast %229 : vector<1x1x32xf32> to vector<1x32xf32>
    %cst_101 = arith.constant dense<0.000000e+00> : vector<4x5xf32>
    %231 = vector.multi_reduction <add>, %226, %cst_101 [2] : vector<4x5x32xf32> to vector<4x5xf32>
    %232 = vector.shape_cast %231 : vector<4x5xf32> to vector<4x5x1xf32>
    %cst_102 = arith.constant 3.200000e+01 : f32
    %233 = vector.broadcast %cst_102 : f32 to vector<4x5x1xf32>
    %234 = arith.divf %232, %233 : vector<4x5x1xf32>
    %235 = vector.broadcast %234 : vector<4x5x1xf32> to vector<4x5x32xf32>
    %236 = arith.subf %226, %235 : vector<4x5x32xf32>
    %237 = arith.mulf %236, %236 : vector<4x5x32xf32>
    %cst_103 = arith.constant dense<0.000000e+00> : vector<4x5xf32>
    %238 = vector.multi_reduction <add>, %237, %cst_103 [2] : vector<4x5x32xf32> to vector<4x5xf32>
    %239 = vector.shape_cast %238 : vector<4x5xf32> to vector<4x5x1xf32>
    %cst_104 = arith.constant 3.200000e+01 : f32
    %240 = vector.broadcast %cst_104 : f32 to vector<4x5x1xf32>
    %241 = arith.divf %239, %240 : vector<4x5x1xf32>
    %242 = vector.broadcast %234 : vector<4x5x1xf32> to vector<4x5x32xf32>
    %243 = arith.subf %226, %242 : vector<4x5x32xf32>
    %cst_105 = arith.constant 9.99999974E-6 : f32
    %244 = vector.broadcast %cst_105 : f32 to vector<4x5x1xf32>
    %245 = arith.addf %241, %244 : vector<4x5x1xf32>
    %246 = math.rsqrt %245 : vector<4x5x1xf32>
    %247 = vector.broadcast %246 : vector<4x5x1xf32> to vector<4x5x32xf32>
    %248 = arith.mulf %243, %247 : vector<4x5x32xf32>
    %249 = vector.shape_cast %228 : vector<1x32xf32> to vector<1x1x32xf32>
    %250 = vector.broadcast %249 : vector<1x1x32xf32> to vector<4x5x32xf32>
    %251 = arith.mulf %248, %250 : vector<4x5x32xf32>
    %252 = vector.shape_cast %230 : vector<1x32xf32> to vector<1x1x32xf32>
    %253 = vector.broadcast %252 : vector<1x1x32xf32> to vector<4x5x32xf32>
    %254 = arith.addf %251, %253 : vector<4x5x32xf32>
    %c1_106 = arith.constant 1 : index
    %c0_107 = arith.constant 0 : index
    %c0_108 = arith.constant 0 : index
    %255 = vector.load %arg8[%c1_106, %c0_107, %c0_108] : memref<2x32x96xf32, #tpu.memory_space<vmem>>, vector<1x32x96xf32>
    %256 = vector.shape_cast %255 : vector<1x32x96xf32> to vector<32x96xf32>
    %257 = vector.shape_cast %254 : vector<4x5x32xf32> to vector<20x32xf32>
    %cst_109 = arith.constant dense<0.000000e+00> : vector<20x96xf32>
    %258 = tpu.matmul %257, %256, %cst_109 {dimension_numbers = #tpu.dot_dimension_numbers<[1], [0], [0], [1], [0, 0, 1, 1], [], []>} : vector<20x32xf32>, vector<32x96xf32>, vector<20x96xf32> -> vector<20x96xf32>
    %259 = vector.shape_cast %258 : vector<20x96xf32> to vector<4x5x96xf32>
    %c1_110 = arith.constant 1 : index
    %c0_111 = arith.constant 0 : index
    %c0_112 = arith.constant 0 : index
    %260 = vector.load %arg9[%c1_110, %c0_111, %c0_112] : memref<2x1x96xf32, #tpu.memory_space<vmem>>, vector<1x1x96xf32>
    %261 = vector.shape_cast %260 : vector<1x1x96xf32> to vector<1x96xf32>
    %262 = vector.shape_cast %261 : vector<1x96xf32> to vector<1x1x96xf32>
    %263 = vector.broadcast %262 : vector<1x1x96xf32> to vector<4x5x96xf32>
    %264 = arith.addf %259, %263 : vector<4x5x96xf32>
    %265 = vector.extract_strided_slice %264 {offsets = [0, 0, 0], sizes = [4, 5, 32], strides = [1, 1, 1]} : vector<4x5x96xf32> to vector<4x5x32xf32>
    %266 = vector.extract_strided_slice %264 {offsets = [0, 0, 32], sizes = [4, 5, 32], strides = [1, 1, 1]} : vector<4x5x96xf32> to vector<4x5x32xf32>
    %267 = vector.extract_strided_slice %264 {offsets = [0, 0, 64], sizes = [4, 5, 32], strides = [1, 1, 1]} : vector<4x5x96xf32> to vector<4x5x32xf32>
    %268 = vector.extract_strided_slice %265 {offsets = [0, 0, 0], sizes = [4, 5, 8], strides = [1, 1, 1]} : vector<4x5x32xf32> to vector<4x5x8xf32>
    %269 = vector.extract_strided_slice %266 {offsets = [0, 0, 0], sizes = [4, 5, 8], strides = [1, 1, 1]} : vector<4x5x32xf32> to vector<4x5x8xf32>
    %270 = vector.extract_strided_slice %267 {offsets = [0, 0, 0], sizes = [4, 5, 8], strides = [1, 1, 1]} : vector<4x5x32xf32> to vector<4x5x8xf32>
    "tpu.trace_start"() <{level = 10 : i32, message = "bqd,bkd->bqk"}> : () -> ()
    %cst_113 = arith.constant dense<0.000000e+00> : vector<4x5x5xf32>
    %271 = tpu.matmul %268, %269, %cst_113 {dimension_numbers = #tpu.dot_dimension_numbers<[2], [2], [1], [1], [0, 0, 0, 1, 1, 1], [0], [0]>} : vector<4x5x8xf32>, vector<4x5x8xf32>, vector<4x5x5xf32> -> vector<4x5x5xf32>
    "tpu.trace_stop"() : () -> ()
    %cst_114 = arith.constant 0.353553385 : f32
    %272 = vector.broadcast %cst_114 : f32 to vector<4x5x5xf32>
    %273 = arith.mulf %271, %272 : vector<4x5x5xf32>
    %cst_115 = arith.constant dense<0xFF800000> : vector<4x5xf32>
    %274 = vector.multi_reduction <maximumf>, %273, %cst_115 [2] : vector<4x5x5xf32> to vector<4x5xf32>
    %cst_116 = arith.constant 0xFF800000 : f32
    %275 = vector.broadcast %cst_116 : f32 to vector<4x5xf32>
    %276 = arith.maximumf %275, %274 : vector<4x5xf32>
    %277 = vector.shape_cast %276 : vector<4x5xf32> to vector<4x5x1xf32>
    %278 = vector.broadcast %277 : vector<4x5x1xf32> to vector<4x5x5xf32>
    %279 = arith.subf %273, %278 : vector<4x5x5xf32>
    %280 = math.exp %279 : vector<4x5x5xf32>
    %cst_117 = arith.constant dense<0.000000e+00> : vector<4x5xf32>
    %281 = vector.multi_reduction <add>, %280, %cst_117 [2] : vector<4x5x5xf32> to vector<4x5xf32>
    %282 = vector.shape_cast %281 : vector<4x5xf32> to vector<4x5x1xf32>
    %283 = vector.broadcast %282 : vector<4x5x1xf32> to vector<4x5x5xf32>
    %284 = arith.divf %280, %283 : vector<4x5x5xf32>
    "tpu.trace_start"() <{level = 10 : i32, message = "bqk,bkd->bqd"}> : () -> ()
    %cst_118 = arith.constant dense<0.000000e+00> : vector<4x5x8xf32>
    %285 = tpu.matmul %284, %270, %cst_118 {dimension_numbers = #tpu.dot_dimension_numbers<[2], [1], [1], [2], [0, 0, 0, 1, 1, 2], [0], [0]>} : vector<4x5x5xf32>, vector<4x5x8xf32>, vector<4x5x8xf32> -> vector<4x5x8xf32>
    "tpu.trace_stop"() : () -> ()
    %286 = vector.extract_strided_slice %265 {offsets = [0, 0, 8], sizes = [4, 5, 8], strides = [1, 1, 1]} : vector<4x5x32xf32> to vector<4x5x8xf32>
    %287 = vector.extract_strided_slice %266 {offsets = [0, 0, 8], sizes = [4, 5, 8], strides = [1, 1, 1]} : vector<4x5x32xf32> to vector<4x5x8xf32>
    %288 = vector.extract_strided_slice %267 {offsets = [0, 0, 8], sizes = [4, 5, 8], strides = [1, 1, 1]} : vector<4x5x32xf32> to vector<4x5x8xf32>
    "tpu.trace_start"() <{level = 10 : i32, message = "bqd,bkd->bqk"}> : () -> ()
    %cst_119 = arith.constant dense<0.000000e+00> : vector<4x5x5xf32>
    %289 = tpu.matmul %286, %287, %cst_119 {dimension_numbers = #tpu.dot_dimension_numbers<[2], [2], [1], [1], [0, 0, 0, 1, 1, 1], [0], [0]>} : vector<4x5x8xf32>, vector<4x5x8xf32>, vector<4x5x5xf32> -> vector<4x5x5xf32>
    "tpu.trace_stop"() : () -> ()
    %cst_120 = arith.constant 0.353553385 : f32
    %290 = vector.broadcast %cst_120 : f32 to vector<4x5x5xf32>
    %291 = arith.mulf %289, %290 : vector<4x5x5xf32>
    %cst_121 = arith.constant dense<0xFF800000> : vector<4x5xf32>
    %292 = vector.multi_reduction <maximumf>, %291, %cst_121 [2] : vector<4x5x5xf32> to vector<4x5xf32>
    %cst_122 = arith.constant 0xFF800000 : f32
    %293 = vector.broadcast %cst_122 : f32 to vector<4x5xf32>
    %294 = arith.maximumf %293, %292 : vector<4x5xf32>
    %295 = vector.shape_cast %294 : vector<4x5xf32> to vector<4x5x1xf32>
    %296 = vector.broadcast %295 : vector<4x5x1xf32> to vector<4x5x5xf32>
    %297 = arith.subf %291, %296 : vector<4x5x5xf32>
    %298 = math.exp %297 : vector<4x5x5xf32>
    %cst_123 = arith.constant dense<0.000000e+00> : vector<4x5xf32>
    %299 = vector.multi_reduction <add>, %298, %cst_123 [2] : vector<4x5x5xf32> to vector<4x5xf32>
    %300 = vector.shape_cast %299 : vector<4x5xf32> to vector<4x5x1xf32>
    %301 = vector.broadcast %300 : vector<4x5x1xf32> to vector<4x5x5xf32>
    %302 = arith.divf %298, %301 : vector<4x5x5xf32>
    "tpu.trace_start"() <{level = 10 : i32, message = "bqk,bkd->bqd"}> : () -> ()
    %cst_124 = arith.constant dense<0.000000e+00> : vector<4x5x8xf32>
    %303 = tpu.matmul %302, %288, %cst_124 {dimension_numbers = #tpu.dot_dimension_numbers<[2], [1], [1], [2], [0, 0, 0, 1, 1, 2], [0], [0]>} : vector<4x5x5xf32>, vector<4x5x8xf32>, vector<4x5x8xf32> -> vector<4x5x8xf32>
    "tpu.trace_stop"() : () -> ()
    %304 = vector.extract_strided_slice %265 {offsets = [0, 0, 16], sizes = [4, 5, 8], strides = [1, 1, 1]} : vector<4x5x32xf32> to vector<4x5x8xf32>
    %305 = vector.extract_strided_slice %266 {offsets = [0, 0, 16], sizes = [4, 5, 8], strides = [1, 1, 1]} : vector<4x5x32xf32> to vector<4x5x8xf32>
    %306 = vector.extract_strided_slice %267 {offsets = [0, 0, 16], sizes = [4, 5, 8], strides = [1, 1, 1]} : vector<4x5x32xf32> to vector<4x5x8xf32>
    "tpu.trace_start"() <{level = 10 : i32, message = "bqd,bkd->bqk"}> : () -> ()
    %cst_125 = arith.constant dense<0.000000e+00> : vector<4x5x5xf32>
    %307 = tpu.matmul %304, %305, %cst_125 {dimension_numbers = #tpu.dot_dimension_numbers<[2], [2], [1], [1], [0, 0, 0, 1, 1, 1], [0], [0]>} : vector<4x5x8xf32>, vector<4x5x8xf32>, vector<4x5x5xf32> -> vector<4x5x5xf32>
    "tpu.trace_stop"() : () -> ()
    %cst_126 = arith.constant 0.353553385 : f32
    %308 = vector.broadcast %cst_126 : f32 to vector<4x5x5xf32>
    %309 = arith.mulf %307, %308 : vector<4x5x5xf32>
    %cst_127 = arith.constant dense<0xFF800000> : vector<4x5xf32>
    %310 = vector.multi_reduction <maximumf>, %309, %cst_127 [2] : vector<4x5x5xf32> to vector<4x5xf32>
    %cst_128 = arith.constant 0xFF800000 : f32
    %311 = vector.broadcast %cst_128 : f32 to vector<4x5xf32>
    %312 = arith.maximumf %311, %310 : vector<4x5xf32>
    %313 = vector.shape_cast %312 : vector<4x5xf32> to vector<4x5x1xf32>
    %314 = vector.broadcast %313 : vector<4x5x1xf32> to vector<4x5x5xf32>
    %315 = arith.subf %309, %314 : vector<4x5x5xf32>
    %316 = math.exp %315 : vector<4x5x5xf32>
    %cst_129 = arith.constant dense<0.000000e+00> : vector<4x5xf32>
    %317 = vector.multi_reduction <add>, %316, %cst_129 [2] : vector<4x5x5xf32> to vector<4x5xf32>
    %318 = vector.shape_cast %317 : vector<4x5xf32> to vector<4x5x1xf32>
    %319 = vector.broadcast %318 : vector<4x5x1xf32> to vector<4x5x5xf32>
    %320 = arith.divf %316, %319 : vector<4x5x5xf32>
    "tpu.trace_start"() <{level = 10 : i32, message = "bqk,bkd->bqd"}> : () -> ()
    %cst_130 = arith.constant dense<0.000000e+00> : vector<4x5x8xf32>
    %321 = tpu.matmul %320, %306, %cst_130 {dimension_numbers = #tpu.dot_dimension_numbers<[2], [1], [1], [2], [0, 0, 0, 1, 1, 2], [0], [0]>} : vector<4x5x5xf32>, vector<4x5x8xf32>, vector<4x5x8xf32> -> vector<4x5x8xf32>
    "tpu.trace_stop"() : () -> ()
    %322 = vector.extract_strided_slice %265 {offsets = [0, 0, 24], sizes = [4, 5, 8], strides = [1, 1, 1]} : vector<4x5x32xf32> to vector<4x5x8xf32>
    %323 = vector.extract_strided_slice %266 {offsets = [0, 0, 24], sizes = [4, 5, 8], strides = [1, 1, 1]} : vector<4x5x32xf32> to vector<4x5x8xf32>
    %324 = vector.extract_strided_slice %267 {offsets = [0, 0, 24], sizes = [4, 5, 8], strides = [1, 1, 1]} : vector<4x5x32xf32> to vector<4x5x8xf32>
    "tpu.trace_start"() <{level = 10 : i32, message = "bqd,bkd->bqk"}> : () -> ()
    %cst_131 = arith.constant dense<0.000000e+00> : vector<4x5x5xf32>
    %325 = tpu.matmul %322, %323, %cst_131 {dimension_numbers = #tpu.dot_dimension_numbers<[2], [2], [1], [1], [0, 0, 0, 1, 1, 1], [0], [0]>} : vector<4x5x8xf32>, vector<4x5x8xf32>, vector<4x5x5xf32> -> vector<4x5x5xf32>
    "tpu.trace_stop"() : () -> ()
    %cst_132 = arith.constant 0.353553385 : f32
    %326 = vector.broadcast %cst_132 : f32 to vector<4x5x5xf32>
    %327 = arith.mulf %325, %326 : vector<4x5x5xf32>
    %cst_133 = arith.constant dense<0xFF800000> : vector<4x5xf32>
    %328 = vector.multi_reduction <maximumf>, %327, %cst_133 [2] : vector<4x5x5xf32> to vector<4x5xf32>
    %cst_134 = arith.constant 0xFF800000 : f32
    %329 = vector.broadcast %cst_134 : f32 to vector<4x5xf32>
    %330 = arith.maximumf %329, %328 : vector<4x5xf32>
    %331 = vector.shape_cast %330 : vector<4x5xf32> to vector<4x5x1xf32>
    %332 = vector.broadcast %331 : vector<4x5x1xf32> to vector<4x5x5xf32>
    %333 = arith.subf %327, %332 : vector<4x5x5xf32>
    %334 = math.exp %333 : vector<4x5x5xf32>
    %cst_135 = arith.constant dense<0.000000e+00> : vector<4x5xf32>
    %335 = vector.multi_reduction <add>, %334, %cst_135 [2] : vector<4x5x5xf32> to vector<4x5xf32>
    %336 = vector.shape_cast %335 : vector<4x5xf32> to vector<4x5x1xf32>
    %337 = vector.broadcast %336 : vector<4x5x1xf32> to vector<4x5x5xf32>
    %338 = arith.divf %334, %337 : vector<4x5x5xf32>
    "tpu.trace_start"() <{level = 10 : i32, message = "bqk,bkd->bqd"}> : () -> ()
    %cst_136 = arith.constant dense<0.000000e+00> : vector<4x5x8xf32>
    %339 = tpu.matmul %338, %324, %cst_136 {dimension_numbers = #tpu.dot_dimension_numbers<[2], [1], [1], [2], [0, 0, 0, 1, 1, 2], [0], [0]>} : vector<4x5x5xf32>, vector<4x5x8xf32>, vector<4x5x8xf32> -> vector<4x5x8xf32>
    "tpu.trace_stop"() : () -> ()
    %340 = tpu.concatenate %285, %303, %321, %339 in 2 : vector<4x5x8xf32>, vector<4x5x8xf32>, vector<4x5x8xf32>, vector<4x5x8xf32> -> vector<4x5x32xf32>
    %c1_137 = arith.constant 1 : index
    %c0_138 = arith.constant 0 : index
    %c0_139 = arith.constant 0 : index
    %341 = vector.load %arg10[%c1_137, %c0_138, %c0_139] : memref<2x32x32xf32, #tpu.memory_space<vmem>>, vector<1x32x32xf32>
    %342 = vector.shape_cast %341 : vector<1x32x32xf32> to vector<32x32xf32>
    %343 = vector.shape_cast %340 : vector<4x5x32xf32> to vector<20x32xf32>
    %cst_140 = arith.constant dense<0.000000e+00> : vector<20x32xf32>
    %344 = tpu.matmul %343, %342, %cst_140 {dimension_numbers = #tpu.dot_dimension_numbers<[1], [0], [0], [1], [0, 0, 1, 1], [], []>} : vector<20x32xf32>, vector<32x32xf32>, vector<20x32xf32> -> vector<20x32xf32>
    %345 = vector.shape_cast %344 : vector<20x32xf32> to vector<4x5x32xf32>
    %346 = arith.addf %226, %345 : vector<4x5x32xf32>
    %c1_141 = arith.constant 1 : index
    %c0_142 = arith.constant 0 : index
    %c0_143 = arith.constant 0 : index
    %347 = vector.load %arg11[%c1_141, %c0_142, %c0_143] : memref<2x1x32xf32, #tpu.memory_space<vmem>>, vector<1x1x32xf32>
    %348 = vector.shape_cast %347 : vector<1x1x32xf32> to vector<1x32xf32>
    %349 = vector.shape_cast %348 : vector<1x32xf32> to vector<1x1x32xf32>
    %350 = vector.broadcast %349 : vector<1x1x32xf32> to vector<4x5x32xf32>
    %351 = arith.addf %346, %350 : vector<4x5x32xf32>
    %c1_144 = arith.constant 1 : index
    %c0_145 = arith.constant 0 : index
    %c0_146 = arith.constant 0 : index
    %352 = vector.load %arg12[%c1_144, %c0_145, %c0_146] : memref<2x1x32xf32, #tpu.memory_space<vmem>>, vector<1x1x32xf32>
    %353 = vector.shape_cast %352 : vector<1x1x32xf32> to vector<1x32xf32>
    %c1_147 = arith.constant 1 : index
    %c0_148 = arith.constant 0 : index
    %c0_149 = arith.constant 0 : index
    %354 = vector.load %arg13[%c1_147, %c0_148, %c0_149] : memref<2x1x32xf32, #tpu.memory_space<vmem>>, vector<1x1x32xf32>
    %355 = vector.shape_cast %354 : vector<1x1x32xf32> to vector<1x32xf32>
    %cst_150 = arith.constant dense<0.000000e+00> : vector<4x5xf32>
    %356 = vector.multi_reduction <add>, %351, %cst_150 [2] : vector<4x5x32xf32> to vector<4x5xf32>
    %357 = vector.shape_cast %356 : vector<4x5xf32> to vector<4x5x1xf32>
    %cst_151 = arith.constant 3.200000e+01 : f32
    %358 = vector.broadcast %cst_151 : f32 to vector<4x5x1xf32>
    %359 = arith.divf %357, %358 : vector<4x5x1xf32>
    %360 = vector.broadcast %359 : vector<4x5x1xf32> to vector<4x5x32xf32>
    %361 = arith.subf %351, %360 : vector<4x5x32xf32>
    %362 = arith.mulf %361, %361 : vector<4x5x32xf32>
    %cst_152 = arith.constant dense<0.000000e+00> : vector<4x5xf32>
    %363 = vector.multi_reduction <add>, %362, %cst_152 [2] : vector<4x5x32xf32> to vector<4x5xf32>
    %364 = vector.shape_cast %363 : vector<4x5xf32> to vector<4x5x1xf32>
    %cst_153 = arith.constant 3.200000e+01 : f32
    %365 = vector.broadcast %cst_153 : f32 to vector<4x5x1xf32>
    %366 = arith.divf %364, %365 : vector<4x5x1xf32>
    %367 = vector.broadcast %359 : vector<4x5x1xf32> to vector<4x5x32xf32>
    %368 = arith.subf %351, %367 : vector<4x5x32xf32>
    %cst_154 = arith.constant 9.99999974E-6 : f32
    %369 = vector.broadcast %cst_154 : f32 to vector<4x5x1xf32>
    %370 = arith.addf %366, %369 : vector<4x5x1xf32>
    %371 = math.rsqrt %370 : vector<4x5x1xf32>
    %372 = vector.broadcast %371 : vector<4x5x1xf32> to vector<4x5x32xf32>
    %373 = arith.mulf %368, %372 : vector<4x5x32xf32>
    %374 = vector.shape_cast %353 : vector<1x32xf32> to vector<1x1x32xf32>
    %375 = vector.broadcast %374 : vector<1x1x32xf32> to vector<4x5x32xf32>
    %376 = arith.mulf %373, %375 : vector<4x5x32xf32>
    %377 = vector.shape_cast %355 : vector<1x32xf32> to vector<1x1x32xf32>
    %378 = vector.broadcast %377 : vector<1x1x32xf32> to vector<4x5x32xf32>
    %379 = arith.addf %376, %378 : vector<4x5x32xf32>
    %c1_155 = arith.constant 1 : index
    %c0_156 = arith.constant 0 : index
    %c0_157 = arith.constant 0 : index
    %380 = vector.load %arg14[%c1_155, %c0_156, %c0_157] : memref<2x32x128xf32, #tpu.memory_space<vmem>>, vector<1x32x128xf32>
    %381 = vector.shape_cast %380 : vector<1x32x128xf32> to vector<32x128xf32>
    %382 = vector.shape_cast %379 : vector<4x5x32xf32> to vector<20x32xf32>
    %cst_158 = arith.constant dense<0.000000e+00> : vector<20x128xf32>
    %383 = tpu.matmul %382, %381, %cst_158 {dimension_numbers = #tpu.dot_dimension_numbers<[1], [0], [0], [1], [0, 0, 1, 1], [], []>} : vector<20x32xf32>, vector<32x128xf32>, vector<20x128xf32> -> vector<20x128xf32>
    %384 = vector.shape_cast %383 : vector<20x128xf32> to vector<4x5x128xf32>
    %c1_159 = arith.constant 1 : index
    %c0_160 = arith.constant 0 : index
    %c0_161 = arith.constant 0 : index
    %385 = vector.load %arg15[%c1_159, %c0_160, %c0_161] : memref<2x1x128xf32, #tpu.memory_space<vmem>>, vector<1x1x128xf32>
    %386 = vector.shape_cast %385 : vector<1x1x128xf32> to vector<1x128xf32>
    %387 = vector.shape_cast %386 : vector<1x128xf32> to vector<1x1x128xf32>
    %388 = vector.broadcast %387 : vector<1x1x128xf32> to vector<4x5x128xf32>
    %389 = arith.addf %384, %388 : vector<4x5x128xf32>
    %cst_162 = arith.constant 1.702000e+00 : f32
    %390 = vector.broadcast %cst_162 : f32 to vector<4x5x128xf32>
    %391 = arith.mulf %390, %389 : vector<4x5x128xf32>
    %392 = arith.negf %391 : vector<4x5x128xf32>
    %393 = math.exp %392 : vector<4x5x128xf32>
    %cst_163 = arith.constant 1.000000e+00 : f32
    %394 = vector.broadcast %cst_163 : f32 to vector<4x5x128xf32>
    %395 = arith.addf %394, %393 : vector<4x5x128xf32>
    %396 = arith.divf %394, %395 : vector<4x5x128xf32>
    %397 = arith.mulf %389, %396 : vector<4x5x128xf32>
    %c1_164 = arith.constant 1 : index
    %c0_165 = arith.constant 0 : index
    %c0_166 = arith.constant 0 : index
    %398 = vector.load %arg16[%c1_164, %c0_165, %c0_166] : memref<2x128x32xf32, #tpu.memory_space<vmem>>, vector<1x128x32xf32>
    %399 = vector.shape_cast %398 : vector<1x128x32xf32> to vector<128x32xf32>
    %400 = vector.shape_cast %397 : vector<4x5x128xf32> to vector<20x128xf32>
    %cst_167 = arith.constant dense<0.000000e+00> : vector<20x32xf32>
    %401 = tpu.matmul %400, %399, %cst_167 {dimension_numbers = #tpu.dot_dimension_numbers<[1], [0], [0], [1], [0, 0, 1, 1], [], []>} : vector<20x128xf32>, vector<128x32xf32>, vector<20x32xf32> -> vector<20x32xf32>
    %402 = vector.shape_cast %401 : vector<20x32xf32> to vector<4x5x32xf32>
    %403 = arith.addf %351, %402 : vector<4x5x32xf32>
    %c1_168 = arith.constant 1 : index
    %c0_169 = arith.constant 0 : index
    %c0_170 = arith.constant 0 : index
    %404 = vector.load %arg17[%c1_168, %c0_169, %c0_170] : memref<2x1x32xf32, #tpu.memory_space<vmem>>, vector<1x1x32xf32>
    %405 = vector.shape_cast %404 : vector<1x1x32xf32> to vector<1x32xf32>
    %406 = vector.shape_cast %405 : vector<1x32xf32> to vector<1x1x32xf32>
    %407 = vector.broadcast %406 : vector<1x1x32xf32> to vector<4x5x32xf32>
    %408 = arith.addf %403, %407 : vector<4x5x32xf32>
    %409 = vector.extract_strided_slice %408 {offsets = [0, 0, 0], sizes = [4, 1, 32], strides = [1, 1, 1]} : vector<4x5x32xf32> to vector<4x1x32xf32>
    %c0_171 = arith.constant 0 : index
    %c0_172 = arith.constant 0 : index
    %410 = vector.load %arg18[%c0_171, %c0_172] : memref<1x32xf32, #tpu.memory_space<vmem>>, vector<1x32xf32>
    %c0_173 = arith.constant 0 : index
    %c0_174 = arith.constant 0 : index
    %411 = vector.load %arg19[%c0_173, %c0_174] : memref<1x32xf32, #tpu.memory_space<vmem>>, vector<1x32xf32>
    %cst_175 = arith.constant dense<0.000000e+00> : vector<4x1xf32>
    %412 = vector.multi_reduction <add>, %409, %cst_175 [2] : vector<4x1x32xf32> to vector<4x1xf32>
    %413 = vector.shape_cast %412 : vector<4x1xf32> to vector<4x1x1xf32>
    %cst_176 = arith.constant 3.200000e+01 : f32
    %414 = vector.broadcast %cst_176 : f32 to vector<4x1x1xf32>
    %415 = arith.divf %413, %414 : vector<4x1x1xf32>
    %416 = vector.broadcast %415 : vector<4x1x1xf32> to vector<4x1x32xf32>
    %417 = arith.subf %409, %416 : vector<4x1x32xf32>
    %418 = arith.mulf %417, %417 : vector<4x1x32xf32>
    %cst_177 = arith.constant dense<0.000000e+00> : vector<4x1xf32>
    %419 = vector.multi_reduction <add>, %418, %cst_177 [2] : vector<4x1x32xf32> to vector<4x1xf32>
    %420 = vector.shape_cast %419 : vector<4x1xf32> to vector<4x1x1xf32>
    %cst_178 = arith.constant 3.200000e+01 : f32
    %421 = vector.broadcast %cst_178 : f32 to vector<4x1x1xf32>
    %422 = arith.divf %420, %421 : vector<4x1x1xf32>
    %423 = vector.broadcast %415 : vector<4x1x1xf32> to vector<4x1x32xf32>
    %424 = arith.subf %409, %423 : vector<4x1x32xf32>
    %cst_179 = arith.constant 9.99999974E-6 : f32
    %425 = vector.broadcast %cst_179 : f32 to vector<4x1x1xf32>
    %426 = arith.addf %422, %425 : vector<4x1x1xf32>
    %427 = math.rsqrt %426 : vector<4x1x1xf32>
    %428 = vector.broadcast %427 : vector<4x1x1xf32> to vector<4x1x32xf32>
    %429 = arith.mulf %424, %428 : vector<4x1x32xf32>
    %430 = vector.shape_cast %410 : vector<1x32xf32> to vector<1x1x32xf32>
    %431 = vector.broadcast %430 : vector<1x1x32xf32> to vector<4x1x32xf32>
    %432 = arith.mulf %429, %431 : vector<4x1x32xf32>
    %433 = vector.shape_cast %411 : vector<1x32xf32> to vector<1x1x32xf32>
    %434 = vector.broadcast %433 : vector<1x1x32xf32> to vector<4x1x32xf32>
    %435 = arith.addf %432, %434 : vector<4x1x32xf32>
    %c0_180 = arith.constant 0 : index
    %c0_181 = arith.constant 0 : index
    %436 = vector.load %arg20[%c0_180, %c0_181] : memref<32x16xf32, #tpu.memory_space<vmem>>, vector<32x16xf32>
    %437 = vector.shape_cast %435 : vector<4x1x32xf32> to vector<4x32xf32>
    %cst_182 = arith.constant dense<0.000000e+00> : vector<4x16xf32>
    %438 = tpu.matmul %437, %436, %cst_182 {dimension_numbers = #tpu.dot_dimension_numbers<[1], [0], [0], [1], [0, 0, 1, 1], [], []>} : vector<4x32xf32>, vector<32x16xf32>, vector<4x16xf32> -> vector<4x16xf32>
    %439 = vector.shape_cast %438 : vector<4x16xf32> to vector<4x1x16xf32>
    %440 = vector.extract_strided_slice %439 {offsets = [0, 0, 0], sizes = [2, 1, 16], strides = [1, 1, 1]} : vector<4x1x16xf32> to vector<2x1x16xf32>
    %441 = vector.extract_strided_slice %439 {offsets = [2, 0, 0], sizes = [2, 1, 16], strides = [1, 1, 1]} : vector<4x1x16xf32> to vector<2x1x16xf32>
    %442 = arith.mulf %440, %441 : vector<2x1x16xf32>
    %cst_183 = arith.constant dense<0.000000e+00> : vector<2x1xf32>
    %443 = vector.multi_reduction <add>, %442, %cst_183 [2] : vector<2x1x16xf32> to vector<2x1xf32>
    %444 = arith.mulf %440, %440 : vector<2x1x16xf32>
    %cst_184 = arith.constant dense<0.000000e+00> : vector<2x1xf32>
    %445 = vector.multi_reduction <add>, %444, %cst_184 [2] : vector<2x1x16xf32> to vector<2x1xf32>
    %446 = math.sqrt %445 : vector<2x1xf32>
    %cst_185 = arith.constant 9.99999993E-9 : f32
    %447 = vector.broadcast %cst_185 : f32 to vector<2x1xf32>
    %448 = arith.maximumf %446, %447 : vector<2x1xf32>
    %449 = arith.mulf %441, %441 : vector<2x1x16xf32>
    %cst_186 = arith.constant dense<0.000000e+00> : vector<2x1xf32>
    %450 = vector.multi_reduction <add>, %449, %cst_186 [2] : vector<2x1x16xf32> to vector<2x1xf32>
    %451 = math.sqrt %450 : vector<2x1xf32>
    %cst_187 = arith.constant 9.99999993E-9 : f32
    %452 = vector.broadcast %cst_187 : f32 to vector<2x1xf32>
    %453 = arith.maximumf %451, %452 : vector<2x1xf32>
    %454 = arith.mulf %448, %453 : vector<2x1xf32>
    %455 = tpu.reciprocal %454 {approx = true} : vector<2x1xf32> -> vector<2x1xf32>
    %456 = arith.mulf %443, %455 : vector<2x1xf32>
    %cst_188 = arith.constant 1.000000e+00 : f32
    %457 = vector.broadcast %cst_188 : f32 to vector<2x1xf32>
    %458 = arith.subf %457, %456 : vector<2x1xf32>
    %459 = vector.shape_cast %458 : vector<2x1xf32> to vector<1x2x1xf32>
    %cst_189 = arith.constant dense<0.000000e+00> : vector<1xf32>
    %460 = vector.multi_reduction <add>, %459, %cst_189 [1, 2] : vector<1x2x1xf32> to vector<1xf32>
    %461 = vector.shape_cast %460 : vector<1xf32> to vector<1x1x1xf32>
    %462 = vector.extract %461[0, 0, 0] : f32 from vector<1x1x1xf32>
    %cst_190 = arith.constant 2.000000e+00 : f32
    %463 = arith.divf %462, %cst_190 : f32
    %464 = vector.broadcast %463 : f32 to vector<1x1xf32>
    %c0_191 = arith.constant 0 : index
    %c0_192 = arith.constant 0 : index
    %465 = vector.load %arg21[%c0_191, %c0_192] : memref<1x1xf32, #tpu.memory_space<vmem>>, vector<1x1xf32>
    tpu.vector_store %arg21[%c0_191, %c0_192], %464 {strides = array<i32>} : memref<1x1xf32, #tpu.memory_space<vmem>>, vector<1x1xf32>,
    return
  }
}

</mosaic_0001>

<bundles_post_ra>
// kernel: image_embedding_loss.1
= control target key start
LH: loop header
LB: loop body
LE: loop exit
PB: predicated region body
PF: predicated region fallthrough
CT: control target
= control target key end

     0   :  { %s20815_s0 = inlined_call_operand.vmem [shape: f32[3,20,256], index: 0, kind: input, shape index: {}]   ;;  %s20816_s1 = inlined_call_operand.vmem [shape: f32[256,64], index: 1, kind: input, shape index: {}]   ;;  %s20817_s2 = inlined_call_operand.vmem [shape: f32[192,32], index: 2, kind: input, shape index: {}]   ;;  %s20818_s3 = inlined_call_operand.vmem [shape: f32[5,32], index: 3, kind: input, shape index: {}]   ;;  %s20819_s4 = inlined_call_operand.vmem [shape: f32[1,32], index: 4, kind: input, shape index: {}]   ;;  %s20820_s5 = inlined_call_operand.vmem [shape: f32[1,32], index: 5, kind: input, shape index: {}]   ;;  %s20821_s6 = inlined_call_operand.vmem [shape: f32[2,1,32], index: 6, kind: input, shape index: {}]   ;;  %s20822_s7 = inlined_call_operand.vmem [shape: f32[2,1,32], index: 7, kind: input, shape index: {}]   ;;  %s20823_s8 = inlined_call_operand.vmem [shape: f32[2,32,96], index: 8, kind: input, shape index: {}]   ;;  %s20824_s9 = inlined_call_operand.vmem [shape: f32[2,1,96], index: 9, kind: input, shape index: {}]   ;;  %s20825_s10 = inlined_call_operand.vmem [shape: f32[2,32,32], index: 10, kind: input, shape index: {}]   ;;  %s20826_s11 = inlined_call_operand.vmem [shape: f32[2,1,32], index: 11, kind: input, shape index: {}]   ;;  %s20827_s12 = inlined_call_operand.vmem [shape: f32[2,1,32], index: 12, kind: input, shape index: {}]   ;;  %s20828_s13 = inlined_call_operand.vmem [shape: f32[2,1,32], index: 13, kind: input, shape index: {}]   ;;  %s20829_s14 = inlined_call_operand.vmem [shape: f32[2,32,128], index: 14, kind: input, shape index: {}]   ;;  %s20830_s15 = inlined_call_operand.vmem [shape: f32[2,1,128], index: 15, kind: input, shape index: {}]   ;;  %s20831_s16 = inlined_call_operand.vmem [shape: f32[2,128,32], index: 16, kind: input, shape index: {}]   ;;  %s20832_s17 = inlined_call_operand.vmem [shape: f32[2,1,32], index: 17, kind: input, shape index: {}]   ;;  %s20833_s18 = inlined_call_operand.vmem [shape: f32[1,32], index: 18, kind: input, shape index: {}]   ;;  %s20834_s19 = inlined_call_operand.vmem [shape: f32[1,32], index: 19, kind: input, shape index: {}]   ;;  %s20835_s20 = inlined_call_operand.vmem [shape: f32[32,16], index: 20, kind: input, shape index: {}]   ;;  %s20836_s21 = inlined_call_operand.hbm [shape: f32[1,1], index: 21, kind: output, shape index: {}]  }
   0x1   :  { %20885 = sst [smem:[#allocation15_spill]] %s20815_s0 }
   0x2   :  { %20886 = sst [smem:[#allocation16_spill]] %s20816_s1 }
   0x3   :  { %20887 = sst [smem:[#allocation17_spill]] %s20817_s2 }
   0x4   :  { %20888 = sst [smem:[#allocation18_spill]] %s20818_s3 }
   0x5   :  { %20889 = sst [smem:[#allocation19_spill]] %s20819_s4 }
   0x6   :  { %20890 = sst [smem:[#allocation20_spill]] %s20820_s5 }
   0x7   :  { %s20891_s26 = sld [smem:[#allocation16_spill]]  ;;  %s20892_s22 = sld [smem:[#allocation15_spill]] }
   0xd   :  { %v103_v0 = vld [vmem:[%s20891_s26 + $0x80] sm:$0xff]  ;;  %v104_v1 = vld [vmem:[%s20891_s26 + $0x88] sm:$0xff]  ;;  %v105_v5 = vld [vmem:[%s20891_s26 + $0x90] sm:$0xff] }
   0xe   :  { %v87_v2 = vld [vmem:[%s20891_s26] sm:$0xff]  ;;  %v16846_v3 = vpack.c.bf16 %v104_v1, %v103_v0  ;;  %v88_v4 = vld [vmem:[%s20891_s26 + $0x8] sm:$0xff]  ;;  %v106_v6 = vld [vmem:[%s20891_s26 + $0x98] sm:$0xff] }
   0xf   :  { %v16857_v7 = vpack.c.bf16 %v88_v4, %v87_v2  ;;  %v16859_v8 = vpack.c.bf16 %v106_v6, %v105_v5  ;;  %v89_v9 = vld [vmem:[%s20891_s26 + $0x10] sm:$0xff]  ;;  %v90_v10 = vld [vmem:[%s20891_s26 + $0x18] sm:$0xff]  ;;  %v107_v11 = vld [vmem:[%s20891_s26 + $0xa0] sm:$0xff] }
  0x10   :  { %16125 = vmatprep.subr.bf16.mxu1 %v16846_v3  ;;  %v108_v12 = vld [vmem:[%s20891_s26 + $0xa8] sm:$0xff]  ;;  %16093 = vmatprep.subr.bf16.mxu0 %v16846_v3  ;;  %v16876_v13 = vpack.c.bf16 %v90_v10, %v89_v9  ;;  %v91_v15 = vld [vmem:[%s20891_s26 + $0x20] sm:$0xff]  ;;  %v109_v17 = vld [vmem:[%s20891_s26 + $0xb0] sm:$0xff] }
  0x11   :  { %16127 = vmatpush3.bf16.msra.mxu1 %v16857_v7  ;;  %16095 = vmatpush3.bf16.msra.mxu0 %v16857_v7  ;;  %v16880_v14 = vpack.c.bf16 %v108_v12, %v107_v11  ;;  %v92_v16 = vld [vmem:[%s20891_s26 + $0x28] sm:$0xff]  ;;  %v110_v18 = vld [vmem:[%s20891_s26 + $0xb8] sm:$0xff]  ;;  %v93_v21 = vld [vmem:[%s20891_s26 + $0x30] sm:$0xff] }
  0x12   :  { %16129 = vmatprep.subr.bf16.mxu1 %v16859_v8  ;;  %16097 = vmatprep.subr.bf16.mxu0 %v16859_v8  ;;  %v16896_v19 = vpack.c.bf16 %v92_v16, %v91_v15  ;;  %v16900_v20 = vpack.c.bf16 %v110_v18, %v109_v17  ;;  %v94_v22 = vld [vmem:[%s20891_s26 + $0x38] sm:$0xff]  ;;  %v111_v23 = vld [vmem:[%s20891_s26 + $0xc0] sm:$0xff]  ;;  %v112_v24 = vld [vmem:[%s20891_s26 + $0xc8] sm:$0xff] }
  0x13   :  { %v76_v25 = vld [vmem:[%s20892_s22 + $0x38] sm:$0xff]  ;;  %v16919_v26 = vpack.c.bf16 %v94_v22, %v93_v21  ;;  %v70_v27 = vld [vmem:[%s20892_s22 + $0x8] sm:$0xff]  ;;  %v16926_v28 = vpack.c.bf16 %v112_v24, %v111_v23  ;;  %v95_v29 = vld [vmem:[%s20891_s26 + $0x40] sm:$0xff] }
  0x14   :  { %263 = vmatprep.mubr.f32.mxu1 %v76_v25  ;;  %v96_v30 = vld [vmem:[%s20891_s26 + $0x48] sm:$0xff]  ;;  %v113_v31 = vld [vmem:[%s20891_s26 + $0xd0] sm:$0xff]  ;;  %v114_v32 = vld [vmem:[%s20891_s26 + $0xd8] sm:$0xff]  ;;  %183 = vmatprep.mubr.f32.mxu0 %v70_v27 }
  0x15   :  { %16131 = vmatpush3.bf16.msra.mxu1 %v16876_v13  ;;  %16099 = vmatpush3.bf16.msra.mxu0 %v16876_v13  ;;  %v16942_v33 = vpack.c.bf16 %v96_v30, %v95_v29 }
  0x16   :  { %16133 = vmatprep.subr.bf16.mxu1 %v16880_v14  ;;  %16101 = vmatprep.subr.bf16.mxu0 %v16880_v14 }
  0x19   :  { %16135 = vmatpush3.bf16.msra.mxu1 %v16896_v19  ;;  %16103 = vmatpush3.bf16.msra.mxu0 %v16896_v19 }
  0x1a   :  { %16137 = vmatprep.subr.bf16.mxu1 %v16900_v20  ;;  %16105 = vmatprep.subr.bf16.mxu0 %v16900_v20 }
  0x1d   :  { %16139 = vmatpush3.bf16.msra.mxu1 %v16919_v26  ;;  %16107 = vmatpush3.bf16.msra.mxu0 %v16919_v26 }
  0x1e   :  { %26 = vsyncpa [#allocation3], 0  ;;  %16141 = vmatprep.subr.bf16.mxu1 %v16926_v28  ;;  %v16112_v34 = vpack.c.bf16 %v114_v32, %v113_v31  ;;  %v97_v35 = vld [vmem:[%s20891_s26 + $0x50] sm:$0xff]  ;;  %v98_v36 = vld [vmem:[%s20891_s26 + $0x58] sm:$0xff]  ;;  %16109 = vmatprep.subr.bf16.mxu0 %v16926_v28  ;;  %v20840_v5 = vmov 0.0|0.0   ;;  %s16709_s1 = smov 64  }
  0x1f   :  { %v115_v37 = vld [vmem:[%s20891_s26 + $0xe0] sm:$0xff]  ;;  %v116_v38 = vld [vmem:[%s20891_s26 + $0xe8] sm:$0xff]  ;;  %v16114_v39 = vpack.c.bf16 %v98_v36, %v97_v35  ;;  %v117_v43 = vld [vmem:[%s20891_s26 + $0xf0] sm:$0xff]  ;;  %vm371_vm0 = vcmask 523264   ;;  %vm881_vm1 = vcmask 258048   ;;  %s20895_s27 = sld [smem:[#allocation19_spill]] }
  0x20   :  { %v16116_v40 = vpack.c.bf16 %v116_v38, %v115_v37  ;;  %v99_v41 = vld [vmem:[%s20891_s26 + $0x60] sm:$0xff]  ;;  %v100_v42 = vld [vmem:[%s20891_s26 + $0x68] sm:$0xff]  ;;  %v118_v44 = vld [vmem:[%s20891_s26 + $0xf8] sm:$0xff]  ;;  %s20896_s29 = sld [smem:[#allocation20_spill]]  ;;  %vm16711_vm2 = vmmov 0   ;;  %vm2463_vm3 = vcmask 261120  }
  0x21   :  { %16143 = vmatpush3.bf16.msra.mxu1 %v16942_v33  ;;  %16111 = vmatpush3.bf16.msra.mxu0 %v16942_v33  ;;  %v16118_v45 = vpack.c.bf16 %v100_v42, %v99_v41  ;;  %v16120_v46 = vpack.c.bf16 %v118_v44, %v117_v43  ;;  %v101_v47 = vld [vmem:[%s20891_s26 + $0x70] sm:$0xff]  ;;  %v102_v48 = vld [vmem:[%s20891_s26 + $0x78] sm:$0xff]  ;;  %v69_v51 = vld [vmem:[%s20892_s22] sm:$0xff]  ;;  %s20893_s26 = sld [smem:[#allocation17_spill]]  ;;  %s16713_s0 = smov 96   ;;  %vm2811_vm4 = vcmask 64512  }
  0x22   :  { %16145 = vmatprep.subr.bf16.mxu1 %v16112_v34  ;;  %16113 = vmatprep.subr.bf16.mxu0 %v16112_v34  ;;  %v16122_v49 = vpack.c.bf16 %v102_v48, %v101_v47  ;;  %v75_v50 = vld [vmem:[%s20892_s22 + $0x30] sm:$0xff]  ;;  %v78_v52 = vld [vmem:[%s20892_s22 + $0x48] sm:$0xff]  ;;  %v72_v53 = vld [vmem:[%s20892_s22 + $0x18] sm:$0xff]  ;;  %vm3250_vm5 = vcmask 36864   ;;  %s16714_s4 = smov 88   ;;  %s16715_s30 = smov 120  }
  0x23   :  { %v77_v54 = vld [vmem:[%s20892_s22 + $0x40] sm:$0xff]  ;;  %v71_v55 = vld [vmem:[%s20892_s22 + $0x10] sm:$0xff]  ;;  %v80_v56 = vld [vmem:[%s20892_s22 + $0x58] sm:$0xf]  ;;  %vm3301_vm6 = vcmask 1044480   ;;  %vm3297_vm7 = vcmask 39936  }
  0x24   :  { %v74_v57 = vld [vmem:[%s20892_s22 + $0x28] sm:$0xf]  ;;  %v79_v58 = vld [vmem:[%s20892_s22 + $0x50] sm:$0xf]  ;;  %v73_v59 = vld [vmem:[%s20892_s22 + $0x20] sm:$0xf] }
  0x25   :  { %16147 = vmatpush3.bf16.msra.mxu1 %v16114_v39  ;;  %16115 = vmatpush3.bf16.msra.mxu0 %v16114_v39  ;;  %v82_v60 = vld [vmem:[%s20892_s22 + $0x68] sm:$0xff]  ;;  %v81_v61 = vld [vmem:[%s20892_s22 + $0x60] sm:$0xff]  ;;  %v84_v62 = vld [vmem:[%s20892_s22 + $0x78] sm:$0xff]  ;;  %s20865_s5 = smov 56   ;;  %s20863_s23 = smov 80   ;;  %vm5661_vm8 = vcmask 130048  }
  0x26   :  { %16149 = vmatprep.subr.bf16.mxu1 %v16116_v40  ;;  %16117 = vmatprep.subr.bf16.mxu0 %v16116_v40  ;;  %v83_v63 = vld [vmem:[%s20892_s22 + $0x70] sm:$0xff]  ;;  %v86_v0 = vld [vmem:[%s20892_s22 + $0x88] sm:$0xf]  ;;  %v85_v1 = vld [vmem:[%s20892_s22 + $0x80] sm:$0xf]  ;;  %s20894_s22 = sld [smem:[#allocation18_spill]] }
  0x27   :  { %v375_v2 = vld [vmem:[%s20893_s26] sm:$0xff]  ;;  %v377_v4 = vld [vmem:[%s20893_s26 + $0x10] sm:$0xff]  ;;  %v380_v10 = vld [vmem:[%s20893_s26 + $0x28] sm:$0xff]  ;;  %s20859_s24 = smov 48   ;;  %s20855_s2 = smov 104   ;;  %vm5666_vm9 = vcmask 195584  }
  0x28   :  { %v379_v9 = vld [vmem:[%s20893_s26 + $0x20] sm:$0xff]  ;;  %v381_v12 = vld [vmem:[%s20893_s26 + $0x30] sm:$0xff]  ;;  %v384_v16 = vld [vmem:[%s20893_s26 + $0x48] sm:$0xff]  ;;  %s20853_s25 = smov 40   ;;  %s16724_s3 = smov 16   ;;  %vm14697_vm10 = vcmask 253952  }
  0x29   :  { %16151 = vmatpush3.bf16.msra.mxu1 %v16118_v45  ;;  %16119 = vmatpush3.bf16.msra.mxu0 %v16118_v45  ;;  %v16195_v11 = vpack.c.bf16 %v380_v10, %v379_v9  ;;  %v383_v15 = vld [vmem:[%s20893_s26 + $0x40] sm:$0xff]  ;;  %v385_v18 = vld [vmem:[%s20893_s26 + $0x50] sm:$0xff]  ;;  %v388_v22 = vld [vmem:[%s20893_s26 + $0x68] sm:$0xff]  ;;  %v16710_v9 = vmov 1966171168   ;;  %s16725_s28 = smov 24  }
  0x2a   :  { %16153 = vmatprep.subr.bf16.mxu1 %v16120_v46  ;;  %16121 = vmatprep.subr.bf16.mxu0 %v16120_v46  ;;  %v16201_v17 = vpack.c.bf16 %v384_v16, %v383_v15  ;;  %v387_v21 = vld [vmem:[%s20893_s26 + $0x60] sm:$0xff]  ;;  %v389_v24 = vld [vmem:[%s20893_s26 + $0x70] sm:$0xff]  ;;  %v390_v25 = vld [vmem:[%s20893_s26 + $0x78] sm:$0xff]  ;;  %v493_v10 = vunpack.c.l.s4 %v16710_v9  ;;  %vm14893_vm11 = vcmask 122880  }
  0x2b   :  { %v16207_v23 = vpack.c.bf16 %v388_v22, %v387_v21  ;;  %v391_v27 = vld [vmem:[%s20893_s26 + $0x80] sm:$0xff]  ;;  %v393_v30 = vld [vmem:[%s20893_s26 + $0x90] sm:$0xff]  ;;  %v394_v31 = vld [vmem:[%s20893_s26 + $0x98] sm:$0xff] }
  0x2c   :  { %v16216_v32 = vpack.c.bf16 %v394_v31, %v393_v30  ;;  %v397_v36 = vld [vmem:[%s20893_s26 + $0xb0] sm:$0xff]  ;;  %v398_v37 = vld [vmem:[%s20893_s26 + $0xb8] sm:$0xff]  ;;  %v633_v15 = vld [vmem:[%s20894_s22] sm:$0x1f]  ;;  %s20857_s22 = smov 72  }
  0x2d   :  { %16155 = vmatpush3.bf16.msra.mxu1 %v16122_v49  ;;  %16123 = vmatpush3.bf16.msra.mxu0 %v16122_v49  ;;  %v16222_v38 = vpack.c.bf16 %v398_v37, %v397_v36 }
  0x2e   :  { %16157 = vmatprep.subr.bf16.mxu0 %v16846_v3  ;;  %v376_v3 = vld [vmem:[%s20893_s26 + $0x8] sm:$0xff]  ;;  %16188 = vmatprep.subr.bf16.mxu1 %v20840_v5 }
  0x2f   :  { %v16189_v6 = vpack.c.bf16 %v376_v3, %v375_v2 }
  0x30   :  { %264 = vmatmul.mubr.f32.vlgmr.msra.gmra.mrb[0].mxu1 %v75_v50  ;;  %184 = vmatmul.mubr.f32.vlgmr.msra.gmra.mrb[0].mxu0 %v69_v51 }
  0x31   :  { %268 = vmatprep.mubr.f32.mxu1 %v78_v52  ;;  %16159 = vmatpush3.bf16.msra.mxu0 %v16857_v7  ;;  %v378_v7 = vld [vmem:[%s20893_s26 + $0x18] sm:$0xff] }
  0x32   :  { %16161 = vmatprep.subr.bf16.mxu0 %v16859_v8  ;;  %188 = vmatprep.mubr.f32.mxu0 %v72_v53  ;;  %v16192_v8 = vpack.c.bf16 %v378_v7, %v377_v4 }
  0x33   :  { %16190 = vmatpush1.bf16.msra.mxu1 %v16189_v6 }
  0x34   :  { %269 = vmatmul.mubr.f32.gmra.mrb[2].mxu1 %v77_v54  ;;  %189 = vmatmul.mubr.f32.gmra.mrb[2].mxu0 %v71_v55 }
  0x35   :  { %273 = vmatprep.mubr.f32.mxu1 %v80_v56  ;;  %16163 = vmatpush3.bf16.msra.mxu0 %v16876_v13  ;;  %v382_v13 = vld [vmem:[%s20893_s26 + $0x38] sm:$0xff] }
  0x36   :  { %16165 = vmatprep.subr.bf16.mxu0 %v16880_v14  ;;  %193 = vmatprep.mubr.f32.mxu0 %v74_v57  ;;  %v16198_v14 = vpack.c.bf16 %v382_v13, %v381_v12  ;;  %v494_v12 = vunpack.c.0.s8 %v493_v10 }
  0x37   :  { %16191 = vmatprep.subr.bf16.mxu1 %v20840_v5 }
  0x38   :  { %274 = vmatmul.mubr.f32.gmra.mrb[4].mxu1 %v79_v58  ;;  %194 = vmatmul.mubr.f32.gmra.mrb[4].mxu0 %v73_v59 }
  0x39   :  { %16167 = vmatpush3.bf16.msra.mxu0 %v16896_v19  ;;  %343 = vmatprep.mubr.f32.mxu0 %v82_v60  ;;  %v386_v19 = vld [vmem:[%s20893_s26 + $0x58] sm:$0xff] }
  0x3a   :  { %16169 = vmatprep.subr.bf16.mxu0 %v16900_v20  ;;  %16193 = vmatpush1.bf16.msra.mxu1 %v16192_v8  ;;  %v16204_v20 = vpack.c.bf16 %v386_v19, %v385_v18 }
  0x3b   :  { %16194 = vmatprep.subr.bf16.mxu1 %v20840_v5 }
  0x3d   :  { %16171 = vmatpush3.bf16.msra.mxu0 %v16919_v26  ;;  %v16210_v26 = vpack.c.bf16 %v390_v25, %v389_v24 }
  0x3e   :  { %16173 = vmatprep.subr.bf16.mxu0 %v16926_v28  ;;  %16196 = vmatpush1.bf16.msra.mxu1 %v16195_v11  ;;  %v392_v28 = vld [vmem:[%s20893_s26 + $0x88] sm:$0xff]  ;;  %v495_v11 = vlaneseq }
  0x3f   :  { %16197 = vmatprep.subr.bf16.mxu1 %v20840_v5  ;;  %v16213_v29 = vpack.c.bf16 %v392_v28, %v391_v27 }
  0x40   :  { %v17131_v13 = vshrl.u32 %v495_v11, 7 }
  0x41   :  { %16175 = vmatpush3.bf16.msra.mxu0 %v16942_v33  ;;  %v395_v33 = vld [vmem:[%s20893_s26 + $0xa0] sm:$0xff] }
  0x42   :  { %16177 = vmatprep.subr.bf16.mxu0 %v16112_v34  ;;  %16199 = vmatpush1.bf16.msra.mxu1 %v16198_v14  ;;  %v396_v34 = vld [vmem:[%s20893_s26 + $0xa8] sm:$0xff]  ;;  %v17134_v14 = vsub.s32 %v494_v12, %v17131_v13  ;;  %s20861_s26 = smov 112  }
  0x43   :  { %16200 = vmatprep.subr.bf16.mxu1 %v20840_v5  ;;  %v16219_v35 = vpack.c.bf16 %v396_v34, %v395_v33 }
  0x44   :  { %v642_v16 = vrot.slane %v633_v15, %v17134_v14 }
  0x45   :  { %16179 = vmatpush3.bf16.msra.mxu0 %v16114_v39 }
  0x46   :  { %16181 = vmatprep.subr.bf16.mxu0 %v16116_v40  ;;  %16202 = vmatpush1.bf16.msra.mxu1 %v16201_v17  ;;  %v635_v17 = vcombine.high %v633_v15, %v633_v15  ;;  %v650_v18 = vcombine.high %v642_v16, %v642_v16  ;;  %v657_v21 = vrot.slane %v642_v16, %v17134_v14 }
  0x47   :  { %16203 = vmatprep.subr.bf16.mxu1 %v20840_v5 }
  0x48   :  { %v17143_v22 = vrot.slane %v650_v18, %v17134_v14  ;;  %v672_v30 = vcombine.high %v657_v21, %v657_v21 }
  0x49   :  { %16183 = vmatpush3.bf16.msra.mxu0 %v16118_v45 }
  0x4a   :  { %16185 = vmatprep.subr.bf16.mxu0 %v16120_v46  ;;  %16205 = vmatpush1.bf16.msra.mxu1 %v16204_v20  ;;  %v649_v20 = vrot.slane %v635_v17, %v17134_v14  ;;  %v673_v31 = vcombine.high %v17143_v22, %v17143_v22 }
  0x4b   :  { %16206 = vmatprep.subr.bf16.mxu1 %v20840_v5 }
  0x4d   :  { %16187 = vmatpush3.bf16.msra.mxu0 %v16122_v49 }
  0x4e   :  { %16208 = vmatpush1.bf16.msra.mxu1 %v16207_v23 }
  0x4f   :  { %16209 = vmatprep.subr.bf16.mxu1 %v20840_v5 }
  0x50   :  { %344 = vmatmul.mubr.f32.vlgmr.msra.gmra.mrb[6].mxu0 %v81_v61 }
  0x51   :  { %348 = vmatprep.mubr.f32.mxu0 %v84_v62 }
  0x52   :  { %16211 = vmatpush1.bf16.msra.mxu1 %v16210_v26 }
  0x53   :  { %16212 = vmatprep.subr.bf16.mxu1 %v20840_v5 }
  0x54   :  { %349 = vmatmul.mubr.f32.gmra.mrb[8].mxu0 %v83_v63 }
  0x55   :  { %353 = vmatprep.mubr.f32.mxu0 %v86_v0 }
  0x56   :  { %16214 = vmatpush1.bf16.msra.mxu1 %v16213_v29  ;;  %v17149_v29 = vrot.slane %v649_v20, %v17134_v14 }
  0x57   :  { %16215 = vmatprep.subr.bf16.mxu1 %v20840_v5 }
  0x58   :  { %354 = vmatmul.mubr.f32.gmra.mrb[10].mxu0 %v85_v1 }
  0x5a   :  { %16217 = vmatpush1.bf16.msra.mxu1 %v16216_v32 }
  0x5b   :  { %16218 = vmatprep.subr.bf16.mxu1 %v20840_v5 }
  0x5e   :  { %16220 = vmatpush1.bf16.msra.mxu1 %v16219_v35 }
  0x5f   :  { %16221 = vmatprep.subr.bf16.mxu1 %v20840_v5 }
  0x62   :  { %16223 = vmatpush1.bf16.msra.mxu1 %v16222_v38 }
  0x63   :  { %16224 = vmatprep.subr.bf16.mxu1 %v20840_v5 }
 0x103   :  { %v15314_v39 = vpop.f32.mrb[0].mxu1  ;;  %v15273_v40 = vpop.f32.mrb[0].mxu0 }
 0x104   :  { %v15315_v41 = vpop.f32.mrb[1].mxu1  ;;  %v15274_v42 = vpop.f32.mrb[1].mxu0 }
 0x105   :  { %v15316_v43 = vadd.f32 %v15315_v41, %v15314_v39  ;;  %v15275_v44 = vadd.f32 %v15274_v42, %v15273_v40 }
 0x107   :  { %v15317_v45 = vpop.f32.mrb[2].mxu1  ;;  %362 = vrot.lane.b32.xlu0 %v15316_v43, %s16709_s1  ;;  %v15276_v46 = vpop.f32.mrb[2].mxu0 }
 0x108   :  { %v15318_v47 = vpop.f32.mrb[3].mxu1  ;;  %v15277_v48 = vpop.f32.mrb[3].mxu0 }
 0x109   :  { %v15319_v49 = vadd.f32 %v15318_v47, %v15317_v45  ;;  %v15278_v50 = vadd.f32 %v15277_v48, %v15276_v46 }
 0x10b   :  { %v15320_v51 = vpop.f32.mrb[4].mxu1  ;;  %364 = vrot.lane.b32.xlu0 %v15319_v49, %s16709_s1  ;;  %v15279_v52 = vpop.f32.mrb[4].mxu0 }
 0x10c   :  { %v15321_v53 = vpop.f32.mrb[5].mxu1  ;;  %v15280_v54 = vpop.f32.mrb[5].mxu0 }
 0x10d   :  { %v15322_v55 = vadd.f32 %v15321_v53, %v15320_v51  ;;  %v15281_v56 = vadd.f32 %v15280_v54, %v15279_v52 }
 0x10f   :  { %366 = vrot.lane.b32.xlu1 %v15322_v55, %s16709_s1 }
 0x123   :  { %v15355_v57 = vpop.f32.mrb[6].mxu0 }
 0x124   :  { %v15356_v58 = vpop.f32.mrb[7].mxu0 }
 0x125   :  { %v15357_v59 = vadd.f32 %v15356_v58, %v15355_v57 }
 0x127   :  { %14993 = vmatprep.mubr.msk.f32.mxu1 %vm371_vm0, %v15357_v59  ;;  %v15358_v60 = vpop.f32.mrb[8].mxu0 }
 0x128   :  { %v15359_v61 = vpop.f32.mrb[9].mxu0 }
 0x129   :  { %v15360_v62 = vadd.f32 %v15359_v61, %v15358_v60 }
 0x12b   :  { %v15361_v63 = vpop.f32.mrb[10].mxu0 }
 0x12c   :  { %v15362_v0 = vpop.f32.mrb[11].mxu0 }
 0x12d   :  { %v15363_v1 = vadd.f32 %v15362_v0, %v15361_v63 }
 0x179   :  { %v363_v2 = vpop.permute.xlu0 %362 }
 0x17a   :  { %v372_v3 = vsel %vm371_vm0, %v15275_v44, %v363_v2 }
 0x17b   :  { %473 = vmatmul.mubr.f32.vlgmr.msra.gmra.mrb[6].mxu1 %v372_v3 }
 0x17c   :  { %14994 = vmatprep.mubr.msk.f32.mxu1 %vm371_vm0, %v15360_v62 }
 0x17d   :  { %v365_v4 = vpop.permute.xlu0 %364 }
 0x17e   :  { %v373_v6 = vsel %vm371_vm0, %v15278_v50, %v365_v4 }
 0x17f   :  { %478 = vmatmul.mubr.f32.gmra.mrb[8].mxu1 %v373_v6 }
 0x180   :  { %14995 = vmatprep.mubr.msk.f32.mxu1 %vm371_vm0, %v15363_v1 }
 0x181   :  { %v367_v7 = vpop.permute.xlu1 %366 }
 0x182   :  { %v374_v8 = vsel %vm371_vm0, %v15281_v56, %v367_v7 }
 0x183   :  { %483 = vmatmul.mubr.f32.gmra.mrb[10].mxu1 %v374_v8 }
 0x24e   :  { %v474_v19 = vpop.f32.mrb[6].mxu1 }
 0x24f   :  { %v491_v23 = vcombine.high %v474_v19, %v474_v19  ;;  %v498_v24 = vrot.slane %v474_v19, %v17134_v14  ;;  %v476_v25 = vpop.f32.mrb[7].mxu1 }
 0x251   :  { %v505_v26 = vrot.slane %v491_v23, %v17134_v14  ;;  %v506_v27 = vcombine.high %v498_v24, %v498_v24  ;;  %v514_v28 = vrot.slane %v498_v24, %v17134_v14 }
 0x252   :  { %v479_v32 = vpop.f32.mrb[8].mxu1 }
 0x253   :  { %v507_v33 = vcombine.high %v505_v26, %v505_v26  ;;  %v521_v34 = vrot.slane %v505_v26, %v17134_v14  ;;  %v528_v35 = vrot.slane %v506_v27, %v17134_v14  ;;  %v536_v36 = vcombine.high %v514_v28, %v514_v28  ;;  %v481_v37 = vpop.f32.mrb[9].mxu1 }
 0x254   :  { %v17155_v38 = vadd.f32 %v657_v21, %v514_v28  ;;  %v540_v39 = vcombine.high %v479_v32, %v479_v32  ;;  %v547_v40 = vrot.slane %v479_v32, %v17134_v14 }
 0x255   :  { %v535_v41 = vrot.slane %v507_v33, %v17134_v14  ;;  %v537_v42 = vcombine.high %v521_v34, %v521_v34  ;;  %v538_v43 = vcombine.high %v528_v35, %v528_v35  ;;  %v17160_v44 = vadd.f32 %v17143_v22, %v528_v35 }
 0x256   :  { %v17162_v45 = vadd.f32 %v672_v30, %v536_v36  ;;  %v17165_v46 = vadd.f32 %v17149_v29, %v521_v34  ;;  %v554_v47 = vrot.slane %v540_v39, %v17134_v14  ;;  %v555_v48 = vcombine.high %v547_v40, %v547_v40  ;;  %v484_v49 = vpop.f32.mrb[10].mxu1 }
 0x257   :  { %v539_v50 = vcombine.high %v535_v41, %v535_v41  ;;  %v17168_v51 = vadd.f32 %v673_v31, %v538_v43  ;;  %v17170_v52 = vadd.f32 %v657_v21, %v535_v41  ;;  %v17173_v53 = vadd.f32 %v17143_v22, %v537_v42  ;;  %v486_v54 = vpop.f32.mrb[11].mxu1 }
 0x258   :  { %v721_v55 = vcombine.low %v17155_v38, %v17160_v44  ;;  %v556_v56 = vcombine.high %v554_v47, %v554_v47  ;;  %v563_v57 = vrot.slane %v547_v40, %v17134_v14  ;;  %v570_v58 = vrot.slane %v554_v47, %v17134_v14 }
 0x259   :  { %v722_v59 = vcombine.low %v17162_v45, %v17168_v51  ;;  %v577_v60 = vrot.slane %v555_v48, %v17134_v14  ;;  %v17182_v61 = vadd.f32 %v672_v30, %v539_v50  ;;  %v595_v62 = vrot.slane %v484_v49, %v17134_v14 }
 0x25a   :  { %v584_v63 = vrot.slane %v556_v56, %v17134_v14  ;;  %v585_v0 = vcombine.high %v563_v57, %v563_v57  ;;  %v586_v1 = vcombine.high %v570_v58, %v570_v58  ;;  %v17186_v2 = vadd.f32 %v673_v31, %v563_v57 }
 0x25b   :  { %v587_v3 = vcombine.high %v577_v60, %v577_v60  ;;  %v17189_v4 = vadd.f32 %v17149_v29, %v577_v60  ;;  %v17191_v6 = vadd.f32 %v672_v30, %v570_v58  ;;  %v596_v7 = vcombine.high %v595_v62, %v595_v62 }
 0x25c   :  { %v588_v8 = vcombine.high %v584_v63, %v584_v63  ;;  %v17193_v9 = vadd.f32 %v657_v21, %v585_v0  ;;  %v17195_v10 = vadd.f32 %v673_v31, %v584_v63  ;;  %v761_v11 = vcombine.low %v17182_v61, %v17186_v2 }
 0x25d   :  { %v17200_v12 = vadd.f32 %v17143_v22, %v587_v3  ;;  %v603_v15 = vrot.slane %v595_v62, %v17134_v14  ;;  %v610_v16 = vrot.slane %v596_v7, %v17134_v14  ;;  %v729_v17 = vrot.slane %v721_v55, %v17134_v14 }
 0x25e   :  { %v800_v18 = vcombine.low %v17191_v6, %v17195_v10  ;;  %v17207_v19 = vadd.f32 %v657_v21, %v588_v8  ;;  %v736_v20 = vrot.slane %v722_v59, %v17134_v14  ;;  %v743_v23 = vrot.slane %v17165_v46, %v17134_v14 }
 0x25f   :  { %v799_v24 = vcombine.low %v17193_v9, %v17200_v12  ;;  %v611_v25 = vcombine.high %v603_v15, %v603_v15  ;;  %v612_v26 = vcombine.high %v610_v16, %v610_v16  ;;  %v17215_v27 = vadd.f32 %v17143_v22, %v603_v15 }
 0x260   :  { %v17217_v28 = vadd.f32 %v672_v30, %v610_v16  ;;  %v744_v32 = vcombine.low %v729_v17, %v736_v20  ;;  %v758_v33 = vrot.slane %v743_v23, %v17134_v14  ;;  %v760_v21 = vcombine.low %v17170_v52, %v17173_v53 }
 0x261   :  { %v17222_v34 = vadd.f32 %v673_v31, %v611_v25  ;;  %v838_v35 = vcombine.low %v17207_v19, %v17215_v27  ;;  %v775_v36 = vrot.slane %v761_v11, %v17134_v14  ;;  %v782_v37 = vrot.slane %v17189_v4, %v17134_v14 }
 0x262   :  { %v751_v22 = vrot.slane %v744_v32, %v17134_v14  ;;  %v768_v30 = vrot.slane %v760_v21, %v17134_v14  ;;  %v17232_v39 = vadd.f32 %v17149_v29, %v586_v1  ;;  %v807_v40 = vrot.slane %v799_v24, %v17134_v14 }
 0x263   :  { %v839_v31 = vcombine.low %v17217_v28, %v17222_v34  ;;  %v814_v41 = vrot.slane %v800_v18, %v17134_v14  ;;  %v17239_v42 = vadd.f32 %v17149_v29, %v612_v26  ;;  %v846_v49 = vrot.slane %v838_v35, %v17134_v14 }
 0x264   :  { %v759_v43 = vcombine.low %v751_v22, %v758_v33  ;;  %v783_v47 = vcombine.low %v768_v30, %v775_v36  ;;  %v821_v48 = vrot.slane %v17232_v39, %v17134_v14  ;;  %v797_v29 = vrot.slane %v782_v37, %v17134_v14 }
 0x265   :  { %v822_v50 = vcombine.low %v807_v40, %v814_v41  ;;  %v853_v54 = vrot.slane %v839_v31, %v17134_v14  ;;  %v860_v55 = vrot.slane %v17239_v42, %v17134_v14  ;;  %v17258_v15 = vsub.s32 0, %v17131_v13 }
 0x266   :  { %v882_v56 = vsel %vm881_vm1, %v759_v43, 0.0  ;;  %v790_v57 = vrot.slane %v783_v47, %v17134_v14  ;;  %v836_v62 = vrot.slane %v821_v48, %v17134_v14  ;;  %v17261_v16 = vsub.s32 1, %v17131_v13 }
 0x267   :  { %883 = vadd.xlane.f32.xlu1 %v882_v56  ;;  %v829_v58 = vrot.slane %v822_v50, %v17134_v14  ;;  %v861_v59 = vcombine.low %v846_v49, %v853_v54  ;;  %v875_v0 = vrot.slane %v860_v55, %v17134_v14  ;;  %v17264_v17 = vsub.s32 2, %v17131_v13 }
 0x268   :  { %v798_v60 = vcombine.low %v790_v57, %v797_v29  ;;  %v17267_v18 = vsub.s32 3, %v17131_v13  ;;  %v17270_v23 = vsub.s32 4, %v17131_v13 }
 0x269   :  { %v868_v63 = vrot.slane %v861_v59, %v17134_v14  ;;  %v837_v3 = vcombine.low %v829_v58, %v836_v62 }
 0x26a   :  { %v885_v1 = vsel %vm881_vm1, %v798_v60, 0.0 }
 0x26b   :  { %886 = vadd.xlane.f32.xlu0 %v885_v1  ;;  %v876_v7 = vcombine.low %v868_v63, %v875_v0  ;;  %v888_v11 = vsel %vm881_vm1, %v837_v3, 0.0 }
 0x26d   :  { %v891_v8 = vsel %vm881_vm1, %v876_v7, 0.0 }
 0x26e   :  { %892 = vadd.xlane.f32.xlu1 %v891_v8 }
 0x26f   :  { %889 = vadd.xlane.f32.xlu0 %v888_v11 }
 0x2f4   :  { %v884_v20 = vpop.xlane.xlu1 %883 }
 0x2f5   :  { %v895_v24 = vmul.f32 0.03125, %v884_v20 }
 0x2f7   :  { %v906_v25 = vrot.slane %v895_v24, %v17258_v15  ;;  %v910_v26 = vrot.slane %v895_v24, %v17261_v16  ;;  %v914_v32 = vrot.slane %v895_v24, %v17264_v17  ;;  %v918_v33 = vrot.slane %v895_v24, %v17267_v18 }
 0x2f8   :  { %v887_v21 = vpop.xlane.xlu0 %886  ;;  %v922_v35 = vrot.slane %v895_v24, %v17270_v23 }
 0x2f9   :  { %v896_v36 = vmul.f32 0.03125, %v887_v21  ;;  %v17278_v37 = vsub.f32 %v17155_v38, %v906_v25  ;;  %v17281_v22 = vsub.f32 %v17160_v44, %v910_v26  ;;  %v17284_v13 = vsub.f32 %v17162_v45, %v914_v32 }
 0x2fa   :  { %v17287_v30 = vsub.f32 %v17168_v51, %v918_v33  ;;  %v17290_v40 = vsub.f32 %v17165_v46, %v922_v35 }
 0x2fb   :  { %v926_v31 = vrot.slane %v896_v36, %v17258_v15  ;;  %v930_v41 = vrot.slane %v896_v36, %v17261_v16  ;;  %v934_v43 = vrot.slane %v896_v36, %v17264_v17  ;;  %v938_v38 = vrot.slane %v896_v36, %v17267_v18  ;;  %v893_v47 = vpop.xlane.xlu1 %892 }
 0x2fc   :  { %v890_v44 = vpop.xlane.xlu0 %889  ;;  %v17296_v48 = vmul.f32 0.03125, %v893_v47  ;;  %v1023_v45 = vmul.f32 %v17278_v37, %v17278_v37  ;;  %v1024_v51 = vmul.f32 %v17281_v22, %v17281_v22  ;;  %v1025_v46 = vmul.f32 %v17284_v13, %v17284_v13 }
 0x2fd   :  { %v897_v49 = vmul.f32 0.03125, %v890_v44  ;;  %v1026_v50 = vmul.f32 %v17287_v30, %v17287_v30  ;;  %v1027_v54 = vmul.f32 %v17290_v40, %v17290_v40  ;;  %v942_v55 = vrot.slane %v896_v36, %v17270_v23 }
 0x2fe   :  { %v966_v56 = vrot.slane %v17296_v48, %v17258_v15  ;;  %v970_v57 = vrot.slane %v17296_v48, %v17261_v16  ;;  %v974_v29 = vrot.slane %v17296_v48, %v17264_v17  ;;  %v1063_v63 = vcombine.low %v1023_v45, %v1024_v51 }
 0x2ff   :  { %v946_v58 = vrot.slane %v897_v49, %v17258_v15  ;;  %v950_v59 = vrot.slane %v897_v49, %v17261_v16  ;;  %v954_v60 = vrot.slane %v897_v49, %v17264_v17  ;;  %v958_v62 = vrot.slane %v897_v49, %v17267_v18 }
 0x300   :  { %v1064_v0 = vcombine.low %v1025_v46, %v1026_v50  ;;  %v1085_v1 = vrot.slane %v1027_v54, %v17134_v14  ;;  %v17321_v3 = vsub.f32 %v17170_v52, %v926_v31  ;;  %v17324_v7 = vsub.f32 %v17173_v53, %v930_v41 }
 0x301   :  { %v17327_v8 = vsub.f32 %v17182_v61, %v934_v43  ;;  %v17330_v11 = vsub.f32 %v17186_v2, %v938_v38  ;;  %v17333_v20 = vsub.f32 %v17189_v4, %v942_v55  ;;  %v1071_v24 = vrot.slane %v1063_v63, %v17134_v14 }
 0x302   :  { %v1078_v25 = vrot.slane %v1064_v0, %v17134_v14  ;;  %v1100_v26 = vrot.slane %v1085_v1, %v17134_v14  ;;  %v1028_v52 = vmul.f32 %v17321_v3, %v17321_v3  ;;  %v1029_v53 = vmul.f32 %v17324_v7, %v17324_v7 }
 0x303   :  { %v1030_v61 = vmul.f32 %v17327_v8, %v17327_v8  ;;  %v1031_v2 = vmul.f32 %v17330_v11, %v17330_v11  ;;  %v1032_v4 = vmul.f32 %v17333_v20, %v17333_v20  ;;  %v962_v33 = vrot.slane %v897_v49, %v17270_v23 }
 0x304   :  { %v1086_v32 = vcombine.low %v1071_v24, %v1078_v25  ;;  %v17350_v21 = vsub.f32 %v17193_v9, %v946_v58  ;;  %v17353_v35 = vsub.f32 %v17200_v12, %v950_v59  ;;  %v1102_v36 = vcombine.low %v1028_v52, %v1029_v53 }
 0x305   :  { %v1103_v31 = vcombine.low %v1030_v61, %v1031_v2  ;;  %v1124_v41 = vrot.slane %v1032_v4, %v17134_v14  ;;  %v17357_v43 = vsub.f32 %v17191_v6, %v954_v60  ;;  %v17361_v47 = vsub.f32 %v17195_v10, %v958_v62 }
 0x306   :  { %v1093_v38 = vrot.slane %v1086_v32, %v17134_v14  ;;  %v17364_v44 = vsub.f32 %v17232_v39, %v962_v33  ;;  %v1033_v9 = vmul.f32 %v17350_v21, %v17350_v21  ;;  %v978_v12 = vrot.slane %v17296_v48, %v17267_v18 }
 0x307   :  { %v1110_v45 = vrot.slane %v1102_v36, %v17134_v14  ;;  %v1117_v51 = vrot.slane %v1103_v31, %v17134_v14  ;;  %v1034_v6 = vmul.f32 %v17353_v35, %v17353_v35  ;;  %v1035_v10 = vmul.f32 %v17357_v43, %v17357_v43 }
 0x308   :  { %v1101_v46 = vcombine.low %v1093_v38, %v1100_v26  ;;  %v1036_v39 = vmul.f32 %v17361_v47, %v17361_v47  ;;  %v1037_v49 = vmul.f32 %v17364_v44, %v17364_v44  ;;  %v982_v55 = vrot.slane %v17296_v48, %v17270_v23 }
 0x309   :  { %v1125_v50 = vcombine.low %v1110_v45, %v1117_v51  ;;  %v1141_v54 = vcombine.low %v1033_v9, %v1034_v6  ;;  %v17383_v58 = vsub.f32 %v17207_v19, %v966_v56  ;;  %v1139_v60 = vrot.slane %v1124_v41, %v17134_v14 }
 0x30a   :  { %v1223_v59 = vsel %vm881_vm1, %v1101_v46, 0.0  ;;  %v1142_v62 = vcombine.low %v1035_v10, %v1036_v39  ;;  %v17388_v63 = vsub.f32 %v17215_v27, %v970_v57  ;;  %v17393_v24 = vsub.f32 %v17217_v28, %v974_v29  ;;  %v14996_v10 = vld [vmem:[%s20895_s27] ss:$0 sm:$0xff]  ;;  %s16723_s27 = smov 8  }
 0x30b   :  { %1224 = vadd.xlane.f32.xlu0 %v1223_v59  ;;  %v1132_v0 = vrot.slane %v1125_v50, %v17134_v14  ;;  %v1149_v1 = vrot.slane %v1141_v54, %v17134_v14  ;;  %v17396_v48 = vsub.f32 %v17222_v34, %v978_v12  ;;  %v1163_v56 = vrot.slane %v1037_v49, %v17134_v14  ;;  %v14997_v49 = vld [vmem:[%s20896_s29] ss:$0 sm:$0xff] }
 0x30c   :  { %v1156_v19 = vrot.slane %v1142_v62, %v17134_v14  ;;  %v17401_v25 = vsub.f32 %v17239_v42, %v982_v55  ;;  %v1038_v27 = vmul.f32 %v17383_v58, %v17383_v58  ;;  %v1039_v26 = vmul.f32 %v17388_v63, %v17388_v63 }
 0x30d   :  { %v1140_v57 = vcombine.low %v1132_v0, %v1139_v60  ;;  %v1040_v28 = vmul.f32 %v17393_v24, %v17393_v24  ;;  %v1041_v34 = vmul.f32 %v17396_v48, %v17396_v48  ;;  %v1178_v4 = vrot.slane %v1163_v56, %v17134_v14 }
 0x30e   :  { %v1164_v29 = vcombine.low %v1149_v1, %v1156_v19  ;;  %v1042_v52 = vmul.f32 %v17401_v25, %v17401_v25  ;;  %v1180_v53 = vcombine.low %v1038_v27, %v1039_v26  ;;  %v1383_v54 = vrot.slane %v14996_v10, %v17134_v14 }
 0x30f   :  { %v1226_v42 = vsel %vm881_vm1, %v1140_v57, 0.0  ;;  %v1181_v61 = vcombine.low %v1040_v28, %v1041_v34  ;;  %v1376_v59 = vcombine.high %v14996_v10, %v14996_v10  ;;  %v1452_v60 = vrot.slane %v14997_v49, %v17134_v14 }
 0x310   :  { %1227 = vadd.xlane.f32.xlu1 %v1226_v42  ;;  %v1171_v2 = vrot.slane %v1164_v29, %v17134_v14  ;;  %v1188_v32 = vrot.slane %v1180_v53, %v17134_v14  ;;  %v1202_v36 = vrot.slane %v1042_v52, %v17134_v14  ;;  %v1391_v0 = vcombine.high %v1383_v54, %v1383_v54 }
 0x311   :  { %v1195_v33 = vrot.slane %v1181_v61, %v17134_v14  ;;  %v1445_v19 = vcombine.high %v14997_v49, %v14997_v49  ;;  %v1390_v27 = vrot.slane %v1376_v59, %v17134_v14  ;;  %v17433_v57 = vrot.slane %v1383_v54, %v17134_v14 }
 0x312   :  { %v1179_v31 = vcombine.low %v1171_v2, %v1178_v4  ;;  %v1217_v12 = vrot.slane %v1202_v36, %v17134_v14  ;;  %v1460_v26 = vcombine.high %v1452_v60, %v1452_v60  ;;  %v17436_v34 = vrot.slane %v1391_v0, %v17134_v14 }
 0x313   :  { %v1203_v41 = vcombine.low %v1188_v32, %v1195_v33  ;;  %v17439_v29 = vrot.slane %v1452_v60, %v17134_v14  ;;  %v1459_v52 = vrot.slane %v1445_v19, %v17134_v14  ;;  %v17443_v61 = vrot.slane %v1390_v27, %v17134_v14 }
 0x314   :  { %v1229_v38 = vsel %vm881_vm1, %v1179_v31, 0.0  ;;  %v17447_v2 = vcombine.high %v17433_v57, %v17433_v57  ;;  %v17450_v4 = vrot.slane %v1460_v26, %v17134_v14 }
 0x315   :  { %1230 = vadd.xlane.f32.xlu0 %v1229_v38  ;;  %v1210_v9 = vrot.slane %v1203_v41, %v17134_v14  ;;  %v17471_v49 = vrot.slane %v1459_v52, %v17134_v14 }
 0x317   :  { %v1218_v45 = vcombine.low %v1210_v9, %v1217_v12  ;;  %v17459_v9 = vcombine.high %v17436_v34, %v17436_v34  ;;  %v17463_v12 = vcombine.high %v17439_v29, %v17439_v29 }
 0x319   :  { %v1232_v51 = vsel %vm881_vm1, %v1218_v45, 0.0 }
 0x31a   :  { %1233 = vadd.xlane.f32.xlu1 %v1232_v51 }
 0x398   :  { %v1225_v6 = vpop.xlane.xlu0 %1224 }
 0x399   :  { %v1235_v46 = vmul.f32 0.03125, %v1225_v6 }
 0x39b   :  { %v1239_v39 = vadd.f32 1e-05, %v1235_v46 }
 0x39d   :  { %16336 = vrsqrt.f32 %v1239_v39  ;;  %v1228_v50 = vpop.xlane.xlu1 %1227 }
 0x39e   :  { %v1236_v55 = vmul.f32 0.03125, %v1228_v50  ;;  %v17475_v50 = vcombine.high %v17450_v4, %v17450_v4 }
 0x3a0   :  { %v1240_v62 = vadd.f32 1e-05, %v1236_v55 }
 0x3a2   :  { %16338 = vrsqrt.f32 %v1240_v62  ;;  %v1231_v1 = vpop.xlane.xlu0 %1230 }
 0x3a3   :  { %v1237_v56 = vmul.f32 0.03125, %v1231_v1 }
 0x3a5   :  { %v1241_v28 = vadd.f32 1e-05, %v1237_v56 }
 0x3a7   :  { %v16337_v42 = vpop.eup %16336  ;;  %16340 = vrsqrt.f32 %v1241_v28  ;;  %v1234_v53 = vpop.xlane.xlu1 %1233 }
 0x3a8   :  { %v1238_v32 = vmul.f32 0.03125, %v1234_v53  ;;  %v1254_v33 = vrot.slane %v16337_v42, %v17258_v15  ;;  %v1258_v36 = vrot.slane %v16337_v42, %v17261_v16  ;;  %v1262_v31 = vrot.slane %v16337_v42, %v17264_v17 }
 0x3a9   :  { %v1266_v41 = vrot.slane %v16337_v42, %v17267_v18  ;;  %v1270_v38 = vrot.slane %v16337_v42, %v17270_v23 }
 0x3aa   :  { %v1242_v45 = vadd.f32 1e-05, %v1238_v32  ;;  %v1351_v51 = vmul.f32 %v1254_v33, %v17278_v37  ;;  %v1352_v6 = vmul.f32 %v1258_v36, %v17281_v22  ;;  %v1353_v46 = vmul.f32 %v1262_v31, %v17284_v13 }
 0x3ab   :  { %v1354_v10 = vmul.f32 %v1266_v41, %v17287_v30  ;;  %v1355_v39 = vmul.f32 %v1270_v38, %v17290_v40 }
 0x3ac   :  { %v16339_v54 = vpop.eup %16338  ;;  %16342 = vrsqrt.f32 %v1242_v45  ;;  %v1420_v55 = vmul.f32 %v17433_v57, %v1351_v51  ;;  %v1421_v37 = vmul.f32 %v17436_v34, %v1352_v6  ;;  %v1422_v22 = vmul.f32 %v17447_v2, %v1353_v46 }
 0x3ad   :  { %v1423_v13 = vmul.f32 %v17459_v9, %v1354_v10  ;;  %v1424_v30 = vmul.f32 %v17443_v61, %v1355_v39  ;;  %v1274_v40 = vrot.slane %v16339_v54, %v17258_v15  ;;  %v1278_v59 = vrot.slane %v16339_v54, %v17261_v16 }
 0x3ae   :  { %v17485_v60 = vadd.f32 %v17439_v29, %v1420_v55  ;;  %v17488_v62 = vadd.f32 %v17450_v4, %v1421_v37  ;;  %v17491_v0 = vadd.f32 %v17463_v12, %v1422_v22  ;;  %v1282_v1 = vrot.slane %v16339_v54, %v17264_v17 }
 0x3af   :  { %v17495_v19 = vadd.f32 %v17475_v50, %v1423_v13  ;;  %v17498_v56 = vadd.f32 %v17471_v49, %v1424_v30  ;;  %v1286_v27 = vrot.slane %v16339_v54, %v17267_v18  ;;  %v1290_v26 = vrot.slane %v16339_v54, %v17270_v23 }
 0x3b0   :  { %v1531_v28 = vcombine.low %v17485_v60, %v17488_v62  ;;  %v1356_v52 = vmul.f32 %v1274_v40, %v17321_v3  ;;  %v1357_v42 = vmul.f32 %v1278_v59, %v17324_v7  ;;  %v1358_v53 = vmul.f32 %v1282_v1, %v17327_v8 }
 0x3b1   :  { %v16341_v32 = vpop.eup %16340  ;;  %v1532_v33 = vcombine.low %v17491_v0, %v17495_v19  ;;  %v1553_v36 = vrot.slane %v17498_v56, %v17134_v14  ;;  %v1359_v31 = vmul.f32 %v1286_v27, %v17330_v11  ;;  %v1360_v41 = vmul.f32 %v1290_v26, %v17333_v20 }
 0x3b2   :  { %v1539_v38 = vrot.slane %v1531_v28, %v17134_v14  ;;  %v1425_v45 = vmul.f32 %v17433_v57, %v1356_v52  ;;  %v1426_v3 = vmul.f32 %v17436_v34, %v1357_v42  ;;  %v1427_v7 = vmul.f32 %v17447_v2, %v1358_v53 }
 0x3b3   :  { %v1546_v8 = vrot.slane %v1532_v33, %v17134_v14  ;;  %v1568_v51 = vrot.slane %v1553_v36, %v17134_v14  ;;  %v1428_v6 = vmul.f32 %v17459_v9, %v1359_v31  ;;  %v1429_v46 = vmul.f32 %v17443_v61, %v1360_v41 }
 0x3b4   :  { %v17522_v11 = vadd.f32 %v17439_v29, %v1425_v45  ;;  %v17525_v20 = vadd.f32 %v17450_v4, %v1426_v3  ;;  %v17528_v10 = vadd.f32 %v17463_v12, %v1427_v7  ;;  %v1294_v39 = vrot.slane %v16341_v32, %v17258_v15 }
 0x3b5   :  { %v1554_v54 = vcombine.low %v1539_v38, %v1546_v8  ;;  %v17532_v55 = vadd.f32 %v17475_v50, %v1428_v6  ;;  %v17535_v37 = vadd.f32 %v17471_v49, %v1429_v46  ;;  %v1298_v22 = vrot.slane %v16341_v32, %v17261_v16 }
 0x3b6   :  { %v16343_v13 = vpop.eup %16342  ;;  %v1570_v30 = vcombine.low %v17522_v11, %v17525_v20  ;;  %v1302_v40 = vrot.slane %v16341_v32, %v17264_v17  ;;  %v1306_v59 = vrot.slane %v16341_v32, %v17267_v18  ;;  %v1310_v1 = vrot.slane %v16341_v32, %v17270_v23 }
 0x3b7   :  { %v1561_v27 = vrot.slane %v1554_v54, %v17134_v14  ;;  %v1571_v26 = vcombine.low %v17528_v10, %v17532_v55  ;;  %v1592_v28 = vrot.slane %v17535_v37, %v17134_v14  ;;  %v1361_v52 = vmul.f32 %v1294_v39, %v17350_v21 }
 0x3b8   :  { %v1578_v42 = vrot.slane %v1570_v30, %v17134_v14  ;;  %v1362_v53 = vmul.f32 %v1298_v22, %v17353_v35  ;;  %v1363_v33 = vmul.f32 %v1302_v40, %v17357_v43  ;;  %v1364_v36 = vmul.f32 %v1306_v59, %v17361_v47 }
 0x3b9   :  { %v1569_v31 = vcombine.low %v1561_v27, %v1568_v51  ;;  %v1585_v32 = vrot.slane %v1571_v26, %v17134_v14  ;;  %v1607_v41 = vrot.slane %v1592_v28, %v17134_v14  ;;  %v1365_v38 = vmul.f32 %v1310_v1, %v17364_v44 }
 0x3ba   :  { %v1430_v45 = vmul.f32 %v17433_v57, %v1361_v52  ;;  %v1431_v3 = vmul.f32 %v17436_v34, %v1362_v53  ;;  %v1432_v21 = vmul.f32 %v17447_v2, %v1363_v33  ;;  %v1433_v7 = vmul.f32 %v17459_v9, %v1364_v36 }
 0x3bb   :  { %v1691_v35 = vsel %vm881_vm1, %v1569_v31, 0.0  ;;  %v1593_v43 = vcombine.low %v1578_v42, %v1585_v32  ;;  %v1434_v47 = vmul.f32 %v17443_v61, %v1365_v38  ;;  %v1314_v8 = vrot.slane %v16343_v13, %v17258_v15 }
 0x3bc   :  { %1692 = vadd.xlane.f32.xlu0 %v1691_v35  ;;  %v17564_v51 = vadd.f32 %v17439_v29, %v1430_v45  ;;  %v17567_v44 = vadd.f32 %v17450_v4, %v1431_v3  ;;  %v17570_v6 = vadd.f32 %v17463_v12, %v1432_v21  ;;  %v17573_v46 = vadd.f32 %v17475_v50, %v1433_v7 }
 0x3bd   :  { %v1600_v39 = vrot.slane %v1593_v43, %v17134_v14  ;;  %v17577_v54 = vadd.f32 %v17471_v49, %v1434_v47  ;;  %v1318_v22 = vrot.slane %v16343_v13, %v17261_v16  ;;  %v1322_v30 = vrot.slane %v16343_v13, %v17264_v17 }
 0x3be   :  { %20897 = vst [vmem:[#allocation5_spill] sm:$0xff] %v17564_v51  ;;  %20898 = vst [vmem:[#allocation6_spill] sm:$0xff] %v17567_v44  ;;  %v1609_v40 = vcombine.low %v17564_v51, %v17567_v44  ;;  %v1610_v59 = vcombine.low %v17570_v6, %v17573_v46  ;;  %v1326_v1 = vrot.slane %v16343_v13, %v17267_v18 }
 0x3bf   :  { %20899 = vst [vmem:[#allocation7_spill] sm:$0xff] %v17573_v46  ;;  %20900 = vst [vmem:[#allocation8_spill] sm:$0xff] %v17577_v54  ;;  %v1330_v27 = vrot.slane %v16343_v13, %v17270_v23  ;;  %v1608_v26 = vcombine.low %v1600_v39, %v1607_v41  ;;  %v1631_v28 = vrot.slane %v17577_v54, %v17134_v14 }
 0x3c0   :  { %v1366_v52 = vmul.f32 %v1314_v8, %v17383_v58  ;;  %v1367_v42 = vmul.f32 %v1318_v22, %v17388_v63  ;;  %v1617_v53 = vrot.slane %v1609_v40, %v17134_v14  ;;  %v1624_v33 = vrot.slane %v1610_v59, %v17134_v14 }
 0x3c1   :  { %v1368_v36 = vmul.f32 %v1322_v30, %v17393_v24  ;;  %v1369_v31 = vmul.f32 %v1326_v1, %v17396_v48  ;;  %v1694_v32 = vsel %vm881_vm1, %v1608_v26, 0.0  ;;  %v1370_v13 = vmul.f32 %v1330_v27, %v17401_v25 }
 0x3c2   :  { %v1435_v41 = vmul.f32 %v17433_v57, %v1366_v52  ;;  %1695 = vadd.xlane.f32.xlu1 %v1694_v32  ;;  %v1632_v38 = vcombine.low %v1617_v53, %v1624_v33  ;;  %v1436_v58 = vmul.f32 %v17436_v34, %v1367_v42  ;;  %v1646_v3 = vrot.slane %v1631_v28, %v17134_v14 }
 0x3c3   :  { %v1437_v63 = vmul.f32 %v17447_v2, %v1368_v36  ;;  %v1438_v45 = vmul.f32 %v17459_v9, %v1369_v31  ;;  %v1439_v24 = vmul.f32 %v17443_v61, %v1370_v13 }
 0x3c4   :  { %v17604_v48 = vadd.f32 %v17439_v29, %v1435_v41  ;;  %v1639_v21 = vrot.slane %v1632_v38, %v17134_v14  ;;  %v17608_v25 = vadd.f32 %v17450_v4, %v1436_v58 }
 0x3c5   :  { %v17611_v57 = vadd.f32 %v17463_v12, %v1437_v63  ;;  %v17614_v34 = vadd.f32 %v17475_v50, %v1438_v45  ;;  %v17617_v2 = vadd.f32 %v17471_v49, %v1439_v24 }
 0x3c6   :  { %20901 = vst [vmem:[#allocation9_spill] sm:$0xff] %v17604_v48  ;;  %20902 = vst [vmem:[#allocation10_spill] sm:$0xff] %v17608_v25  ;;  %v1647_v9 = vcombine.low %v1639_v21, %v1646_v3  ;;  %v1648_v61 = vcombine.low %v17604_v48, %v17608_v25 }
 0x3c7   :  { %20903 = vst [vmem:[#allocation11_spill] sm:$0xff] %v17611_v57  ;;  %20904 = vst [vmem:[#allocation12_spill] sm:$0xff] %v17614_v34  ;;  %v1649_v29 = vcombine.low %v17611_v57, %v17614_v34  ;;  %v1670_v50 = vrot.slane %v17617_v2, %v17134_v14 }
 0x3c8   :  { %20905 = vst [vmem:[#allocation13_spill] sm:$0xff] %v17617_v2  ;;  %v1697_v7 = vsel %vm881_vm1, %v1647_v9, 0.0  ;;  %v1656_v4 = vrot.slane %v1648_v61, %v17134_v14 }
 0x3c9   :  { %v1663_v12 = vrot.slane %v1649_v29, %v17134_v14  ;;  %1698 = vadd.xlane.f32.xlu0 %v1697_v7  ;;  %v1685_v43 = vrot.slane %v1670_v50, %v17134_v14 }
 0x3cb   :  { %v1671_v35 = vcombine.low %v1656_v4, %v1663_v12 }
 0x3cd   :  { %v1678_v49 = vrot.slane %v1671_v35, %v17134_v14 }
 0x3cf   :  { %v1686_v47 = vcombine.low %v1678_v49, %v1685_v43 }
 0x3d1   :  { %v1700_v8 = vsel %vm881_vm1, %v1686_v47, 0.0 }
 0x3d2   :  { %1701 = vadd.xlane.f32.xlu1 %v1700_v8 }
 0x449   :  { %v1693_v39 = vpop.xlane.xlu0 %1692 }
 0x44a   :  { %v1703_v22 = vmul.f32 0.03125, %v1693_v39 }
 0x44c   :  { %v1714_v30 = vrot.slane %v1703_v22, %v17258_v15  ;;  %v1718_v40 = vrot.slane %v1703_v22, %v17261_v16  ;;  %v1722_v59 = vrot.slane %v1703_v22, %v17264_v17  ;;  %v1726_v1 = vrot.slane %v1703_v22, %v17267_v18 }
 0x44d   :  { %v1730_v27 = vrot.slane %v1703_v22, %v17270_v23 }
 0x44e   :  { %v17637_v26 = vsub.f32 %v17485_v60, %v1714_v30  ;;  %v17640_v28 = vsub.f32 %v17488_v62, %v1718_v40  ;;  %v17643_v52 = vsub.f32 %v17491_v0, %v1722_v59  ;;  %v17646_v42 = vsub.f32 %v17495_v19, %v1726_v1 }
 0x44f   :  { %v1696_v53 = vpop.xlane.xlu1 %1695  ;;  %v17649_v33 = vsub.f32 %v17498_v56, %v1730_v27 }
 0x450   :  { %v1704_v36 = vmul.f32 0.03125, %v1696_v53  ;;  %v1831_v31 = vmul.f32 %v17637_v26, %v17637_v26  ;;  %v1832_v32 = vmul.f32 %v17640_v28, %v17640_v28  ;;  %v1833_v13 = vmul.f32 %v17643_v52, %v17643_v52 }
 0x451   :  { %v1834_v41 = vmul.f32 %v17646_v42, %v17646_v42  ;;  %v1835_v38 = vmul.f32 %v17649_v33, %v17649_v33 }
 0x452   :  { %v1734_v58 = vrot.slane %v1704_v36, %v17258_v15  ;;  %v1738_v63 = vrot.slane %v1704_v36, %v17261_v16  ;;  %v1742_v45 = vrot.slane %v1704_v36, %v17264_v17  ;;  %v1746_v3 = vrot.slane %v1704_v36, %v17267_v18 }
 0x453   :  { %v1871_v24 = vcombine.low %v1831_v31, %v1832_v32  ;;  %v1872_v21 = vcombine.low %v1833_v13, %v1834_v41  ;;  %v1893_v9 = vrot.slane %v1835_v38, %v17134_v14  ;;  %v1750_v61 = vrot.slane %v1704_v36, %v17270_v23 }
 0x454   :  { %v17668_v29 = vsub.f32 %v17522_v11, %v1734_v58  ;;  %v17671_v7 = vsub.f32 %v17525_v20, %v1738_v63  ;;  %v17674_v4 = vsub.f32 %v17528_v10, %v1742_v45  ;;  %v17677_v12 = vsub.f32 %v17532_v55, %v1746_v3 }
 0x455   :  { %v1879_v50 = vrot.slane %v1871_v24, %v17134_v14  ;;  %v1886_v35 = vrot.slane %v1872_v21, %v17134_v14  ;;  %v17682_v49 = vsub.f32 %v17535_v37, %v1750_v61  ;;  %v1908_v1 = vrot.slane %v1893_v9, %v17134_v14 }
 0x456   :  { %v1699_v43 = vpop.xlane.xlu0 %1698  ;;  %v1836_v47 = vmul.f32 %v17668_v29, %v17668_v29  ;;  %v1837_v8 = vmul.f32 %v17671_v7, %v17671_v7  ;;  %v1838_v39 = vmul.f32 %v17674_v4, %v17674_v4  ;;  %v1839_v22 = vmul.f32 %v17677_v12, %v17677_v12 }
 0x457   :  { %v1705_v30 = vmul.f32 0.03125, %v1699_v43  ;;  %v1894_v40 = vcombine.low %v1879_v50, %v1886_v35  ;;  %v1840_v59 = vmul.f32 %v17682_v49, %v17682_v49 }
 0x458   :  { %v1910_v27 = vcombine.low %v1836_v47, %v1837_v8  ;;  %v1911_v53 = vcombine.low %v1838_v39, %v1839_v22 }
 0x459   :  { %v1754_v36 = vrot.slane %v1705_v30, %v17258_v15  ;;  %v1758_v31 = vrot.slane %v1705_v30, %v17261_v16  ;;  %v1762_v32 = vrot.slane %v1705_v30, %v17264_v17  ;;  %v1766_v13 = vrot.slane %v1705_v30, %v17267_v18 }
 0x45a   :  { %v1901_v41 = vrot.slane %v1894_v40, %v17134_v14  ;;  %v1918_v38 = vrot.slane %v1910_v27, %v17134_v14  ;;  %v1925_v58 = vrot.slane %v1911_v53, %v17134_v14  ;;  %v1932_v63 = vrot.slane %v1840_v59, %v17134_v14 }
 0x45b   :  { %v1770_v45 = vrot.slane %v1705_v30, %v17270_v23  ;;  %v17705_v3 = vsub.f32 %v17564_v51, %v1754_v36  ;;  %v17708_v24 = vsub.f32 %v17567_v44, %v1758_v31  ;;  %v17711_v21 = vsub.f32 %v17570_v6, %v1762_v32 }
 0x45c   :  { %v1909_v9 = vcombine.low %v1901_v41, %v1908_v1  ;;  %v1933_v61 = vcombine.low %v1918_v38, %v1925_v58  ;;  %v17714_v50 = vsub.f32 %v17573_v46, %v1766_v13  ;;  %v1947_v40 = vrot.slane %v1932_v63, %v17134_v14 }
 0x45d   :  { %v17717_v35 = vsub.f32 %v17577_v54, %v1770_v45  ;;  %v1841_v43 = vmul.f32 %v17705_v3, %v17705_v3  ;;  %v1842_v47 = vmul.f32 %v17708_v24, %v17708_v24  ;;  %v1843_v8 = vmul.f32 %v17711_v21, %v17711_v21 }
 0x45e   :  { %v2031_v22 = vsel %vm881_vm1, %v1909_v9, 0.0  ;;  %v1940_v30 = vrot.slane %v1933_v61, %v17134_v14  ;;  %v1844_v59 = vmul.f32 %v17714_v50, %v17714_v50 }
 0x45f   :  { %v1702_v39 = vpop.xlane.xlu1 %1701  ;;  %2032 = vadd.xlane.f32.xlu0 %v2031_v22  ;;  %v1845_v27 = vmul.f32 %v17717_v35, %v17717_v35  ;;  %v1949_v53 = vcombine.low %v1841_v43, %v1842_v47 }
 0x460   :  { %v1706_v1 = vmul.f32 0.03125, %v1702_v39  ;;  %v1948_v36 = vcombine.low %v1940_v30, %v1947_v40  ;;  %v1950_v31 = vcombine.low %v1843_v8, %v1844_v59 }
 0x461   :  { %v1957_v63 = vrot.slane %v1949_v53, %v17134_v14  ;;  %v1971_v9 = vrot.slane %v1845_v27, %v17134_v14 }
 0x462   :  { %v1774_v32 = vrot.slane %v1706_v1, %v17258_v15  ;;  %v1778_v13 = vrot.slane %v1706_v1, %v17261_v16  ;;  %v1782_v41 = vrot.slane %v1706_v1, %v17264_v17  ;;  %v1786_v38 = vrot.slane %v1706_v1, %v17267_v18 }
 0x463   :  { %v2034_v58 = vsel %vm881_vm1, %v1948_v36, 0.0  ;;  %v1964_v45 = vrot.slane %v1950_v31, %v17134_v14  ;;  %v1790_v61 = vrot.slane %v1706_v1, %v17270_v23  ;;  %v1986_v53 = vrot.slane %v1971_v9, %v17134_v14 }
 0x464   :  { %2035 = vadd.xlane.f32.xlu1 %v2034_v58  ;;  %v17742_v43 = vsub.f32 %v17604_v48, %v1774_v32  ;;  %v17745_v47 = vsub.f32 %v17608_v25, %v1778_v13  ;;  %v17748_v8 = vsub.f32 %v17611_v57, %v1782_v41  ;;  %v17751_v22 = vsub.f32 %v17614_v34, %v1786_v38 }
 0x465   :  { %v1972_v39 = vcombine.low %v1957_v63, %v1964_v45  ;;  %v17754_v30 = vsub.f32 %v17617_v2, %v1790_v61 }
 0x466   :  { %v1846_v40 = vmul.f32 %v17742_v43, %v17742_v43  ;;  %v1847_v59 = vmul.f32 %v17745_v47, %v17745_v47  ;;  %v1848_v1 = vmul.f32 %v17748_v8, %v17748_v8  ;;  %v1849_v36 = vmul.f32 %v17751_v22, %v17751_v22 }
 0x467   :  { %v1979_v27 = vrot.slane %v1972_v39, %v17134_v14  ;;  %v1850_v31 = vmul.f32 %v17754_v30, %v17754_v30 }
 0x468   :  { %v1988_v32 = vcombine.low %v1846_v40, %v1847_v59  ;;  %v1989_v41 = vcombine.low %v1848_v1, %v1849_v36  ;;  %v2317_v40 = vld [vmem:[%s20823_s8] sm:$0xff]  ;;  %v2318_v59 = vld [vmem:[%s20823_s8 + $0x8] sm:$0xff]  ;;  %v2319_v1 = vld [vmem:[%s20823_s8 + $0x10] sm:$0xff]  ;;  %v20906_v36 = vmov 0.0|0.0  }
 0x469   :  { %v1987_v13 = vcombine.low %v1979_v27, %v1986_v53  ;;  %v2010_v45 = vrot.slane %v1850_v31, %v17134_v14  ;;  %v16225_v27 = vpack.c.bf16 %v2318_v59, %v2317_v40  ;;  %v2320_v53 = vld [vmem:[%s20823_s8 + $0x18] sm:$0xff] }
 0x46a   :  { %v1996_v38 = vrot.slane %v1988_v32, %v17134_v14  ;;  %v2003_v63 = vrot.slane %v1989_v41, %v17134_v14 }
 0x46b   :  { %v2037_v58 = vsel %vm881_vm1, %v1987_v13, 0.0  ;;  %v2025_v39 = vrot.slane %v2010_v45, %v17134_v14  ;;  %16226 = vmatpush3.bf16.msra.mxu1 %v16225_v27  ;;  %v14998_v13 = vld [vmem:[%s20821_s6] ss:$0 sm:$0xff] }
 0x46c   :  { %2038 = vadd.xlane.f32.xlu0 %v2037_v58  ;;  %v2011_v61 = vcombine.low %v1996_v38, %v2003_v63  ;;  %16227 = vmatprep.subr.bf16.mxu1 %v20906_v36  ;;  %v14999_v58 = vld [vmem:[%s20822_s7] ss:$0 sm:$0xff]  ;;  %v2191_v45 = vrot.slane %v14998_v13, %v17134_v14 }
 0x46d   :  { %v2253_v59 = vcombine.high %v14999_v58, %v14999_v58 }
 0x46e   :  { %v2018_v9 = vrot.slane %v2011_v61, %v17134_v14  ;;  %v2199_v40 = vcombine.high %v2191_v45, %v2191_v45 }
 0x470   :  { %v2026_v5 = vcombine.low %v2018_v9, %v2025_v39  ;;  %v2184_v9 = vcombine.high %v14998_v13, %v14998_v13  ;;  %v2260_v39 = vrot.slane %v14999_v58, %v17134_v14 }
 0x472   :  { %v2040_v2 = vsel %vm881_vm1, %v2026_v5, 0.0  ;;  %v20843_v5 = vmov 0.0   ;;  %v2268_v27 = vcombine.high %v2260_v39, %v2260_v39  ;;  %v17814_v58 = vrot.slane %v2260_v39, %v17134_v14 }
 0x473   :  { %2041 = vadd.xlane.f32.xlu1 %v2040_v2  ;;  %15585 = vmatprep.mubr.msk.f32.mxu1 %vm16711_vm2, %v20843_v5  ;;  %v16228_v2 = vpack.c.bf16 %v2320_v53, %v2319_v1  ;;  %v2198_v1 = vrot.slane %v2184_v9, %v17134_v14 }
 0x474   :  { %15594 = vmatprep.subr.mxu0 %v20843_v5  ;;  %15596 = vmatprep.mubr.msk.f32.mxu0 %vm16711_vm2, %v20843_v5  ;;  %v17842_v25 = vcombine.high %v17814_v58, %v17814_v58 }
 0x475   :  { %16229 = vmatpush3.bf16.msra.mxu1 %v16228_v2 }
 0x476   :  { %15604 = vmatprep.subr.mxu1 %v20843_v5 }
 0x4ec   :  { %v2033_v31 = vpop.xlane.xlu0 %2032 }
 0x4ed   :  { %v2043_v32 = vmul.f32 0.03125, %v2033_v31  ;;  %v17804_v31 = vrot.slane %v2191_v45, %v17134_v14 }
 0x4ef   :  { %v2047_v41 = vadd.f32 1e-05, %v2043_v32  ;;  %v17807_v32 = vrot.slane %v2199_v40, %v17134_v14 }
 0x4f1   :  { %v2036_v38 = vpop.xlane.xlu1 %2035  ;;  %16344 = vrsqrt.f32 %v2047_v41  ;;  %v2267_v41 = vrot.slane %v2253_v59, %v17134_v14  ;;  %v17830_v39 = vcombine.high %v17807_v32, %v17807_v32 }
 0x4f2   :  { %v2044_v63 = vmul.f32 0.03125, %v2036_v38 }
 0x4f4   :  { %v2048_v61 = vadd.f32 1e-05, %v2044_v63  ;;  %v17811_v63 = vrot.slane %v2198_v1, %v17134_v14  ;;  %v17826_v1 = vcombine.high %v17804_v31, %v17804_v31 }
 0x4f6   :  { %16346 = vrsqrt.f32 %v2048_v61  ;;  %v17817_v61 = vrot.slane %v2268_v27, %v17134_v14 }
 0x4f8   :  { %v17846_v48 = vcombine.high %v17817_v61, %v17817_v61 }
 0x4f9   :  { %v2039_v53 = vpop.xlane.xlu0 %2038 }
 0x4fa   :  { %v2045_v2 = vmul.f32 0.03125, %v2039_v53 }
 0x4fb   :  { %v16345_v38 = vpop.eup %16344 }
 0x4fc   :  { %v2049_v13 = vadd.f32 1e-05, %v2045_v2  ;;  %v2062_v9 = vrot.slane %v16345_v38, %v17258_v15  ;;  %v2066_v45 = vrot.slane %v16345_v38, %v17261_v16  ;;  %v2070_v40 = vrot.slane %v16345_v38, %v17264_v17 }
 0x4fd   :  { %v2074_v53 = vrot.slane %v16345_v38, %v17267_v18  ;;  %v2078_v59 = vrot.slane %v16345_v38, %v17270_v23  ;;  %v17838_v38 = vrot.slane %v2267_v41, %v17134_v14 }
 0x4fe   :  { %16348 = vrsqrt.f32 %v2049_v13  ;;  %v2159_v27 = vmul.f32 %v2062_v9, %v17637_v26  ;;  %v2160_v2 = vmul.f32 %v2066_v45, %v17640_v28  ;;  %v2161_v5 = vmul.f32 %v2070_v40, %v17643_v52 }
 0x4ff   :  { %v2162_v34 = vmul.f32 %v2074_v53, %v17646_v42  ;;  %v2163_v13 = vmul.f32 %v2078_v59, %v17649_v33 }
 0x500   :  { %v16347_v57 = vpop.eup %16346  ;;  %v2042_v26 = vpop.xlane.xlu1 %2041  ;;  %v2228_v33 = vmul.f32 %v17804_v31, %v2159_v27  ;;  %v2229_v41 = vmul.f32 %v17807_v32, %v2160_v2  ;;  %v2230_v45 = vmul.f32 %v17826_v1, %v2161_v5 }
 0x501   :  { %v2082_v28 = vrot.slane %v16347_v57, %v17258_v15  ;;  %v2086_v52 = vrot.slane %v16347_v57, %v17261_v16  ;;  %v2090_v42 = vrot.slane %v16347_v57, %v17264_v17  ;;  %v2046_v9 = vmul.f32 0.03125, %v2042_v26 }
 0x502   :  { %v2231_v40 = vmul.f32 %v17830_v39, %v2162_v34  ;;  %v2232_v54 = vmul.f32 %v17811_v63, %v2163_v13  ;;  %v2297_v51 = vadd.f32 %v17814_v58, %v2228_v33  ;;  %v2298_v27 = vadd.f32 %v17817_v61, %v2229_v41 }
 0x503   :  { %v2164_v53 = vmul.f32 %v2082_v28, %v17668_v29  ;;  %v2165_v59 = vmul.f32 %v2086_v52, %v17671_v7  ;;  %v2166_v44 = vmul.f32 %v2090_v42, %v17674_v4  ;;  %v2050_v46 = vadd.f32 1e-05, %v2046_v9 }
 0x504   :  { %v2299_v26 = vadd.f32 %v17842_v25, %v2230_v45  ;;  %v2300_v29 = vadd.f32 %v17846_v48, %v2231_v40  ;;  %v2301_v7 = vadd.f32 %v17838_v38, %v2232_v54  ;;  %v2341_v4 = vcombine.low %v2297_v51, %v2298_v27 }
 0x505   :  { %v2233_v2 = vmul.f32 %v17804_v31, %v2164_v53  ;;  %v2234_v5 = vmul.f32 %v17807_v32, %v2165_v59  ;;  %v2235_v34 = vmul.f32 %v17826_v1, %v2166_v44  ;;  %16350 = vrsqrt.f32 %v2050_v46 }
 0x506   :  { %v2094_v13 = vrot.slane %v16347_v57, %v17267_v18  ;;  %v2342_v33 = vcombine.low %v2299_v26, %v2300_v29  ;;  %v2351_v41 = vrot.slane %v2341_v4, %v17134_v14  ;;  %v2098_v44 = vrot.slane %v16347_v57, %v17270_v23 }
 0x507   :  { %v2302_v28 = vadd.f32 %v17814_v58, %v2233_v2  ;;  %v2303_v52 = vadd.f32 %v17817_v61, %v2234_v5  ;;  %v2304_v42 = vadd.f32 %v17842_v25, %v2235_v34 }
 0x508   :  { %v16349_v9 = vpop.eup %16348  ;;  %v2167_v46 = vmul.f32 %v2094_v13, %v17677_v12  ;;  %v2358_v51 = vrot.slane %v2342_v33, %v17134_v14  ;;  %v2168_v12 = vmul.f32 %v2098_v44, %v17682_v49 }
 0x509   :  { %v2343_v45 = vcombine.low %v2301_v7, %v2302_v28  ;;  %v2344_v54 = vcombine.low %v2303_v52, %v2304_v42  ;;  %v2102_v40 = vrot.slane %v16349_v9, %v17258_v15  ;;  %v2106_v53 = vrot.slane %v16349_v9, %v17261_v16 }
 0x50a   :  { %v2110_v59 = vrot.slane %v16349_v9, %v17264_v17  ;;  %v2114_v27 = vrot.slane %v16349_v9, %v17267_v18  ;;  %v2118_v26 = vrot.slane %v16349_v9, %v17270_v23  ;;  %v2373_v5 = vcombine.low %v2351_v41, %v2358_v51 }
 0x50b   :  { %v2365_v2 = vrot.slane %v2343_v45, %v17134_v14  ;;  %v2372_v57 = vrot.slane %v2344_v54, %v17134_v14  ;;  %v2169_v34 = vmul.f32 %v2102_v40, %v17705_v3  ;;  %v2170_v29 = vmul.f32 %v2106_v53, %v17708_v24 }
 0x50c   :  { %v2171_v7 = vmul.f32 %v2110_v59, %v17711_v21  ;;  %v2172_v4 = vmul.f32 %v2114_v27, %v17714_v50  ;;  %v2381_v28 = vrot.slane %v2373_v5, %v17134_v14  ;;  %v2173_v52 = vmul.f32 %v2118_v26, %v17717_v35 }
 0x50d   :  { %v2374_v13 = vcombine.low %v2365_v2, %v2372_v57  ;;  %v2236_v42 = vmul.f32 %v17830_v39, %v2167_v46  ;;  %v2237_v33 = vmul.f32 %v17811_v63, %v2168_v12  ;;  %v2238_v9 = vmul.f32 %v17804_v31, %v2169_v34 }
 0x50e   :  { %v2239_v49 = vmul.f32 %v17807_v32, %v2170_v29  ;;  %v2240_v3 = vmul.f32 %v17826_v1, %v2171_v7  ;;  %v2241_v21 = vmul.f32 %v17830_v39, %v2172_v4  ;;  %v2242_v50 = vmul.f32 %v17811_v63, %v2173_v52 }
 0x50f   :  { %v2388_v24 = vrot.slane %v2374_v13, %v17134_v14  ;;  %v2305_v41 = vadd.f32 %v17846_v48, %v2236_v42  ;;  %v16351_v44 = vpop.eup %16350  ;;  %v2306_v35 = vadd.f32 %v17838_v38, %v2237_v33  ;;  %v2307_v46 = vadd.f32 %v17814_v58, %v2238_v9 }
 0x510   :  { %v2308_v45 = vadd.f32 %v17817_v61, %v2239_v49  ;;  %v2309_v54 = vadd.f32 %v17842_v25, %v2240_v3  ;;  %v2122_v40 = vrot.slane %v16351_v44, %v17258_v15  ;;  %v2310_v53 = vadd.f32 %v17846_v48, %v2241_v21 }
 0x511   :  { %v2389_v51 = vcombine.low %v2381_v28, %v2388_v24  ;;  %v2126_v27 = vrot.slane %v16351_v44, %v17261_v16  ;;  %v2130_v26 = vrot.slane %v16351_v44, %v17264_v17  ;;  %v2390_v57 = vcombine.low %v2305_v41, %v2306_v35 }
 0x512   :  { %v2391_v59 = vcombine.low %v2307_v46, %v2308_v45  ;;  %v2174_v2 = vmul.f32 %v2122_v40, %v17742_v43  ;;  %v2134_v5 = vrot.slane %v16351_v44, %v17267_v18  ;;  %v2138_v12 = vrot.slane %v16351_v44, %v17270_v23 }
 0x513   :  { %15586 = vmatmul.mubr.msk.f32.vlgmr.msra.gmra.mrb[12].mxu1 %vm2463_vm3, %v2389_v51  ;;  %v20907_v34 = vmov 0.0   ;;  %v2311_v29 = vadd.f32 %v17838_v38, %v2242_v50  ;;  %v2392_v7 = vcombine.low %v2309_v54, %v2310_v53  ;;  %v2175_v4 = vmul.f32 %v2126_v27, %v17745_v47 }
 0x514   :  { %15588 = vmatprep.mubr.msk.f32.mxu1 %vm16711_vm2, %v20907_v34  ;;  %v2176_v13 = vmul.f32 %v2130_v26, %v17748_v8  ;;  %v2243_v28 = vmul.f32 %v17804_v31, %v2174_v2  ;;  %v2407_v52 = vrot.slane %v2391_v59, %v17134_v14  ;;  %v2177_v43 = vmul.f32 %v2134_v5, %v17751_v22 }
 0x515   :  { %v2178_v42 = vmul.f32 %v2138_v12, %v17754_v30  ;;  %v2244_v33 = vmul.f32 %v17807_v32, %v2175_v4  ;;  %v2400_v3 = vrot.slane %v2390_v57, %v17134_v14  ;;  %v2414_v31 = vrot.slane %v2392_v7, %v17134_v14 }
 0x516   :  { %v2245_v9 = vmul.f32 %v17826_v1, %v2176_v13  ;;  %v2312_v49 = vadd.f32 %v17814_v58, %v2243_v28  ;;  %v2246_v47 = vmul.f32 %v17830_v39, %v2177_v43 }
 0x517   :  { %v2247_v8 = vmul.f32 %v17811_v63, %v2178_v42  ;;  %v2313_v24 = vadd.f32 %v17817_v61, %v2244_v33  ;;  %v2422_v30 = vcombine.low %v2400_v3, %v2407_v52 }
 0x518   :  { %v2314_v22 = vadd.f32 %v17842_v25, %v2245_v9  ;;  %v2393_v21 = vcombine.low %v2311_v29, %v2312_v49  ;;  %v2315_v32 = vadd.f32 %v17846_v48, %v2246_v47 }
 0x519   :  { %v2316_v1 = vadd.f32 %v17838_v38, %v2247_v8  ;;  %v2430_v39 = vrot.slane %v2422_v30, %v17134_v14  ;;  %v15003_v38 = vld [vmem:[%s20824_s9] ss:$0 sm:$0xff] }
 0x51a   :  { %v2439_v50 = vcombine.low %v2313_v24, %v2314_v22  ;;  %v2421_v58 = vrot.slane %v2393_v21, %v17134_v14  ;;  %v2708_v45 = vrot.slane %v15003_v38, %v17134_v14  ;;  %v2701_v54 = vcombine.high %v15003_v38, %v15003_v38 }
 0x51b   :  { %v2440_v41 = vcombine.low %v2315_v32, %v2316_v1 }
 0x51c   :  { %v2423_v44 = vcombine.low %v2414_v31, %v2421_v58  ;;  %v2447_v63 = vrot.slane %v2439_v50, %v17134_v14  ;;  %v2716_v51 = vcombine.high %v2708_v45, %v2708_v45  ;;  %v2715_v53 = vrot.slane %v2701_v54, %v17134_v14 }
 0x51d   :  { %v2454_v35 = vrot.slane %v2440_v41, %v17134_v14  ;;  %v17948_v59 = vrot.slane %v2708_v45, %v17134_v14 }
 0x51e   :  { %v2437_v61 = vrot.slane %v2423_v44, %v17134_v14  ;;  %v17952_v2 = vrot.slane %v2716_v51, %v17134_v14  ;;  %v17957_v7 = vrot.slane %v2715_v53, %v17134_v14 }
 0x51f   :  { %v2455_v46 = vcombine.low %v2447_v63, %v2454_v35  ;;  %v17961_v4 = vcombine.high %v17948_v59, %v17948_v59 }
 0x520   :  { %v2438_v25 = vcombine.low %v2430_v39, %v2437_v61  ;;  %v17967_v43 = vcombine.high %v17952_v2, %v17952_v2 }
 0x521   :  { %v2462_v48 = vrot.slane %v2455_v46, %v17134_v14 }
 0x522   :  { %15589 = vmatmul.mubr.msk.f32.gmra.mrb[14].mxu1 %vm2463_vm3, %v2438_v25 }
 0x523   :  { %15591 = vmatprep.mubr.msk.f32.mxu1 %vm16711_vm2, %v20907_v34 }
 0x526   :  { %15592 = vmatmul.mubr.msk.f32.gmra.mrb[16].mxu1 %vm2463_vm3, %v2462_v48 }
 0x527   :  { %15606 = vmatprep.mubr.msk.f32.mxu1 %vm16711_vm2, %v20907_v34 }
 0x5e6   :  { %v2536_v40 = vpop.f32.mrb[12].mxu1 }
 0x5e7   :  { %v2553_v27 = vcombine.high %v2536_v40, %v2536_v40  ;;  %v2560_v26 = vrot.slane %v2536_v40, %v17134_v14  ;;  %v15587_v57 = vpop.f32.mrb[13].mxu1 }
 0x5e9   :  { %v2567_v5 = vrot.slane %v2553_v27, %v17134_v14  ;;  %v2568_v12 = vcombine.high %v2560_v26, %v2560_v26  ;;  %v2576_v29 = vrot.slane %v2560_v26, %v17134_v14 }
 0x5eb   :  { %v2583_v13 = vrot.slane %v2567_v5, %v17134_v14  ;;  %v2590_v28 = vrot.slane %v2568_v12, %v17134_v14  ;;  %v2598_v52 = vcombine.high %v2576_v29, %v2576_v29  ;;  %v2569_v42 = vcombine.high %v2567_v5, %v2567_v5 }
 0x5ec   :  { %v2745_v49 = vadd.f32 %v17948_v59, %v2576_v29 }
 0x5ed   :  { %v2600_v33 = vcombine.high %v2590_v28, %v2590_v28  ;;  %v2746_v9 = vadd.f32 %v17952_v2, %v2590_v28  ;;  %v2747_v3 = vadd.f32 %v17961_v4, %v2598_v52  ;;  %v2749_v8 = vadd.f32 %v17957_v7, %v2583_v13 }
 0x5ee   :  { %v2597_v31 = vrot.slane %v2569_v42, %v17134_v14  ;;  %v2599_v24 = vcombine.high %v2583_v13, %v2583_v13 }
 0x5ef   :  { %v2748_v47 = vadd.f32 %v17967_v43, %v2600_v33  ;;  %v2770_v22 = vcombine.low %v2745_v49, %v2746_v9  ;;  %v2792_v1 = vrot.slane %v2749_v8, %v17134_v14 }
 0x5f0   :  { %v2750_v50 = vadd.f32 %v17948_v59, %v2597_v31  ;;  %v2751_v58 = vadd.f32 %v17952_v2, %v2599_v24  ;;  %v2601_v44 = vcombine.high %v2597_v31, %v2597_v31 }
 0x5f1   :  { %v2771_v21 = vcombine.low %v2747_v3, %v2748_v47  ;;  %v2778_v30 = vrot.slane %v2770_v22, %v17134_v14  ;;  %v2807_v35 = vrot.slane %v2792_v1, %v17134_v14 }
 0x5f2   :  { %v2891_v48 = vcombine.low %v2750_v50, %v2751_v58  ;;  %v2752_v40 = vadd.f32 %v17961_v4, %v2601_v44 }
 0x5f3   :  { %v2785_v32 = vrot.slane %v2771_v21, %v17134_v14 }
 0x5f4   :  { %v2899_v13 = vrot.slane %v2891_v48, %v17134_v14 }
 0x5f5   :  { %v2793_v41 = vcombine.low %v2778_v30, %v2785_v32  ;;  %v2541_v39 = vpop.f32.mrb[14].mxu1 }
 0x5f6   :  { %v2602_v61 = vcombine.high %v2541_v39, %v2541_v39  ;;  %v2609_v25 = vrot.slane %v2541_v39, %v17134_v14  ;;  %v15590_v46 = vpop.f32.mrb[15].mxu1 }
 0x5f7   :  { %v2800_v63 = vrot.slane %v2793_v41, %v17134_v14 }
 0x5f8   :  { %v2616_v45 = vrot.slane %v2602_v61, %v17134_v14  ;;  %v2617_v54 = vcombine.high %v2609_v25, %v2609_v25  ;;  %v2625_v51 = vrot.slane %v2609_v25, %v17134_v14 }
 0x5f9   :  { %v17983_v38 = vcombine.low %v2800_v63, %v2807_v35  ;;  %v2546_v53 = vpop.f32.mrb[16].mxu1 }
 0x5fa   :  { %v2618_v27 = vcombine.high %v2616_v45, %v2616_v45  ;;  %v2632_v26 = vrot.slane %v2616_v45, %v17134_v14  ;;  %v2639_v57 = vrot.slane %v2617_v54, %v17134_v14  ;;  %v2647_v5 = vcombine.high %v2625_v51, %v2625_v51  ;;  %v15593_v12 = vpop.f32.mrb[17].mxu1 }
 0x5fb   :  { %2809 = vrot.lane.b32.xlu0 %v17983_v38, %s16713_s0  ;;  %v2753_v29 = vadd.f32 %v17967_v43, %v2625_v51  ;;  %v2657_v28 = vrot.slane %v2546_v53, %v17134_v14 }
 0x5fc   :  { %v2646_v52 = vrot.slane %v2618_v27, %v17134_v14  ;;  %v2648_v42 = vcombine.high %v2632_v26, %v2632_v26  ;;  %v2649_v33 = vcombine.high %v2639_v57, %v2639_v57  ;;  %v2754_v9 = vadd.f32 %v17957_v7, %v2639_v57 }
 0x5fd   :  { %v2755_v49 = vadd.f32 %v17948_v59, %v2647_v5  ;;  %v2757_v3 = vadd.f32 %v17961_v4, %v2632_v26  ;;  %v2892_v47 = vcombine.low %v2752_v40, %v2753_v29  ;;  %v2658_v8 = vcombine.high %v2657_v28, %v2657_v28 }
 0x5fe   :  { %v2650_v31 = vcombine.high %v2646_v52, %v2646_v52  ;;  %v2756_v24 = vadd.f32 %v17952_v2, %v2649_v33  ;;  %v2758_v22 = vadd.f32 %v17967_v43, %v2646_v52  ;;  %v2759_v21 = vadd.f32 %v17957_v7, %v2648_v42 }
 0x5ff   :  { %v2906_v30 = vrot.slane %v2892_v47, %v17134_v14  ;;  %v2913_v32 = vrot.slane %v2754_v9, %v17134_v14  ;;  %v2665_v1 = vrot.slane %v2657_v28, %v17134_v14  ;;  %v2672_v50 = vrot.slane %v2658_v8, %v17134_v14 }
 0x600   :  { %v3011_v58 = vcombine.low %v2755_v49, %v2756_v24  ;;  %v3012_v41 = vcombine.low %v2757_v3, %v2758_v22  ;;  %v2760_v44 = vadd.f32 %v17948_v59, %v2650_v31  ;;  %v3033_v63 = vrot.slane %v2759_v21, %v17134_v14 }
 0x601   :  { %v2914_v39 = vcombine.low %v2899_v13, %v2906_v30  ;;  %v2673_v35 = vcombine.high %v2665_v1, %v2665_v1  ;;  %v2674_v61 = vcombine.high %v2672_v50, %v2672_v50  ;;  %v2928_v25 = vrot.slane %v2913_v32, %v17134_v14 }
 0x602   :  { %v3019_v46 = vrot.slane %v3011_v58, %v17134_v14  ;;  %v3026_v48 = vrot.slane %v3012_v41, %v17134_v14  ;;  %v2761_v45 = vadd.f32 %v17952_v2, %v2665_v1  ;;  %v2762_v51 = vadd.f32 %v17961_v4, %v2672_v50 }
 0x603   :  { %v2921_v54 = vrot.slane %v2914_v39, %v17134_v14  ;;  %v2763_v40 = vadd.f32 %v17967_v43, %v2673_v35  ;;  %v2764_v59 = vadd.f32 %v17957_v7, %v2674_v61  ;;  %v3048_v29 = vrot.slane %v3033_v63, %v17134_v14 }
 0x604   :  { %v3034_v53 = vcombine.low %v3019_v46, %v3026_v48  ;;  %v3131_v27 = vcombine.low %v2760_v44, %v2761_v45 }
 0x605   :  { %v18016_v26 = vcombine.low %v2921_v54, %v2928_v25  ;;  %v3132_v57 = vcombine.low %v2762_v51, %v2763_v40  ;;  %v3153_v13 = vrot.slane %v2764_v59, %v17134_v14 }
 0x606   :  { %v3041_v5 = vrot.slane %v3034_v53, %v17134_v14  ;;  %v3139_v12 = vrot.slane %v3131_v27, %v17134_v14 }
 0x607   :  { %v3146_v2 = vrot.slane %v3132_v57, %v17134_v14  ;;  %2930 = vrot.lane.b32.xlu1 %v18016_v26, %s16713_s0  ;;  %v3168_v28 = vrot.slane %v3153_v13, %v17134_v14 }
 0x608   :  { %v18025_v4 = vcombine.low %v3041_v5, %v3048_v29 }
 0x609   :  { %v3154_v7 = vcombine.low %v3139_v12, %v3146_v2 }
 0x60b   :  { %v3161_v43 = vrot.slane %v3154_v7, %v17134_v14  ;;  %3050 = vrot.lane.b32.xlu1 %v18025_v4, %s16713_s0 }
 0x60d   :  { %v18031_v52 = vcombine.low %v3161_v43, %v3168_v28 }
 0x60f   :  { %3170 = vrot.lane.b32.xlu0 %v18031_v52, %s16713_s0 }
 0x66d   :  { %v2810_v42 = vpop.permute.xlu0 %2809 }
 0x66e   :  { %15595 = vmatpush3.xpose.msk.msra.mxu0 %vm2811_vm4, %v2810_v42 }
 0x66f   :  { %15599 = vmatprep.subr.mxu0 %v20907_v34 }
 0x671   :  { %15597 = vmatmul.mubr.msk.f32.vlgmr.msra.gmra.mrb[12].mxu0 %vm2811_vm4, %v17983_v38 }
 0x672   :  { %15601 = vmatprep.mubr.msk.f32.mxu0 %vm16711_vm2, %v20907_v34 }
 0x679   :  { %v2931_v33 = vpop.permute.xlu1 %2930 }
 0x67a   :  { %15600 = vmatpush3.xpose.msk.msra.mxu0 %vm2811_vm4, %v2931_v33 }
 0x67b   :  { %15609 = vmatprep.subr.mxu0 %v20907_v34 }
 0x67d   :  { %v3051_v9 = vpop.permute.xlu1 %3050  ;;  %15602 = vmatmul.mubr.msk.f32.vlgmr.msra.gmra.mrb[14].mxu0 %vm2811_vm4, %v18016_v26 }
 0x67e   :  { %15605 = vmatpush3.xpose.msk.msra.mxu1 %vm2811_vm4, %v3051_v9  ;;  %15611 = vmatprep.mubr.msk.f32.mxu0 %vm16711_vm2, %v20907_v34 }
 0x67f   :  { %15614 = vmatprep.subr.mxu1 %v20907_v34 }
 0x681   :  { %v3171_v49 = vpop.permute.xlu0 %3170  ;;  %15607 = vmatmul.mubr.msk.f32.vlgmr.msra.gmra.mrb[18].mxu1 %vm2811_vm4, %v18025_v4 }
 0x682   :  { %15610 = vmatpush3.xpose.msk.msra.mxu0 %vm2811_vm4, %v3171_v49  ;;  %15616 = vmatprep.mubr.msk.f32.mxu1 %vm16711_vm2, %v20907_v34 }
 0x683   :  { %15619 = vmatprep.subr.mxu0 %v20907_v34 }
 0x685   :  { %15612 = vmatmul.mubr.msk.f32.vlgmr.msra.gmra.mrb[16].mxu0 %vm2811_vm4, %v18031_v52 }
 0x686   :  { %15621 = vmatprep.mubr.msk.f32.mxu0 %vm16711_vm2, %v20907_v34 }
 0x744   :  { %v2882_v3 = vpop.f32.mrb[12].mxu0 }
 0x745   :  { %v3246_v47 = vmul.f32 0.35355338, %v2882_v3  ;;  %v15598_v8 = vpop.f32.mrb[13].mxu0 }
 0x747   :  { %v3251_v31 = vsel %vm3250_vm5, %v3246_v47, -inf }
 0x748   :  { %3252 = vmax.xlane.f32.xlu1 %v3251_v31 }
 0x750   :  { %v3002_v24 = vpop.f32.mrb[14].mxu0 }
 0x751   :  { %v3247_v22 = vmul.f32 0.35355338, %v3002_v24  ;;  %v15603_v21 = vpop.f32.mrb[15].mxu0 }
 0x753   :  { %v3254_v30 = vsel %vm3250_vm5, %v3247_v22, -inf }
 0x754   :  { %v3122_v32 = vpop.f32.mrb[18].mxu1  ;;  %3255 = vmax.xlane.f32.xlu0 %v3254_v30 }
 0x755   :  { %v3248_v1 = vmul.f32 0.35355338, %v3122_v32  ;;  %v15608_v50 = vpop.f32.mrb[19].mxu1 }
 0x757   :  { %v3257_v58 = vsel %vm3250_vm5, %v3248_v1, -inf }
 0x758   :  { %v3242_v41 = vpop.f32.mrb[16].mxu0  ;;  %3258 = vmax.xlane.f32.xlu0 %v3257_v58 }
 0x759   :  { %v3249_v44 = vmul.f32 0.35355338, %v3242_v41  ;;  %v15613_v39 = vpop.f32.mrb[17].mxu0 }
 0x75b   :  { %v3260_v63 = vsel %vm3250_vm5, %v3249_v44, -inf }
 0x75c   :  { %3261 = vmax.xlane.f32.xlu1 %v3260_v63 }
 0x76d   :  { %3374 = vrot.lane.b32.xlu1 %v18016_v26, %s16709_s1 }
 0x76e   :  { %3295 = vrot.lane.b32.xlu0 %v17983_v38, %s16709_s1 }
 0x771   :  { %3451 = vrot.lane.b32.xlu1 %v18025_v4, %s16709_s1 }
 0x772   :  { %3528 = vrot.lane.b32.xlu0 %v18031_v52, %s16709_s1 }
 0x775   :  { %3607 = vrot.lane.b32.xlu1 %v17983_v38, %s16714_s4 }
 0x776   :  { %3685 = vrot.lane.b32.xlu0 %v18016_v26, %s16714_s4 }
 0x779   :  { %3605 = vrot.lane.b32.xlu1 %v17983_v38, %s16715_s30 }
 0x7d5   :  { %v3253_v35 = vpop.xlane.xlu1 %3252 }
 0x7d6   :  { %v3263_v61 = vsub.f32 %v3246_v47, %v3253_v35 }
 0x7d8   :  { %v3267_v25 = vmul.f32 1.442695, %v3263_v61 }
 0x7da   :  { %16352 = vpow2.f32 %v3267_v25 }
 0x7e1   :  { %v3256_v46 = vpop.xlane.xlu0 %3255 }
 0x7e2   :  { %v3264_v48 = vsub.f32 %v3247_v22, %v3256_v46 }
 0x7e4   :  { %v16353_v45 = vpop.eup %16352  ;;  %v3269_v54 = vmul.f32 1.442695, %v3264_v48 }
 0x7e5   :  { %v3275_v51 = vsel %vm3250_vm5, %v16353_v45, 0.0  ;;  %v3259_v40 = vpop.xlane.xlu0 %3258 }
 0x7e6   :  { %3276 = vadd.xlane.f32.xlu0 %v3275_v51  ;;  %16354 = vpow2.f32 %v3269_v54  ;;  %v3265_v59 = vsub.f32 %v3248_v1, %v3259_v40 }
 0x7e8   :  { %v3271_v53 = vmul.f32 1.442695, %v3265_v59 }
 0x7e9   :  { %v3262_v27 = vpop.xlane.xlu1 %3261  ;;  %v3296_v57 = vpop.permute.xlu0 %3295 }
 0x7ea   :  { %v3266_v5 = vsub.f32 %v3249_v44, %v3262_v27  ;;  %16356 = vpow2.f32 %v3271_v53  ;;  %15615 = vmatpush3.msk.msra.mxu1 %vm3301_vm6, %v3296_v57 }
 0x7eb   :  { %15624 = vmatprep.subr.mxu1 %v20907_v34 }
 0x7ec   :  { %v3273_v12 = vmul.f32 1.442695, %v3266_v5 }
 0x7ed   :  { %v3375_v29 = vpop.permute.xlu1 %3374  ;;  %v3529_v33 = vpop.permute.xlu0 %3528 }
 0x7ee   :  { %16358 = vpow2.f32 %v3273_v12  ;;  %15620 = vmatpush3.msk.msra.mxu0 %vm3301_vm6, %v3375_v29 }
 0x7ef   :  { %15629 = vmatprep.subr.mxu0 %v20907_v34 }
 0x7f0   :  { %v16355_v2 = vpop.eup %16354 }
 0x7f1   :  { %v3278_v13 = vsel %vm3250_vm5, %v16355_v2, 0.0  ;;  %v3686_v9 = vpop.permute.xlu0 %3685  ;;  %v3452_v49 = vpop.permute.xlu1 %3451 }
 0x7f2   :  { %3279 = vadd.xlane.f32.xlu1 %v3278_v13 }
 0x7f4   :  { %v16357_v7 = vpop.eup %16356 }
 0x7f5   :  { %v3281_v43 = vsel %vm3250_vm5, %v16357_v7, 0.0  ;;  %v3608_v47 = vpop.permute.xlu1 %3607 }
 0x7f6   :  { %3282 = vadd.xlane.f32.xlu0 %v3281_v43 }
 0x7f8   :  { %v16359_v28 = vpop.eup %16358 }
 0x7f9   :  { %v3284_v42 = vsel %vm3250_vm5, %v16359_v28, 0.0  ;;  %v3606_v8 = vpop.permute.xlu1 %3605 }
 0x7fa   :  { %3285 = vadd.xlane.f32.xlu1 %v3284_v42 }
 0x80b   :  { %3763 = vrot.lane.b32.xlu1 %v18025_v4, %s16714_s4 }
 0x80c   :  { %3683 = vrot.lane.b32.xlu0 %v18016_v26, %s16715_s30 }
 0x80f   :  { %3761 = vrot.lane.b32.xlu1 %v18025_v4, %s16715_s30 }
 0x810   :  { %3841 = vrot.lane.b32.xlu0 %v18031_v52, %s16714_s4 }
 0x814   :  { %3839 = vrot.lane.b32.xlu0 %v18031_v52, %s16715_s30 }
 0x873   :  { %v3277_v3 = vpop.xlane.xlu0 %3276 }
 0x874   :  { %16360 = vrcp.f32 %v3277_v3 }
 0x87e   :  { %v16361_v31 = vpop.eup %16360 }
 0x87f   :  { %v3288_v24 = vmul.f32 %v16361_v31, %v16353_v45  ;;  %v3280_v22 = vpop.xlane.xlu1 %3279 }
 0x880   :  { %16362 = vrcp.f32 %v3280_v22 }
 0x881   :  { %15617 = vmatmul.mubr.msk.f32.vlgmr.msra.gmra.mrb[20].mxu1 %vm3297_vm7, %v3288_v24 }
 0x882   :  { %15625 = vmatpush3.msk.msra.mxu1 %vm3301_vm6, %v3452_v49  ;;  %15626 = vmatprep.mubr.msk.f32.mxu1 %vm16711_vm2, %v20907_v34 }
 0x883   :  { %15634 = vmatprep.subr.mxu1 %v20907_v34  ;;  %v3283_v21 = vpop.xlane.xlu0 %3282 }
 0x884   :  { %16364 = vrcp.f32 %v3283_v21 }
 0x887   :  { %v3286_v30 = vpop.xlane.xlu1 %3285  ;;  %v3684_v41 = vpop.permute.xlu0 %3683 }
 0x888   :  { %16366 = vrcp.f32 %v3286_v30 }
 0x88a   :  { %v16363_v32 = vpop.eup %16362 }
 0x88b   :  { %v3290_v1 = vmul.f32 %v16363_v32, %v16355_v2  ;;  %v3764_v39 = vpop.permute.xlu1 %3763  ;;  %v3842_v35 = vpop.permute.xlu0 %3841 }
 0x88d   :  { %15622 = vmatmul.mubr.msk.f32.vlgmr.msra.gmra.mrb[18].mxu0 %vm3297_vm7, %v3290_v1 }
 0x88e   :  { %v16365_v50 = vpop.eup %16364  ;;  %15630 = vmatpush3.msk.msra.mxu0 %vm3301_vm6, %v3529_v33  ;;  %15631 = vmatprep.mubr.msk.f32.mxu0 %vm16711_vm2, %v20907_v34 }
 0x88f   :  { %v3292_v58 = vmul.f32 %v16365_v50, %v16357_v7  ;;  %15639 = vmatprep.subr.mxu0 %v20907_v34  ;;  %v3762_v61 = vpop.permute.xlu1 %3761  ;;  %v3840_v25 = vpop.permute.xlu0 %3839 }
 0x891   :  { %15627 = vmatmul.mubr.msk.f32.vlgmr.msra.gmra.mrb[22].mxu1 %vm3297_vm7, %v3292_v58 }
 0x892   :  { %v16367_v44 = vpop.eup %16366  ;;  %15635 = vmatpush3.xpose.msk.msra.mxu1 %vm2811_vm4, %v3608_v47  ;;  %15636 = vmatprep.mubr.msk.f32.mxu1 %vm16711_vm2, %v20907_v34 }
 0x893   :  { %v3294_v63 = vmul.f32 %v16367_v44, %v16359_v28  ;;  %15644 = vmatprep.subr.mxu1 %v20907_v34 }
 0x895   :  { %15632 = vmatmul.mubr.msk.f32.vlgmr.msra.gmra.mrb[20].mxu0 %vm3297_vm7, %v3294_v63  ;;  %15637 = vmatmul.mubr.msk.f32.vlgmr.msra.gmra.mrb[24].mxu1 %vm2811_vm4, %v3606_v8 }
 0x896   :  { %15640 = vmatpush3.xpose.msk.msra.mxu0 %vm2811_vm4, %v3686_v9  ;;  %15645 = vmatpush3.xpose.msk.msra.mxu1 %vm2811_vm4, %v3764_v39 }
 0x897   :  { %15641 = vmatprep.mubr.msk.f32.mxu0 %vm16711_vm2, %v20907_v34  ;;  %15649 = vmatprep.subr.mxu0 %v20907_v34 }
 0x898   :  { %15646 = vmatprep.mubr.msk.f32.mxu1 %vm16711_vm2, %v20907_v34  ;;  %15654 = vmatprep.subr.mxu1 %v20907_v34 }
 0x899   :  { %15642 = vmatmul.mubr.msk.f32.vlgmr.msra.gmra.mrb[22].mxu0 %vm2811_vm4, %v3684_v41  ;;  %15647 = vmatmul.mubr.msk.f32.vlgmr.msra.gmra.mrb[26].mxu1 %vm2811_vm4, %v3762_v61 }
 0x89a   :  { %15650 = vmatpush3.xpose.msk.msra.mxu0 %vm2811_vm4, %v3842_v35  ;;  %15651 = vmatprep.mubr.msk.f32.mxu0 %vm16711_vm2, %v20907_v34 }
 0x89b   :  { %15659 = vmatprep.subr.mxu0 %v20907_v34  ;;  %15656 = vmatprep.mubr.msk.f32.mxu1 %vm16711_vm2, %v20907_v34 }
 0x89d   :  { %15652 = vmatmul.mubr.msk.f32.vlgmr.msra.gmra.mrb[24].mxu0 %vm2811_vm4, %v3840_v25 }
 0x89e   :  { %15661 = vmatprep.mubr.msk.f32.mxu0 %vm16711_vm2, %v20907_v34 }
 0x954   :  { %v18131_v46 = vpop.f32.mrb[20].mxu1 }
 0x955   :  { %v15618_v48 = vpop.f32.mrb[21].mxu1 }
 0x960   :  { %v18133_v45 = vpop.f32.mrb[18].mxu0 }
 0x961   :  { %v15623_v54 = vpop.f32.mrb[19].mxu0 }
 0x964   :  { %v18135_v51 = vpop.f32.mrb[22].mxu1 }
 0x965   :  { %v15628_v40 = vpop.f32.mrb[23].mxu1 }
 0x968   :  { %v18137_v59 = vpop.f32.mrb[20].mxu0  ;;  %v3679_v53 = vpop.f32.mrb[24].mxu1 }
 0x969   :  { %v15633_v27 = vpop.f32.mrb[21].mxu0  ;;  %v3917_v57 = vmul.f32 0.35355338, %v3679_v53  ;;  %v15638_v5 = vpop.f32.mrb[25].mxu1 }
 0x96b   :  { %v3921_v12 = vsel %vm3250_vm5, %v3917_v57, -inf }
 0x96c   :  { %v3757_v29 = vpop.f32.mrb[22].mxu0  ;;  %3922 = vmax.xlane.f32.xlu1 %v3921_v12  ;;  %v3835_v2 = vpop.f32.mrb[26].mxu1 }
 0x96d   :  { %v3918_v13 = vmul.f32 0.35355338, %v3757_v29  ;;  %v15643_v7 = vpop.f32.mrb[23].mxu0  ;;  %v15648_v43 = vpop.f32.mrb[27].mxu1  ;;  %v3919_v28 = vmul.f32 0.35355338, %v3835_v2 }
 0x96f   :  { %v3924_v42 = vsel %vm3250_vm5, %v3918_v13, -inf  ;;  %v3927_v47 = vsel %vm3250_vm5, %v3919_v28, -inf }
 0x970   :  { %3925 = vmax.xlane.f32.xlu0 %v3924_v42  ;;  %v3913_v33 = vpop.f32.mrb[24].mxu0 }
 0x971   :  { %v3920_v9 = vmul.f32 0.35355338, %v3913_v33  ;;  %v15653_v49 = vpop.f32.mrb[25].mxu0 }
 0x973   :  { %v3930_v3 = vsel %vm3250_vm5, %v3920_v9, -inf }
 0x974   :  { %3931 = vmax.xlane.f32.xlu1 %v3930_v3  ;;  %3928 = vmax.xlane.f32.xlu0 %v3927_v47 }
 0x985   :  { %4042 = vrot.lane.b32.xlu1 %v18016_v26, %s20865_s5 }
 0x989   :  { %4119 = vrot.lane.b32.xlu1 %v18025_v4, %s20865_s5 }
 0x98a   :  { %3965 = vrot.lane.b32.xlu0 %v17983_v38, %s20865_s5 }
 0x98d   :  { %4275 = vrot.lane.b32.xlu1 %v17983_v38, %s20863_s23 }
 0x98e   :  { %4196 = vrot.lane.b32.xlu0 %v18031_v52, %s20865_s5 }
 0x991   :  { %4273 = vrot.lane.b32.xlu1 %v17983_v38, %s20861_s26 }
 0x992   :  { %4353 = vrot.lane.b32.xlu0 %v18016_v26, %s20863_s23 }
 0x9f9   :  { %v3923_v8 = vpop.xlane.xlu1 %3922 }
 0x9fa   :  { %v3933_v31 = vsub.f32 %v3917_v57, %v3923_v8 }
 0x9fc   :  { %v3937_v24 = vmul.f32 1.442695, %v3933_v31 }
 0x9fd   :  { %v3926_v22 = vpop.xlane.xlu0 %3925 }
 0x9fe   :  { %16368 = vpow2.f32 %v3937_v24  ;;  %v3934_v21 = vsub.f32 %v3918_v13, %v3926_v22 }
 0xa00   :  { %v3939_v30 = vmul.f32 1.442695, %v3934_v21 }
 0xa01   :  { %v3932_v32 = vpop.xlane.xlu1 %3931  ;;  %v3929_v1 = vpop.xlane.xlu0 %3928 }
 0xa02   :  { %16370 = vpow2.f32 %v3939_v30  ;;  %v3936_v50 = vsub.f32 %v3920_v9, %v3932_v32  ;;  %v3935_v58 = vsub.f32 %v3919_v28, %v3929_v1 }
 0xa04   :  { %v3943_v41 = vmul.f32 1.442695, %v3936_v50  ;;  %v3941_v44 = vmul.f32 1.442695, %v3935_v58 }
 0xa05   :  { %v4043_v39 = vpop.permute.xlu1 %4042  ;;  %v3966_v63 = vpop.permute.xlu0 %3965 }
 0xa06   :  { %16372 = vpow2.f32 %v3943_v41  ;;  %15655 = vmatpush3.msk.msra.mxu1 %vm3301_vm6, %v3966_v63  ;;  %15660 = vmatpush3.msk.msra.mxu0 %vm3301_vm6, %v4043_v39 }
 0xa07   :  { %16374 = vpow2.f32 %v3941_v44  ;;  %15664 = vmatprep.subr.mxu1 %v20907_v34  ;;  %15669 = vmatprep.subr.mxu0 %v20907_v34 }
 0xa08   :  { %v16369_v35 = vpop.eup %16368 }
 0xa09   :  { %v3945_v61 = vsel %vm3250_vm5, %v16369_v35, 0.0  ;;  %v4120_v57 = vpop.permute.xlu1 %4119  ;;  %v4197_v5 = vpop.permute.xlu0 %4196 }
 0xa0a   :  { %3946 = vadd.xlane.f32.xlu0 %v3945_v61 }
 0xa0c   :  { %v16371_v25 = vpop.eup %16370 }
 0xa0d   :  { %v3948_v48 = vsel %vm3250_vm5, %v16371_v25, 0.0  ;;  %v4276_v12 = vpop.permute.xlu1 %4275  ;;  %v4354_v29 = vpop.permute.xlu0 %4353 }
 0xa0e   :  { %3949 = vadd.xlane.f32.xlu1 %v3948_v48 }
 0xa10   :  { %v16373_v54 = vpop.eup %16372 }
 0xa11   :  { %v16375_v40 = vpop.eup %16374  ;;  %v3954_v53 = vsel %vm3250_vm5, %v16373_v54, 0.0  ;;  %v4274_v2 = vpop.permute.xlu1 %4273 }
 0xa12   :  { %3955 = vadd.xlane.f32.xlu1 %v3954_v53  ;;  %v3951_v27 = vsel %vm3250_vm5, %v16375_v40, 0.0 }
 0xa13   :  { %3952 = vadd.xlane.f32.xlu0 %v3951_v27 }
 0xa23   :  { %4431 = vrot.lane.b32.xlu1 %v18025_v4, %s20863_s23 }
 0xa27   :  { %4429 = vrot.lane.b32.xlu1 %v18025_v4, %s20861_s26 }
 0xa29   :  { %4351 = vrot.lane.b32.xlu0 %v18016_v26, %s20861_s26 }
 0xa2d   :  { %4509 = vrot.lane.b32.xlu0 %v18031_v52, %s20863_s23 }
 0xa31   :  { %4507 = vrot.lane.b32.xlu0 %v18031_v52, %s20861_s26 }
 0xa97   :  { %v3947_v13 = vpop.xlane.xlu0 %3946 }
 0xa98   :  { %16376 = vrcp.f32 %v3947_v13 }
 0xa9b   :  { %v3950_v7 = vpop.xlane.xlu1 %3949 }
 0xa9c   :  { %16378 = vrcp.f32 %v3950_v7 }
 0xa9f   :  { %v3956_v43 = vpop.xlane.xlu1 %3955 }
 0xaa0   :  { %16380 = vrcp.f32 %v3956_v43  ;;  %v3953_v28 = vpop.xlane.xlu0 %3952 }
 0xaa1   :  { %16382 = vrcp.f32 %v3953_v28 }
 0xaa2   :  { %v16377_v42 = vpop.eup %16376 }
 0xaa3   :  { %v3958_v33 = vmul.f32 %v16377_v42, %v16369_v35  ;;  %v4432_v22 = vpop.permute.xlu1 %4431 }
 0xaa4   :  { %v4352_v8 = vpop.permute.xlu0 %4351 }
 0xaa5   :  { %15657 = vmatmul.mubr.msk.f32.vlgmr.msra.gmra.mrb[28].mxu1 %vm3297_vm7, %v3958_v33 }
 0xaa6   :  { %v16379_v9 = vpop.eup %16378  ;;  %15665 = vmatpush3.msk.msra.mxu1 %vm3301_vm6, %v4120_v57  ;;  %15666 = vmatprep.mubr.msk.f32.mxu1 %vm16711_vm2, %v20907_v34 }
 0xaa7   :  { %v3960_v49 = vmul.f32 %v16379_v9, %v16371_v25  ;;  %15674 = vmatprep.subr.mxu1 %v20907_v34  ;;  %v4430_v30 = vpop.permute.xlu1 %4429 }
 0xaa8   :  { %v4510_v21 = vpop.permute.xlu0 %4509 }
 0xaa9   :  { %15662 = vmatmul.mubr.msk.f32.vlgmr.msra.gmra.mrb[26].mxu0 %vm3297_vm7, %v3960_v49 }
 0xaaa   :  { %v16381_v3 = vpop.eup %16380  ;;  %15670 = vmatpush3.msk.msra.mxu0 %vm3301_vm6, %v4197_v5  ;;  %15671 = vmatprep.mubr.msk.f32.mxu0 %vm16711_vm2, %v20907_v34 }
 0xaab   :  { %v16383_v47 = vpop.eup %16382  ;;  %v3964_v31 = vmul.f32 %v16381_v3, %v16373_v54  ;;  %15679 = vmatprep.subr.mxu0 %v20907_v34 }
 0xaac   :  { %v3962_v24 = vmul.f32 %v16383_v47, %v16375_v40  ;;  %v4508_v32 = vpop.permute.xlu0 %4507 }
 0xaad   :  { %15672 = vmatmul.mubr.msk.f32.vlgmr.msra.gmra.mrb[28].mxu0 %vm3297_vm7, %v3964_v31 }
 0xaae   :  { %15667 = vmatmul.mubr.msk.f32.vlgmr.msra.gmra.mrb[30].mxu1 %vm3297_vm7, %v3962_v24  ;;  %15681 = vmatprep.mubr.msk.f32.mxu0 %vm16711_vm2, %v20907_v34 }
 0xaaf   :  { %15675 = vmatpush3.xpose.msk.msra.mxu1 %vm2811_vm4, %v4276_v12  ;;  %15676 = vmatprep.mubr.msk.f32.mxu1 %vm16711_vm2, %v20907_v34 }
 0xab0   :  { %15684 = vmatprep.subr.mxu1 %v20907_v34 }
 0xab1   :  { %15680 = vmatpush3.xpose.msk.msra.mxu0 %vm2811_vm4, %v4354_v29 }
 0xab2   :  { %15677 = vmatmul.mubr.msk.f32.vlgmr.msra.gmra.mrb[32].mxu1 %vm2811_vm4, %v4274_v2  ;;  %15689 = vmatprep.subr.mxu0 %v20907_v34 }
 0xab3   :  { %15685 = vmatpush3.xpose.msk.msra.mxu1 %vm2811_vm4, %v4432_v22  ;;  %15686 = vmatprep.mubr.msk.f32.mxu1 %vm16711_vm2, %v20907_v34 }
 0xab4   :  { %15682 = vmatmul.mubr.msk.f32.vlgmr.msra.gmra.mrb[30].mxu0 %vm2811_vm4, %v4352_v8  ;;  %15694 = vmatprep.subr.mxu1 %v20907_v34 }
 0xab5   :  { %15690 = vmatpush3.xpose.msk.msra.mxu0 %vm2811_vm4, %v4510_v21  ;;  %15691 = vmatprep.mubr.msk.f32.mxu0 %vm16711_vm2, %v20907_v34 }
 0xab6   :  { %15687 = vmatmul.mubr.msk.f32.vlgmr.msra.gmra.mrb[34].mxu1 %vm2811_vm4, %v4430_v30  ;;  %15699 = vmatprep.subr.mxu0 %v20907_v34 }
 0xab7   :  { %15696 = vmatprep.mubr.msk.f32.mxu1 %vm16711_vm2, %v20907_v34 }
 0xab8   :  { %15692 = vmatmul.mubr.msk.f32.vlgmr.msra.gmra.mrb[32].mxu0 %vm2811_vm4, %v4508_v32 }
 0xab9   :  { %15701 = vmatprep.mubr.msk.f32.mxu0 %vm16711_vm2, %v20907_v34 }
 0xb78   :  { %v18211_v1 = vpop.f32.mrb[28].mxu1 }
 0xb79   :  { %v15658_v50 = vpop.f32.mrb[29].mxu1 }
 0xb7c   :  { %v18213_v58 = vpop.f32.mrb[26].mxu0 }
 0xb7d   :  { %v15663_v41 = vpop.f32.mrb[27].mxu0 }
 0xb80   :  { %v18215_v44 = vpop.f32.mrb[28].mxu0 }
 0xb81   :  { %v18217_v39 = vpop.f32.mrb[30].mxu1  ;;  %v15673_v63 = vpop.f32.mrb[29].mxu0 }
 0xb82   :  { %v15668_v35 = vpop.f32.mrb[31].mxu1 }
 0xb85   :  { %v4347_v61 = vpop.f32.mrb[32].mxu1 }
 0xb86   :  { %v4585_v25 = vmul.f32 0.35355338, %v4347_v61  ;;  %v15678_v48 = vpop.f32.mrb[33].mxu1 }
 0xb87   :  { %v4425_v54 = vpop.f32.mrb[30].mxu0 }
 0xb88   :  { %v4586_v40 = vmul.f32 0.35355338, %v4425_v54  ;;  %v15683_v53 = vpop.f32.mrb[31].mxu0  ;;  %v4589_v27 = vsel %vm3250_vm5, %v4585_v25, -inf }
 0xb89   :  { %4590 = vmax.xlane.f32.xlu1 %v4589_v27  ;;  %v4503_v57 = vpop.f32.mrb[34].mxu1 }
 0xb8a   :  { %v4587_v5 = vmul.f32 0.35355338, %v4503_v57  ;;  %v15688_v12 = vpop.f32.mrb[35].mxu1  ;;  %v4592_v29 = vsel %vm3250_vm5, %v4586_v40, -inf }
 0xb8b   :  { %4593 = vmax.xlane.f32.xlu0 %v4592_v29  ;;  %v4581_v2 = vpop.f32.mrb[32].mxu0 }
 0xb8c   :  { %v4588_v13 = vmul.f32 0.35355338, %v4581_v2  ;;  %v15693_v7 = vpop.f32.mrb[33].mxu0  ;;  %v4595_v28 = vsel %vm3250_vm5, %v4587_v5, -inf }
 0xb8e   :  { %v4598_v43 = vsel %vm3250_vm5, %v4588_v13, -inf }
 0xb8f   :  { %4599 = vmax.xlane.f32.xlu1 %v4598_v43  ;;  %4596 = vmax.xlane.f32.xlu0 %v4595_v28 }
 0xba0   :  { %4710 = vrot.lane.b32.xlu1 %v18016_v26, %s20859_s24 }
 0xba4   :  { %4787 = vrot.lane.b32.xlu1 %v18025_v4, %s20859_s24 }
 0xba5   :  { %4633 = vrot.lane.b32.xlu0 %v17983_v38, %s20859_s24 }
 0xba8   :  { %4943 = vrot.lane.b32.xlu1 %v17983_v38, %s20857_s22 }
 0xba9   :  { %4864 = vrot.lane.b32.xlu0 %v18031_v52, %s20859_s24 }
 0xbac   :  { %4941 = vrot.lane.b32.xlu1 %v17983_v38, %s20855_s2 }
 0xc16   :  { %v4591_v42 = vpop.xlane.xlu1 %4590 }
 0xc17   :  { %v4601_v33 = vsub.f32 %v4585_v25, %v4591_v42 }
 0xc18   :  { %v4594_v9 = vpop.xlane.xlu0 %4593 }
 0xc19   :  { %v4605_v49 = vmul.f32 1.442695, %v4601_v33  ;;  %v4602_v3 = vsub.f32 %v4586_v40, %v4594_v9 }
 0xc1b   :  { %16384 = vpow2.f32 %v4605_v49  ;;  %v4607_v47 = vmul.f32 1.442695, %v4602_v3 }
 0xc1c   :  { %v4600_v8 = vpop.xlane.xlu1 %4599  ;;  %v4597_v31 = vpop.xlane.xlu0 %4596 }
 0xc1d   :  { %16386 = vpow2.f32 %v4607_v47  ;;  %v4604_v24 = vsub.f32 %v4588_v13, %v4600_v8  ;;  %v4603_v25 = vsub.f32 %v4587_v5, %v4597_v31 }
 0xc1f   :  { %v4611_v22 = vmul.f32 1.442695, %v4604_v24  ;;  %v4609_v48 = vmul.f32 1.442695, %v4603_v25 }
 0xc20   :  { %v4711_v21 = vpop.permute.xlu1 %4710  ;;  %v4634_v30 = vpop.permute.xlu0 %4633 }
 0xc21   :  { %16388 = vpow2.f32 %v4611_v22  ;;  %15695 = vmatpush3.msk.msra.mxu1 %vm3301_vm6, %v4634_v30  ;;  %15700 = vmatpush3.msk.msra.mxu0 %vm3301_vm6, %v4711_v21 }
 0xc22   :  { %15704 = vmatprep.subr.mxu1 %v20907_v34  ;;  %15709 = vmatprep.subr.mxu0 %v20907_v34  ;;  %16390 = vpow2.f32 %v4609_v48 }
 0xc24   :  { %v4788_v53 = vpop.permute.xlu1 %4787  ;;  %v4865_v57 = vpop.permute.xlu0 %4864 }
 0xc25   :  { %v16385_v32 = vpop.eup %16384 }
 0xc26   :  { %v4613_v50 = vsel %vm3250_vm5, %v16385_v32, 0.0 }
 0xc27   :  { %v16387_v41 = vpop.eup %16386  ;;  %4614 = vadd.xlane.f32.xlu0 %v4613_v50 }
 0xc28   :  { %v4616_v63 = vsel %vm3250_vm5, %v16387_v41, 0.0  ;;  %v4944_v27 = vpop.permute.xlu1 %4943 }
 0xc29   :  { %4617 = vadd.xlane.f32.xlu1 %v4616_v63 }
 0xc2b   :  { %v16389_v35 = vpop.eup %16388 }
 0xc2c   :  { %v4622_v61 = vsel %vm3250_vm5, %v16389_v35, 0.0  ;;  %v16391_v54 = vpop.eup %16390  ;;  %v4942_v12 = vpop.permute.xlu1 %4941 }
 0xc2d   :  { %4623 = vadd.xlane.f32.xlu1 %v4622_v61  ;;  %v4619_v40 = vsel %vm3250_vm5, %v16391_v54, 0.0 }
 0xc3d   :  { %5021 = vrot.lane.b32.xlu0 %v18016_v26, %s20857_s22 }
 0xc3e   :  { %5099 = vrot.lane.b32.xlu1 %v18025_v4, %s20857_s22 }
 0xc42   :  { %5097 = vrot.lane.b32.xlu1 %v18025_v4, %s20855_s2 }
 0xc5c   :  { %4620 = vadd.xlane.f32.xlu0 %v4619_v40 }
 0xc72   :  { %5019 = vrot.lane.b32.xlu0 %v18016_v26, %s20855_s2 }
 0xc76   :  { %5177 = vrot.lane.b32.xlu0 %v18031_v52, %s20857_s22 }
 0xc7a   :  { %5175 = vrot.lane.b32.xlu0 %v18031_v52, %s20855_s2 }
 0xcb4   :  { %v4615_v5 = vpop.xlane.xlu0 %4614 }
 0xcb5   :  { %16392 = vrcp.f32 %v4615_v5 }
 0xcb6   :  { %v4618_v29 = vpop.xlane.xlu1 %4617 }
 0xcb7   :  { %16394 = vrcp.f32 %v4618_v29 }
 0xcb8   :  { %v5022_v9 = vpop.permute.xlu0 %5021 }
 0xcba   :  { %v4624_v2 = vpop.xlane.xlu1 %4623 }
 0xcbb   :  { %16396 = vrcp.f32 %v4624_v2 }
 0xcbe   :  { %v5100_v22 = vpop.permute.xlu1 %5099 }
 0xcbf   :  { %v16393_v13 = vpop.eup %16392 }
 0xcc0   :  { %v4626_v7 = vmul.f32 %v16393_v13, %v16385_v32 }
 0xcc1   :  { %v16395_v43 = vpop.eup %16394 }
 0xcc2   :  { %15697 = vmatmul.mubr.msk.f32.vlgmr.msra.gmra.mrb[36].mxu1 %vm3297_vm7, %v4626_v7  ;;  %v4628_v28 = vmul.f32 %v16395_v43, %v16387_v41  ;;  %v5098_v21 = vpop.permute.xlu1 %5097 }
 0xcc3   :  { %15705 = vmatpush3.msk.msra.mxu1 %vm3301_vm6, %v4788_v53  ;;  %15706 = vmatprep.mubr.msk.f32.mxu1 %vm16711_vm2, %v20907_v34 }
 0xcc4   :  { %15702 = vmatmul.mubr.msk.f32.vlgmr.msra.gmra.mrb[34].mxu0 %vm3297_vm7, %v4628_v28  ;;  %15714 = vmatprep.subr.mxu1 %v20907_v34 }
 0xcc5   :  { %v16397_v42 = vpop.eup %16396  ;;  %15710 = vmatpush3.msk.msra.mxu0 %vm3301_vm6, %v4865_v57  ;;  %15711 = vmatprep.mubr.msk.f32.mxu0 %vm16711_vm2, %v20907_v34 }
 0xcc6   :  { %v4632_v33 = vmul.f32 %v16397_v42, %v16389_v35  ;;  %15719 = vmatprep.subr.mxu0 %v20907_v34 }
 0xcc8   :  { %15712 = vmatmul.mubr.msk.f32.vlgmr.msra.gmra.mrb[36].mxu0 %vm3297_vm7, %v4632_v33 }
 0xcc9   :  { %15721 = vmatprep.mubr.msk.f32.mxu0 %vm16711_vm2, %v20907_v34 }
 0xccc   :  { %15720 = vmatpush3.xpose.msk.msra.mxu0 %vm2811_vm4, %v5022_v9 }
 0xccd   :  { %15729 = vmatprep.subr.mxu0 %v20907_v34 }
 0xce9   :  { %v4621_v49 = vpop.xlane.xlu0 %4620 }
 0xcea   :  { %16398 = vrcp.f32 %v4621_v49 }
 0xced   :  { %v5020_v3 = vpop.permute.xlu0 %5019 }
 0xcee   :  { %15722 = vmatmul.mubr.msk.f32.vlgmr.msra.gmra.mrb[38].mxu0 %vm2811_vm4, %v5020_v3 }
 0xcef   :  { %15731 = vmatprep.mubr.msk.f32.mxu0 %vm16711_vm2, %v20907_v34 }
 0xcf1   :  { %v5178_v47 = vpop.permute.xlu0 %5177 }
 0xcf2   :  { %15730 = vmatpush3.xpose.msk.msra.mxu0 %vm2811_vm4, %v5178_v47 }
 0xcf3   :  { %15739 = vmatprep.subr.mxu0 %v20907_v34 }
 0xcf4   :  { %v16399_v8 = vpop.eup %16398 }
 0xcf5   :  { %v5176_v31 = vpop.permute.xlu0 %5175  ;;  %v4630_v24 = vmul.f32 %v16399_v8, %v16391_v54 }
 0xcf6   :  { %15732 = vmatmul.mubr.msk.f32.vlgmr.msra.gmra.mrb[40].mxu0 %vm2811_vm4, %v5176_v31 }
 0xcf7   :  { %15707 = vmatmul.mubr.msk.f32.vlgmr.msra.gmra.mrb[38].mxu1 %vm3297_vm7, %v4630_v24  ;;  %15741 = vmatprep.mubr.msk.f32.mxu0 %vm16711_vm2, %v20907_v34 }
 0xcf8   :  { %15715 = vmatpush3.xpose.msk.msra.mxu1 %vm2811_vm4, %v4944_v27  ;;  %15716 = vmatprep.mubr.msk.f32.mxu1 %vm16711_vm2, %v20907_v34 }
 0xcf9   :  { %15724 = vmatprep.subr.mxu1 %v20907_v34 }
 0xcfb   :  { %15717 = vmatmul.mubr.msk.f32.vlgmr.msra.gmra.mrb[40].mxu1 %vm2811_vm4, %v4942_v12 }
 0xcfc   :  { %15725 = vmatpush3.xpose.msk.msra.mxu1 %vm2811_vm4, %v5100_v22  ;;  %15726 = vmatprep.mubr.msk.f32.mxu1 %vm16711_vm2, %v20907_v34 }
 0xcfd   :  { %15734 = vmatprep.subr.mxu1 %v20907_v34 }
 0xcff   :  { %15727 = vmatmul.mubr.msk.f32.vlgmr.msra.gmra.mrb[42].mxu1 %vm2811_vm4, %v5098_v21 }
 0xd00   :  { %15736 = vmatprep.mubr.msk.f32.mxu1 %vm16711_vm2, %v20907_v34 }
 0xd95   :  { %v18291_v30 = vpop.f32.mrb[36].mxu1 }
 0xd96   :  { %v15698_v32 = vpop.f32.mrb[37].mxu1 }
 0xd97   :  { %v18293_v50 = vpop.f32.mrb[34].mxu0 }
 0xd98   :  { %v15703_v41 = vpop.f32.mrb[35].mxu0 }
 0xd9b   :  { %v18295_v63 = vpop.f32.mrb[36].mxu0 }
 0xd9c   :  { %v15713_v35 = vpop.f32.mrb[37].mxu0 }
 0xdc1   :  { %v5093_v61 = vpop.f32.mrb[38].mxu0 }
 0xdc2   :  { %v5254_v25 = vmul.f32 0.35355338, %v5093_v61  ;;  %v15723_v48 = vpop.f32.mrb[39].mxu0 }
 0xdc4   :  { %v5260_v54 = vsel %vm3250_vm5, %v5254_v25, -inf }
 0xdc5   :  { %5261 = vmax.xlane.f32.xlu0 %v5260_v54 }
 0xdc9   :  { %v5249_v40 = vpop.f32.mrb[40].mxu0 }
 0xdca   :  { %v4860_v53 = vpop.f32.mrb[38].mxu1  ;;  %v15733_v27 = vpop.f32.mrb[41].mxu0  ;;  %v5256_v2 = vmul.f32 0.35355338, %v5249_v40 }
 0xdcb   :  { %v15708_v57 = vpop.f32.mrb[39].mxu1 }
 0xdcc   :  { %v5266_v42 = vsel %vm3250_vm5, %v5256_v2, -inf }
 0xdce   :  { %v5015_v12 = vpop.f32.mrb[40].mxu1 }
 0xdcf   :  { %v5253_v5 = vmul.f32 0.35355338, %v5015_v12  ;;  %v15718_v29 = vpop.f32.mrb[41].mxu1 }
 0xdd1   :  { %v5257_v13 = vsel %vm3250_vm5, %v5253_v5, -inf }
 0xdd2   :  { %5258 = vmax.xlane.f32.xlu1 %v5257_v13  ;;  %v5171_v7 = vpop.f32.mrb[42].mxu1 }
 0xdd3   :  { %v5255_v43 = vmul.f32 0.35355338, %v5171_v7  ;;  %v15728_v28 = vpop.f32.mrb[43].mxu1 }
 0xdd5   :  { %v5263_v33 = vsel %vm3250_vm5, %v5255_v43, -inf }
 0xdd6   :  { %5267 = vmax.xlane.f32.xlu1 %v5266_v42  ;;  %5264 = vmax.xlane.f32.xlu0 %v5263_v33  ;;  %v5671_v33 = vld [vmem:[%s20825_s10] sm:$0xff] }
 0xde7   :  { %5378 = vrot.lane.b32.xlu1 %v18016_v26, %s20853_s25 }
 0xdec   :  { %5301 = vrot.lane.b32.xlu0 %v17983_v38, %s20853_s25 }
 0xe52   :  { %v5262_v9 = vpop.xlane.xlu0 %5261 }
 0xe53   :  { %v5270_v49 = vsub.f32 %v5254_v25, %v5262_v9  ;;  %v5672_v9 = vld [vmem:[%s20825_s10 + $0x8] sm:$0xff] }
 0xe55   :  { %v5275_v3 = vmul.f32 1.442695, %v5270_v49 }
 0xe57   :  { %16400 = vpow2.f32 %v5275_v3  ;;  %v16231_v3 = vpack.c.bf16 %v5672_v9, %v5671_v33 }
 0xe5f   :  { %v5259_v47 = vpop.xlane.xlu1 %5258 }
 0xe60   :  { %v5269_v8 = vsub.f32 %v5253_v5, %v5259_v47 }
 0xe61   :  { %v16401_v31 = vpop.eup %16400 }
 0xe62   :  { %v5273_v24 = vmul.f32 1.442695, %v5269_v8  ;;  %v5284_v22 = vsel %vm3250_vm5, %v16401_v31, 0.0  ;;  %v5673_v8 = vld [vmem:[%s20825_s10 + $0x10] sm:$0xff] }
 0xe63   :  { %5285 = vadd.xlane.f32.xlu1 %v5284_v22  ;;  %v5268_v21 = vpop.xlane.xlu1 %5267  ;;  %v5265_v32 = vpop.xlane.xlu0 %5264 }
 0xe64   :  { %16402 = vpow2.f32 %v5273_v24  ;;  %v5272_v41 = vsub.f32 %v5256_v2, %v5268_v21  ;;  %v5271_v35 = vsub.f32 %v5255_v43, %v5265_v32 }
 0xe66   :  { %v5279_v26 = vmul.f32 1.442695, %v5272_v41  ;;  %v5277_v61 = vmul.f32 1.442695, %v5271_v35 }
 0xe67   :  { %v5379_v48 = vpop.permute.xlu1 %5378  ;;  %v5302_v38 = vpop.permute.xlu0 %5301 }
 0xe68   :  { %16404 = vpow2.f32 %v5279_v26  ;;  %15735 = vmatpush3.msk.msra.mxu1 %vm3301_vm6, %v5302_v38  ;;  %15740 = vmatpush3.msk.msra.mxu0 %vm3301_vm6, %v5379_v48 }
 0xe69   :  { %16406 = vpow2.f32 %v5277_v61  ;;  %15749 = vmatprep.subr.mxu0 %v20907_v34  ;;  %15744 = vmatprep.subr.mxu1 %v20907_v34 }
 0xe6e   :  { %v16403_v25 = vpop.eup %16402 }
 0xe6f   :  { %v5281_v54 = vsel %vm3250_vm5, %v16403_v25, 0.0 }
 0xe70   :  { %5282 = vadd.xlane.f32.xlu0 %v5281_v54 }
 0xe72   :  { %v16405_v40 = vpop.eup %16404 }
 0xe73   :  { %v16407_v27 = vpop.eup %16406  ;;  %v5290_v57 = vsel %vm3250_vm5, %v16405_v40, 0.0 }
 0xe74   :  { %5291 = vadd.xlane.f32.xlu1 %v5290_v57  ;;  %v5287_v12 = vsel %vm3250_vm5, %v16407_v27, 0.0 }
 0xe75   :  { %5288 = vadd.xlane.f32.xlu0 %v5287_v12 }
 0xe85   :  { %5455 = vrot.lane.b32.xlu1 %v18025_v4, %s20853_s25 }
 0xe89   :  { %5613 = vrot.lane.b32.xlu1 %v18211_v1, %s16723_s27 }
 0xe8b   :  { %5532 = vrot.lane.b32.xlu0 %v18031_v52, %s20853_s25  ;;  %s20951_s25 = smov 40  }
 0xe8d   :  { %5629 = vrot.lane.b32.xlu1 %v18291_v30, %s16724_s3 }
 0xe8f   :  { %5615 = vrot.lane.b32.xlu0 %v18213_v58, %s16723_s27 }
 0xe91   :  { %5617 = vrot.lane.b32.xlu1 %v18217_v39, %s16723_s27 }
 0xe93   :  { %5631 = vrot.lane.b32.xlu0 %v18293_v50, %s16724_s3 }
 0xe97   :  { %5633 = vrot.lane.b32.xlu0 %v4860_v53, %s16724_s3 }
 0xef0   :  { %v5286_v4 = vpop.xlane.xlu1 %5285 }
 0xef1   :  { %16408 = vrcp.f32 %v5286_v4 }
 0xefb   :  { %v16409_v1 = vpop.eup %16408 }
 0xefc   :  { %v5296_v5 = vmul.f32 %v16409_v1, %v16401_v31  ;;  %v5674_v31 = vld [vmem:[%s20825_s10 + $0x18] sm:$0xff] }
 0xefd   :  { %v5283_v52 = vpop.xlane.xlu0 %5282  ;;  %v16234_v22 = vpack.c.bf16 %v5674_v31, %v5673_v8 }
 0xefe   :  { %16410 = vrcp.f32 %v5283_v52  ;;  %15742 = vmatmul.mubr.msk.f32.vlgmr.msra.gmra.mrb[42].mxu0 %vm3297_vm7, %v5296_v5 }
 0xeff   :  { %15751 = vmatprep.mubr.msk.f32.mxu0 %vm16711_vm2, %v20907_v34 }
 0xf01   :  { %v5292_v58 = vpop.xlane.xlu1 %5291 }
 0xf02   :  { %16412 = vrcp.f32 %v5292_v58  ;;  %v5289_v30 = vpop.xlane.xlu0 %5288 }
 0xf03   :  { %16414 = vrcp.f32 %v5289_v30 }
 0xf05   :  { %v5456_v29 = vpop.permute.xlu1 %5455 }
 0xf06   :  { %v5533_v39 = vpop.permute.xlu0 %5532 }
 0xf07   :  { %15750 = vmatpush3.msk.msra.mxu0 %vm3301_vm6, %v5533_v39 }
 0xf08   :  { %v16411_v50 = vpop.eup %16410  ;;  %16236 = vmatprep.subr.bf16.mxu0 %v20906_v36 }
 0xf09   :  { %v5294_v53 = vmul.f32 %v16411_v50, %v16403_v25  ;;  %v5614_v48 = vpop.permute.xlu1 %5613 }
 0xf0a   :  { %v5616_v35 = vpop.permute.xlu0 %5615  ;;  %v5657_v4 = vsel %vm2811_vm4, %v18131_v46, %v5614_v48 }
 0xf0b   :  { %15737 = vmatmul.mubr.msk.f32.vlgmr.msra.gmra.mrb[44].mxu1 %vm3297_vm7, %v5294_v53 }
 0xf0c   :  { %v16413_v2 = vpop.eup %16412  ;;  %15745 = vmatpush3.msk.msra.mxu1 %vm3301_vm6, %v5456_v29  ;;  %15746 = vmatprep.mubr.msk.f32.mxu1 %vm16711_vm2, %v20907_v34 }
 0xf0d   :  { %v16415_v13 = vpop.eup %16414  ;;  %v5300_v7 = vmul.f32 %v16413_v2, %v16405_v40  ;;  %16230 = vmatprep.subr.bf16.mxu1 %v20906_v36  ;;  %v5630_v40 = vpop.permute.xlu1 %5629 }
 0xf0e   :  { %v5298_v43 = vmul.f32 %v16415_v13, %v16407_v27  ;;  %v5632_v26 = vpop.permute.xlu0 %5631 }
 0xf0f   :  { %15752 = vmatmul.mubr.msk.f32.vlgmr.msra.gmra.mrb[44].mxu0 %vm3297_vm7, %v5300_v7 }
 0xf10   :  { %15747 = vmatmul.mubr.msk.f32.vlgmr.msra.gmra.mrb[46].mxu1 %vm3297_vm7, %v5298_v43  ;;  %15779 = vmatprep.mubr.msk.f32.mxu0 %vm16711_vm2, %v20907_v34 }
 0xf11   :  { %15762 = vmatprep.mubr.msk.f32.mxu1 %vm16711_vm2, %v20907_v34  ;;  %16232 = vmatpush3.bf16.msra.mxu1 %v16231_v3  ;;  %v5618_v12 = vpop.permute.xlu1 %5617 }
 0xf12   :  { %16233 = vmatprep.subr.bf16.mxu1 %v20906_v36  ;;  %v5634_v61 = vpop.permute.xlu0 %5633  ;;  %v5659_v39 = vsel %vm2811_vm4, %v18135_v51, %v5618_v12 }
 0xf13   :  { %v5664_v43 = vsel %vm5661_vm8, %v5659_v39, %v5634_v61 }
 0xf15   :  { %16235 = vmatpush3.bf16.msra.mxu1 %v16234_v22 }
 0xf16   :  { %16242 = vmatprep.subr.bf16.mxu1 %v20906_v36 }
 0xfd1   :  { %v5451_v28 = vpop.f32.mrb[42].mxu0 }
 0xfd2   :  { %v15743_v42 = vpop.f32.mrb[43].mxu0  ;;  %5647 = vrot.lane.b32.xlu0 %v5451_v28, %s16725_s28 }
 0xfde   :  { %v5374_v49 = vpop.f32.mrb[44].mxu1 }
 0xfdf   :  { %5645 = vrot.lane.b32.xlu1 %v5374_v49, %s16725_s28  ;;  %v15738_v47 = vpop.f32.mrb[45].mxu1 }
 0xfe2   :  { %v5605_v24 = vpop.f32.mrb[44].mxu0 }
 0xfe3   :  { %v5528_v21 = vpop.f32.mrb[46].mxu1  ;;  %v15753_v32 = vpop.f32.mrb[45].mxu0  ;;  %5619 = vrot.lane.b32.xlu1 %v18215_v44, %s16723_s27  ;;  %v5658_v44 = vsel %vm2811_vm4, %v18133_v45, %v5616_v35  ;;  %v5662_v45 = vsel %vm5661_vm8, %v5657_v4, %v5630_v40 }
 0xfe4   :  { %5649 = vrot.lane.b32.xlu0 %v5528_v21, %s16725_s28  ;;  %v15748_v41 = vpop.f32.mrb[47].mxu1  ;;  %v5663_v38 = vsel %vm5661_vm8, %v5658_v44, %v5632_v26 }
 0xfe7   :  { %5635 = vrot.lane.b32.xlu1 %v18295_v63, %s16724_s3 }
 0xfe8   :  { %5651 = vrot.lane.b32.xlu0 %v5605_v24, %s16725_s28 }
0x1044   :  { %v5648_v25 = vpop.permute.xlu0 %5647 }
0x1045   :  { %v5668_v54 = vsel %vm5666_vm9, %v5663_v38, %v5648_v25 }
0x1046   :  { %v5725_v27 = vrot.slane %v5668_v54, %v17134_v14  ;;  %v5718_v1 = vcombine.high %v5668_v54, %v5668_v54 }
0x1048   :  { %v5733_v63 = vcombine.high %v5725_v27, %v5725_v27  ;;  %v5740_v57 = vrot.slane %v5725_v27, %v17134_v14  ;;  %v5732_v29 = vrot.slane %v5718_v1, %v17134_v14 }
0x104a   :  { %v5754_v5 = vrot.slane %v5733_v63, %v17134_v14  ;;  %v5755_v52 = vcombine.high %v5740_v57, %v5740_v57  ;;  %v5747_v3 = vrot.slane %v5732_v29, %v17134_v14 }
0x104c   :  { %v5838_v2 = vcombine.low %v5754_v5, %v5755_v52  ;;  %v5756_v28 = vcombine.high %v5754_v5, %v5754_v5 }
0x104e   :  { %v5866_v47 = vrot.slane %v5838_v2, %v17134_v14  ;;  %v5884_v35 = vcombine.low %v5756_v28, %v5747_v3 }
0x1051   :  { %v5646_v58 = vpop.permute.xlu1 %5645 }
0x1052   :  { %v5667_v30 = vsel %vm5666_vm9, %v5662_v45, %v5646_v58 }
0x1053   :  { %v5679_v50 = vcombine.high %v5667_v30, %v5667_v30  ;;  %v5686_v53 = vrot.slane %v5667_v30, %v17134_v14 }
0x1055   :  { %v5693_v46 = vrot.slane %v5679_v50, %v17134_v14  ;;  %v5694_v13 = vcombine.high %v5686_v53, %v5686_v53  ;;  %v5620_v7 = vpop.permute.xlu1 %5619  ;;  %v5701_v33 = vrot.slane %v5686_v53, %v17134_v14  ;;  %v5894_v53 = vrot.slane %v5884_v35, %v17134_v14 }
0x1056   :  { %v5650_v42 = vpop.permute.xlu0 %5649  ;;  %v5660_v32 = vsel %vm2811_vm4, %v18137_v59, %v5620_v7 }
0x1057   :  { %v5708_v9 = vrot.slane %v5693_v46, %v17134_v14  ;;  %v5715_v51 = vrot.slane %v5694_v13, %v17134_v14  ;;  %v5669_v49 = vsel %vm5666_vm9, %v5664_v43, %v5650_v42 }
0x1058   :  { %v5757_v8 = vcombine.high %v5669_v49, %v5669_v49  ;;  %v5764_v31 = vrot.slane %v5669_v49, %v17134_v14 }
0x1059   :  { %v5835_v24 = vcombine.low %v5701_v33, %v5715_v51  ;;  %v15068_v22 = vcombine.high %v5701_v33, %v5715_v51  ;;  %v5837_v21 = vcombine.low %v5708_v9, %v5740_v57  ;;  %v5636_v41 = vpop.permute.xlu1 %5635 }
0x105a   :  { %v5771_v26 = vrot.slane %v5757_v8, %v17134_v14  ;;  %v5772_v61 = vcombine.high %v5764_v31, %v5764_v31  ;;  %v5665_v48 = vsel %vm5661_vm8, %v5660_v32, %v5636_v41  ;;  %v5652_v44 = vpop.permute.xlu0 %5651  ;;  %v5779_v27 = vrot.slane %v5764_v31, %v17134_v14  ;;  %v15073_v41 = vld [vmem:[%s20826_s11] ss:$0 sm:$0xff] }
0x105b   :  { %v5845_v38 = vrot.slane %v5835_v24, %v17134_v14  ;;  %v5852_v25 = vrot.slane %v15068_v22, %v17134_v14  ;;  %v5859_v54 = vrot.slane %v5837_v21, %v17134_v14  ;;  %v5670_v40 = vsel %vm5666_vm9, %v5665_v48, %v5652_v44 }
0x105c   :  { %v5793_v59 = vrot.slane %v5772_v61, %v17134_v14  ;;  %v5796_v63 = vcombine.high %v5670_v40, %v5670_v40  ;;  %v5803_v57 = vrot.slane %v5670_v40, %v17134_v14  ;;  %v5786_v1 = vrot.slane %v5771_v26, %v17134_v14 }
0x105d   :  { %v5867_v12 = vcombine.low %v5845_v38, %v5852_v25  ;;  %v5868_v4 = vcombine.low %v5859_v54, %v5866_v47  ;;  %v6221_v35 = vrot.slane %v15073_v41, %v17134_v14  ;;  %v6214_v26 = vcombine.high %v15073_v41, %v15073_v41 }
0x105e   :  { %v5885_v5 = vcombine.low %v5779_v27, %v5793_v59  ;;  %v5810_v52 = vrot.slane %v5796_v63, %v17134_v14  ;;  %v5811_v45 = vcombine.high %v5803_v57, %v5803_v57  ;;  %v15069_v30 = vcombine.high %v5779_v27, %v5793_v59 }
0x105f   :  { %v5875_v58 = vrot.slane %v5867_v12, %v17134_v14  ;;  %v5818_v39 = vrot.slane %v5803_v57, %v17134_v14  ;;  %v5882_v50 = vrot.slane %v5868_v4, %v17134_v14  ;;  %v6229_v61 = vcombine.high %v6221_v35, %v6221_v35 }
0x1060   :  { %v5901_v29 = vrot.slane %v5885_v5, %v17134_v14  ;;  %v5832_v2 = vrot.slane %v5811_v45, %v17134_v14  ;;  %v5825_v28 = vrot.slane %v5810_v52, %v17134_v14  ;;  %v5908_v33 = vrot.slane %v15069_v30, %v17134_v14 }
0x1061   :  { %v5833_v46 = vcombine.high %v5818_v39, %v5818_v39  ;;  %v5887_v13 = vcombine.low %v5786_v1, %v5818_v39  ;;  %v5883_v7 = vcombine.low %v5875_v58, %v5882_v50  ;;  %v6228_v54 = vrot.slane %v6214_v26, %v17134_v14 }
0x1062   :  { %v5916_v43 = vcombine.low %v5894_v53, %v5901_v29  ;;  %v5834_v42 = vcombine.high %v5832_v2, %v5832_v2  ;;  %v18433_v40 = vrot.slane %v6221_v35, %v17134_v14  ;;  %v18436_v27 = vrot.slane %v6229_v61, %v17134_v14 }
0x1063   :  { %v5915_v9 = vrot.slane %v5887_v13, %v17134_v14  ;;  %v5933_v51 = vcombine.low %v5832_v2, %v5833_v46  ;;  %15763 = vmatmul.mubr.msk.f32.vlgmr.msra.gmra.mrb[48].mxu1 %vm2463_vm3, %v5883_v7  ;;  %v18444_v45 = vrot.slane %v6228_v54, %v17134_v14 }
0x1064   :  { %v5934_v49 = vcombine.low %v5834_v42, %v5825_v28  ;;  %15765 = vmatprep.mubr.msk.f32.mxu1 %vm16711_vm2, %v20907_v34  ;;  %v5924_v31 = vrot.slane %v5916_v43, %v17134_v14  ;;  %v18448_v58 = vcombine.high %v18433_v40, %v18433_v40  ;;  %v18452_v30 = vcombine.high %v18436_v27, %v18436_v27 }
0x1065   :  { %v5917_v3 = vcombine.low %v5908_v33, %v5915_v9  ;;  %v5941_v8 = vrot.slane %v5933_v51, %v17134_v14 }
0x1066   :  { %v5948_v47 = vrot.slane %v5934_v49, %v17134_v14 }
0x1067   :  { %v5931_v24 = vrot.slane %v5917_v3, %v17134_v14 }
0x1068   :  { %v5949_v21 = vcombine.low %v5941_v8, %v5948_v47 }
0x1069   :  { %v5932_v22 = vcombine.low %v5924_v31, %v5931_v24 }
0x106a   :  { %v5956_v32 = vrot.slane %v5949_v21, %v17134_v14 }
0x106b   :  { %15766 = vmatmul.mubr.msk.f32.gmra.mrb[50].mxu1 %vm2463_vm3, %v5932_v22 }
0x106c   :  { %15768 = vmatprep.mubr.msk.f32.mxu1 %vm16711_vm2, %v20907_v34 }
0x106f   :  { %15769 = vmatmul.mubr.msk.f32.gmra.mrb[52].mxu1 %vm2463_vm3, %v5956_v32 }
0x1070   :  { %15820 = vmatprep.mubr.msk.f32.mxu1 %vm16711_vm2, %v20907_v34 }
0x1136   :  { %v6029_v48 = vpop.f32.mrb[48].mxu1 }
0x1137   :  { %v6046_v44 = vcombine.high %v6029_v48, %v6029_v48  ;;  %v6053_v38 = vrot.slane %v6029_v48, %v17134_v14  ;;  %v15764_v25 = vpop.f32.mrb[49].mxu1 }
0x1139   :  { %v6060_v59 = vrot.slane %v6046_v44, %v17134_v14  ;;  %v6061_v63 = vcombine.high %v6053_v38, %v6053_v38  ;;  %v6069_v57 = vrot.slane %v6053_v38, %v17134_v14 }
0x113b   :  { %v6062_v12 = vcombine.high %v6060_v59, %v6060_v59  ;;  %v6076_v4 = vrot.slane %v6060_v59, %v17134_v14  ;;  %v6083_v1 = vrot.slane %v6061_v63, %v17134_v14  ;;  %v6091_v5 = vcombine.high %v6069_v57, %v6069_v57 }
0x113c   :  { %v6188_v52 = vadd.f32 %v6069_v57, %v17485_v60 }
0x113d   :  { %v6090_v39 = vrot.slane %v6062_v12, %v17134_v14  ;;  %v6092_v50 = vcombine.high %v6076_v4, %v6076_v4  ;;  %v6093_v53 = vcombine.high %v6083_v1, %v6083_v1  ;;  %v6189_v29 = vadd.f32 %v6083_v1, %v17488_v62 }
0x113e   :  { %v6190_v2 = vadd.f32 %v6091_v5, %v17491_v0  ;;  %v6192_v60 = vadd.f32 %v6076_v4, %v17498_v56  ;;  %v18459_v46 = vadd.f32 %v18433_v40, %v6188_v52  ;;  %v6034_v13 = vpop.f32.mrb[50].mxu1 }
0x113f   :  { %v6094_v7 = vcombine.high %v6090_v39, %v6090_v39  ;;  %v6191_v43 = vadd.f32 %v6093_v53, %v17495_v19  ;;  %v6193_v28 = vadd.f32 %v6090_v39, %v17522_v11  ;;  %v6194_v42 = vadd.f32 %v6092_v50, %v17525_v20  ;;  %v15767_v33 = vpop.f32.mrb[51].mxu1  ;;  %v20908_v50 = vld [vmem:[#allocation5_spill] sm:$0xff] }
0x1140   :  { %v18465_v9 = vadd.f32 %v18436_v27, %v6189_v29  ;;  %v18468_v62 = vadd.f32 %v18448_v58, %v6190_v2  ;;  %v18471_v0 = vadd.f32 %v18444_v45, %v6192_v60  ;;  %v6095_v56 = vcombine.high %v6034_v13, %v6034_v13  ;;  %v20909_v29 = vld [vmem:[#allocation7_spill] sm:$0xff]  ;;  %v20910_v60 = vld [vmem:[#allocation8_spill] sm:$0xff] }
0x1141   :  { %v6195_v51 = vadd.f32 %v6094_v7, %v17528_v10  ;;  %v18475_v49 = vadd.f32 %v18452_v30, %v6191_v43  ;;  %v18478_v19 = vadd.f32 %v18433_v40, %v6193_v28  ;;  %v18481_v11 = vadd.f32 %v18436_v27, %v6194_v42  ;;  %v20911_v43 = vld [vmem:[#allocation6_spill] sm:$0xff]  ;;  %v20912_v28 = vld [vmem:[#allocation9_spill] sm:$0xff] }
0x1142   :  { %v6102_v20 = vrot.slane %v6034_v13, %v17134_v14  ;;  %v6109_v3 = vrot.slane %v6095_v56, %v17134_v14  ;;  %v6039_v47 = vpop.f32.mrb[52].mxu1  ;;  %v6300_v8 = vcombine.low %v18459_v46, %v18465_v9  ;;  %v6322_v21 = vrot.slane %v18471_v0, %v17134_v14 }
0x1143   :  { %v18488_v31 = vadd.f32 %v18448_v58, %v6195_v51  ;;  %v6150_v10 = vrot.slane %v6039_v47, %v17134_v14  ;;  %v15770_v24 = vpop.f32.mrb[53].mxu1  ;;  %v6301_v22 = vcombine.low %v18468_v62, %v18475_v49  ;;  %v6339_v38 = vcombine.low %v18478_v19, %v18481_v11 }
0x1144   :  { %v6110_v32 = vcombine.high %v6102_v20, %v6102_v20  ;;  %v6111_v41 = vcombine.high %v6109_v3, %v6109_v3  ;;  %v6118_v35 = vrot.slane %v6102_v20, %v17134_v14  ;;  %v6125_v26 = vrot.slane %v6109_v3, %v17134_v14  ;;  %v20916_v3 = vld [vmem:[#allocation10_spill] sm:$0xff]  ;;  %v20919_v24 = vld [vmem:[#allocation11_spill] sm:$0xff] }
0x1145   :  { %v6151_v61 = vcombine.high %v6150_v10, %v6150_v10  ;;  %v6158_v48 = vrot.slane %v6150_v10, %v17134_v14  ;;  %v6308_v44 = vrot.slane %v6300_v8, %v17134_v14 }
0x1146   :  { %v6132_v25 = vrot.slane %v6110_v32, %v17134_v14  ;;  %v6139_v54 = vrot.slane %v6111_v41, %v17134_v14  ;;  %v6140_v59 = vcombine.high %v6118_v35, %v6118_v35  ;;  %v6141_v63 = vcombine.high %v6125_v26, %v6125_v26  ;;  %v20920_v32 = vld [vmem:[#allocation12_spill] sm:$0xff] }
0x1147   :  { %v6196_v57 = vadd.f32 %v6118_v35, %v17532_v55  ;;  %v6200_v12 = vadd.f32 %v6125_v26, %v17570_v6  ;;  %v6165_v4 = vrot.slane %v6151_v61, %v17134_v14  ;;  %v6166_v1 = vcombine.high %v6158_v48, %v6158_v48  ;;  %v20922_v26 = vld [vmem:[#allocation13_spill] sm:$0xff] }
0x1148   :  { %v6142_v5 = vcombine.high %v6132_v25, %v6132_v25  ;;  %v6143_v52 = vcombine.high %v6139_v54, %v6139_v54  ;;  %v6197_v39 = vadd.f32 %v6132_v25, %v17535_v37  ;;  %v6198_v53 = vadd.f32 %v6140_v59, %v20908_v50 }
0x1149   :  { %v6201_v2 = vadd.f32 %v6139_v54, %v20909_v29  ;;  %v6202_v13 = vadd.f32 %v6141_v63, %v20910_v60  ;;  %v18511_v7 = vadd.f32 %v18452_v30, %v6196_v57  ;;  %v6315_v55 = vrot.slane %v6301_v22, %v17134_v14 }
0x114a   :  { %v6199_v6 = vadd.f32 %v6142_v5, %v20911_v43  ;;  %v6203_v42 = vadd.f32 %v6143_v52, %v20912_v28  ;;  %v18517_v33 = vadd.f32 %v18444_v45, %v6197_v39  ;;  %v18520_v37 = vadd.f32 %v18448_v58, %v6200_v12 }
0x114b   :  { %v18523_v56 = vadd.f32 %v18433_v40, %v6198_v53  ;;  %v18526_v51 = vadd.f32 %v18452_v30, %v6201_v2  ;;  %v6167_v20 = vcombine.high %v6165_v4, %v6165_v4  ;;  %v6204_v47 = vadd.f32 %v6158_v48, %v20916_v3 }
0x114c   :  { %20913 = vst [vmem:[#allocation5_spill] sm:$0xff] %v18520_v37  ;;  %v18530_v8 = vadd.f32 %v18436_v27, %v6199_v6  ;;  %v18533_v10 = vadd.f32 %v18433_v40, %v6203_v42  ;;  %v6205_v22 = vadd.f32 %v6165_v4, %v20919_v24  ;;  %v6206_v41 = vadd.f32 %v6166_v1, %v20920_v32 }
0x114d   :  { %20914 = vst [vmem:[#allocation7_spill] sm:$0xff] %v18523_v56  ;;  %20915 = vst [vmem:[#allocation8_spill] sm:$0xff] %v18526_v51  ;;  %v18538_v35 = vadd.f32 %v18444_v45, %v6202_v13  ;;  %v6207_v61 = vadd.f32 %v6167_v20, %v20922_v26  ;;  %v18542_v25 = vadd.f32 %v18436_v27, %v6204_v47 }
0x114e   :  { %20917 = vst [vmem:[#allocation6_spill] sm:$0xff] %v18530_v8  ;;  %20918 = vst [vmem:[#allocation9_spill] sm:$0xff] %v18533_v10  ;;  %v6323_v54 = vcombine.low %v6308_v44, %v6315_v55  ;;  %v18545_v48 = vadd.f32 %v18448_v58, %v6205_v22  ;;  %v18548_v59 = vadd.f32 %v18452_v30, %v6206_v41 }
0x114f   :  { %20921 = vst [vmem:[#allocation10_spill] sm:$0xff] %v18538_v35  ;;  %20923 = vst [vmem:[#allocation11_spill] sm:$0xff] %v18542_v25  ;;  %v6337_v40 = vrot.slane %v6322_v21, %v17134_v14  ;;  %v6340_v63 = vcombine.low %v18488_v31, %v18511_v7  ;;  %v18554_v57 = vadd.f32 %v18444_v45, %v6207_v61 }
0x1150   :  { %20924 = vst [vmem:[#allocation12_spill] sm:$0xff] %v18545_v48  ;;  %20925 = vst [vmem:[#allocation13_spill] sm:$0xff] %v18548_v59  ;;  %v6417_v12 = vcombine.low %v18533_v10, %v18542_v25  ;;  %v6330_v27 = vrot.slane %v6323_v54, %v17134_v14  ;;  %v6347_v44 = vrot.slane %v6339_v38, %v17134_v14 }
0x1151   :  { %20926 = vst [vmem:[#allocation14_spill] sm:$0xff] %v18554_v57  ;;  %v6354_v58 = vrot.slane %v6340_v63, %v17134_v14  ;;  %v6361_v30 = vrot.slane %v18517_v33, %v17134_v14  ;;  %v6378_v21 = vcombine.low %v18523_v56, %v18530_v8  ;;  %v6379_v4 = vcombine.low %v18520_v37, %v18526_v51 }
0x1152   :  { %v6338_v45 = vcombine.low %v6330_v27, %v6337_v40  ;;  %v6418_v1 = vcombine.low %v18545_v48, %v18548_v59  ;;  %v6425_v5 = vrot.slane %v6417_v12, %v17134_v14  ;;  %v6400_v50 = vrot.slane %v18538_v35, %v17134_v14 }
0x1153   :  { %v6362_v52 = vcombine.low %v6347_v44, %v6354_v58  ;;  %v6386_v38 = vrot.slane %v6378_v21, %v17134_v14  ;;  %v6393_v39 = vrot.slane %v6379_v4, %v17134_v14  ;;  %v6439_v2 = vrot.slane %v18554_v57, %v17134_v14 }
0x1154   :  { %v6460_v53 = vsel %vm881_vm1, %v6338_v45, 0.0  ;;  %v6432_v29 = vrot.slane %v6418_v1, %v17134_v14  ;;  %v6376_v13 = vrot.slane %v6361_v30, %v17134_v14  ;;  %v6415_v42 = vrot.slane %v6400_v50, %v17134_v14 }
0x1155   :  { %6461 = vadd.xlane.f32.xlu1 %v6460_v53  ;;  %v6369_v60 = vrot.slane %v6362_v52, %v17134_v14  ;;  %v6401_v55 = vcombine.low %v6386_v38, %v6393_v39  ;;  %v6454_v3 = vrot.slane %v6439_v2, %v17134_v14 }
0x1156   :  { %v6440_v43 = vcombine.low %v6425_v5, %v6432_v29 }
0x1157   :  { %v6377_v6 = vcombine.low %v6369_v60, %v6376_v13  ;;  %v6408_v28 = vrot.slane %v6401_v55, %v17134_v14 }
0x1158   :  { %v6447_v20 = vrot.slane %v6440_v43, %v17134_v14 }
0x1159   :  { %v6463_v47 = vsel %vm881_vm1, %v6377_v6, 0.0  ;;  %v6416_v24 = vcombine.low %v6408_v28, %v6415_v42 }
0x115a   :  { %6464 = vadd.xlane.f32.xlu0 %v6463_v47  ;;  %v6455_v22 = vcombine.low %v6447_v20, %v6454_v3 }
0x115b   :  { %v6466_v32 = vsel %vm881_vm1, %v6416_v24, 0.0 }
0x115c   :  { %v6469_v41 = vsel %vm881_vm1, %v6455_v22, 0.0 }
0x115d   :  { %6470 = vadd.xlane.f32.xlu1 %v6469_v41 }
0x115e   :  { %6467 = vadd.xlane.f32.xlu0 %v6466_v32 }
0x11e2   :  { %v6462_v26 = vpop.xlane.xlu1 %6461 }
0x11e3   :  { %v6472_v61 = vmul.f32 0.03125, %v6462_v26 }
0x11e5   :  { %v6483_v54 = vrot.slane %v6472_v61, %v17258_v15  ;;  %v6487_v40 = vrot.slane %v6472_v61, %v17261_v16  ;;  %v6491_v63 = vrot.slane %v6472_v61, %v17264_v17  ;;  %v6495_v12 = vrot.slane %v6472_v61, %v17267_v18 }
0x11e6   :  { %v6499_v27 = vrot.slane %v6472_v61, %v17270_v23 }
0x11e7   :  { %v6465_v44 = vpop.xlane.xlu0 %6464  ;;  %v18593_v58 = vsub.f32 %v18459_v46, %v6483_v54  ;;  %v18596_v30 = vsub.f32 %v18465_v9, %v6487_v40  ;;  %v18599_v21 = vsub.f32 %v18468_v62, %v6491_v63  ;;  %v18602_v4 = vsub.f32 %v18475_v49, %v6495_v12 }
0x11e8   :  { %v6473_v45 = vmul.f32 0.03125, %v6465_v44  ;;  %v18605_v1 = vsub.f32 %v18471_v0, %v6499_v27 }
0x11e9   :  { %v6600_v5 = vmul.f32 %v18593_v58, %v18593_v58  ;;  %v6601_v52 = vmul.f32 %v18596_v30, %v18596_v30  ;;  %v6602_v38 = vmul.f32 %v18599_v21, %v18599_v21  ;;  %v6603_v39 = vmul.f32 %v18602_v4, %v18602_v4 }
0x11ea   :  { %v6503_v50 = vrot.slane %v6473_v45, %v17258_v15  ;;  %v6507_v53 = vrot.slane %v6473_v45, %v17261_v16  ;;  %v6511_v29 = vrot.slane %v6473_v45, %v17264_v17  ;;  %v6515_v2 = vrot.slane %v6473_v45, %v17267_v18  ;;  %v6471_v60 = vpop.xlane.xlu1 %6470 }
0x11eb   :  { %v6468_v13 = vpop.xlane.xlu0 %6467  ;;  %v6475_v55 = vmul.f32 0.03125, %v6471_v60  ;;  %v6604_v43 = vmul.f32 %v18605_v1, %v18605_v1  ;;  %v6640_v6 = vcombine.low %v6600_v5, %v6601_v52  ;;  %v6641_v28 = vcombine.low %v6602_v38, %v6603_v39 }
0x11ec   :  { %v6474_v42 = vmul.f32 0.03125, %v6468_v13  ;;  %v6519_v20 = vrot.slane %v6473_v45, %v17270_v23  ;;  %v18623_v3 = vsub.f32 %v18478_v19, %v6503_v50  ;;  %v18626_v47 = vsub.f32 %v18481_v11, %v6507_v53 }
0x11ed   :  { %v6543_v24 = vrot.slane %v6475_v55, %v17258_v15  ;;  %v6547_v22 = vrot.slane %v6475_v55, %v17261_v16  ;;  %v6551_v32 = vrot.slane %v6475_v55, %v17264_v17  ;;  %v6555_v41 = vrot.slane %v6475_v55, %v17267_v18 }
0x11ee   :  { %v6523_v26 = vrot.slane %v6474_v42, %v17258_v15  ;;  %v6527_v61 = vrot.slane %v6474_v42, %v17261_v16  ;;  %v6531_v54 = vrot.slane %v6474_v42, %v17264_v17  ;;  %v6535_v40 = vrot.slane %v6474_v42, %v17267_v18 }
0x11ef   :  { %v6648_v63 = vrot.slane %v6640_v6, %v17134_v14  ;;  %v6655_v12 = vrot.slane %v6641_v28, %v17134_v14  ;;  %v6662_v27 = vrot.slane %v6604_v43, %v17134_v14  ;;  %v18640_v44 = vsub.f32 %v18488_v31, %v6511_v29 }
0x11f0   :  { %v18643_v45 = vsub.f32 %v18511_v7, %v6515_v2  ;;  %v18646_v5 = vsub.f32 %v18517_v33, %v6519_v20  ;;  %v6605_v52 = vmul.f32 %v18623_v3, %v18623_v3  ;;  %v6606_v38 = vmul.f32 %v18626_v47, %v18626_v47 }
0x11f1   :  { %v6663_v39 = vcombine.low %v6648_v63, %v6655_v12  ;;  %v6677_v50 = vrot.slane %v6662_v27, %v17134_v14  ;;  %v6607_v53 = vmul.f32 %v18640_v44, %v18640_v44  ;;  %v6539_v29 = vrot.slane %v6474_v42, %v17270_v23 }
0x11f2   :  { %v6608_v2 = vmul.f32 %v18643_v45, %v18643_v45  ;;  %v6609_v60 = vmul.f32 %v18646_v5, %v18646_v5  ;;  %v6679_v13 = vcombine.low %v6605_v52, %v6606_v38  ;;  %v18661_v43 = vsub.f32 %v18523_v56, %v6523_v26 }
0x11f3   :  { %v6670_v6 = vrot.slane %v6663_v39, %v17134_v14  ;;  %v18665_v28 = vsub.f32 %v18530_v8, %v6527_v61  ;;  %v18668_v20 = vsub.f32 %v18520_v37, %v6531_v54  ;;  %v18671_v42 = vsub.f32 %v18526_v51, %v6535_v40 }
0x11f4   :  { %v6680_v63 = vcombine.low %v6607_v53, %v6608_v2  ;;  %v6687_v12 = vrot.slane %v6679_v13, %v17134_v14  ;;  %v6701_v27 = vrot.slane %v6609_v60, %v17134_v14  ;;  %v18676_v52 = vsub.f32 %v18538_v35, %v6539_v29 }
0x11f5   :  { %v6678_v26 = vcombine.low %v6670_v6, %v6677_v50  ;;  %v6610_v38 = vmul.f32 %v18661_v43, %v18661_v43  ;;  %v6611_v61 = vmul.f32 %v18665_v28, %v18665_v28  ;;  %v6612_v54 = vmul.f32 %v18668_v20, %v18668_v20 }
0x11f6   :  { %v6694_v40 = vrot.slane %v6680_v63, %v17134_v14  ;;  %v6613_v39 = vmul.f32 %v18671_v42, %v18671_v42  ;;  %v6614_v53 = vmul.f32 %v18676_v52, %v18676_v52  ;;  %v6559_v2 = vrot.slane %v6475_v55, %v17270_v23 }
0x11f7   :  { %v6800_v29 = vsel %vm881_vm1, %v6678_v26, 0.0  ;;  %v6718_v50 = vcombine.low %v6610_v38, %v6611_v61  ;;  %v18692_v60 = vsub.f32 %v18533_v10, %v6543_v24  ;;  %v6716_v6 = vrot.slane %v6701_v27, %v17134_v14 }
0x11f8   :  { %6801 = vadd.xlane.f32.xlu0 %v6800_v29  ;;  %v6702_v13 = vcombine.low %v6687_v12, %v6694_v40  ;;  %v6719_v35 = vcombine.low %v6612_v54, %v6613_v39  ;;  %v18696_v63 = vsub.f32 %v18542_v25, %v6547_v22  ;;  %v18700_v8 = vsub.f32 %v18545_v48, %v6551_v32 }
0x11f9   :  { %v6726_v51 = vrot.slane %v6718_v50, %v17134_v14  ;;  %v18703_v26 = vsub.f32 %v18548_v59, %v6555_v41  ;;  %v18706_v55 = vsub.f32 %v18554_v57, %v6559_v2  ;;  %v6740_v27 = vrot.slane %v6614_v53, %v17134_v14 }
0x11fa   :  { %v6709_v24 = vrot.slane %v6702_v13, %v17134_v14  ;;  %v6733_v12 = vrot.slane %v6719_v35, %v17134_v14  ;;  %v6615_v22 = vmul.f32 %v18692_v60, %v18692_v60  ;;  %v6616_v38 = vmul.f32 %v18696_v63, %v18696_v63 }
0x11fb   :  { %v6617_v32 = vmul.f32 %v18700_v8, %v18700_v8  ;;  %v6618_v41 = vmul.f32 %v18703_v26, %v18703_v26  ;;  %v6619_v61 = vmul.f32 %v18706_v55, %v18706_v55  ;;  %v6755_v50 = vrot.slane %v6740_v27, %v17134_v14  ;;  %v7086_v27 = vld [vmem:[%s20829_s14] sm:$0xff] }
0x11fc   :  { %v6717_v54 = vcombine.low %v6709_v24, %v6716_v6  ;;  %v6741_v40 = vcombine.low %v6726_v51, %v6733_v12  ;;  %v6757_v35 = vcombine.low %v6615_v22, %v6616_v38  ;;  %v7087_v38 = vld [vmem:[%s20829_s14 + $0x8] sm:$0xff] }
0x11fd   :  { %v6758_v39 = vcombine.low %v6617_v32, %v6618_v41  ;;  %v6779_v57 = vrot.slane %v6619_v61, %v17134_v14  ;;  %v16237_v32 = vpack.c.bf16 %v7087_v38, %v7086_v27  ;;  %v15074_v61 = vld [vmem:[%s20827_s12] ss:$0 sm:$0xff] }
0x11fe   :  { %v6803_v53 = vsel %vm881_vm1, %v6717_v54, 0.0  ;;  %v6748_v29 = vrot.slane %v6741_v40, %v17134_v14  ;;  %v6765_v2 = vrot.slane %v6757_v35, %v17134_v14  ;;  %v6960_v35 = vrot.slane %v15074_v61, %v17134_v14 }
0x11ff   :  { %6804 = vadd.xlane.f32.xlu1 %v6803_v53  ;;  %v6772_v13 = vrot.slane %v6758_v39, %v17134_v14  ;;  %v6794_v24 = vrot.slane %v6779_v57, %v17134_v14  ;;  %16238 = vmatpush3.bf16.msra.mxu0 %v16237_v32  ;;  %v15075_v39 = vld [vmem:[%s20828_s13] ss:$0 sm:$0xff] }
0x1200   :  { %v6756_v59 = vcombine.low %v6748_v29, %v6755_v50  ;;  %16239 = vmatprep.subr.bf16.mxu0 %v20906_v36  ;;  %v6953_v29 = vcombine.high %v15074_v61, %v15074_v61  ;;  %v6968_v50 = vcombine.high %v6960_v35, %v6960_v35 }
0x1201   :  { %v6780_v48 = vcombine.low %v6765_v2, %v6772_v13  ;;  %v7029_v2 = vrot.slane %v15075_v39, %v17134_v14 }
0x1202   :  { %v6806_v6 = vsel %vm881_vm1, %v6756_v59, 0.0  ;;  %v7088_v59 = vld [vmem:[%s20829_s14 + $0x10] sm:$0xff] }
0x1203   :  { %6807 = vadd.xlane.f32.xlu0 %v6806_v6  ;;  %v6787_v51 = vrot.slane %v6780_v48, %v17134_v14  ;;  %v7089_v48 = vld [vmem:[%s20829_s14 + $0x18] sm:$0xff]  ;;  %v7037_v27 = vcombine.high %v7029_v2, %v7029_v2 }
0x1204   :  { %v16240_v57 = vpack.c.bf16 %v7089_v48, %v7088_v59  ;;  %v7022_v59 = vcombine.high %v15075_v39, %v15075_v39  ;;  %v18761_v48 = vrot.slane %v7029_v2, %v17134_v14 }
0x1205   :  { %v6795_v12 = vcombine.low %v6787_v51, %v6794_v24  ;;  %v6967_v24 = vrot.slane %v6953_v29, %v17134_v14 }
0x1206   :  { %16241 = vmatpush3.bf16.msra.mxu0 %v16240_v57 }
0x1207   :  { %v6809_v22 = vsel %vm881_vm1, %v6795_v12, 0.0  ;;  %16266 = vmatprep.subr.bf16.mxu0 %v20906_v36  ;;  %v18755_v12 = vrot.slane %v6960_v35, %v17134_v14 }
0x1208   :  { %6810 = vadd.xlane.f32.xlu1 %v6809_v22  ;;  %v18758_v22 = vrot.slane %v6968_v50, %v17134_v14 }
0x1209   :  { %v18768_v61 = vcombine.high %v18755_v12, %v18755_v12 }
0x1285   :  { %v6802_v41 = vpop.xlane.xlu0 %6801 }
0x1286   :  { %v6812_v54 = vmul.f32 0.03125, %v6802_v41  ;;  %v18764_v41 = vrot.slane %v6967_v24, %v17134_v14 }
0x1288   :  { %v6816_v40 = vadd.f32 1e-05, %v6812_v54  ;;  %v18772_v54 = vcombine.high %v18758_v22, %v18758_v22 }
0x128a   :  { %16416 = vrsqrt.f32 %v6816_v40  ;;  %v18775_v40 = vrot.slane %v7037_v27, %v17134_v14 }
0x128c   :  { %v6805_v53 = vpop.xlane.xlu1 %6804 }
0x128d   :  { %v6813_v13 = vmul.f32 0.03125, %v6805_v53 }
0x128f   :  { %v6817_v6 = vadd.f32 1e-05, %v6813_v13 }
0x1290   :  { %v6808_v51 = vpop.xlane.xlu0 %6807 }
0x1291   :  { %16418 = vrsqrt.f32 %v6817_v6  ;;  %v6814_v38 = vmul.f32 0.03125, %v6808_v51  ;;  %v7036_v6 = vrot.slane %v7022_v59, %v17134_v14 }
0x1293   :  { %v6818_v32 = vadd.f32 1e-05, %v6814_v38  ;;  %v18788_v38 = vcombine.high %v18761_v48, %v18761_v48 }
0x1294   :  { %v16417_v57 = vpop.eup %16416 }
0x1295   :  { %16420 = vrsqrt.f32 %v6818_v32  ;;  %v6811_v35 = vpop.xlane.xlu1 %6810  ;;  %v6831_v39 = vrot.slane %v16417_v57, %v17258_v15  ;;  %v6835_v53 = vrot.slane %v16417_v57, %v17261_v16  ;;  %v6839_v29 = vrot.slane %v16417_v57, %v17264_v17 }
0x1296   :  { %v6815_v50 = vmul.f32 0.03125, %v6811_v35  ;;  %v6843_v2 = vrot.slane %v16417_v57, %v17267_v18  ;;  %v6847_v13 = vrot.slane %v16417_v57, %v17270_v23  ;;  %v18794_v57 = vcombine.high %v18775_v40, %v18775_v40 }
0x1297   :  { %v6928_v51 = vmul.f32 %v6831_v39, %v18593_v58  ;;  %v6929_v24 = vmul.f32 %v6835_v53, %v18596_v30  ;;  %v6930_v27 = vmul.f32 %v6839_v29, %v18599_v21  ;;  %v18801_v39 = vrot.slane %v7036_v6, %v17134_v14 }
0x1298   :  { %v6819_v32 = vadd.f32 1e-05, %v6815_v50  ;;  %v6931_v25 = vmul.f32 %v6843_v2, %v18602_v4  ;;  %v6932_v35 = vmul.f32 %v6847_v13, %v18605_v1 }
0x1299   :  { %v6997_v59 = vmul.f32 %v18755_v12, %v6928_v51  ;;  %v6998_v58 = vmul.f32 %v18758_v22, %v6929_v24  ;;  %v6999_v30 = vmul.f32 %v18768_v61, %v6930_v27 }
0x129a   :  { %16422 = vrsqrt.f32 %v6819_v32  ;;  %v7000_v21 = vmul.f32 %v18772_v54, %v6931_v25  ;;  %v7001_v4 = vmul.f32 %v18764_v41, %v6932_v35 }
0x129b   :  { %v16419_v53 = vpop.eup %16418  ;;  %v7066_v1 = vadd.f32 %v18761_v48, %v6997_v59  ;;  %v7067_v29 = vadd.f32 %v18775_v40, %v6998_v58  ;;  %v7068_v50 = vadd.f32 %v18788_v38, %v6999_v30 }
0x129c   :  { %v6851_v2 = vrot.slane %v16419_v53, %v17258_v15  ;;  %v6855_v13 = vrot.slane %v16419_v53, %v17261_v16  ;;  %v6859_v51 = vrot.slane %v16419_v53, %v17264_v17  ;;  %v7069_v25 = vadd.f32 %v18794_v57, %v7000_v21 }
0x129d   :  { %v7110_v24 = vcombine.low %v7066_v1, %v7067_v29  ;;  %v6863_v6 = vrot.slane %v16419_v53, %v17267_v18  ;;  %v6867_v27 = vrot.slane %v16419_v53, %v17270_v23  ;;  %v7070_v10 = vadd.f32 %v18801_v39, %v7001_v4 }
0x129e   :  { %v6933_v32 = vmul.f32 %v6851_v2, %v18623_v3  ;;  %v6934_v35 = vmul.f32 %v6855_v13, %v18626_v47  ;;  %v6935_v59 = vmul.f32 %v6859_v51, %v18640_v44  ;;  %v7111_v58 = vcombine.low %v7068_v50, %v7069_v25 }
0x129f   :  { %v16421_v30 = vpop.eup %16420  ;;  %v7120_v37 = vrot.slane %v7110_v24, %v17134_v14  ;;  %v6936_v56 = vmul.f32 %v6863_v6, %v18643_v45  ;;  %v6937_v21 = vmul.f32 %v6867_v27, %v18646_v5 }
0x12a0   :  { %v7002_v1 = vmul.f32 %v18755_v12, %v6933_v32  ;;  %v7003_v53 = vmul.f32 %v18758_v22, %v6934_v35  ;;  %v7004_v3 = vmul.f32 %v18768_v61, %v6935_v59  ;;  %v7127_v47 = vrot.slane %v7111_v58, %v17134_v14 }
0x12a1   :  { %v6871_v44 = vrot.slane %v16421_v30, %v17258_v15  ;;  %v6875_v29 = vrot.slane %v16421_v30, %v17261_v16  ;;  %v6879_v4 = vrot.slane %v16421_v30, %v17264_v17  ;;  %v6883_v50 = vrot.slane %v16421_v30, %v17267_v18 }
0x12a2   :  { %v7071_v45 = vadd.f32 %v18761_v48, %v7002_v1  ;;  %v7072_v5 = vadd.f32 %v18775_v40, %v7003_v53  ;;  %v7073_v2 = vadd.f32 %v18788_v38, %v7004_v3  ;;  %v7142_v13 = vcombine.low %v7120_v37, %v7127_v47 }
0x12a3   :  { %v6887_v51 = vrot.slane %v16421_v30, %v17270_v23  ;;  %v6938_v25 = vmul.f32 %v6871_v44, %v18661_v43  ;;  %v6939_v24 = vmul.f32 %v6875_v29, %v18665_v28  ;;  %v6940_v6 = vmul.f32 %v6879_v4, %v18668_v20 }
0x12a4   :  { %v16423_v27 = vpop.eup %16422  ;;  %v7112_v32 = vcombine.low %v7070_v10, %v7071_v45  ;;  %v7113_v35 = vcombine.low %v7072_v5, %v7073_v2  ;;  %v7150_v59 = vrot.slane %v7142_v13, %v17134_v14  ;;  %v6941_v58 = vmul.f32 %v6883_v50, %v18671_v42 }
0x12a5   :  { %v6891_v1 = vrot.slane %v16423_v27, %v17258_v15  ;;  %v6942_v53 = vmul.f32 %v6887_v51, %v18676_v52  ;;  %v7005_v37 = vmul.f32 %v18772_v54, %v6936_v56  ;;  %v7006_v30 = vmul.f32 %v18764_v41, %v6937_v21 }
0x12a6   :  { %v7134_v43 = vrot.slane %v7112_v32, %v17134_v14  ;;  %v7141_v28 = vrot.slane %v7113_v35, %v17134_v14  ;;  %v7007_v20 = vmul.f32 %v18755_v12, %v6938_v25  ;;  %v7008_v10 = vmul.f32 %v18758_v22, %v6939_v24 }
0x12a7   :  { %v6943_v3 = vmul.f32 %v6891_v1, %v18692_v60  ;;  %v7009_v42 = vmul.f32 %v18768_v61, %v6940_v6  ;;  %v7010_v47 = vmul.f32 %v18772_v54, %v6941_v58  ;;  %v7011_v52 = vmul.f32 %v18764_v41, %v6942_v53 }
0x12a8   :  { %v7143_v44 = vcombine.low %v7134_v43, %v7141_v28  ;;  %v7074_v56 = vadd.f32 %v18794_v57, %v7005_v37  ;;  %v7075_v21 = vadd.f32 %v18801_v39, %v7006_v30  ;;  %v7076_v29 = vadd.f32 %v18761_v48, %v7007_v20 }
0x12a9   :  { %v7012_v4 = vmul.f32 %v18755_v12, %v6943_v3  ;;  %v7077_v50 = vadd.f32 %v18775_v40, %v7008_v10  ;;  %v7078_v45 = vadd.f32 %v18788_v38, %v7009_v42  ;;  %v7079_v60 = vadd.f32 %v18794_v57, %v7010_v47 }
0x12aa   :  { %v7157_v5 = vrot.slane %v7143_v44, %v17134_v14  ;;  %v7080_v2 = vadd.f32 %v18801_v39, %v7011_v52  ;;  %v7159_v13 = vcombine.low %v7074_v56, %v7075_v21  ;;  %v6895_v51 = vrot.slane %v16423_v27, %v17261_v16 }
0x12ab   :  { %v7081_v25 = vadd.f32 %v18761_v48, %v7012_v4  ;;  %v7160_v24 = vcombine.low %v7076_v29, %v7077_v50  ;;  %v7161_v6 = vcombine.low %v7078_v45, %v7079_v60  ;;  %v6899_v32 = vrot.slane %v16423_v27, %v17264_v17  ;;  %v7695_v4 = vld [vmem:[%s20831_s16 + $0x10] sm:$0xff]  ;;  %v7696_v50 = vld [vmem:[%s20831_s16 + $0x18] sm:$0xff]  ;;  %v7697_v60 = vld [vmem:[%s20831_s16 + $0x20] sm:$0xff] }
0x12ac   :  { %v7158_v12 = vcombine.low %v7150_v59, %v7157_v5  ;;  %v6903_v35 = vrot.slane %v16423_v27, %v17267_v18  ;;  %v6907_v58 = vrot.slane %v16423_v27, %v17270_v23  ;;  %v7169_v53 = vrot.slane %v7159_v13, %v17134_v14  ;;  %v7698_v5 = vld [vmem:[%s20831_s16 + $0x28] sm:$0xff]  ;;  %v7699_v13 = vld [vmem:[%s20831_s16 + $0x30] sm:$0xff] }
0x12ad   :  { %v7162_v1 = vcombine.low %v7080_v2, %v7081_v25  ;;  %v7176_v37 = vrot.slane %v7160_v24, %v17134_v14  ;;  %v6944_v30 = vmul.f32 %v6895_v51, %v18696_v63  ;;  %v6945_v48 = vmul.f32 %v6899_v32, %v18700_v8  ;;  %v7700_v51 = vld [vmem:[%s20831_s16 + $0x38] sm:$0xff]  ;;  %v7701_v24 = vld [vmem:[%s20831_s16 + $0x40] sm:$0xff] }
0x12ae   :  { %15780 = vmatmul.mubr.msk.f32.vlgmr.msra.gmra.mrb[46].mxu0 %vm2463_vm3, %v7158_v12  ;;  %v6946_v43 = vmul.f32 %v6903_v35, %v18703_v26  ;;  %v6947_v28 = vmul.f32 %v6907_v58, %v18706_v55  ;;  %v7183_v27 = vrot.slane %v7161_v6, %v17134_v14  ;;  %v16246_v45 = vpack.c.bf16 %v7696_v50, %v7695_v4  ;;  %v7702_v6 = vld [vmem:[%s20831_s16 + $0x48] sm:$0xff]  ;;  %v7703_v12 = vld [vmem:[%s20831_s16 + $0x50] sm:$0xff]  ;;  %v7704_v35 = vld [vmem:[%s20831_s16 + $0x58] sm:$0xff] }
0x12af   :  { %15782 = vmatprep.mubr.msk.f32.mxu0 %vm16711_vm2, %v20907_v34  ;;  %v7190_v59 = vrot.slane %v7162_v1, %v17134_v14  ;;  %v7191_v20 = vcombine.low %v7169_v53, %v7176_v37  ;;  %v7013_v10 = vmul.f32 %v18758_v22, %v6944_v30  ;;  %v7014_v63 = vmul.f32 %v18768_v61, %v6945_v48  ;;  %v7705_v1 = vld [vmem:[%s20831_s16 + $0x60] sm:$0xff]  ;;  %v7706_v53 = vld [vmem:[%s20831_s16 + $0x68] sm:$0xff]  ;;  %v7707_v30 = vld [vmem:[%s20831_s16 + $0x70] sm:$0xff] }
0x12b0   :  { %v7015_v3 = vmul.f32 %v18772_v54, %v6946_v43  ;;  %v7016_v8 = vmul.f32 %v18764_v41, %v6947_v28  ;;  %v16249_v2 = vpack.c.bf16 %v7698_v5, %v7697_v60  ;;  %v16252_v25 = vpack.c.bf16 %v7700_v51, %v7699_v13  ;;  %v7708_v48 = vld [vmem:[%s20831_s16 + $0x78] sm:$0xff]  ;;  %v15079_v28 = vld [vmem:[%s20830_s15] ss:$0 sm:$0xff] }
0x12b1   :  { %v7192_v42 = vcombine.low %v7183_v27, %v7190_v59  ;;  %v7082_v26 = vadd.f32 %v18775_v40, %v7013_v10  ;;  %v7083_v55 = vadd.f32 %v18788_v38, %v7014_v63  ;;  %v7199_v44 = vrot.slane %v7191_v20, %v17134_v14 }
0x12b2   :  { %v7084_v47 = vadd.f32 %v18794_v57, %v7015_v3  ;;  %v7085_v52 = vadd.f32 %v18801_v39, %v7016_v8  ;;  %v7693_v57 = vld [vmem:[%s20831_s16] sm:$0xff]  ;;  %v7694_v39 = vld [vmem:[%s20831_s16 + $0x8] sm:$0xff]  ;;  %v16255_v32 = vpack.c.bf16 %v7702_v6, %v7701_v24  ;;  %v16258_v58 = vpack.c.bf16 %v7704_v35, %v7703_v12 }
0x12b3   :  { %v7206_v56 = vrot.slane %v7192_v42, %v17134_v14  ;;  %v7208_v22 = vcombine.low %v7082_v26, %v7083_v55  ;;  %v16243_v29 = vpack.c.bf16 %v7694_v39, %v7693_v57  ;;  %v16261_v37 = vpack.c.bf16 %v7706_v53, %v7705_v1 }
0x12b4   :  { %v7209_v21 = vcombine.low %v7084_v47, %v7085_v52  ;;  %v16264_v43 = vpack.c.bf16 %v7708_v48, %v7707_v30  ;;  %v7476_v27 = vrot.slane %v15079_v28, %v17134_v14  ;;  %v7469_v59 = vcombine.high %v15079_v28, %v15079_v28 }
0x12b5   :  { %v7207_v61 = vcombine.low %v7199_v44, %v7206_v56  ;;  %v7216_v54 = vrot.slane %v7208_v22, %v17134_v14  ;;  %16244 = vmatpush3.bf16.msra.mxu1 %v16243_v29 }
0x12b6   :  { %v7223_v41 = vrot.slane %v7209_v21, %v17134_v14  ;;  %16245 = vmatprep.subr.bf16.mxu1 %v20906_v36  ;;  %v7484_v20 = vcombine.high %v7476_v27, %v7476_v27  ;;  %v7483_v63 = vrot.slane %v7469_v59, %v17134_v14  ;;  %v18955_v3 = vrot.slane %v7476_v27, %v17134_v14 }
0x12b7   :  { %15783 = vmatmul.mubr.msk.f32.gmra.mrb[48].mxu0 %vm2463_vm3, %v7207_v61 }
0x12b8   :  { %15785 = vmatprep.mubr.msk.f32.mxu0 %vm16711_vm2, %v20907_v34  ;;  %v7224_v40 = vcombine.low %v7216_v54, %v7223_v41  ;;  %v18958_v8 = vrot.slane %v7484_v20, %v17134_v14  ;;  %v18964_v56 = vrot.slane %v7483_v63, %v17134_v14  ;;  %v18968_v22 = vcombine.high %v18955_v3, %v18955_v3 }
0x12b9   :  { %16247 = vmatpush3.bf16.msra.mxu1 %v16246_v45 }
0x12ba   :  { %v7231_v38 = vrot.slane %v7224_v40, %v17134_v14  ;;  %16248 = vmatprep.subr.bf16.mxu1 %v20906_v36  ;;  %v18972_v21 = vcombine.high %v18958_v8, %v18958_v8 }
0x12bc   :  { %15786 = vmatmul.mubr.msk.f32.gmra.mrb[50].mxu0 %vm2463_vm3, %v7231_v38 }
0x12bd   :  { %15837 = vmatprep.mubr.msk.f32.mxu0 %vm16711_vm2, %v20907_v34  ;;  %16250 = vmatpush3.bf16.msra.mxu1 %v16249_v2 }
0x12be   :  { %16251 = vmatprep.subr.bf16.mxu1 %v20906_v36 }
0x12c1   :  { %16253 = vmatpush3.bf16.msra.mxu1 %v16252_v25 }
0x12c2   :  { %16254 = vmatprep.subr.bf16.mxu1 %v20906_v36 }
0x12c5   :  { %16256 = vmatpush3.bf16.msra.mxu1 %v16255_v32 }
0x12c6   :  { %16257 = vmatprep.subr.bf16.mxu1 %v20906_v36 }
0x12c9   :  { %16259 = vmatpush3.bf16.msra.mxu1 %v16258_v58 }
0x12ca   :  { %16260 = vmatprep.subr.bf16.mxu1 %v20906_v36 }
0x12cd   :  { %16262 = vmatpush3.bf16.msra.mxu1 %v16261_v37 }
0x12ce   :  { %16263 = vmatprep.subr.bf16.mxu1 %v20906_v36 }
0x12d1   :  { %16265 = vmatpush3.bf16.msra.mxu1 %v16264_v43 }
0x12d2   :  { %15871 = vmatprep.subr.mxu1 %v20907_v34 }
0x1381   :  { %v7304_v10 = vpop.f32.mrb[46].mxu0 }
0x1382   :  { %v7321_v42 = vcombine.high %v7304_v10, %v7304_v10  ;;  %v7328_v26 = vrot.slane %v7304_v10, %v17134_v14  ;;  %v15781_v55 = vpop.f32.mrb[47].mxu0 }
0x1384   :  { %v7335_v47 = vrot.slane %v7321_v42, %v17134_v14  ;;  %v7336_v52 = vcombine.high %v7328_v26, %v7328_v26  ;;  %v7344_v44 = vrot.slane %v7328_v26, %v17134_v14 }
0x1386   :  { %v7337_v61 = vcombine.high %v7335_v47, %v7335_v47  ;;  %v7351_v54 = vrot.slane %v7335_v47, %v17134_v14  ;;  %v7358_v41 = vrot.slane %v7336_v52, %v17134_v14  ;;  %v7366_v40 = vcombine.high %v7344_v44, %v7344_v44 }
0x1387   :  { %v18977_v38 = vadd.f32 %v18955_v3, %v7344_v44 }
0x1388   :  { %v7365_v57 = vrot.slane %v7337_v61, %v17134_v14  ;;  %v7367_v39 = vcombine.high %v7351_v54, %v7351_v54  ;;  %v7368_v29 = vcombine.high %v7358_v41, %v7358_v41  ;;  %v18981_v4 = vadd.f32 %v18958_v8, %v7358_v41 }
0x1389   :  { %v18984_v50 = vadd.f32 %v18968_v22, %v7366_v40  ;;  %v18987_v45 = vadd.f32 %v18964_v56, %v7351_v54  ;;  %v15080_v60 = vmul.f32 -1.702, %v18977_v38 }
0x138a   :  { %v7369_v5 = vcombine.high %v7365_v57, %v7365_v57  ;;  %v18991_v2 = vadd.f32 %v18972_v21, %v7368_v29  ;;  %v18994_v13 = vadd.f32 %v18955_v3, %v7365_v57  ;;  %v18997_v51 = vadd.f32 %v18958_v8, %v7367_v39  ;;  %v7309_v25 = vpop.f32.mrb[48].mxu0 }
0x138b   :  { %v15081_v24 = vmul.f32 -1.702, %v18981_v4  ;;  %v15082_v6 = vmul.f32 -1.702, %v18984_v50  ;;  %v15084_v32 = vmul.f32 -1.702, %v18987_v45  ;;  %v7370_v12 = vcombine.high %v7309_v25, %v7309_v25 }
0x138c   :  { %v19003_v35 = vadd.f32 %v18968_v22, %v7369_v5  ;;  %v15083_v58 = vmul.f32 -1.702, %v18991_v2  ;;  %v15085_v1 = vmul.f32 -1.702, %v18994_v13  ;;  %v15086_v53 = vmul.f32 -1.702, %v18997_v51 }
0x138d   :  { %v7573_v37 = vmul.f32 1.442695, %v15080_v60  ;;  %v7575_v30 = vmul.f32 1.442695, %v15081_v24  ;;  %v7577_v48 = vmul.f32 1.442695, %v15082_v6  ;;  %v7377_v43 = vrot.slane %v7309_v25, %v17134_v14 }
0x138e   :  { %v15087_v28 = vmul.f32 -1.702, %v19003_v35  ;;  %v7579_v27 = vmul.f32 1.442695, %v15083_v58  ;;  %v7384_v59 = vrot.slane %v7370_v12, %v17134_v14  ;;  %v7581_v20 = vmul.f32 1.442695, %v15084_v32 }
0x138f   :  { %16424 = vpow2.f32 %v7573_v37  ;;  %v7385_v10 = vcombine.high %v7377_v43, %v7377_v43  ;;  %v15784_v63 = vpop.f32.mrb[49].mxu0  ;;  %v7583_v42 = vmul.f32 1.442695, %v15085_v1  ;;  %v7393_v55 = vrot.slane %v7377_v43, %v17134_v14 }
0x1390   :  { %16426 = vpow2.f32 %v7575_v30  ;;  %v7386_v26 = vcombine.high %v7384_v59, %v7384_v59  ;;  %v7314_v47 = vpop.f32.mrb[50].mxu0  ;;  %v7585_v52 = vmul.f32 1.442695, %v15086_v53  ;;  %v7587_v54 = vmul.f32 1.442695, %v15087_v28 }
0x1391   :  { %16428 = vpow2.f32 %v7577_v48  ;;  %v7407_v44 = vrot.slane %v7385_v10, %v17134_v14  ;;  %v15787_v61 = vpop.f32.mrb[51].mxu0  ;;  %v7400_v41 = vrot.slane %v7384_v59, %v17134_v14  ;;  %v19015_v40 = vadd.f32 %v18972_v21, %v7393_v55 }
0x1392   :  { %16430 = vpow2.f32 %v7579_v27  ;;  %v7414_v57 = vrot.slane %v7386_v26, %v17134_v14  ;;  %v7425_v39 = vrot.slane %v7314_v47, %v17134_v14  ;;  %v7415_v29 = vcombine.high %v7393_v55, %v7393_v55 }
0x1393   :  { %16432 = vpow2.f32 %v7581_v20  ;;  %v7417_v60 = vcombine.high %v7407_v44, %v7407_v44  ;;  %v7416_v5 = vcombine.high %v7400_v41, %v7400_v41  ;;  %v15088_v25 = vmul.f32 -1.702, %v19015_v40 }
0x1394   :  { %16434 = vpow2.f32 %v7583_v42  ;;  %v7418_v24 = vcombine.high %v7414_v57, %v7414_v57  ;;  %v7426_v6 = vcombine.high %v7425_v39, %v7425_v39  ;;  %v19021_v32 = vadd.f32 %v18964_v56, %v7407_v44 }
0x1395   :  { %16436 = vpow2.f32 %v7585_v52  ;;  %v19024_v12 = vadd.f32 %v18955_v3, %v7415_v29  ;;  %v19027_v1 = vadd.f32 %v18958_v8, %v7417_v60  ;;  %v19030_v53 = vadd.f32 %v18968_v22, %v7400_v41 }
0x1396   :  { %16438 = vpow2.f32 %v7587_v54  ;;  %v7589_v37 = vmul.f32 1.442695, %v15088_v25  ;;  %v19033_v43 = vadd.f32 %v18972_v21, %v7414_v57  ;;  %v19036_v28 = vadd.f32 %v18964_v56, %v7416_v5 }
0x1397   :  { %v7433_v27 = vrot.slane %v7425_v39, %v17134_v14  ;;  %v19040_v10 = vadd.f32 %v18955_v3, %v7418_v24  ;;  %v7440_v63 = vrot.slane %v7426_v6, %v17134_v14  ;;  %v15089_v55 = vmul.f32 -1.702, %v19021_v32 }
0x1398   :  { %16440 = vpow2.f32 %v7589_v37  ;;  %v15090_v47 = vmul.f32 -1.702, %v19024_v12  ;;  %v15091_v61 = vmul.f32 -1.702, %v19027_v1  ;;  %v15092_v54 = vmul.f32 -1.702, %v19030_v53 }
0x1399   :  { %v16425_v58 = vpop.eup %16424  ;;  %v15093_v57 = vmul.f32 -1.702, %v19033_v43  ;;  %v7441_v39 = vcombine.high %v7433_v27, %v7433_v27  ;;  %v15094_v5 = vmul.f32 -1.702, %v19036_v28  ;;  %v7442_v25 = vcombine.high %v7440_v63, %v7440_v63 }
0x139a   :  { %v16427_v30 = vpop.eup %16426  ;;  %v7613_v48 = vadd.f32 1.0, %v16425_v58  ;;  %v7591_v58 = vmul.f32 1.442695, %v15089_v55  ;;  %v19050_v37 = vadd.f32 %v18958_v8, %v7433_v27 }
0x139b   :  { %v16429_v59 = vpop.eup %16428  ;;  %v7614_v20 = vadd.f32 1.0, %v16427_v30  ;;  %v19060_v55 = vadd.f32 %v18964_v56, %v7442_v25  ;;  %v7599_v8 = vmul.f32 1.442695, %v15093_v57 }
0x139c   :  { %v16431_v42 = vpop.eup %16430  ;;  %v7615_v26 = vadd.f32 1.0, %v16429_v59  ;;  %16442 = vrcp.f32 %v7613_v48  ;;  %v7593_v48 = vmul.f32 1.442695, %v15090_v47  ;;  %v19053_v59 = vadd.f32 %v18968_v22, %v7440_v63 }
0x139d   :  { %v16433_v52 = vpop.eup %16432  ;;  %v7616_v44 = vadd.f32 1.0, %v16431_v42  ;;  %16444 = vrcp.f32 %v7614_v20  ;;  %v15095_v20 = vmul.f32 -1.702, %v19040_v10  ;;  %v7595_v42 = vmul.f32 1.442695, %v15091_v61 }
0x139e   :  { %v16435_v41 = vpop.eup %16434  ;;  %v7617_v3 = vadd.f32 1.0, %v16433_v52  ;;  %16446 = vrcp.f32 %v7615_v26  ;;  %v19057_v26 = vadd.f32 %v18972_v21, %v7441_v39  ;;  %v7597_v52 = vmul.f32 1.442695, %v15092_v54 }
0x139f   :  { %v16437_v29 = vpop.eup %16436  ;;  %v7618_v60 = vadd.f32 1.0, %v16435_v41  ;;  %16448 = vrcp.f32 %v7616_v44  ;;  %v15096_v27 = vmul.f32 -1.702, %v19050_v37  ;;  %v7601_v22 = vmul.f32 1.442695, %v15094_v5 }
0x13a0   :  { %v16439_v24 = vpop.eup %16438  ;;  %v7619_v6 = vadd.f32 1.0, %v16437_v29  ;;  %16450 = vrcp.f32 %v7617_v3  ;;  %v15097_v63 = vmul.f32 -1.702, %v19053_v59  ;;  %v7603_v61 = vmul.f32 1.442695, %v15095_v20 }
0x13a1   :  { %v7620_v30 = vadd.f32 1.0, %v16439_v24  ;;  %16452 = vrcp.f32 %v7618_v60  ;;  %v15098_v21 = vmul.f32 -1.702, %v19057_v26  ;;  %v15099_v54 = vmul.f32 -1.702, %v19060_v55 }
0x13a2   :  { %16454 = vrcp.f32 %v7619_v6  ;;  %v16441_v47 = vpop.eup %16440  ;;  %v7605_v57 = vmul.f32 1.442695, %v15096_v27  ;;  %v7607_v60 = vmul.f32 1.442695, %v15097_v63 }
0x13a3   :  { %16456 = vrcp.f32 %v7620_v30  ;;  %v7609_v6 = vmul.f32 1.442695, %v15098_v21  ;;  %v7611_v20 = vmul.f32 1.442695, %v15099_v54 }
0x13a4   :  { %16458 = vpow2.f32 %v7591_v58 }
0x13a5   :  { %16460 = vpow2.f32 %v7593_v48  ;;  %v7621_v48 = vadd.f32 1.0, %v16441_v47 }
0x13a6   :  { %v16443_v44 = vpop.eup %16442  ;;  %16462 = vpow2.f32 %v7595_v42 }
0x13a7   :  { %v16445_v41 = vpop.eup %16444  ;;  %16464 = vpow2.f32 %v7597_v52  ;;  %v7673_v29 = vmul.f32 %v16443_v44, %v18977_v38 }
0x13a8   :  { %v16447_v56 = vpop.eup %16446  ;;  %v7674_v3 = vmul.f32 %v16445_v41, %v18981_v4  ;;  %16466 = vpow2.f32 %v7599_v8 }
0x13a9   :  { %v16449_v39 = vpop.eup %16448  ;;  %16468 = vpow2.f32 %v7601_v22  ;;  %v7675_v25 = vmul.f32 %v16447_v56, %v18984_v50 }
0x13aa   :  { %v16451_v5 = vpop.eup %16450  ;;  %v7676_v24 = vmul.f32 %v16449_v39, %v18991_v2  ;;  %16470 = vpow2.f32 %v7603_v61  ;;  %v7729_v30 = vcombine.low %v7673_v29, %v7674_v3 }
0x13ab   :  { %v16453_v58 = vpop.eup %16452  ;;  %v7677_v4 = vmul.f32 %v16451_v5, %v18987_v45  ;;  %16472 = vpow2.f32 %v7605_v57 }
0x13ac   :  { %v16455_v42 = vpop.eup %16454  ;;  %v7678_v52 = vmul.f32 %v16453_v58, %v18994_v13  ;;  %v7730_v8 = vcombine.low %v7675_v25, %v7676_v24  ;;  %16474 = vpow2.f32 %v7607_v60  ;;  %v7739_v13 = vrot.slane %v7729_v30, %v17134_v14 }
0x13ad   :  { %v16457_v38 = vpop.eup %16456  ;;  %v7679_v27 = vmul.f32 %v16455_v42, %v18997_v51  ;;  %16476 = vpow2.f32 %v7609_v6 }
0x13ae   :  { %v16459_v50 = vpop.eup %16458  ;;  %v7680_v2 = vmul.f32 %v16457_v38, %v19003_v35  ;;  %v7731_v22 = vcombine.low %v7677_v4, %v7678_v52  ;;  %v7746_v63 = vrot.slane %v7730_v8, %v17134_v14  ;;  %16478 = vpow2.f32 %v7611_v20 }
0x13af   :  { %v16461_v47 = vpop.eup %16460  ;;  %v7622_v44 = vadd.f32 1.0, %v16459_v50  ;;  %16480 = vrcp.f32 %v7621_v48 }
0x13b0   :  { %v16463_v61 = vpop.eup %16462  ;;  %v7732_v45 = vcombine.low %v7679_v27, %v7680_v2  ;;  %v7623_v21 = vadd.f32 1.0, %v16461_v47  ;;  %v7753_v51 = vrot.slane %v7731_v22, %v17134_v14  ;;  %v7761_v3 = vcombine.low %v7739_v13, %v7746_v63 }
0x13b1   :  { %v16465_v41 = vpop.eup %16464  ;;  %v7624_v54 = vadd.f32 1.0, %v16463_v61  ;;  %16482 = vrcp.f32 %v7622_v44 }
0x13b2   :  { %v16467_v56 = vpop.eup %16466  ;;  %v7760_v35 = vrot.slane %v7732_v45, %v17134_v14  ;;  %v7625_v57 = vadd.f32 1.0, %v16465_v41  ;;  %16484 = vrcp.f32 %v7623_v21  ;;  %v7769_v58 = vrot.slane %v7761_v3, %v17134_v14 }
0x13b3   :  { %v16469_v39 = vpop.eup %16468  ;;  %v7626_v29 = vadd.f32 1.0, %v16467_v56  ;;  %16486 = vrcp.f32 %v7624_v54 }
0x13b4   :  { %v16471_v60 = vpop.eup %16470  ;;  %v7762_v5 = vcombine.low %v7753_v51, %v7760_v35  ;;  %v7627_v25 = vadd.f32 1.0, %v16469_v39  ;;  %16488 = vrcp.f32 %v7625_v57 }
0x13b5   :  { %v7628_v24 = vadd.f32 1.0, %v16471_v60  ;;  %16490 = vrcp.f32 %v7626_v29  ;;  %v16473_v6 = vpop.eup %16472 }
0x13b6   :  { %16492 = vrcp.f32 %v7627_v25  ;;  %v7776_v30 = vrot.slane %v7762_v5, %v17134_v14  ;;  %v16475_v48 = vpop.eup %16474  ;;  %v7629_v20 = vadd.f32 1.0, %v16473_v6 }
0x13b7   :  { %16494 = vrcp.f32 %v7628_v24  ;;  %v16477_v42 = vpop.eup %16476  ;;  %v7630_v4 = vadd.f32 1.0, %v16475_v48 }
0x13b8   :  { %v7777_v52 = vcombine.low %v7769_v58, %v7776_v30  ;;  %v16479_v8 = vpop.eup %16478  ;;  %v7631_v38 = vadd.f32 1.0, %v16477_v42  ;;  %16496 = vrcp.f32 %v7629_v20 }
0x13b9   :  { %v16481_v27 = vpop.eup %16480  ;;  %v7632_v50 = vadd.f32 1.0, %v16479_v8  ;;  %16498 = vrcp.f32 %v7630_v4 }
0x13ba   :  { %15821 = vmatmul.mubr.f32.vlgmr.msra.gmra.mrb[54].mxu1 %v7777_v52  ;;  %16500 = vrcp.f32 %v7631_v38  ;;  %v7681_v61 = vmul.f32 %v16481_v27, %v19015_v40 }
0x13bb   :  { %v16483_v2 = vpop.eup %16482  ;;  %15823 = vmatprep.mubr.msk.f32.mxu1 %vm16711_vm2, %v20907_v34  ;;  %16502 = vrcp.f32 %v7632_v50 }
0x13bc   :  { %v16485_v22 = vpop.eup %16484  ;;  %v7682_v63 = vmul.f32 %v16483_v2, %v19021_v32 }
0x13bd   :  { %v16487_v47 = vpop.eup %16486  ;;  %v7683_v45 = vmul.f32 %v16485_v22, %v19024_v12 }
0x13be   :  { %v16489_v44 = vpop.eup %16488  ;;  %v7684_v13 = vmul.f32 %v16487_v47, %v19027_v1  ;;  %v7778_v56 = vcombine.low %v7681_v61, %v7682_v63 }
0x13bf   :  { %v16491_v21 = vpop.eup %16490  ;;  %v7685_v51 = vmul.f32 %v16489_v44, %v19030_v53 }
0x13c0   :  { %v16493_v41 = vpop.eup %16492  ;;  %v7686_v54 = vmul.f32 %v16491_v21, %v19033_v43  ;;  %v7779_v35 = vcombine.low %v7683_v45, %v7684_v13  ;;  %v7788_v1 = vrot.slane %v7778_v56, %v17134_v14 }
0x13c1   :  { %v16495_v3 = vpop.eup %16494  ;;  %v7687_v32 = vmul.f32 %v16493_v41, %v19036_v28 }
0x13c2   :  { %v7688_v57 = vmul.f32 %v16495_v3, %v19040_v10  ;;  %v7780_v39 = vcombine.low %v7685_v51, %v7686_v54  ;;  %v7795_v40 = vrot.slane %v7779_v35, %v17134_v14  ;;  %v16497_v29 = vpop.eup %16496 }
0x13c3   :  { %v16499_v12 = vpop.eup %16498  ;;  %v7689_v53 = vmul.f32 %v16497_v29, %v19050_v37 }
0x13c4   :  { %v7781_v60 = vcombine.low %v7687_v32, %v7688_v57  ;;  %v16501_v5 = vpop.eup %16500  ;;  %v7690_v43 = vmul.f32 %v16499_v12, %v19053_v59  ;;  %v7802_v24 = vrot.slane %v7780_v39, %v17134_v14  ;;  %v7810_v6 = vcombine.low %v7788_v1, %v7795_v40 }
0x13c5   :  { %v16503_v25 = vpop.eup %16502  ;;  %v7691_v10 = vmul.f32 %v16501_v5, %v19057_v26 }
0x13c6   :  { %v7809_v28 = vrot.slane %v7781_v60, %v17134_v14  ;;  %v7692_v58 = vmul.f32 %v16503_v25, %v19060_v55  ;;  %v7827_v30 = vcombine.low %v7689_v53, %v7690_v43  ;;  %v7818_v42 = vrot.slane %v7810_v6, %v17134_v14  ;;  %v15100_v55 = vld [vmem:[%s20832_s17] ss:$0 sm:$0xff] }
0x13c7   :  { %v8112_v38 = vrot.slane %v15100_v55, %v17134_v14  ;;  %v8105_v27 = vcombine.high %v15100_v55, %v15100_v55 }
0x13c8   :  { %v7811_v48 = vcombine.low %v7802_v24, %v7809_v28  ;;  %v7828_v20 = vcombine.low %v7691_v10, %v7692_v58  ;;  %v7835_v37 = vrot.slane %v7827_v30, %v17134_v14 }
0x13c9   :  { %v8120_v50 = vcombine.high %v8112_v38, %v8112_v38  ;;  %v8119_v44 = vrot.slane %v8105_v27, %v17134_v14  ;;  %v19114_v61 = vrot.slane %v8112_v38, %v17134_v14 }
0x13ca   :  { %v7825_v4 = vrot.slane %v7811_v48, %v17134_v14  ;;  %v7842_v59 = vrot.slane %v7828_v20, %v17134_v14 }
0x13cb   :  { %v19119_v41 = vrot.slane %v8120_v50, %v17134_v14  ;;  %v19125_v3 = vrot.slane %v8119_v44, %v17134_v14  ;;  %v19130_v39 = vcombine.high %v19114_v61, %v19114_v61 }
0x13cc   :  { %v7826_v52 = vcombine.low %v7818_v42, %v7825_v4  ;;  %v7843_v8 = vcombine.low %v7835_v37, %v7842_v59 }
0x13cd   :  { %v19134_v40 = vcombine.high %v19119_v41, %v19119_v41 }
0x13ce   :  { %15824 = vmatmul.mubr.f32.gmra.mrb[56].mxu1 %v7826_v52  ;;  %v7850_v26 = vrot.slane %v7843_v8, %v17134_v14 }
0x13cf   :  { %15826 = vmatprep.mubr.msk.f32.mxu1 %vm16711_vm2, %v20907_v34 }
0x13d2   :  { %15827 = vmatmul.mubr.f32.gmra.mrb[58].mxu1 %v7850_v26 }
0x13d3   :  { %15873 = vmatprep.mubr.msk.f32.mxu1 %vm16711_vm2, %v20907_v34 }
0x148d   :  { %v7920_v2 = vpop.f32.mrb[54].mxu1 }
0x148e   :  { %v7937_v22 = vcombine.high %v7920_v2, %v7920_v2  ;;  %v7944_v63 = vrot.slane %v7920_v2, %v17134_v14  ;;  %v15822_v47 = vpop.f32.mrb[55].mxu1 }
0x1490   :  { %v7951_v45 = vrot.slane %v7937_v22, %v17134_v14  ;;  %v7952_v13 = vcombine.high %v7944_v63, %v7944_v63  ;;  %v7960_v21 = vrot.slane %v7944_v63, %v17134_v14 }
0x1492   :  { %v7967_v51 = vrot.slane %v7951_v45, %v17134_v14  ;;  %v7974_v54 = vrot.slane %v7952_v13, %v17134_v14  ;;  %v7982_v56 = vcombine.high %v7960_v21, %v7960_v21  ;;  %v8079_v35 = vadd.f32 %v7960_v21, %v18459_v46 }
0x1493   :  { %v7953_v60 = vcombine.high %v7951_v45, %v7951_v45 }
0x1494   :  { %v7984_v32 = vcombine.high %v7974_v54, %v7974_v54  ;;  %v8080_v57 = vadd.f32 %v7974_v54, %v18465_v9  ;;  %v8081_v29 = vadd.f32 %v7982_v56, %v18468_v62  ;;  %v8083_v12 = vadd.f32 %v7967_v51, %v18471_v0 }
0x1495   :  { %v19140_v1 = vadd.f32 %v19114_v61, %v8079_v35  ;;  %v7983_v25 = vcombine.high %v7967_v51, %v7967_v51 }
0x1496   :  { %v8082_v46 = vadd.f32 %v7984_v32, %v18475_v49  ;;  %v19143_v9 = vadd.f32 %v19119_v41, %v8080_v57  ;;  %v19146_v5 = vadd.f32 %v19130_v39, %v8081_v29  ;;  %v19152_v43 = vadd.f32 %v19125_v3, %v8083_v12  ;;  %v20927_v57 = vld [vmem:[#allocation7_spill] sm:$0xff]  ;;  %v20928_v12 = vld [vmem:[#allocation5_spill] sm:$0xff] }
0x1497   :  { %v7981_v49 = vrot.slane %v7953_v60, %v17134_v14  ;;  %v8085_v48 = vadd.f32 %v7983_v25, %v18481_v11  ;;  %v20930_v25 = vld [vmem:[#allocation8_spill] sm:$0xff] }
0x1498   :  { %v19149_v53 = vadd.f32 %v19134_v40, %v8082_v46  ;;  %v8193_v62 = vcombine.low %v19140_v1, %v19143_v9  ;;  %v8215_v6 = vrot.slane %v19152_v43, %v17134_v14 }
0x1499   :  { %v7985_v58 = vcombine.high %v7981_v49, %v7981_v49  ;;  %v8084_v30 = vadd.f32 %v7981_v49, %v18478_v19  ;;  %v19173_v38 = vadd.f32 %v19119_v41, %v8085_v48  ;;  %v20932_v48 = vld [vmem:[#allocation9_spill] sm:$0xff] }
0x149a   :  { %v8194_v0 = vcombine.low %v19146_v5, %v19149_v53  ;;  %v8201_v24 = vrot.slane %v8193_v62, %v17134_v14  ;;  %v8230_v42 = vrot.slane %v8215_v6, %v17134_v14 }
0x149b   :  { %v8086_v26 = vadd.f32 %v7985_v58, %v18488_v31  ;;  %v19170_v55 = vadd.f32 %v19114_v61, %v8084_v30 }
0x149c   :  { %v8208_v28 = vrot.slane %v8194_v0, %v17134_v14  ;;  %v20929_v0 = vld [vmem:[#allocation6_spill] sm:$0xff] }
0x149d   :  { %v19181_v45 = vadd.f32 %v19130_v39, %v8086_v26  ;;  %v8232_v51 = vcombine.low %v19170_v55, %v19173_v38 }
0x149e   :  { %v8216_v10 = vcombine.low %v8201_v24, %v8208_v28  ;;  %v20931_v28 = vld [vmem:[#allocation10_spill] sm:$0xff] }
0x149f   :  { %v8240_v30 = vrot.slane %v8232_v51, %v17134_v14 }
0x14a0   :  { %v8223_v20 = vrot.slane %v8216_v10, %v17134_v14 }
0x14a1   :  { %v7925_v4 = vpop.f32.mrb[56].mxu1 }
0x14a2   :  { %v7986_v37 = vcombine.high %v7925_v4, %v7925_v4  ;;  %v7993_v59 = vrot.slane %v7925_v4, %v17134_v14  ;;  %v15825_v52 = vpop.f32.mrb[57].mxu1  ;;  %v8231_v8 = vcombine.low %v8223_v20, %v8230_v42 }
0x14a4   :  { %v8000_v19 = vrot.slane %v7986_v37, %v17134_v14  ;;  %v8001_v11 = vcombine.high %v7993_v59, %v7993_v59  ;;  %v8009_v27 = vrot.slane %v7993_v59, %v17134_v14  ;;  %v8353_v50 = vsel %vm881_vm1, %v8231_v8, 0.0  ;;  %v20935_v8 = vld [vmem:[#allocation11_spill] sm:$0xff] }
0x14a5   :  { %v7930_v2 = vpop.f32.mrb[58].mxu1  ;;  %8354 = vadd.xlane.f32.xlu0 %v8353_v50 }
0x14a6   :  { %v8002_v22 = vcombine.high %v8000_v19, %v8000_v19  ;;  %v8016_v63 = vrot.slane %v8000_v19, %v17134_v14  ;;  %v8023_v31 = vrot.slane %v8001_v11, %v17134_v14  ;;  %v8031_v47 = vcombine.high %v8009_v27, %v8009_v27  ;;  %v15828_v44 = vpop.f32.mrb[59].mxu1 }
0x14a7   :  { %v8087_v13 = vadd.f32 %v8009_v27, %v18511_v7  ;;  %v8041_v21 = vrot.slane %v7930_v2, %v17134_v14 }
0x14a8   :  { %v8030_v54 = vrot.slane %v8002_v22, %v17134_v14  ;;  %v8032_v56 = vcombine.high %v8016_v63, %v8016_v63  ;;  %v8033_v35 = vcombine.high %v8023_v31, %v8023_v31  ;;  %v8088_v32 = vadd.f32 %v8023_v31, %v18517_v33 }
0x14a9   :  { %v8089_v29 = vadd.f32 %v8031_v47, %v20927_v57  ;;  %v8091_v46 = vadd.f32 %v8016_v63, %v20928_v12  ;;  %v19192_v60 = vadd.f32 %v19134_v40, %v8087_v13  ;;  %v8042_v62 = vcombine.high %v8041_v21, %v8041_v21  ;;  %v20938_v63 = vld [vmem:[#allocation12_spill] sm:$0xff]  ;;  %v20939_v47 = vld [vmem:[#allocation13_spill] sm:$0xff] }
0x14aa   :  { %v8034_v7 = vcombine.high %v8030_v54, %v8030_v54  ;;  %v8090_v49 = vadd.f32 %v8033_v35, %v20929_v0  ;;  %v8092_v24 = vadd.f32 %v8030_v54, %v20930_v25  ;;  %v8093_v6 = vadd.f32 %v8032_v56, %v20931_v28  ;;  %v20941_v56 = vld [vmem:[#allocation14_spill] sm:$0xff] }
0x14ab   :  { %v19198_v10 = vadd.f32 %v19125_v3, %v8088_v32  ;;  %v19201_v33 = vadd.f32 %v19114_v61, %v8089_v29  ;;  %v8049_v58 = vrot.slane %v8041_v21, %v17134_v14  ;;  %v19210_v4 = vadd.f32 %v19130_v39, %v8091_v46 }
0x14ac   :  { %v8094_v20 = vadd.f32 %v8034_v7, %v20932_v48  ;;  %v19207_v42 = vadd.f32 %v19119_v41, %v8090_v49  ;;  %v19213_v37 = vadd.f32 %v19134_v40, %v8092_v24  ;;  %v8056_v59 = vrot.slane %v8042_v62, %v17134_v14 }
0x14ad   :  { %v8057_v52 = vcombine.high %v8049_v58, %v8049_v58  ;;  %v8095_v26 = vadd.f32 %v8049_v58, %v20935_v8  ;;  %v8233_v19 = vcombine.low %v19181_v45, %v19192_v60  ;;  %v19220_v11 = vadd.f32 %v19125_v3, %v8093_v6 }
0x14ae   :  { %20933 = vst [vmem:[#allocation7_spill] sm:$0xff] %v19207_v42  ;;  %20934 = vst [vmem:[#allocation5_spill] sm:$0xff] %v19213_v37  ;;  %v19223_v27 = vadd.f32 %v19114_v61, %v8094_v20  ;;  %v8271_v50 = vcombine.low %v19201_v33, %v19207_v42  ;;  %v8272_v2 = vcombine.low %v19210_v4, %v19213_v37 }
0x14af   :  { %20936 = vst [vmem:[#allocation6_spill] sm:$0xff] %v19220_v11  ;;  %v8058_v22 = vcombine.high %v8056_v59, %v8056_v59  ;;  %v8096_v31 = vadd.f32 %v8056_v59, %v20938_v63  ;;  %v8097_v44 = vadd.f32 %v8057_v52, %v20939_v47  ;;  %v19232_v13 = vadd.f32 %v19119_v41, %v8095_v26 }
0x14b0   :  { %20937 = vst [vmem:[#allocation8_spill] sm:$0xff] %v19223_v27  ;;  %v8247_v21 = vrot.slane %v8233_v19, %v17134_v14  ;;  %v8254_v61 = vrot.slane %v19198_v10, %v17134_v14  ;;  %v8279_v51 = vrot.slane %v8271_v50, %v17134_v14  ;;  %v8286_v54 = vrot.slane %v8272_v2, %v17134_v14 }
0x14b1   :  { %20940 = vst [vmem:[#allocation10_spill] sm:$0xff] %v19232_v13  ;;  %v8098_v35 = vadd.f32 %v8058_v22, %v20941_v56  ;;  %v19241_v32 = vadd.f32 %v19130_v39, %v8096_v31  ;;  %v19244_v57 = vadd.f32 %v19134_v40, %v8097_v44  ;;  %v8310_v41 = vcombine.low %v19223_v27, %v19232_v13 }
0x14b2   :  { %v8255_v29 = vcombine.low %v8240_v30, %v8247_v21  ;;  %v8293_v12 = vrot.slane %v19220_v11, %v17134_v14  ;;  %v8294_v46 = vcombine.low %v8279_v51, %v8286_v54  ;;  %v8269_v40 = vrot.slane %v8254_v61, %v17134_v14 }
0x14b3   :  { %20942 = vst [vmem:[#allocation9_spill] sm:$0xff] %v19241_v32  ;;  %20943 = vst [vmem:[#allocation11_spill] sm:$0xff] %v19244_v57  ;;  %v19251_v62 = vadd.f32 %v19125_v3, %v8098_v35  ;;  %v8311_v7 = vcombine.low %v19241_v32, %v19244_v57  ;;  %v8318_v39 = vrot.slane %v8310_v41, %v17134_v14 }
0x14b4   :  { %v8262_v0 = vrot.slane %v8255_v29, %v17134_v14  ;;  %v8301_v49 = vrot.slane %v8294_v46, %v17134_v14  ;;  %v8308_v25 = vrot.slane %v8293_v12, %v17134_v14 }
0x14b5   :  { %20944 = vst [vmem:[#allocation12_spill] sm:$0xff] %v19251_v62  ;;  %v8325_v24 = vrot.slane %v8311_v7, %v17134_v14  ;;  %v8332_v28 = vrot.slane %v19251_v62, %v17134_v14 }
0x14b6   :  { %v8270_v3 = vcombine.low %v8262_v0, %v8269_v40  ;;  %v8309_v6 = vcombine.low %v8301_v49, %v8308_v25 }
0x14b7   :  { %v8333_v58 = vcombine.low %v8318_v39, %v8325_v24  ;;  %v8347_v59 = vrot.slane %v8332_v28, %v17134_v14 }
0x14b8   :  { %v8356_v30 = vsel %vm881_vm1, %v8270_v3, 0.0  ;;  %v8359_v48 = vsel %vm881_vm1, %v8309_v6, 0.0 }
0x14b9   :  { %8357 = vadd.xlane.f32.xlu1 %v8356_v30  ;;  %8360 = vadd.xlane.f32.xlu0 %v8359_v48  ;;  %v8340_v20 = vrot.slane %v8333_v58, %v17134_v14 }
0x14bb   :  { %v8348_v52 = vcombine.low %v8340_v20, %v8347_v59 }
0x14bd   :  { %v8362_v8 = vsel %vm881_vm1, %v8348_v52, 0.0 }
0x14be   :  { %8363 = vadd.xlane.f32.xlu1 %v8362_v8 }
0x1532   :  { %v8355_v26 = vpop.xlane.xlu0 %8354 }
0x1533   :  { %v8365_v19 = vmul.f32 0.03125, %v8355_v26 }
0x1535   :  { %v8376_v50 = vrot.slane %v8365_v19, %v17258_v15  ;;  %v8380_v2 = vrot.slane %v8365_v19, %v17261_v16  ;;  %v8384_v22 = vrot.slane %v8365_v19, %v17264_v17  ;;  %v8388_v63 = vrot.slane %v8365_v19, %v17267_v18 }
0x1536   :  { %v8392_v31 = vrot.slane %v8365_v19, %v17270_v23 }
0x1537   :  { %v19274_v47 = vsub.f32 %v19140_v1, %v8376_v50  ;;  %v19277_v44 = vsub.f32 %v19143_v9, %v8380_v2  ;;  %v19280_v21 = vsub.f32 %v19146_v5, %v8384_v22  ;;  %v19283_v61 = vsub.f32 %v19149_v53, %v8388_v63 }
0x1538   :  { %v19286_v51 = vsub.f32 %v19152_v43, %v8392_v31 }
0x1539   :  { %v8493_v54 = vmul.f32 %v19274_v47, %v19274_v47  ;;  %v8494_v56 = vmul.f32 %v19277_v44, %v19277_v44  ;;  %v8495_v35 = vmul.f32 %v19280_v21, %v19280_v21  ;;  %v8496_v41 = vmul.f32 %v19283_v61, %v19283_v61 }
0x153a   :  { %v8497_v29 = vmul.f32 %v19286_v51, %v19286_v51 }
0x153b   :  { %v8533_v12 = vcombine.low %v8493_v54, %v8494_v56  ;;  %v8534_v46 = vcombine.low %v8495_v35, %v8496_v41 }
0x153c   :  { %v8555_v0 = vrot.slane %v8497_v29, %v17134_v14 }
0x153d   :  { %v8541_v7 = vrot.slane %v8533_v12, %v17134_v14  ;;  %v8548_v39 = vrot.slane %v8534_v46, %v17134_v14 }
0x153e   :  { %v8570_v25 = vrot.slane %v8555_v0, %v17134_v14 }
0x153f   :  { %v8556_v40 = vcombine.low %v8541_v7, %v8548_v39 }
0x1541   :  { %v8563_v49 = vrot.slane %v8556_v40, %v17134_v14 }
0x1543   :  { %v8571_v24 = vcombine.low %v8563_v49, %v8570_v25 }
0x1545   :  { %v8693_v28 = vsel %vm881_vm1, %v8571_v24, 0.0 }
0x1546   :  { %v8358_v3 = vpop.xlane.xlu1 %8357  ;;  %v8361_v6 = vpop.xlane.xlu0 %8360  ;;  %8694 = vadd.xlane.f32.xlu0 %v8693_v28 }
0x1547   :  { %v8366_v58 = vmul.f32 0.03125, %v8358_v3  ;;  %v8367_v30 = vmul.f32 0.03125, %v8361_v6 }
0x1549   :  { %v8396_v48 = vrot.slane %v8366_v58, %v17258_v15  ;;  %v8400_v20 = vrot.slane %v8366_v58, %v17261_v16  ;;  %v8404_v59 = vrot.slane %v8366_v58, %v17264_v17  ;;  %v8408_v52 = vrot.slane %v8366_v58, %v17267_v18 }
0x154a   :  { %v8416_v8 = vrot.slane %v8367_v30, %v17258_v15  ;;  %v8420_v26 = vrot.slane %v8367_v30, %v17261_v16  ;;  %v8424_v19 = vrot.slane %v8367_v30, %v17264_v17  ;;  %v8428_v50 = vrot.slane %v8367_v30, %v17267_v18 }
0x154b   :  { %v8364_v2 = vpop.xlane.xlu1 %8363  ;;  %v8412_v22 = vrot.slane %v8366_v58, %v17270_v23  ;;  %v19314_v63 = vsub.f32 %v19170_v55, %v8396_v48  ;;  %v19317_v31 = vsub.f32 %v19173_v38, %v8400_v20  ;;  %v19320_v54 = vsub.f32 %v19181_v45, %v8404_v59 }
0x154c   :  { %v8368_v56 = vmul.f32 0.03125, %v8364_v2  ;;  %v19323_v35 = vsub.f32 %v19192_v60, %v8408_v52  ;;  %v8432_v41 = vrot.slane %v8367_v30, %v17270_v23  ;;  %v19327_v29 = vsub.f32 %v19201_v33, %v8416_v8 }
0x154d   :  { %v19330_v12 = vsub.f32 %v19198_v10, %v8412_v22  ;;  %v8498_v46 = vmul.f32 %v19314_v63, %v19314_v63  ;;  %v8499_v7 = vmul.f32 %v19317_v31, %v19317_v31  ;;  %v8500_v39 = vmul.f32 %v19320_v54, %v19320_v54 }
0x154e   :  { %v8436_v0 = vrot.slane %v8368_v56, %v17258_v15  ;;  %v8440_v40 = vrot.slane %v8368_v56, %v17261_v16  ;;  %v8444_v49 = vrot.slane %v8368_v56, %v17264_v17  ;;  %v8448_v25 = vrot.slane %v8368_v56, %v17267_v18 }
0x154f   :  { %v8501_v24 = vmul.f32 %v19323_v35, %v19323_v35  ;;  %v8502_v28 = vmul.f32 %v19330_v12, %v19330_v12  ;;  %v8572_v3 = vcombine.low %v8498_v46, %v8499_v7  ;;  %v19347_v6 = vsub.f32 %v19207_v42, %v8420_v26 }
0x1550   :  { %v19350_v58 = vsub.f32 %v19210_v4, %v8424_v19  ;;  %v19353_v30 = vsub.f32 %v19213_v37, %v8428_v50  ;;  %v19356_v48 = vsub.f32 %v19220_v11, %v8432_v41  ;;  %v8503_v20 = vmul.f32 %v19327_v29, %v19327_v29 }
0x1551   :  { %v8573_v59 = vcombine.low %v8500_v39, %v8501_v24  ;;  %v8580_v52 = vrot.slane %v8572_v3, %v17134_v14  ;;  %v8594_v8 = vrot.slane %v8502_v28, %v17134_v14  ;;  %v8504_v26 = vmul.f32 %v19347_v6, %v19347_v6 }
0x1552   :  { %v8505_v19 = vmul.f32 %v19350_v58, %v19350_v58  ;;  %v8506_v50 = vmul.f32 %v19353_v30, %v19353_v30  ;;  %v8507_v2 = vmul.f32 %v19356_v48, %v19356_v48  ;;  %v8452_v22 = vrot.slane %v8368_v56, %v17270_v23 }
0x1553   :  { %v8587_v41 = vrot.slane %v8573_v59, %v17134_v14  ;;  %v8611_v46 = vcombine.low %v8503_v20, %v8504_v26  ;;  %v19373_v7 = vsub.f32 %v19223_v27, %v8436_v0  ;;  %v8609_v39 = vrot.slane %v8594_v8, %v17134_v14 }
0x1554   :  { %v8612_v24 = vcombine.low %v8505_v19, %v8506_v50  ;;  %v19377_v28 = vsub.f32 %v19232_v13, %v8440_v40  ;;  %v19380_v3 = vsub.f32 %v19241_v32, %v8444_v49  ;;  %v19384_v56 = vsub.f32 %v19244_v57, %v8448_v25 }
0x1555   :  { %v8595_v42 = vcombine.low %v8580_v52, %v8587_v41  ;;  %v8619_v11 = vrot.slane %v8611_v46, %v17134_v14  ;;  %v19387_v20 = vsub.f32 %v19251_v62, %v8452_v22  ;;  %v8633_v59 = vrot.slane %v8507_v2, %v17134_v14 }
0x1556   :  { %v8626_v0 = vrot.slane %v8612_v24, %v17134_v14  ;;  %v8508_v40 = vmul.f32 %v19373_v7, %v19373_v7  ;;  %v8509_v49 = vmul.f32 %v19377_v28, %v19377_v28  ;;  %v8510_v8 = vmul.f32 %v19380_v3, %v19380_v3 }
0x1557   :  { %v8602_v52 = vrot.slane %v8595_v42, %v17134_v14  ;;  %v8511_v25 = vmul.f32 %v19384_v56, %v19384_v56  ;;  %v8512_v26 = vmul.f32 %v19387_v20, %v19387_v20  ;;  %v8648_v46 = vrot.slane %v8633_v59, %v17134_v14 }
0x1558   :  { %v8634_v19 = vcombine.low %v8619_v11, %v8626_v0  ;;  %v8650_v50 = vcombine.low %v8508_v40, %v8509_v49  ;;  %v15105_v49 = vld [vmem:[%s20823_s8 + $0x20] sm:$0xff] }
0x1559   :  { %v8610_v2 = vcombine.low %v8602_v52, %v8609_v39  ;;  %v8651_v22 = vcombine.low %v8510_v8, %v8511_v25  ;;  %v8672_v57 = vrot.slane %v8512_v26, %v17134_v14  ;;  %v15106_v52 = vld [vmem:[%s20823_s8 + $0x28] sm:$0xff] }
0x155a   :  { %v8641_v41 = vrot.slane %v8634_v19, %v17134_v14  ;;  %v8658_v24 = vrot.slane %v8650_v50, %v17134_v14  ;;  %v15103_v19 = vld [vmem:[%s20821_s6 + $0x1] ss:$0 sm:$0xff] }
0x155b   :  { %v8696_v42 = vsel %vm881_vm1, %v8610_v2, 0.0  ;;  %v8665_v62 = vrot.slane %v8651_v22, %v17134_v14  ;;  %v8687_v0 = vrot.slane %v8672_v57, %v17134_v14  ;;  %v15104_v50 = vld [vmem:[%s20822_s7 + $0x1] ss:$0 sm:$0xff]  ;;  %v8853_v2 = vrot.slane %v15103_v19, %v17134_v14 }
0x155c   :  { %8697 = vadd.xlane.f32.xlu1 %v8696_v42  ;;  %v8649_v32 = vcombine.low %v8641_v41, %v8648_v46  ;;  %v8922_v22 = vrot.slane %v15104_v50, %v17134_v14 }
0x155d   :  { %v8673_v13 = vcombine.low %v8658_v24, %v8665_v62  ;;  %v16267_v62 = vpack.c.bf16 %v15106_v52, %v15105_v49  ;;  %v8861_v41 = vcombine.high %v8853_v2, %v8853_v2  ;;  %v19435_v46 = vrot.slane %v8853_v2, %v17134_v14 }
0x155e   :  { %v8699_v11 = vsel %vm881_vm1, %v8649_v32, 0.0  ;;  %v15107_v32 = vld [vmem:[%s20823_s8 + $0x30] sm:$0xff]  ;;  %v8930_v24 = vcombine.high %v8922_v22, %v8922_v22 }
0x155f   :  { %8700 = vadd.xlane.f32.xlu0 %v8699_v11  ;;  %v8680_v39 = vrot.slane %v8673_v13, %v17134_v14  ;;  %v15108_v13 = vld [vmem:[%s20823_s8 + $0x38] sm:$0xff]  ;;  %16268 = vmatpush3.bf16.msra.mxu0 %v16267_v62  ;;  %v19438_v11 = vrot.slane %v8861_v41, %v17134_v14  ;;  %v19447_v52 = vcombine.high %v19435_v46, %v19435_v46  ;;  %s20945_s8 = smov 56  }
0x1560   :  { %v16270_v57 = vpack.c.bf16 %v15108_v13, %v15107_v32  ;;  %16269 = vmatprep.subr.bf16.mxu0 %v20906_v36  ;;  %v19450_v32 = vrot.slane %v8922_v22, %v17134_v14  ;;  %v19453_v62 = vrot.slane %v8930_v24, %v17134_v14 }
0x1561   :  { %v8688_v40 = vcombine.low %v8680_v39, %v8687_v0 }
0x1562   :  { %v19465_v22 = vcombine.high %v19450_v32, %v19450_v32  ;;  %v19469_v41 = vcombine.high %v19453_v62, %v19453_v62 }
0x1563   :  { %v8702_v59 = vsel %vm881_vm1, %v8688_v40, 0.0  ;;  %16271 = vmatpush3.bf16.msra.mxu0 %v16270_v57 }
0x1564   :  { %8703 = vadd.xlane.f32.xlu1 %v8702_v59  ;;  %15846 = vmatprep.subr.mxu0 %v20907_v34 }
0x15d3   :  { %v8695_v8 = vpop.xlane.xlu0 %8694 }
0x15d4   :  { %v8705_v25 = vmul.f32 0.03125, %v8695_v8 }
0x15d6   :  { %v8709_v26 = vadd.f32 1e-05, %v8705_v25  ;;  %v19460_v25 = vcombine.high %v19438_v11, %v19438_v11 }
0x15d8   :  { %16504 = vrsqrt.f32 %v8709_v26 }
0x15e2   :  { %v16505_v42 = vpop.eup %16504 }
0x15e3   :  { %v8724_v39 = vrot.slane %v16505_v42, %v17258_v15  ;;  %v8728_v0 = vrot.slane %v16505_v42, %v17261_v16  ;;  %v8732_v40 = vrot.slane %v16505_v42, %v17264_v17  ;;  %v8736_v59 = vrot.slane %v16505_v42, %v17267_v18 }
0x15e5   :  { %v8821_v49 = vmul.f32 %v8724_v39, %v19274_v47  ;;  %v8822_v13 = vmul.f32 %v8728_v0, %v19277_v44  ;;  %v8823_v57 = vmul.f32 %v8732_v40, %v19280_v21  ;;  %v8824_v8 = vmul.f32 %v8736_v59, %v19283_v61 }
0x15e6   :  { %v8846_v47 = vcombine.high %v15103_v19, %v15103_v19  ;;  %v8740_v59 = vrot.slane %v16505_v42, %v17270_v23 }
0x15e7   :  { %v8890_v2 = vmul.f32 %v19435_v46, %v8821_v49  ;;  %v8891_v21 = vmul.f32 %v19438_v11, %v8822_v13  ;;  %v8892_v61 = vmul.f32 %v19447_v52, %v8823_v57  ;;  %v8893_v24 = vmul.f32 %v19460_v25, %v8824_v8 }
0x15e8   :  { %v8860_v0 = vrot.slane %v8846_v47, %v17134_v14  ;;  %v8915_v49 = vcombine.high %v15104_v50, %v15104_v50  ;;  %v8825_v50 = vmul.f32 %v8740_v59, %v19286_v51 }
0x15e9   :  { %v8698_v26 = vpop.xlane.xlu1 %8697  ;;  %v8959_v27 = vadd.f32 %v19450_v32, %v8890_v2  ;;  %v8960_v37 = vadd.f32 %v19453_v62, %v8891_v21  ;;  %v8962_v13 = vadd.f32 %v19469_v41, %v8893_v24 }
0x15ea   :  { %v8706_v44 = vmul.f32 0.03125, %v8698_v26  ;;  %v8961_v26 = vadd.f32 %v19465_v22, %v8892_v61  ;;  %v8929_v47 = vrot.slane %v8915_v49, %v17134_v14 }
0x15eb   :  { %v9004_v42 = vcombine.low %v8959_v27, %v8960_v37 }
0x15ec   :  { %v8710_v39 = vadd.f32 1e-05, %v8706_v44  ;;  %v8701_v19 = vpop.xlane.xlu0 %8700  ;;  %v19481_v44 = vrot.slane %v8860_v0, %v17134_v14  ;;  %v9005_v2 = vcombine.low %v8961_v26, %v8962_v13  ;;  %v19486_v21 = vrot.slane %v8929_v47, %v17134_v14 }
0x15ed   :  { %v8707_v40 = vmul.f32 0.03125, %v8701_v19  ;;  %v9014_v24 = vrot.slane %v9004_v42, %v17134_v14 }
0x15ee   :  { %16506 = vrsqrt.f32 %v8710_v39  ;;  %v8894_v61 = vmul.f32 %v19481_v44, %v8825_v50 }
0x15ef   :  { %v8711_v57 = vadd.f32 1e-05, %v8707_v40  ;;  %v9021_v40 = vrot.slane %v9005_v2, %v17134_v14 }
0x15f0   :  { %v8963_v27 = vadd.f32 %v19486_v21, %v8894_v61 }
0x15f1   :  { %16508 = vrsqrt.f32 %v8711_v57  ;;  %v8704_v8 = vpop.xlane.xlu1 %8703  ;;  %v9036_v59 = vcombine.low %v9014_v24, %v9021_v40 }
0x15f2   :  { %v8708_v19 = vmul.f32 0.03125, %v8704_v8 }
0x15f4   :  { %v8712_v39 = vadd.f32 1e-05, %v8708_v19 }
0x15f6   :  { %16510 = vrsqrt.f32 %v8712_v39 }
0x15f8   :  { %v16507_v0 = vpop.eup %16506 }
0x15f9   :  { %v8744_v57 = vrot.slane %v16507_v0, %v17258_v15  ;;  %v8748_v49 = vrot.slane %v16507_v0, %v17261_v16  ;;  %v8752_v51 = vrot.slane %v16507_v0, %v17264_v17  ;;  %v8756_v37 = vrot.slane %v16507_v0, %v17267_v18 }
0x15fa   :  { %v8760_v26 = vrot.slane %v16507_v0, %v17270_v23 }
0x15fb   :  { %v16509_v13 = vpop.eup %16508  ;;  %v8826_v8 = vmul.f32 %v8744_v57, %v19314_v63  ;;  %v8827_v47 = vmul.f32 %v8748_v49, %v19317_v31  ;;  %v8828_v19 = vmul.f32 %v8752_v51, %v19320_v54  ;;  %v8829_v50 = vmul.f32 %v8756_v37, %v19323_v35 }
0x15fc   :  { %v8764_v42 = vrot.slane %v16509_v13, %v17258_v15  ;;  %v8768_v2 = vrot.slane %v16509_v13, %v17261_v16  ;;  %v8772_v39 = vrot.slane %v16509_v13, %v17264_v17  ;;  %v8776_v61 = vrot.slane %v16509_v13, %v17267_v18 }
0x15fd   :  { %v8895_v24 = vmul.f32 %v19435_v46, %v8826_v8  ;;  %v8896_v40 = vmul.f32 %v19438_v11, %v8827_v47  ;;  %v8897_v63 = vmul.f32 %v19447_v52, %v8828_v19  ;;  %v8780_v31 = vrot.slane %v16509_v13, %v17270_v23 }
0x15fe   :  { %v8830_v54 = vmul.f32 %v8760_v26, %v19330_v12  ;;  %v8831_v35 = vmul.f32 %v8764_v42, %v19327_v29  ;;  %v8832_v0 = vmul.f32 %v8768_v2, %v19347_v6  ;;  %v8833_v57 = vmul.f32 %v8772_v39, %v19350_v58 }
0x15ff   :  { %v8964_v49 = vadd.f32 %v19450_v32, %v8895_v24  ;;  %v8965_v51 = vadd.f32 %v19453_v62, %v8896_v40  ;;  %v8966_v37 = vadd.f32 %v19465_v22, %v8897_v63  ;;  %v8834_v8 = vmul.f32 %v8776_v61, %v19353_v30 }
0x1600   :  { %v16511_v47 = vpop.eup %16510  ;;  %v8835_v19 = vmul.f32 %v8780_v31, %v19356_v48  ;;  %v8898_v13 = vmul.f32 %v19460_v25, %v8829_v50  ;;  %v8899_v12 = vmul.f32 %v19481_v44, %v8830_v54  ;;  %v8900_v29 = vmul.f32 %v19435_v46, %v8831_v35 }
0x1601   :  { %v9006_v6 = vcombine.low %v8963_v27, %v8964_v49  ;;  %v9007_v26 = vcombine.low %v8965_v51, %v8966_v37  ;;  %v8784_v58 = vrot.slane %v16511_v47, %v17258_v15  ;;  %v8901_v42 = vmul.f32 %v19438_v11, %v8832_v0 }
0x1602   :  { %v8902_v2 = vmul.f32 %v19447_v52, %v8833_v57  ;;  %v8903_v39 = vmul.f32 %v19460_v25, %v8834_v8  ;;  %v8904_v30 = vmul.f32 %v19481_v44, %v8835_v19  ;;  %v8967_v48 = vadd.f32 %v19469_v41, %v8898_v13 }
0x1603   :  { %v9028_v50 = vrot.slane %v9006_v6, %v17134_v14  ;;  %v9035_v61 = vrot.slane %v9007_v26, %v17134_v14  ;;  %v8836_v24 = vmul.f32 %v8784_v58, %v19373_v7  ;;  %v8968_v27 = vadd.f32 %v19486_v21, %v8899_v12 }
0x1604   :  { %v8969_v40 = vadd.f32 %v19450_v32, %v8900_v29  ;;  %v8970_v63 = vadd.f32 %v19453_v62, %v8901_v42  ;;  %v8971_v31 = vadd.f32 %v19465_v22, %v8902_v2  ;;  %v8972_v54 = vadd.f32 %v19469_v41, %v8903_v39 }
0x1605   :  { %v9037_v35 = vcombine.low %v9028_v50, %v9035_v61  ;;  %v9044_v0 = vrot.slane %v9036_v59, %v17134_v14  ;;  %v8905_v57 = vmul.f32 %v19435_v46, %v8836_v24  ;;  %v9053_v49 = vcombine.low %v8967_v48, %v8968_v27 }
0x1606   :  { %v9054_v51 = vcombine.low %v8969_v40, %v8970_v63  ;;  %v9055_v37 = vcombine.low %v8971_v31, %v8972_v54  ;;  %v8788_v7 = vrot.slane %v16511_v47, %v17261_v16  ;;  %v8792_v8 = vrot.slane %v16511_v47, %v17264_v17 }
0x1607   :  { %v9051_v19 = vrot.slane %v9037_v35, %v17134_v14  ;;  %v8973_v13 = vadd.f32 %v19486_v21, %v8904_v30  ;;  %v8974_v12 = vadd.f32 %v19450_v32, %v8905_v57  ;;  %v8796_v29 = vrot.slane %v16511_v47, %v17267_v18 }
0x1608   :  { %v9063_v6 = vrot.slane %v9053_v49, %v17134_v14  ;;  %v9070_v59 = vrot.slane %v9054_v51, %v17134_v14  ;;  %v8800_v46 = vrot.slane %v16511_v47, %v17270_v23  ;;  %v8837_v26 = vmul.f32 %v8788_v7, %v19377_v28 }
0x1609   :  { %v9052_v58 = vcombine.low %v9044_v0, %v9051_v19  ;;  %v9056_v42 = vcombine.low %v8973_v13, %v8974_v12  ;;  %v8838_v2 = vmul.f32 %v8792_v8, %v19380_v3  ;;  %v8839_v39 = vmul.f32 %v8796_v29, %v19384_v56 }
0x160a   :  { %v9077_v30 = vrot.slane %v9055_v37, %v17134_v14  ;;  %v8840_v32 = vmul.f32 %v8800_v46, %v19387_v20  ;;  %v8906_v48 = vmul.f32 %v19438_v11, %v8837_v26  ;;  %v9085_v61 = vcombine.low %v9063_v6, %v9070_v59 }
0x160b   :  { %15838 = vmatmul.mubr.msk.f32.vlgmr.msra.gmra.mrb[52].mxu0 %vm2463_vm3, %v9052_v58  ;;  %v9084_v50 = vrot.slane %v9056_v42, %v17134_v14  ;;  %v8907_v47 = vmul.f32 %v19447_v52, %v8838_v2  ;;  %v8908_v28 = vmul.f32 %v19460_v25, %v8839_v39 }
0x160c   :  { %15840 = vmatprep.mubr.msk.f32.mxu0 %vm16711_vm2, %v20907_v34  ;;  %v8909_v3 = vmul.f32 %v19481_v44, %v8840_v32  ;;  %v8975_v56 = vadd.f32 %v19453_v62, %v8906_v48  ;;  %v9093_v40 = vrot.slane %v9085_v61, %v17134_v14 }
0x160d   :  { %v9086_v24 = vcombine.low %v9077_v30, %v9084_v50  ;;  %v8976_v20 = vadd.f32 %v19465_v22, %v8907_v47  ;;  %v8977_v11 = vadd.f32 %v19469_v41, %v8908_v28  ;;  %v15113_v41 = vld [vmem:[%s20824_s9 + $0x1] ss:$0 sm:$0xff]  ;;  %s20946_s9 = smov 80  }
0x160e   :  { %v8978_v27 = vadd.f32 %v19486_v21, %v8909_v3  ;;  %v9371_v21 = vrot.slane %v15113_v41, %v17134_v14  ;;  %v9364_v35 = vcombine.high %v15113_v41, %v15113_v41 }
0x160f   :  { %v9100_v52 = vrot.slane %v9086_v24, %v17134_v14  ;;  %v9102_v63 = vcombine.low %v8975_v56, %v8976_v20 }
0x1610   :  { %v9103_v25 = vcombine.low %v8977_v11, %v8978_v27  ;;  %v9379_v0 = vcombine.high %v9371_v21, %v9371_v21  ;;  %v9378_v49 = vrot.slane %v9364_v35, %v17134_v14  ;;  %v19580_v51 = vrot.slane %v9371_v21, %v17134_v14 }
0x1611   :  { %v9101_v31 = vcombine.low %v9093_v40, %v9100_v52  ;;  %v9110_v54 = vrot.slane %v9102_v63, %v17134_v14 }
0x1612   :  { %v9117_v44 = vrot.slane %v9103_v25, %v17134_v14  ;;  %v19583_v37 = vrot.slane %v9379_v0, %v17134_v14  ;;  %v19589_v6 = vrot.slane %v9378_v49, %v17134_v14  ;;  %v19593_v59 = vcombine.high %v19580_v51, %v19580_v51 }
0x1613   :  { %15841 = vmatmul.mubr.msk.f32.gmra.mrb[54].mxu0 %vm2463_vm3, %v9101_v31 }
0x1614   :  { %15843 = vmatprep.mubr.msk.f32.mxu0 %vm16711_vm2, %v20907_v34  ;;  %v9118_v62 = vcombine.low %v9110_v54, %v9117_v44  ;;  %v19597_v46 = vcombine.high %v19583_v37, %v19583_v37 }
0x1616   :  { %v9125_v22 = vrot.slane %v9118_v62, %v17134_v14 }
0x1618   :  { %15844 = vmatmul.mubr.msk.f32.gmra.mrb[56].mxu0 %vm2463_vm3, %v9125_v22 }
0x1619   :  { %15848 = vmatprep.mubr.msk.f32.mxu0 %vm16711_vm2, %v20907_v34 }
0x16de   :  { %v9198_v57 = vpop.f32.mrb[52].mxu0 }
0x16df   :  { %v9215_v7 = vcombine.high %v9198_v57, %v9198_v57  ;;  %v9222_v8 = vrot.slane %v9198_v57, %v17134_v14  ;;  %v15839_v19 = vpop.f32.mrb[53].mxu0 }
0x16e1   :  { %v9229_v13 = vrot.slane %v9215_v7, %v17134_v14  ;;  %v9230_v12 = vcombine.high %v9222_v8, %v9222_v8  ;;  %v9238_v29 = vrot.slane %v9222_v8, %v17134_v14 }
0x16e3   :  { %v9231_v26 = vcombine.high %v9229_v13, %v9229_v13  ;;  %v9245_v58 = vrot.slane %v9229_v13, %v17134_v14  ;;  %v9252_v42 = vrot.slane %v9230_v12, %v17134_v14  ;;  %v9260_v2 = vcombine.high %v9238_v29, %v9238_v29 }
0x16e4   :  { %v9408_v50 = vadd.f32 %v19580_v51, %v9238_v29 }
0x16e5   :  { %v9259_v39 = vrot.slane %v9231_v26, %v17134_v14  ;;  %v9261_v30 = vcombine.high %v9245_v58, %v9245_v58  ;;  %v9262_v32 = vcombine.high %v9252_v42, %v9252_v42  ;;  %v9409_v48 = vadd.f32 %v19583_v37, %v9252_v42 }
0x16e6   :  { %v9410_v61 = vadd.f32 %v19593_v59, %v9260_v2  ;;  %v9412_v47 = vadd.f32 %v19589_v6, %v9245_v58  ;;  %v9203_v28 = vpop.f32.mrb[54].mxu0 }
0x16e7   :  { %v9263_v3 = vcombine.high %v9259_v39, %v9259_v39  ;;  %v9411_v56 = vadd.f32 %v19597_v46, %v9262_v32  ;;  %v9413_v24 = vadd.f32 %v19580_v51, %v9259_v39  ;;  %v9414_v20 = vadd.f32 %v19583_v37, %v9261_v30  ;;  %v15842_v11 = vpop.f32.mrb[55].mxu0 }
0x16e8   :  { %v9433_v27 = vcombine.low %v9408_v50, %v9409_v48  ;;  %v9455_v40 = vrot.slane %v9412_v47, %v17134_v14  ;;  %v9264_v52 = vcombine.high %v9203_v28, %v9203_v28  ;;  %v9271_v63 = vrot.slane %v9203_v28, %v17134_v14 }
0x16e9   :  { %v9434_v25 = vcombine.low %v9410_v61, %v9411_v56  ;;  %v9553_v31 = vcombine.low %v9413_v24, %v9414_v20  ;;  %v9415_v62 = vadd.f32 %v19593_v59, %v9263_v3 }
0x16ea   :  { %v9278_v54 = vrot.slane %v9264_v52, %v17134_v14  ;;  %v9279_v44 = vcombine.high %v9271_v63, %v9271_v63  ;;  %v9441_v22 = vrot.slane %v9433_v27, %v17134_v14  ;;  %v9470_v21 = vrot.slane %v9455_v40, %v17134_v14 }
0x16eb   :  { %v9448_v41 = vrot.slane %v9434_v25, %v17134_v14  ;;  %v9287_v35 = vrot.slane %v9271_v63, %v17134_v14  ;;  %v9208_v0 = vpop.f32.mrb[56].mxu0  ;;  %v9561_v8 = vrot.slane %v9553_v31, %v17134_v14 }
0x16ec   :  { %v9280_v57 = vcombine.high %v9278_v54, %v9278_v54  ;;  %v9294_v49 = vrot.slane %v9278_v54, %v17134_v14  ;;  %v9301_v7 = vrot.slane %v9279_v44, %v17134_v14  ;;  %v15845_v19 = vpop.f32.mrb[57].mxu0  ;;  %v9319_v26 = vrot.slane %v9208_v0, %v17134_v14 }
0x16ed   :  { %v9456_v13 = vcombine.low %v9441_v22, %v9448_v41  ;;  %v9309_v12 = vcombine.high %v9287_v35, %v9287_v35  ;;  %v9416_v29 = vadd.f32 %v19597_v46, %v9287_v35 }
0x16ee   :  { %v9308_v58 = vrot.slane %v9280_v57, %v17134_v14  ;;  %v9310_v42 = vcombine.high %v9294_v49, %v9294_v49  ;;  %v9311_v2 = vcombine.high %v9301_v7, %v9301_v7  ;;  %v9417_v39 = vadd.f32 %v19589_v6, %v9301_v7 }
0x16ef   :  { %v9463_v30 = vrot.slane %v9456_v13, %v17134_v14  ;;  %v9418_v32 = vadd.f32 %v19580_v51, %v9309_v12  ;;  %v9420_v48 = vadd.f32 %v19593_v59, %v9294_v49  ;;  %v9554_v50 = vcombine.low %v9415_v62, %v9416_v29 }
0x16f0   :  { %v9312_v61 = vcombine.high %v9308_v58, %v9308_v58  ;;  %v9419_v47 = vadd.f32 %v19583_v37, %v9311_v2  ;;  %v9421_v28 = vadd.f32 %v19597_v46, %v9308_v58  ;;  %v9422_v3 = vadd.f32 %v19589_v6, %v9310_v42 }
0x16f1   :  { %v19630_v56 = vcombine.low %v9463_v30, %v9470_v21  ;;  %v9568_v24 = vrot.slane %v9554_v50, %v17134_v14  ;;  %v9575_v20 = vrot.slane %v9417_v39, %v17134_v14  ;;  %v9320_v11 = vcombine.high %v9319_v26, %v9319_v26 }
0x16f2   :  { %v9673_v27 = vcombine.low %v9418_v32, %v9419_v47  ;;  %v9674_v40 = vcombine.low %v9420_v48, %v9421_v28  ;;  %v9327_v52 = vrot.slane %v9319_v26, %v17134_v14  ;;  %v9695_v25 = vrot.slane %v9422_v3, %v17134_v14 }
0x16f3   :  { %v9576_v63 = vcombine.low %v9561_v8, %v9568_v24  ;;  %v9334_v31 = vrot.slane %v9320_v11, %v17134_v14  ;;  %v9423_v54 = vadd.f32 %v19580_v51, %v9312_v61  ;;  %9472 = vrot.lane.b32.xlu0 %v19630_v56, %s16713_s0  ;;  %v9590_v44 = vrot.slane %v9575_v20, %v17134_v14 }
0x16f4   :  { %v9681_v62 = vrot.slane %v9673_v27, %v17134_v14  ;;  %v9688_v22 = vrot.slane %v9674_v40, %v17134_v14  ;;  %v9335_v41 = vcombine.high %v9327_v52, %v9327_v52  ;;  %v9424_v0 = vadd.f32 %v19583_v37, %v9327_v52 }
0x16f5   :  { %v9583_v21 = vrot.slane %v9576_v63, %v17134_v14  ;;  %v9336_v35 = vcombine.high %v9334_v31, %v9334_v31  ;;  %v9425_v57 = vadd.f32 %v19593_v59, %v9334_v31  ;;  %v9710_v12 = vrot.slane %v9695_v25, %v17134_v14 }
0x16f6   :  { %v9696_v49 = vcombine.low %v9681_v62, %v9688_v22  ;;  %v9426_v51 = vadd.f32 %v19597_v46, %v9335_v41  ;;  %v9793_v19 = vcombine.low %v9423_v54, %v9424_v0 }
0x16f7   :  { %v19647_v7 = vcombine.low %v9583_v21, %v9590_v44  ;;  %v9427_v8 = vadd.f32 %v19589_v6, %v9336_v35 }
0x16f8   :  { %v9703_v13 = vrot.slane %v9696_v49, %v17134_v14  ;;  %v9794_v29 = vcombine.low %v9425_v57, %v9426_v51  ;;  %v9801_v26 = vrot.slane %v9793_v19, %v17134_v14 }
0x16f9   :  { %9592 = vrot.lane.b32.xlu1 %v19647_v7, %s16713_s0  ;;  %v9815_v46 = vrot.slane %v9427_v8, %v17134_v14 }
0x16fa   :  { %v19655_v37 = vcombine.low %v9703_v13, %v9710_v12  ;;  %v9808_v59 = vrot.slane %v9794_v29, %v17134_v14 }
0x16fb   :  { %v9830_v42 = vrot.slane %v9815_v46, %v17134_v14 }
0x16fc   :  { %v9816_v58 = vcombine.low %v9801_v26, %v9808_v59 }
0x16fd   :  { %9712 = vrot.lane.b32.xlu1 %v19655_v37, %s16713_s0 }
0x16fe   :  { %v9823_v6 = vrot.slane %v9816_v58, %v17134_v14 }
0x1700   :  { %v19663_v2 = vcombine.low %v9823_v6, %v9830_v42 }
0x1702   :  { %9832 = vrot.lane.b32.xlu0 %v19663_v2, %s16713_s0  ;;  %s20948_s0 = smov 48  }
0x1765   :  { %v9473_v39 = vpop.permute.xlu0 %9472 }
0x1766   :  { %15847 = vmatpush3.xpose.msk.msra.mxu0 %vm2811_vm4, %v9473_v39 }
0x1767   :  { %15851 = vmatprep.subr.mxu0 %v20907_v34 }
0x1769   :  { %15849 = vmatmul.mubr.msk.f32.vlgmr.msra.gmra.mrb[58].mxu0 %vm2811_vm4, %v19630_v56 }
0x176a   :  { %15853 = vmatprep.mubr.msk.f32.mxu0 %vm16711_vm2, %v20907_v34 }
0x176b   :  { %v9593_v30 = vpop.permute.xlu1 %9592 }
0x176c   :  { %15852 = vmatpush3.xpose.msk.msra.mxu0 %vm2811_vm4, %v9593_v30 }
0x176d   :  { %15856 = vmatprep.subr.mxu0 %v20907_v34 }
0x176f   :  { %v9713_v32 = vpop.permute.xlu1 %9712  ;;  %15854 = vmatmul.mubr.msk.f32.vlgmr.msra.gmra.mrb[60].mxu0 %vm2811_vm4, %v19647_v7 }
0x1770   :  { %15857 = vmatpush3.xpose.msk.msra.mxu0 %vm2811_vm4, %v9713_v32  ;;  %15858 = vmatprep.mubr.msk.f32.mxu0 %vm16711_vm2, %v20907_v34 }
0x1771   :  { %15861 = vmatprep.subr.mxu0 %v20907_v34 }
0x1773   :  { %15859 = vmatmul.mubr.msk.f32.vlgmr.msra.gmra.mrb[62].mxu0 %vm2811_vm4, %v19655_v37 }
0x1774   :  { %v9833_v48 = vpop.permute.xlu0 %9832  ;;  %15863 = vmatprep.mubr.msk.f32.mxu0 %vm16711_vm2, %v20907_v34 }
0x1775   :  { %15862 = vmatpush3.xpose.msk.msra.mxu0 %vm2811_vm4, %v9833_v48 }
0x1776   :  { %15866 = vmatprep.subr.mxu0 %v20907_v34 }
0x1778   :  { %15864 = vmatmul.mubr.msk.f32.vlgmr.msra.gmra.mrb[64].mxu0 %vm2811_vm4, %v19663_v2 }
0x1779   :  { %15868 = vmatprep.mubr.msk.f32.mxu0 %vm16711_vm2, %v20907_v34 }
0x183c   :  { %v9544_v50 = vpop.f32.mrb[58].mxu0 }
0x183d   :  { %v9908_v61 = vmul.f32 0.35355338, %v9544_v50  ;;  %v15850_v47 = vpop.f32.mrb[59].mxu0 }
0x183f   :  { %v9912_v28 = vsel %vm3250_vm5, %v9908_v61, -inf }
0x1840   :  { %9913 = vmax.xlane.f32.xlu1 %v9912_v28 }
0x1842   :  { %v9664_v3 = vpop.f32.mrb[60].mxu0 }
0x1843   :  { %v9909_v24 = vmul.f32 0.35355338, %v9664_v3  ;;  %v15855_v20 = vpop.f32.mrb[61].mxu0 }
0x1845   :  { %v9915_v11 = vsel %vm3250_vm5, %v9909_v24, -inf }
0x1846   :  { %9916 = vmax.xlane.f32.xlu0 %v9915_v11  ;;  %v9784_v27 = vpop.f32.mrb[62].mxu0 }
0x1847   :  { %v9910_v40 = vmul.f32 0.35355338, %v9784_v27  ;;  %v15860_v52 = vpop.f32.mrb[63].mxu0 }
0x1849   :  { %v9918_v63 = vsel %vm3250_vm5, %v9910_v40, -inf }
0x184a   :  { %9919 = vmax.xlane.f32.xlu0 %v9918_v63 }
0x184b   :  { %v9904_v25 = vpop.f32.mrb[64].mxu0 }
0x184c   :  { %v9911_v31 = vmul.f32 0.35355338, %v9904_v25  ;;  %v15865_v54 = vpop.f32.mrb[65].mxu0 }
0x184e   :  { %v9921_v44 = vsel %vm3250_vm5, %v9911_v31, -inf }
0x184f   :  { %9922 = vmax.xlane.f32.xlu1 %v9921_v44 }
0x1860   :  { %10033 = vrot.lane.b32.xlu1 %v19647_v7, %s16709_s1  ;;  %9956 = vrot.lane.b32.xlu0 %v19630_v56, %s16709_s1 }
0x1864   :  { %10110 = vrot.lane.b32.xlu1 %v19655_v37, %s16709_s1  ;;  %10187 = vrot.lane.b32.xlu0 %v19663_v2, %s16709_s1  ;;  %s20947_s1 = smov 112  }
0x1868   :  { %10266 = vrot.lane.b32.xlu1 %v19630_v56, %s16714_s4  ;;  %10344 = vrot.lane.b32.xlu0 %v19647_v7, %s16714_s4 }
0x186c   :  { %10264 = vrot.lane.b32.xlu1 %v19630_v56, %s16715_s30 }
0x18cd   :  { %v9914_v62 = vpop.xlane.xlu1 %9913 }
0x18ce   :  { %v9924_v22 = vsub.f32 %v9908_v61, %v9914_v62 }
0x18d0   :  { %v9928_v41 = vmul.f32 1.442695, %v9924_v22 }
0x18d2   :  { %16512 = vpow2.f32 %v9928_v41 }
0x18d3   :  { %v9917_v21 = vpop.xlane.xlu0 %9916 }
0x18d4   :  { %v9925_v35 = vsub.f32 %v9909_v24, %v9917_v21 }
0x18d6   :  { %v9930_v0 = vmul.f32 1.442695, %v9925_v35 }
0x18d7   :  { %v9920_v57 = vpop.xlane.xlu0 %9919 }
0x18d8   :  { %16514 = vpow2.f32 %v9930_v0  ;;  %v9926_v49 = vsub.f32 %v9910_v40, %v9920_v57 }
0x18da   :  { %v9932_v51 = vmul.f32 1.442695, %v9926_v49 }
0x18db   :  { %v9957_v8 = vpop.permute.xlu0 %9956 }
0x18dc   :  { %v16513_v19 = vpop.eup %16512  ;;  %16516 = vpow2.f32 %v9932_v51  ;;  %v9923_v13 = vpop.xlane.xlu1 %9922  ;;  %15867 = vmatpush3.msk.msra.mxu0 %vm3301_vm6, %v9957_v8 }
0x18dd   :  { %v9927_v12 = vsub.f32 %v9911_v31, %v9923_v13  ;;  %v9936_v29 = vsel %vm3250_vm5, %v16513_v19, 0.0  ;;  %15876 = vmatprep.subr.mxu0 %v20907_v34 }
0x18de   :  { %9937 = vadd.xlane.f32.xlu0 %v9936_v29 }
0x18df   :  { %v9934_v26 = vmul.f32 1.442695, %v9927_v12  ;;  %v10188_v32 = vpop.permute.xlu0 %10187 }
0x18e0   :  { %v10034_v59 = vpop.permute.xlu1 %10033 }
0x18e1   :  { %16518 = vpow2.f32 %v9934_v26  ;;  %15872 = vmatpush3.msk.msra.mxu1 %vm3301_vm6, %v10034_v59 }
0x18e2   :  { %v16515_v46 = vpop.eup %16514  ;;  %15881 = vmatprep.subr.mxu1 %v20907_v34 }
0x18e3   :  { %v9939_v58 = vsel %vm3250_vm5, %v16515_v46, 0.0  ;;  %v10345_v50 = vpop.permute.xlu0 %10344 }
0x18e4   :  { %9940 = vadd.xlane.f32.xlu1 %v9939_v58  ;;  %v10111_v48 = vpop.permute.xlu1 %10110 }
0x18e6   :  { %v16517_v6 = vpop.eup %16516 }
0x18e7   :  { %v9942_v42 = vsel %vm3250_vm5, %v16517_v6, 0.0 }
0x18e8   :  { %9943 = vadd.xlane.f32.xlu0 %v9942_v42  ;;  %v10267_v61 = vpop.permute.xlu1 %10266 }
0x18eb   :  { %v16519_v39 = vpop.eup %16518 }
0x18ec   :  { %v9945_v30 = vsel %vm3250_vm5, %v16519_v39, 0.0  ;;  %v10265_v28 = vpop.permute.xlu1 %10264 }
0x18ed   :  { %9946 = vadd.xlane.f32.xlu1 %v9945_v30 }
0x18fe   :  { %10422 = vrot.lane.b32.xlu1 %v19655_v37, %s16714_s4  ;;  %10342 = vrot.lane.b32.xlu0 %v19647_v7, %s16715_s30 }
0x1902   :  { %10420 = vrot.lane.b32.xlu1 %v19655_v37, %s16715_s30  ;;  %10500 = vrot.lane.b32.xlu0 %v19663_v2, %s16714_s4  ;;  %s20949_s4 = smov 72  }
0x1906   :  { %10498 = vrot.lane.b32.xlu0 %v19663_v2, %s16715_s30  ;;  %s20950_s30 = smov 104  }
0x196b   :  { %v9938_v47 = vpop.xlane.xlu0 %9937 }
0x196c   :  { %16520 = vrcp.f32 %v9938_v47 }
0x1971   :  { %v9941_v3 = vpop.xlane.xlu1 %9940 }
0x1972   :  { %16522 = vrcp.f32 %v9941_v3 }
0x1975   :  { %v9944_v24 = vpop.xlane.xlu0 %9943 }
0x1976   :  { %v16521_v20 = vpop.eup %16520  ;;  %16524 = vrcp.f32 %v9944_v24 }
0x1977   :  { %v9949_v11 = vmul.f32 %v16521_v20, %v16513_v19 }
0x1979   :  { %15869 = vmatmul.mubr.msk.f32.vlgmr.msra.gmra.mrb[66].mxu0 %vm3297_vm7, %v9949_v11  ;;  %v10343_v31 = vpop.permute.xlu0 %10342 }
0x197a   :  { %v9947_v27 = vpop.xlane.xlu1 %9946  ;;  %15877 = vmatpush3.msk.msra.mxu0 %vm3301_vm6, %v10111_v48  ;;  %15878 = vmatprep.mubr.msk.f32.mxu0 %vm16711_vm2, %v20907_v34 }
0x197b   :  { %16526 = vrcp.f32 %v9947_v27  ;;  %15886 = vmatprep.subr.mxu0 %v20907_v34 }
0x197c   :  { %v16523_v40 = vpop.eup %16522 }
0x197d   :  { %v9951_v52 = vmul.f32 %v16523_v40, %v16515_v46  ;;  %v10501_v22 = vpop.permute.xlu0 %10500 }
0x197e   :  { %v10423_v54 = vpop.permute.xlu1 %10422 }
0x197f   :  { %15874 = vmatmul.mubr.msk.f32.vlgmr.msra.gmra.mrb[60].mxu1 %vm3297_vm7, %v9951_v52 }
0x1980   :  { %v16525_v63 = vpop.eup %16524  ;;  %15882 = vmatpush3.msk.msra.mxu1 %vm3301_vm6, %v10188_v32  ;;  %15883 = vmatprep.mubr.msk.f32.mxu1 %vm16711_vm2, %v20907_v34 }
0x1981   :  { %v9953_v25 = vmul.f32 %v16525_v63, %v16517_v6  ;;  %15891 = vmatprep.subr.mxu1 %v20907_v34  ;;  %v10499_v21 = vpop.permute.xlu0 %10498 }
0x1982   :  { %v10421_v41 = vpop.permute.xlu1 %10420 }
0x1983   :  { %15879 = vmatmul.mubr.msk.f32.vlgmr.msra.gmra.mrb[68].mxu0 %vm3297_vm7, %v9953_v25 }
0x1984   :  { %15887 = vmatpush3.xpose.msk.msra.mxu0 %vm2811_vm4, %v10267_v61  ;;  %15888 = vmatprep.mubr.msk.f32.mxu0 %vm16711_vm2, %v20907_v34 }
0x1985   :  { %v16527_v44 = vpop.eup %16526  ;;  %15896 = vmatprep.subr.mxu0 %v20907_v34 }
0x1986   :  { %v9955_v62 = vmul.f32 %v16527_v44, %v16519_v39 }
0x1987   :  { %15889 = vmatmul.mubr.msk.f32.vlgmr.msra.gmra.mrb[70].mxu0 %vm2811_vm4, %v10265_v28 }
0x1988   :  { %15884 = vmatmul.mubr.msk.f32.vlgmr.msra.gmra.mrb[62].mxu1 %vm3297_vm7, %v9955_v62  ;;  %15897 = vmatpush3.xpose.msk.msra.mxu0 %vm2811_vm4, %v10423_v54 }
0x1989   :  { %15892 = vmatpush3.xpose.msk.msra.mxu1 %vm2811_vm4, %v10345_v50  ;;  %15893 = vmatprep.mubr.msk.f32.mxu1 %vm16711_vm2, %v20907_v34 }
0x198a   :  { %15898 = vmatprep.mubr.msk.f32.mxu0 %vm16711_vm2, %v20907_v34  ;;  %15901 = vmatprep.subr.mxu1 %v20907_v34 }
0x198b   :  { %15899 = vmatmul.mubr.msk.f32.vlgmr.msra.gmra.mrb[72].mxu0 %vm2811_vm4, %v10421_v41  ;;  %15906 = vmatprep.subr.mxu0 %v20907_v34 }
0x198c   :  { %15894 = vmatmul.mubr.msk.f32.vlgmr.msra.gmra.mrb[64].mxu1 %vm2811_vm4, %v10343_v31  ;;  %15908 = vmatprep.mubr.msk.f32.mxu0 %vm16711_vm2, %v20907_v34 }
0x198d   :  { %15902 = vmatpush3.xpose.msk.msra.mxu1 %vm2811_vm4, %v10501_v22  ;;  %15903 = vmatprep.mubr.msk.f32.mxu1 %vm16711_vm2, %v20907_v34 }
0x198e   :  { %15911 = vmatprep.subr.mxu1 %v20907_v34 }
0x1990   :  { %15904 = vmatmul.mubr.msk.f32.vlgmr.msra.gmra.mrb[66].mxu1 %vm2811_vm4, %v10499_v21 }
0x1991   :  { %15913 = vmatprep.mubr.msk.f32.mxu1 %vm16711_vm2, %v20907_v34 }
0x1a4c   :  { %v19763_v35 = vpop.f32.mrb[66].mxu0 }
0x1a4d   :  { %v15870_v0 = vpop.f32.mrb[67].mxu0 }
0x1a52   :  { %v19765_v57 = vpop.f32.mrb[60].mxu1 }
0x1a53   :  { %v15875_v49 = vpop.f32.mrb[61].mxu1 }
0x1a56   :  { %v19767_v51 = vpop.f32.mrb[68].mxu0 }
0x1a57   :  { %v15880_v8 = vpop.f32.mrb[69].mxu0 }
0x1a5a   :  { %v10338_v19 = vpop.f32.mrb[70].mxu0 }
0x1a5b   :  { %v19769_v13 = vpop.f32.mrb[62].mxu1  ;;  %v10576_v12 = vmul.f32 0.35355338, %v10338_v19  ;;  %v15890_v29 = vpop.f32.mrb[71].mxu0 }
0x1a5c   :  { %v15885_v26 = vpop.f32.mrb[63].mxu1 }
0x1a5d   :  { %v10580_v59 = vsel %vm3250_vm5, %v10576_v12, -inf }
0x1a5e   :  { %10581 = vmax.xlane.f32.xlu1 %v10580_v59  ;;  %v10494_v46 = vpop.f32.mrb[72].mxu0 }
0x1a5f   :  { %v10416_v58 = vpop.f32.mrb[64].mxu1  ;;  %v15900_v6 = vpop.f32.mrb[73].mxu0  ;;  %v10578_v30 = vmul.f32 0.35355338, %v10494_v46 }
0x1a60   :  { %v10577_v42 = vmul.f32 0.35355338, %v10416_v58  ;;  %v15895_v39 = vpop.f32.mrb[65].mxu1 }
0x1a61   :  { %v10586_v47 = vsel %vm3250_vm5, %v10578_v30, -inf }
0x1a62   :  { %v10583_v32 = vsel %vm3250_vm5, %v10577_v42, -inf }
0x1a63   :  { %10584 = vmax.xlane.f32.xlu0 %v10583_v32  ;;  %v10572_v48 = vpop.f32.mrb[66].mxu1 }
0x1a64   :  { %v10579_v50 = vmul.f32 0.35355338, %v10572_v48  ;;  %v15905_v61 = vpop.f32.mrb[67].mxu1 }
0x1a66   :  { %v10589_v28 = vsel %vm3250_vm5, %v10579_v50, -inf }
0x1a67   :  { %10587 = vmax.xlane.f32.xlu0 %v10586_v47  ;;  %10590 = vmax.xlane.f32.xlu1 %v10589_v28 }
0x1a78   :  { %10701 = vrot.lane.b32.xlu1 %v19647_v7, %s20945_s8 }
0x1a7c   :  { %10778 = vrot.lane.b32.xlu1 %v19655_v37, %s20945_s8 }
0x1a7d   :  { %10624 = vrot.lane.b32.xlu0 %v19630_v56, %s20945_s8 }
0x1a80   :  { %10934 = vrot.lane.b32.xlu1 %v19630_v56, %s20946_s9 }
0x1a81   :  { %10855 = vrot.lane.b32.xlu0 %v19663_v2, %s20945_s8 }
0x1a84   :  { %10932 = vrot.lane.b32.xlu1 %v19630_v56, %s20947_s1 }
0x1a85   :  { %11012 = vrot.lane.b32.xlu0 %v19647_v7, %s20946_s9 }
0x1aeb   :  { %v10582_v3 = vpop.xlane.xlu1 %10581 }
0x1aec   :  { %v10592_v24 = vsub.f32 %v10576_v12, %v10582_v3 }
0x1aee   :  { %v10596_v20 = vmul.f32 1.442695, %v10592_v24 }
0x1af0   :  { %16528 = vpow2.f32 %v10596_v20  ;;  %v10585_v11 = vpop.xlane.xlu0 %10584 }
0x1af1   :  { %v10593_v27 = vsub.f32 %v10577_v42, %v10585_v11 }
0x1af3   :  { %v10598_v40 = vmul.f32 1.442695, %v10593_v27 }
0x1af4   :  { %v10588_v52 = vpop.xlane.xlu0 %10587  ;;  %v10591_v63 = vpop.xlane.xlu1 %10590 }
0x1af5   :  { %16530 = vpow2.f32 %v10598_v40  ;;  %v10594_v25 = vsub.f32 %v10578_v30, %v10588_v52  ;;  %v10595_v31 = vsub.f32 %v10579_v50, %v10591_v63 }
0x1af7   :  { %v10600_v54 = vmul.f32 1.442695, %v10594_v25  ;;  %v10602_v44 = vmul.f32 1.442695, %v10595_v31 }
0x1af8   :  { %v10625_v62 = vpop.permute.xlu0 %10624  ;;  %v10702_v22 = vpop.permute.xlu1 %10701 }
0x1af9   :  { %16532 = vpow2.f32 %v10600_v54  ;;  %15907 = vmatpush3.msk.msra.mxu0 %vm3301_vm6, %v10625_v62  ;;  %15912 = vmatpush3.msk.msra.mxu1 %vm3301_vm6, %v10702_v22 }
0x1afa   :  { %v16529_v41 = vpop.eup %16528  ;;  %16534 = vpow2.f32 %v10602_v44  ;;  %15916 = vmatprep.subr.mxu0 %v20907_v34  ;;  %15921 = vmatprep.subr.mxu1 %v20907_v34 }
0x1afb   :  { %v10604_v21 = vsel %vm3250_vm5, %v16529_v41, 0.0 }
0x1afc   :  { %10605 = vadd.xlane.f32.xlu0 %v10604_v21  ;;  %v10779_v26 = vpop.permute.xlu1 %10778  ;;  %v10856_v59 = vpop.permute.xlu0 %10855 }
0x1aff   :  { %v16531_v0 = vpop.eup %16530 }
0x1b00   :  { %v10607_v49 = vsel %vm3250_vm5, %v16531_v0, 0.0  ;;  %v10935_v46 = vpop.permute.xlu1 %10934  ;;  %v11013_v58 = vpop.permute.xlu0 %11012 }
0x1b01   :  { %10608 = vadd.xlane.f32.xlu1 %v10607_v49 }
0x1b03   :  { %v16533_v8 = vpop.eup %16532 }
0x1b04   :  { %v16535_v19 = vpop.eup %16534  ;;  %v10610_v12 = vsel %vm3250_vm5, %v16533_v8, 0.0  ;;  %v10933_v42 = vpop.permute.xlu1 %10932 }
0x1b05   :  { %10611 = vadd.xlane.f32.xlu0 %v10610_v12  ;;  %v10613_v29 = vsel %vm3250_vm5, %v16535_v19, 0.0 }
0x1b06   :  { %10614 = vadd.xlane.f32.xlu1 %v10613_v29 }
0x1b17   :  { %11090 = vrot.lane.b32.xlu1 %v19655_v37, %s20946_s9 }
0x1b1b   :  { %11088 = vrot.lane.b32.xlu1 %v19655_v37, %s20947_s1  ;;  %11010 = vrot.lane.b32.xlu0 %v19647_v7, %s20947_s1 }
0x1b1f   :  { %11168 = vrot.lane.b32.xlu0 %v19663_v2, %s20946_s9 }
0x1b23   :  { %11166 = vrot.lane.b32.xlu0 %v19663_v2, %s20947_s1 }
0x1b89   :  { %v10606_v6 = vpop.xlane.xlu0 %10605 }
0x1b8a   :  { %16536 = vrcp.f32 %v10606_v6 }
0x1b8e   :  { %v10609_v39 = vpop.xlane.xlu1 %10608 }
0x1b8f   :  { %16538 = vrcp.f32 %v10609_v39 }
0x1b92   :  { %v10612_v30 = vpop.xlane.xlu0 %10611 }
0x1b93   :  { %16540 = vrcp.f32 %v10612_v30  ;;  %v10615_v32 = vpop.xlane.xlu1 %10614 }
0x1b94   :  { %v16537_v48 = vpop.eup %16536  ;;  %16542 = vrcp.f32 %v10615_v32 }
0x1b95   :  { %v10617_v50 = vmul.f32 %v16537_v48, %v16529_v41 }
0x1b96   :  { %v11011_v20 = vpop.permute.xlu0 %11010 }
0x1b97   :  { %15909 = vmatmul.mubr.msk.f32.vlgmr.msra.gmra.mrb[74].mxu0 %vm3297_vm7, %v10617_v50  ;;  %v11091_v27 = vpop.permute.xlu1 %11090 }
0x1b98   :  { %15917 = vmatpush3.msk.msra.mxu0 %vm3301_vm6, %v10779_v26  ;;  %15918 = vmatprep.mubr.msk.f32.mxu0 %vm16711_vm2, %v20907_v34 }
0x1b99   :  { %v16539_v61 = vpop.eup %16538  ;;  %15926 = vmatprep.subr.mxu0 %v20907_v34 }
0x1b9a   :  { %v10619_v47 = vmul.f32 %v16539_v61, %v16531_v0  ;;  %v11169_v40 = vpop.permute.xlu0 %11168 }
0x1b9b   :  { %v11089_v52 = vpop.permute.xlu1 %11088 }
0x1b9c   :  { %15914 = vmatmul.mubr.msk.f32.vlgmr.msra.gmra.mrb[68].mxu1 %vm3297_vm7, %v10619_v47 }
0x1b9d   :  { %v16541_v28 = vpop.eup %16540  ;;  %15922 = vmatpush3.msk.msra.mxu1 %vm3301_vm6, %v10856_v59  ;;  %15923 = vmatprep.mubr.msk.f32.mxu1 %vm16711_vm2, %v20907_v34 }
0x1b9e   :  { %v16543_v3 = vpop.eup %16542  ;;  %v10621_v24 = vmul.f32 %v16541_v28, %v16533_v8  ;;  %15931 = vmatprep.subr.mxu1 %v20907_v34  ;;  %v11167_v63 = vpop.permute.xlu0 %11166 }
0x1b9f   :  { %v10623_v11 = vmul.f32 %v16543_v3, %v16535_v19 }
0x1ba0   :  { %15919 = vmatmul.mubr.msk.f32.vlgmr.msra.gmra.mrb[76].mxu0 %vm3297_vm7, %v10621_v24 }
0x1ba1   :  { %15924 = vmatmul.mubr.msk.f32.vlgmr.msra.gmra.mrb[70].mxu1 %vm3297_vm7, %v10623_v11  ;;  %15927 = vmatpush3.xpose.msk.msra.mxu0 %vm2811_vm4, %v10935_v46 }
0x1ba2   :  { %15928 = vmatprep.mubr.msk.f32.mxu0 %vm16711_vm2, %v20907_v34  ;;  %15936 = vmatprep.subr.mxu0 %v20907_v34 }
0x1ba3   :  { %15933 = vmatprep.mubr.msk.f32.mxu1 %vm16711_vm2, %v20907_v34 }
0x1ba4   :  { %15932 = vmatpush3.xpose.msk.msra.mxu1 %vm2811_vm4, %v11013_v58  ;;  %15929 = vmatmul.mubr.msk.f32.vlgmr.msra.gmra.mrb[78].mxu0 %vm2811_vm4, %v10933_v42 }
0x1ba5   :  { %15937 = vmatpush3.xpose.msk.msra.mxu0 %vm2811_vm4, %v11091_v27  ;;  %15941 = vmatprep.subr.mxu1 %v20907_v34 }
0x1ba6   :  { %15938 = vmatprep.mubr.msk.f32.mxu0 %vm16711_vm2, %v20907_v34  ;;  %15946 = vmatprep.subr.mxu0 %v20907_v34 }
0x1ba7   :  { %15934 = vmatmul.mubr.msk.f32.vlgmr.msra.gmra.mrb[72].mxu1 %vm2811_vm4, %v11011_v20 }
0x1ba8   :  { %15942 = vmatpush3.xpose.msk.msra.mxu1 %vm2811_vm4, %v11169_v40  ;;  %15939 = vmatmul.mubr.msk.f32.vlgmr.msra.gmra.mrb[80].mxu0 %vm2811_vm4, %v11089_v52 }
0x1ba9   :  { %15943 = vmatprep.mubr.msk.f32.mxu1 %vm16711_vm2, %v20907_v34  ;;  %15951 = vmatprep.subr.mxu1 %v20907_v34 }
0x1baa   :  { %15948 = vmatprep.mubr.msk.f32.mxu0 %vm16711_vm2, %v20907_v34 }
0x1bab   :  { %15944 = vmatmul.mubr.msk.f32.vlgmr.msra.gmra.mrb[74].mxu1 %vm2811_vm4, %v11167_v63 }
0x1bac   :  { %15953 = vmatprep.mubr.msk.f32.mxu1 %vm16711_vm2, %v20907_v34 }
0x1c6a   :  { %v19843_v25 = vpop.f32.mrb[74].mxu0 }
0x1c6b   :  { %v15910_v31 = vpop.f32.mrb[75].mxu0 }
0x1c6f   :  { %v19845_v54 = vpop.f32.mrb[68].mxu1 }
0x1c70   :  { %v15915_v44 = vpop.f32.mrb[69].mxu1 }
0x1c73   :  { %v19847_v62 = vpop.f32.mrb[76].mxu0 }
0x1c74   :  { %v19849_v22 = vpop.f32.mrb[70].mxu1  ;;  %v15920_v41 = vpop.f32.mrb[77].mxu0 }
0x1c75   :  { %v15925_v21 = vpop.f32.mrb[71].mxu1 }
0x1c77   :  { %v11006_v0 = vpop.f32.mrb[78].mxu0 }
0x1c78   :  { %v11244_v49 = vmul.f32 0.35355338, %v11006_v0  ;;  %v15930_v8 = vpop.f32.mrb[79].mxu0 }
0x1c7a   :  { %v11084_v19 = vpop.f32.mrb[72].mxu1  ;;  %v11248_v12 = vsel %vm3250_vm5, %v11244_v49, -inf }
0x1c7b   :  { %v11245_v29 = vmul.f32 0.35355338, %v11084_v19  ;;  %v15935_v26 = vpop.f32.mrb[73].mxu1  ;;  %11249 = vmax.xlane.f32.xlu1 %v11248_v12  ;;  %v11162_v59 = vpop.f32.mrb[80].mxu0 }
0x1c7c   :  { %v15940_v46 = vpop.f32.mrb[81].mxu0  ;;  %v11246_v58 = vmul.f32 0.35355338, %v11162_v59 }
0x1c7d   :  { %v11251_v6 = vsel %vm3250_vm5, %v11245_v29, -inf }
0x1c7e   :  { %11252 = vmax.xlane.f32.xlu0 %v11251_v6  ;;  %v11240_v42 = vpop.f32.mrb[74].mxu1  ;;  %v11254_v30 = vsel %vm3250_vm5, %v11246_v58, -inf }
0x1c7f   :  { %v15945_v39 = vpop.f32.mrb[75].mxu1  ;;  %v11247_v32 = vmul.f32 0.35355338, %v11240_v42 }
0x1c81   :  { %v11257_v48 = vsel %vm3250_vm5, %v11247_v32, -inf }
0x1c82   :  { %11255 = vmax.xlane.f32.xlu0 %v11254_v30 }
0x1c8c   :  { %11369 = vrot.lane.b32.xlu1 %v19647_v7, %s20948_s0 }
0x1c90   :  { %11446 = vrot.lane.b32.xlu1 %v19655_v37, %s20948_s0 }
0x1c94   :  { %11602 = vrot.lane.b32.xlu1 %v19630_v56, %s20949_s4 }
0x1c98   :  { %11292 = vrot.lane.b32.xlu0 %v19630_v56, %s20948_s0 }
0x1c9c   :  { %11523 = vrot.lane.b32.xlu0 %v19663_v2, %s20948_s0 }
0x1ca0   :  { %11680 = vrot.lane.b32.xlu0 %v19647_v7, %s20949_s4 }
0x1cb8   :  { %11258 = vmax.xlane.f32.xlu1 %v11257_v48 }
0x1cc9   :  { %11600 = vrot.lane.b32.xlu1 %v19630_v56, %s20950_s30 }
0x1d08   :  { %v11250_v50 = vpop.xlane.xlu1 %11249 }
0x1d09   :  { %v11260_v61 = vsub.f32 %v11244_v49, %v11250_v50 }
0x1d0b   :  { %v11264_v47 = vmul.f32 1.442695, %v11260_v61  ;;  %v11253_v28 = vpop.xlane.xlu0 %11252 }
0x1d0c   :  { %v11261_v3 = vsub.f32 %v11245_v29, %v11253_v28  ;;  %v11370_v24 = vpop.permute.xlu1 %11369 }
0x1d0d   :  { %16544 = vpow2.f32 %v11264_v47  ;;  %15952 = vmatpush3.msk.msra.mxu1 %vm3301_vm6, %v11370_v24 }
0x1d0e   :  { %v11266_v20 = vmul.f32 1.442695, %v11261_v3  ;;  %15961 = vmatprep.subr.mxu1 %v20907_v34 }
0x1d0f   :  { %v11256_v11 = vpop.xlane.xlu0 %11255 }
0x1d10   :  { %16546 = vpow2.f32 %v11266_v20  ;;  %v11262_v27 = vsub.f32 %v11246_v58, %v11256_v11  ;;  %v11447_v49 = vpop.permute.xlu1 %11446 }
0x1d12   :  { %v11268_v40 = vmul.f32 1.442695, %v11262_v27 }
0x1d13   :  { %v11293_v52 = vpop.permute.xlu0 %11292 }
0x1d14   :  { %16548 = vpow2.f32 %v11268_v40  ;;  %15947 = vmatpush3.msk.msra.mxu0 %vm3301_vm6, %v11293_v52  ;;  %v11603_v8 = vpop.permute.xlu1 %11602 }
0x1d15   :  { %15956 = vmatprep.subr.mxu0 %v20907_v34 }
0x1d17   :  { %v16545_v63 = vpop.eup %16544  ;;  %v11524_v46 = vpop.permute.xlu0 %11523 }
0x1d18   :  { %v11272_v31 = vsel %vm3250_vm5, %v16545_v63, 0.0 }
0x1d19   :  { %11273 = vadd.xlane.f32.xlu0 %v11272_v31 }
0x1d1a   :  { %v16547_v44 = vpop.eup %16546 }
0x1d1b   :  { %v11275_v41 = vsel %vm3250_vm5, %v16547_v44, 0.0  ;;  %v11681_v58 = vpop.permute.xlu0 %11680 }
0x1d1c   :  { %11276 = vadd.xlane.f32.xlu1 %v11275_v41 }
0x1d1e   :  { %v16549_v21 = vpop.eup %16548 }
0x1d1f   :  { %v11278_v0 = vsel %vm3250_vm5, %v16549_v21, 0.0 }
0x1d20   :  { %11279 = vadd.xlane.f32.xlu0 %v11278_v0 }
0x1d2d   :  { %11758 = vrot.lane.b32.xlu1 %v19655_v37, %s20949_s4 }
0x1d36   :  { %11678 = vrot.lane.b32.xlu0 %v19647_v7, %s20950_s30 }
0x1d3a   :  { %11836 = vrot.lane.b32.xlu0 %v19663_v2, %s20949_s4 }
0x1d3e   :  { %11834 = vrot.lane.b32.xlu0 %v19663_v2, %s20950_s30 }
0x1d45   :  { %v11259_v19 = vpop.xlane.xlu1 %11258 }
0x1d46   :  { %v11263_v12 = vsub.f32 %v11247_v32, %v11259_v19 }
0x1d48   :  { %v11270_v29 = vmul.f32 1.442695, %v11263_v12 }
0x1d49   :  { %v11601_v6 = vpop.permute.xlu1 %11600 }
0x1d4a   :  { %16550 = vpow2.f32 %v11270_v29 }
0x1d54   :  { %v16551_v26 = vpop.eup %16550 }
0x1d55   :  { %v11281_v59 = vsel %vm3250_vm5, %v16551_v26, 0.0 }
0x1d56   :  { %11282 = vadd.xlane.f32.xlu1 %v11281_v59 }
0x1d67   :  { %11756 = vrot.lane.b32.xlu1 %v19655_v37, %s20950_s30 }
0x1da6   :  { %v11274_v42 = vpop.xlane.xlu0 %11273 }
0x1da7   :  { %16552 = vrcp.f32 %v11274_v42 }
0x1da9   :  { %v11277_v39 = vpop.xlane.xlu1 %11276 }
0x1daa   :  { %16554 = vrcp.f32 %v11277_v39 }
0x1dad   :  { %v11280_v30 = vpop.xlane.xlu0 %11279  ;;  %v11759_v3 = vpop.permute.xlu1 %11758 }
0x1dae   :  { %16556 = vrcp.f32 %v11280_v30 }
0x1db1   :  { %v16553_v48 = vpop.eup %16552  ;;  %v11679_v11 = vpop.permute.xlu0 %11678 }
0x1db2   :  { %v11285_v32 = vmul.f32 %v16553_v48, %v16545_v63 }
0x1db4   :  { %v16555_v50 = vpop.eup %16554  ;;  %15949 = vmatmul.mubr.msk.f32.vlgmr.msra.gmra.mrb[82].mxu0 %vm3297_vm7, %v11285_v32 }
0x1db5   :  { %v11287_v61 = vmul.f32 %v16555_v50, %v16547_v44  ;;  %15957 = vmatpush3.msk.msra.mxu0 %vm3301_vm6, %v11447_v49  ;;  %15958 = vmatprep.mubr.msk.f32.mxu0 %vm16711_vm2, %v20907_v34  ;;  %v11837_v52 = vpop.permute.xlu0 %11836 }
0x1db6   :  { %15966 = vmatprep.subr.mxu0 %v20907_v34 }
0x1db7   :  { %15954 = vmatmul.mubr.msk.f32.vlgmr.msra.gmra.mrb[76].mxu1 %vm3297_vm7, %v11287_v61 }
0x1db8   :  { %v16557_v47 = vpop.eup %16556  ;;  %15962 = vmatpush3.msk.msra.mxu1 %vm3301_vm6, %v11524_v46  ;;  %15963 = vmatprep.mubr.msk.f32.mxu1 %vm16711_vm2, %v20907_v34 }
0x1db9   :  { %v11289_v28 = vmul.f32 %v16557_v47, %v16549_v21  ;;  %15971 = vmatprep.subr.mxu1 %v20907_v34  ;;  %v11835_v63 = vpop.permute.xlu0 %11834 }
0x1dbb   :  { %15959 = vmatmul.mubr.msk.f32.vlgmr.msra.gmra.mrb[84].mxu0 %vm3297_vm7, %v11289_v28 }
0x1dbc   :  { %15967 = vmatpush3.xpose.msk.msra.mxu0 %vm2811_vm4, %v11603_v8  ;;  %15968 = vmatprep.mubr.msk.f32.mxu0 %vm16711_vm2, %v20907_v34 }
0x1dbd   :  { %15976 = vmatprep.subr.mxu0 %v20907_v34 }
0x1dbf   :  { %15969 = vmatmul.mubr.msk.f32.vlgmr.msra.gmra.mrb[86].mxu0 %vm2811_vm4, %v11601_v6 }
0x1dc0   :  { %15977 = vmatpush3.xpose.msk.msra.mxu0 %vm2811_vm4, %v11759_v3  ;;  %15978 = vmatprep.mubr.msk.f32.mxu0 %vm16711_vm2, %v20907_v34 }
0x1dc1   :  { %15986 = vmatprep.subr.mxu0 %v20907_v34 }
0x1de3   :  { %v11283_v24 = vpop.xlane.xlu1 %11282 }
0x1de4   :  { %16558 = vrcp.f32 %v11283_v24 }
0x1de7   :  { %v11757_v20 = vpop.permute.xlu1 %11756 }
0x1de8   :  { %15979 = vmatmul.mubr.msk.f32.vlgmr.msra.gmra.mrb[88].mxu0 %vm2811_vm4, %v11757_v20 }
0x1de9   :  { %15988 = vmatprep.mubr.msk.f32.mxu0 %vm16711_vm2, %v20907_v34 }
0x1dee   :  { %v16559_v27 = vpop.eup %16558 }
0x1def   :  { %v11291_v40 = vmul.f32 %v16559_v27, %v16551_v26 }
0x1df1   :  { %15964 = vmatmul.mubr.msk.f32.vlgmr.msra.gmra.mrb[78].mxu1 %vm3297_vm7, %v11291_v40 }
0x1df2   :  { %15972 = vmatpush3.xpose.msk.msra.mxu1 %vm2811_vm4, %v11681_v58  ;;  %15973 = vmatprep.mubr.msk.f32.mxu1 %vm16711_vm2, %v20907_v34 }
0x1df3   :  { %15981 = vmatprep.subr.mxu1 %v20907_v34 }
0x1df5   :  { %15974 = vmatmul.mubr.msk.f32.vlgmr.msra.gmra.mrb[80].mxu1 %vm2811_vm4, %v11679_v11 }
0x1df6   :  { %15982 = vmatpush3.xpose.msk.msra.mxu1 %vm2811_vm4, %v11837_v52  ;;  %15983 = vmatprep.mubr.msk.f32.mxu1 %vm16711_vm2, %v20907_v34 }
0x1df7   :  { %15991 = vmatprep.subr.mxu1 %v20907_v34 }
0x1df9   :  { %15984 = vmatmul.mubr.msk.f32.vlgmr.msra.gmra.mrb[82].mxu1 %vm2811_vm4, %v11835_v63 }
0x1dfa   :  { %15993 = vmatprep.mubr.msk.f32.mxu1 %vm16711_vm2, %v20907_v34 }
0x1e87   :  { %v19923_v31 = vpop.f32.mrb[82].mxu0 }
0x1e88   :  { %v15950_v44 = vpop.f32.mrb[83].mxu0 }
0x1e8a   :  { %v19925_v41 = vpop.f32.mrb[76].mxu1 }
0x1e8b   :  { %v15955_v21 = vpop.f32.mrb[77].mxu1 }
0x1e8e   :  { %v19927_v0 = vpop.f32.mrb[84].mxu0 }
0x1e8f   :  { %v15960_v49 = vpop.f32.mrb[85].mxu0 }
0x1e92   :  { %v11674_v8 = vpop.f32.mrb[86].mxu0 }
0x1e93   :  { %v11912_v19 = vmul.f32 0.35355338, %v11674_v8  ;;  %v15970_v12 = vpop.f32.mrb[87].mxu0 }
0x1e95   :  { %v11916_v29 = vsel %vm3250_vm5, %v11912_v19, -inf }
0x1e96   :  { %11917 = vmax.xlane.f32.xlu1 %v11916_v29 }
0x1ebb   :  { %v11830_v26 = vpop.f32.mrb[88].mxu0 }
0x1ebc   :  { %v15980_v59 = vpop.f32.mrb[89].mxu0  ;;  %v11914_v30 = vmul.f32 0.35355338, %v11830_v26 }
0x1ebe   :  { %v11922_v47 = vsel %vm3250_vm5, %v11914_v30, -inf }
0x1ec4   :  { %v19930_v46 = vpop.f32.mrb[78].mxu1 }
0x1ec5   :  { %v15965_v58 = vpop.f32.mrb[79].mxu1 }
0x1ec8   :  { %v11752_v6 = vpop.f32.mrb[80].mxu1 }
0x1ec9   :  { %v11913_v42 = vmul.f32 0.35355338, %v11752_v6  ;;  %v15975_v39 = vpop.f32.mrb[81].mxu1 }
0x1ecb   :  { %v11919_v48 = vsel %vm3250_vm5, %v11913_v42, -inf }
0x1ecc   :  { %11920 = vmax.xlane.f32.xlu0 %v11919_v48  ;;  %v11908_v32 = vpop.f32.mrb[82].mxu1 }
0x1ecd   :  { %v11915_v50 = vmul.f32 0.35355338, %v11908_v32  ;;  %v15985_v61 = vpop.f32.mrb[83].mxu1 }
0x1ecf   :  { %v11925_v28 = vsel %vm3250_vm5, %v11915_v50, -inf }
0x1ed0   :  { %11923 = vmax.xlane.f32.xlu0 %v11922_v47  ;;  %11926 = vmax.xlane.f32.xlu1 %v11925_v28 }
0x1ee1   :  { %12037 = vrot.lane.b32.xlu1 %v19647_v7, %s20951_s25 }
0x1ee6   :  { %11960 = vrot.lane.b32.xlu0 %v19630_v56, %s20951_s25 }
0x1f23   :  { %v11918_v3 = vpop.xlane.xlu1 %11917 }
0x1f24   :  { %v11928_v24 = vsub.f32 %v11912_v19, %v11918_v3 }
0x1f26   :  { %v11932_v20 = vmul.f32 1.442695, %v11928_v24 }
0x1f28   :  { %16560 = vpow2.f32 %v11932_v20  ;;  %v15178_v20 = vld [vmem:[%s20825_s10 + $0x20] sm:$0xff] }
0x1f32   :  { %v16561_v11 = vpop.eup %16560 }
0x1f33   :  { %v11940_v27 = vsel %vm3250_vm5, %v16561_v11, 0.0 }
0x1f34   :  { %11941 = vadd.xlane.f32.xlu0 %v11940_v27 }
0x1f59   :  { %v11921_v40 = vpop.xlane.xlu0 %11920 }
0x1f5a   :  { %v11929_v52 = vsub.f32 %v11913_v42, %v11921_v40 }
0x1f5c   :  { %v11934_v63 = vmul.f32 1.442695, %v11929_v52 }
0x1f5d   :  { %v11924_v44 = vpop.xlane.xlu0 %11923  ;;  %v11927_v21 = vpop.xlane.xlu1 %11926 }
0x1f5e   :  { %16562 = vpow2.f32 %v11934_v63  ;;  %v11930_v49 = vsub.f32 %v11914_v30, %v11924_v44  ;;  %v11931_v8 = vsub.f32 %v11915_v50, %v11927_v21  ;;  %v15181_v63 = vld [vmem:[%s20825_s10 + $0x38] sm:$0xff] }
0x1f60   :  { %v11936_v7 = vmul.f32 1.442695, %v11930_v49  ;;  %v11938_v12 = vmul.f32 1.442695, %v11931_v8 }
0x1f61   :  { %v11961_v29 = vpop.permute.xlu0 %11960  ;;  %v12038_v56 = vpop.permute.xlu1 %12037 }
0x1f62   :  { %16564 = vpow2.f32 %v11936_v7  ;;  %15987 = vmatpush3.msk.msra.mxu0 %vm3301_vm6, %v11961_v29  ;;  %15992 = vmatpush3.msk.msra.mxu1 %vm3301_vm6, %v12038_v56 }
0x1f63   :  { %16566 = vpow2.f32 %v11938_v12  ;;  %15996 = vmatprep.subr.mxu0 %v20907_v34  ;;  %16001 = vmatprep.subr.mxu1 %v20907_v34 }
0x1f68   :  { %v16563_v19 = vpop.eup %16562 }
0x1f69   :  { %v11943_v26 = vsel %vm3250_vm5, %v16563_v19, 0.0 }
0x1f6a   :  { %11944 = vadd.xlane.f32.xlu1 %v11943_v26 }
0x1f6c   :  { %v16565_v59 = vpop.eup %16564 }
0x1f6d   :  { %v16567_v58 = vpop.eup %16566  ;;  %v11946_v6 = vsel %vm3250_vm5, %v16565_v59, 0.0 }
0x1f6e   :  { %11947 = vadd.xlane.f32.xlu0 %v11946_v6  ;;  %v11949_v42 = vsel %vm3250_vm5, %v16567_v58, 0.0  ;;  %vm14962_vm5 = vcmask 1024  }
0x1f6f   :  { %11950 = vadd.xlane.f32.xlu1 %v11949_v42 }
0x1f80   :  { %12114 = vrot.lane.b32.xlu1 %v19655_v37, %s20951_s25 }
0x1f84   :  { %12272 = vrot.lane.b32.xlu1 %v19843_v25, %s16723_s27  ;;  %12191 = vrot.lane.b32.xlu0 %v19663_v2, %s20951_s25 }
0x1f88   :  { %12288 = vrot.lane.b32.xlu1 %v19923_v31, %s16724_s3  ;;  %12274 = vrot.lane.b32.xlu0 %v19845_v54, %s16723_s27 }
0x1f8c   :  { %12276 = vrot.lane.b32.xlu1 %v19847_v62, %s16723_s27  ;;  %12290 = vrot.lane.b32.xlu0 %v19925_v41, %s16724_s3 }
0x1f90   :  { %12292 = vrot.lane.b32.xlu0 %v19927_v0, %s16724_s3 }
0x1fc1   :  { %v11942_v37 = vpop.xlane.xlu0 %11941 }
0x1fc2   :  { %16568 = vrcp.f32 %v11942_v37 }
0x1fcc   :  { %v16569_v25 = vpop.eup %16568 }
0x1fcd   :  { %v11953_v39 = vmul.f32 %v16569_v25, %v16561_v11  ;;  %v15179_v11 = vld [vmem:[%s20825_s10 + $0x28] sm:$0xff] }
0x1fce   :  { %v16273_v27 = vpack.c.bf16 %v15179_v11, %v15178_v20 }
0x1fcf   :  { %15989 = vmatmul.mubr.msk.f32.vlgmr.msra.gmra.mrb[90].mxu0 %vm3297_vm7, %v11953_v39 }
0x1fd0   :  { %15998 = vmatprep.mubr.msk.f32.mxu0 %vm16711_vm2, %v20907_v34 }
0x1ff7   :  { %v11945_v2 = vpop.xlane.xlu1 %11944 }
0x1ff8   :  { %16570 = vrcp.f32 %v11945_v2 }
0x1ffb   :  { %v11948_v54 = vpop.xlane.xlu0 %11947 }
0x1ffc   :  { %16572 = vrcp.f32 %v11948_v54  ;;  %v11951_v62 = vpop.xlane.xlu1 %11950 }
0x1ffd   :  { %16574 = vrcp.f32 %v11951_v62 }
0x1fff   :  { %v12192_v30 = vpop.permute.xlu0 %12191 }
0x2000   :  { %v12115_v31 = vpop.permute.xlu1 %12114 }
0x2001   :  { %15997 = vmatpush3.msk.msra.mxu0 %vm3301_vm6, %v12115_v31 }
0x2002   :  { %v16571_v41 = vpop.eup %16570  ;;  %16272 = vmatprep.subr.bf16.mxu0 %v20906_v36 }
0x2003   :  { %v11955_v0 = vmul.f32 %v16571_v41, %v16563_v19  ;;  %v12275_v56 = vpop.permute.xlu0 %12274 }
0x2004   :  { %v12273_v49 = vpop.permute.xlu1 %12272  ;;  %v12317_v2 = vsel %vm2811_vm4, %v19765_v57, %v12275_v56 }
0x2005   :  { %15994 = vmatmul.mubr.msk.f32.vlgmr.msra.gmra.mrb[84].mxu1 %vm3297_vm7, %v11955_v0  ;;  %v12316_v29 = vsel %vm2811_vm4, %v19763_v35, %v12273_v49 }
0x2006   :  { %v16573_v48 = vpop.eup %16572  ;;  %16002 = vmatpush3.msk.msra.mxu1 %vm3301_vm6, %v12192_v30  ;;  %16003 = vmatprep.mubr.msk.f32.mxu1 %vm16711_vm2, %v20907_v34  ;;  %vm14977_vm6 = vcmask 0  }
0x2007   :  { %v16575_v32 = vpop.eup %16574  ;;  %v11957_v50 = vmul.f32 %v16573_v48, %v16565_v59  ;;  %16278 = vmatprep.subr.bf16.mxu1 %v20906_v36 }
0x2008   :  { %v11959_v61 = vmul.f32 %v16575_v32, %v16567_v58  ;;  %v12289_v8 = vpop.permute.xlu1 %12288  ;;  %v12291_v58 = vpop.permute.xlu0 %12290 }
0x2009   :  { %15999 = vmatmul.mubr.msk.f32.vlgmr.msra.gmra.mrb[92].mxu0 %vm3297_vm7, %v11957_v50  ;;  %v12320_v19 = vsel %vm5661_vm8, %v12316_v29, %v12289_v8  ;;  %v12321_v62 = vsel %vm5661_vm8, %v12317_v2, %v12291_v58 }
0x200a   :  { %16004 = vmatmul.mubr.msk.f32.vlgmr.msra.gmra.mrb[86].mxu1 %vm3297_vm7, %v11959_v61  ;;  %16014 = vmatprep.mubr.msk.f32.mxu0 %vm16711_vm2, %v20907_v34 }
0x200b   :  { %16031 = vmatprep.mubr.msk.f32.mxu1 %vm16711_vm2, %v20907_v34  ;;  %16274 = vmatpush3.bf16.msra.mxu0 %v16273_v27 }
0x200c   :  { %16275 = vmatprep.subr.bf16.mxu0 %v20906_v36  ;;  %v12277_v7 = vpop.permute.xlu1 %12276  ;;  %v12293_v37 = vpop.permute.xlu0 %12292 }
0x200d   :  { %v12318_v31 = vsel %vm2811_vm4, %v19767_v51, %v12277_v7 }
0x200e   :  { %v12322_v57 = vsel %vm5661_vm8, %v12318_v31, %v12293_v37 }
0x20a2   :  { %v12033_v47 = vpop.f32.mrb[90].mxu0 }
0x20a3   :  { %v15990_v28 = vpop.f32.mrb[91].mxu0  ;;  %12304 = vrot.lane.b32.xlu1 %v12033_v47, %s16725_s28 }
0x20a7   :  { %12278 = vrot.lane.b32.xlu1 %v19849_v22, %s16723_s27 }
0x20ab   :  { %12294 = vrot.lane.b32.xlu1 %v19930_v46, %s16724_s3  ;;  %v15180_v46 = vld [vmem:[%s20825_s10 + $0x30] sm:$0xff] }
0x20ac   :  { %v16276_v21 = vpack.c.bf16 %v15181_v63, %v15180_v46 }
0x20ae   :  { %16277 = vmatpush3.bf16.msra.mxu0 %v16276_v21 }
0x20af   :  { %16284 = vmatprep.subr.bf16.mxu0 %v20906_v36 }
0x20d8   :  { %v12110_v3 = vpop.f32.mrb[84].mxu1 }
0x20d9   :  { %12306 = vrot.lane.b32.xlu0 %v12110_v3, %s16725_s28  ;;  %v15995_v24 = vpop.f32.mrb[85].mxu1 }
0x20dc   :  { %v12187_v40 = vpop.f32.mrb[92].mxu0 }
0x20dd   :  { %v12264_v52 = vpop.f32.mrb[86].mxu1  ;;  %v16000_v22 = vpop.f32.mrb[93].mxu0  ;;  %12308 = vrot.lane.b32.xlu0 %v12187_v40, %s16725_s28 }
0x20de   :  { %v16005_v44 = vpop.f32.mrb[87].mxu1 }
0x20e1   :  { %12310 = vrot.lane.b32.xlu0 %v12264_v52, %s16725_s28 }
0x2115   :  { %v12305_v12 = vpop.permute.xlu1 %12304 }
0x2116   :  { %v12324_v26 = vsel %vm5666_vm9, %v12320_v19, %v12305_v12 }
0x2117   :  { %v12344_v59 = vrot.slane %v12324_v26, %v17134_v14  ;;  %v12337_v42 = vcombine.high %v12324_v26, %v12324_v26 }
0x2119   :  { %v12352_v6 = vcombine.high %v12344_v59, %v12344_v59  ;;  %v12359_v39 = vrot.slane %v12344_v59, %v17134_v14  ;;  %v12351_v35 = vrot.slane %v12337_v42, %v17134_v14  ;;  %v12279_v54 = vpop.permute.xlu1 %12278 }
0x211a   :  { %v12319_v46 = vsel %vm2811_vm4, %v19769_v13, %v12279_v54  ;;  %vm14959_vm4 = vcmask 1041409  }
0x211b   :  { %v12373_v25 = vrot.slane %v12352_v6, %v17134_v14  ;;  %v12366_v61 = vrot.slane %v12351_v35, %v17134_v14 }
0x211d   :  { %v12493_v41 = vcombine.low %v12359_v39, %v12373_v25  ;;  %v15182_v0 = vcombine.high %v12359_v39, %v12373_v25  ;;  %v12295_v20 = vpop.permute.xlu1 %12294 }
0x211e   :  { %v12323_v49 = vsel %vm5661_vm8, %v12319_v46, %v12295_v20 }
0x211f   :  { %v12503_v47 = vrot.slane %v12493_v41, %v17134_v14  ;;  %v12510_v28 = vrot.slane %v15182_v0, %v17134_v14 }
0x2121   :  { %v12525_v21 = vcombine.low %v12503_v47, %v12510_v28 }
0x2123   :  { %v12533_v0 = vrot.slane %v12525_v21, %v17134_v14 }
0x214b   :  { %v12307_v30 = vpop.permute.xlu0 %12306 }
0x214c   :  { %v12325_v48 = vsel %vm5666_vm9, %v12321_v62, %v12307_v30 }
0x214d   :  { %v12376_v32 = vcombine.high %v12325_v48, %v12325_v48  ;;  %v12383_v50 = vrot.slane %v12325_v48, %v17134_v14 }
0x214f   :  { %v12391_v3 = vcombine.high %v12383_v50, %v12383_v50  ;;  %v12398_v24 = vrot.slane %v12383_v50, %v17134_v14  ;;  %v12309_v51 = vpop.permute.xlu0 %12308  ;;  %v12390_v11 = vrot.slane %v12376_v32, %v17134_v14 }
0x2150   :  { %v12326_v27 = vsel %vm5666_vm9, %v12322_v57, %v12309_v51 }
0x2151   :  { %v12412_v40 = vrot.slane %v12391_v3, %v17134_v14  ;;  %v12413_v52 = vcombine.high %v12398_v24, %v12398_v24  ;;  %v12495_v22 = vcombine.low %v12366_v61, %v12398_v24  ;;  %v12415_v63 = vcombine.high %v12326_v27, %v12326_v27 }
0x2152   :  { %v12422_v44 = vrot.slane %v12326_v27, %v17134_v14  ;;  %v12405_v29 = vrot.slane %v12390_v11, %v17134_v14 }
0x2153   :  { %v12414_v8 = vcombine.high %v12412_v40, %v12412_v40  ;;  %v12496_v7 = vcombine.low %v12412_v40, %v12413_v52  ;;  %v12311_v12 = vpop.permute.xlu0 %12310  ;;  %v12429_v56 = vrot.slane %v12415_v63, %v17134_v14  ;;  %v12517_v59 = vrot.slane %v12495_v22, %v17134_v14 }
0x2154   :  { %v12430_v19 = vcombine.high %v12422_v44, %v12422_v44  ;;  %v12327_v26 = vsel %vm5666_vm9, %v12323_v49, %v12311_v12  ;;  %v12437_v37 = vrot.slane %v12422_v44, %v17134_v14 }
0x2155   :  { %v12524_v13 = vrot.slane %v12496_v7, %v17134_v14  ;;  %v12454_v58 = vcombine.high %v12327_v26, %v12327_v26  ;;  %v12461_v6 = vrot.slane %v12327_v26, %v17134_v14  ;;  %v12542_v42 = vcombine.low %v12414_v8, %v12405_v29  ;;  %v15188_v8 = vld [vmem:[%s20826_s11 + $0x1] ss:$0 sm:$0xff] }
0x2156   :  { %v12451_v25 = vrot.slane %v12430_v19, %v17134_v14  ;;  %v12444_v54 = vrot.slane %v12429_v56, %v17134_v14  ;;  %v12880_v7 = vrot.slane %v15188_v8, %v17134_v14  ;;  %v12873_v56 = vcombine.high %v15188_v8, %v15188_v8 }
0x2157   :  { %v12526_v39 = vcombine.low %v12517_v59, %v12524_v13  ;;  %v12468_v2 = vrot.slane %v12454_v58, %v17134_v14  ;;  %v12469_v35 = vcombine.high %v12461_v6, %v12461_v6  ;;  %v12476_v41 = vrot.slane %v12461_v6, %v17134_v14 }
0x2158   :  { %v12543_v62 = vcombine.low %v12437_v37, %v12451_v25  ;;  %v15183_v31 = vcombine.high %v12437_v37, %v12451_v25  ;;  %v12552_v32 = vrot.slane %v12542_v42, %v17134_v14  ;;  %v12888_v12 = vcombine.high %v12880_v7, %v12880_v7 }
0x2159   :  { %v12540_v30 = vrot.slane %v12526_v39, %v17134_v14  ;;  %v12490_v48 = vrot.slane %v12469_v35, %v17134_v14  ;;  %v12491_v61 = vcombine.high %v12476_v41, %v12476_v41  ;;  %v12545_v57 = vcombine.low %v12444_v54, %v12476_v41 }
0x215a   :  { %v12559_v50 = vrot.slane %v12543_v62, %v17134_v14  ;;  %v12483_v47 = vrot.slane %v12468_v2, %v17134_v14  ;;  %v12566_v24 = vrot.slane %v15183_v31, %v17134_v14  ;;  %v20067_v13 = vrot.slane %v12880_v7, %v17134_v14 }
0x215b   :  { %v12492_v28 = vcombine.high %v12490_v48, %v12490_v48  ;;  %v12541_v3 = vcombine.low %v12533_v0, %v12540_v30  ;;  %v12573_v20 = vrot.slane %v12545_v57, %v17134_v14  ;;  %v12591_v11 = vcombine.low %v12490_v48, %v12491_v61 }
0x215c   :  { %v12574_v51 = vcombine.low %v12552_v32, %v12559_v50  ;;  %v20070_v58 = vrot.slane %v12888_v12, %v17134_v14  ;;  %v12887_v25 = vrot.slane %v12873_v56, %v17134_v14  ;;  %v20080_v31 = vcombine.high %v20067_v13, %v20067_v13 }
0x215d   :  { %v12592_v27 = vcombine.low %v12492_v28, %v12483_v47  ;;  %16015 = vmatmul.mubr.msk.f32.vlgmr.msra.gmra.mrb[94].mxu0 %vm2463_vm3, %v12541_v3  ;;  %v12575_v40 = vcombine.low %v12566_v24, %v12573_v20  ;;  %v12599_v22 = vrot.slane %v12591_v11, %v17134_v14 }
0x215e   :  { %16017 = vmatprep.mubr.msk.f32.mxu0 %vm16711_vm2, %v20907_v34  ;;  %v12582_v46 = vrot.slane %v12574_v51, %v17134_v14  ;;  %v20084_v41 = vcombine.high %v20070_v58, %v20070_v58  ;;  %v20091_v28 = vrot.slane %v12887_v25, %v17134_v14 }
0x215f   :  { %v12606_v52 = vrot.slane %v12592_v27, %v17134_v14  ;;  %v12589_v63 = vrot.slane %v12575_v40, %v17134_v14 }
0x2161   :  { %v12590_v44 = vcombine.low %v12582_v46, %v12589_v63  ;;  %v12607_v21 = vcombine.low %v12599_v22, %v12606_v52 }
0x2163   :  { %16018 = vmatmul.mubr.msk.f32.gmra.mrb[96].mxu0 %vm2463_vm3, %v12590_v44  ;;  %v12614_v49 = vrot.slane %v12607_v21, %v17134_v14 }
0x2164   :  { %16020 = vmatprep.mubr.msk.f32.mxu0 %vm16711_vm2, %v20907_v34 }
0x2167   :  { %16021 = vmatmul.mubr.msk.f32.gmra.mrb[98].mxu0 %vm2463_vm3, %v12614_v49 }
0x2168   :  { %16072 = vmatprep.mubr.msk.f32.mxu0 %vm16711_vm2, %v20907_v34 }
0x2230   :  { %v12687_v29 = vpop.f32.mrb[94].mxu0 }
0x2231   :  { %v12704_v19 = vcombine.high %v12687_v29, %v12687_v29  ;;  %v12711_v26 = vrot.slane %v12687_v29, %v17134_v14  ;;  %v16016_v59 = vpop.f32.mrb[95].mxu0 }
0x2233   :  { %v12718_v6 = vrot.slane %v12704_v19, %v17134_v14  ;;  %v12719_v42 = vcombine.high %v12711_v26, %v12711_v26  ;;  %v12727_v37 = vrot.slane %v12711_v26, %v17134_v14 }
0x2235   :  { %v12720_v39 = vcombine.high %v12718_v6, %v12718_v6  ;;  %v12734_v2 = vrot.slane %v12718_v6, %v17134_v14  ;;  %v12741_v35 = vrot.slane %v12719_v42, %v17134_v14  ;;  %v12749_v54 = vcombine.high %v12727_v37, %v12727_v37 }
0x2236   :  { %v12846_v62 = vadd.f32 %v12727_v37, %v19140_v1  ;;  %v12692_v50 = vpop.f32.mrb[96].mxu0 }
0x2237   :  { %v12748_v0 = vrot.slane %v12720_v39, %v17134_v14  ;;  %v12750_v30 = vcombine.high %v12734_v2, %v12734_v2  ;;  %v12751_v48 = vcombine.high %v12741_v35, %v12741_v35  ;;  %v12847_v32 = vadd.f32 %v12741_v35, %v19143_v9  ;;  %v16019_v47 = vpop.f32.mrb[97].mxu0  ;;  %v20952_v35 = vld [vmem:[#allocation5_spill] sm:$0xff] }
0x2238   :  { %v12848_v61 = vadd.f32 %v12749_v54, %v19146_v5  ;;  %v12850_v57 = vadd.f32 %v12734_v2, %v19152_v43  ;;  %v12753_v1 = vcombine.high %v12692_v50, %v12692_v50  ;;  %v20097_v11 = vadd.f32 %v20067_v13, %v12846_v62  ;;  %v20953_v62 = vld [vmem:[#allocation6_spill] sm:$0xff] }
0x2239   :  { %v12752_v3 = vcombine.high %v12748_v0, %v12748_v0  ;;  %v12849_v24 = vadd.f32 %v12751_v48, %v19149_v53  ;;  %v12851_v51 = vadd.f32 %v12748_v0, %v19170_v55  ;;  %v12852_v20 = vadd.f32 %v12750_v30, %v19173_v38  ;;  %v20954_v30 = vld [vmem:[#allocation7_spill] sm:$0xff] }
0x223a   :  { %v20100_v9 = vadd.f32 %v20070_v58, %v12847_v32  ;;  %v12760_v5 = vrot.slane %v12692_v50, %v17134_v14  ;;  %v12767_v43 = vrot.slane %v12753_v1, %v17134_v14  ;;  %v20106_v40 = vadd.f32 %v20080_v31, %v12848_v61  ;;  %v12697_v38 = vpop.f32.mrb[98].mxu0  ;;  %v20955_v32 = vld [vmem:[#allocation8_spill] sm:$0xff]  ;;  %v20956_v1 = vld [vmem:[#allocation10_spill] sm:$0xff] }
0x223b   :  { %v12853_v27 = vadd.f32 %v12752_v3, %v19181_v45  ;;  %v20109_v53 = vadd.f32 %v20084_v41, %v12849_v24  ;;  %v20112_v55 = vadd.f32 %v20067_v13, %v12851_v51  ;;  %v16022_v44 = vpop.f32.mrb[99].mxu0  ;;  %v20117_v21 = vadd.f32 %v20070_v58, %v12852_v20  ;;  %v20957_v51 = vld [vmem:[#allocation9_spill] sm:$0xff] }
0x223c   :  { %v12768_v52 = vcombine.high %v12760_v5, %v12760_v5  ;;  %v12769_v22 = vcombine.high %v12767_v43, %v12767_v43  ;;  %v12776_v46 = vrot.slane %v12760_v5, %v17134_v14  ;;  %v12783_v63 = vrot.slane %v12767_v43, %v17134_v14  ;;  %v20958_v43 = vld [vmem:[#allocation11_spill] sm:$0xff] }
0x223d   :  { %v20120_v45 = vadd.f32 %v20080_v31, %v12853_v27  ;;  %v12808_v49 = vrot.slane %v12697_v38, %v17134_v14  ;;  %v20124_v8 = vadd.f32 %v20091_v28, %v12850_v57  ;;  %v12961_v6 = vcombine.low %v20097_v11, %v20100_v9 }
0x223e   :  { %v12790_v7 = vrot.slane %v12768_v52, %v17134_v14  ;;  %v12797_v12 = vrot.slane %v12769_v22, %v17134_v14  ;;  %v12798_v29 = vcombine.high %v12776_v46, %v12776_v46  ;;  %v12799_v56 = vcombine.high %v12783_v63, %v12783_v63 }
0x223f   :  { %v12854_v19 = vadd.f32 %v12776_v46, %v19192_v60  ;;  %v12809_v26 = vcombine.high %v12808_v49, %v12808_v49  ;;  %v12816_v59 = vrot.slane %v12808_v49, %v17134_v14  ;;  %v12858_v39 = vadd.f32 %v12783_v63, %v19210_v4  ;;  %v20959_v46 = vld [vmem:[#allocation12_spill] sm:$0xff] }
0x2240   :  { %v12800_v42 = vcombine.high %v12790_v7, %v12790_v7  ;;  %v12801_v37 = vcombine.high %v12797_v12, %v12797_v12  ;;  %v12856_v25 = vadd.f32 %v12798_v29, %v19201_v33  ;;  %v12855_v2 = vadd.f32 %v12790_v7, %v19198_v10 }
0x2241   :  { %v12859_v54 = vadd.f32 %v12797_v12, %v20952_v35  ;;  %v12860_v0 = vadd.f32 %v12799_v56, %v20953_v62  ;;  %v20138_v60 = vadd.f32 %v20084_v41, %v12854_v19  ;;  %v12823_v33 = vrot.slane %v12809_v26, %v17134_v14 }
0x2242   :  { %v12857_v48 = vadd.f32 %v12800_v42, %v20954_v30  ;;  %v12861_v50 = vadd.f32 %v12801_v37, %v20955_v32  ;;  %v20143_v61 = vadd.f32 %v20067_v13, %v12856_v25  ;;  %v12824_v57 = vcombine.high %v12816_v59, %v12816_v59 }
0x2243   :  { %v20147_v4 = vadd.f32 %v20084_v41, %v12859_v54  ;;  %v13001_v10 = vcombine.low %v20120_v45, %v20138_v60  ;;  %v12862_v47 = vadd.f32 %v12816_v59, %v20956_v1  ;;  %v12825_v24 = vcombine.high %v12823_v33, %v12823_v33 }
0x2244   :  { %v20153_v3 = vadd.f32 %v20070_v58, %v12857_v48  ;;  %v12863_v20 = vadd.f32 %v12823_v33, %v20957_v51  ;;  %v20157_v5 = vadd.f32 %v20067_v13, %v12861_v50  ;;  %v12864_v27 = vadd.f32 %v12824_v57, %v20958_v43 }
0x2245   :  { %v20161_v38 = vadd.f32 %v20070_v58, %v12862_v47  ;;  %v12962_v52 = vcombine.low %v20106_v40, %v20109_v53  ;;  %v12969_v22 = vrot.slane %v12961_v6, %v17134_v14  ;;  %v12865_v63 = vadd.f32 %v12825_v24, %v20959_v46 }
0x2246   :  { %v20168_v44 = vadd.f32 %v20080_v31, %v12863_v20  ;;  %v12983_v49 = vrot.slane %v20124_v8, %v17134_v14  ;;  %v20173_v13 = vadd.f32 %v20091_v28, %v12855_v2  ;;  %v20176_v7 = vadd.f32 %v20084_v41, %v12864_v27 }
0x2247   :  { %v13078_v58 = vcombine.low %v20157_v5, %v20161_v38  ;;  %v12976_v12 = vrot.slane %v12962_v52, %v17134_v14  ;;  %v13000_v29 = vcombine.low %v20112_v55, %v20117_v21  ;;  %v20184_v56 = vadd.f32 %v20080_v31, %v12858_v39 }
0x2248   :  { %v13015_v19 = vrot.slane %v13001_v10, %v17134_v14  ;;  %v13022_v26 = vrot.slane %v20173_v13, %v17134_v14  ;;  %v20190_v59 = vadd.f32 %v20091_v28, %v12860_v0  ;;  %v13079_v41 = vcombine.low %v20168_v44, %v20176_v7 }
0x2249   :  { %v12984_v6 = vcombine.low %v12969_v22, %v12976_v12  ;;  %v13008_v42 = vrot.slane %v13000_v29, %v17134_v14  ;;  %v13039_v37 = vcombine.low %v20143_v61, %v20153_v3  ;;  %v12998_v31 = vrot.slane %v12983_v49, %v17134_v14 }
0x224a   :  { %v13040_v25 = vcombine.low %v20184_v56, %v20147_v4  ;;  %v20201_v39 = vadd.f32 %v20091_v28, %v12865_v63  ;;  %v13086_v62 = vrot.slane %v13078_v58, %v17134_v14  ;;  %v13061_v30 = vrot.slane %v20190_v59, %v17134_v14 }
0x224b   :  { %v12991_v2 = vrot.slane %v12984_v6, %v17134_v14  ;;  %v13023_v35 = vcombine.low %v13008_v42, %v13015_v19  ;;  %v13047_v54 = vrot.slane %v13039_v37, %v17134_v14  ;;  %v13093_v48 = vrot.slane %v13079_v41, %v17134_v14 }
0x224c   :  { %v13054_v0 = vrot.slane %v13040_v25, %v17134_v14  ;;  %v13100_v32 = vrot.slane %v20201_v39, %v17134_v14  ;;  %v13037_v33 = vrot.slane %v13022_v26, %v17134_v14  ;;  %v13076_v51 = vrot.slane %v13061_v30, %v17134_v14 }
0x224d   :  { %v12999_v50 = vcombine.low %v12991_v2, %v12998_v31  ;;  %v13030_v28 = vrot.slane %v13023_v35, %v17134_v14  ;;  %v13101_v57 = vcombine.low %v13086_v62, %v13093_v48 }
0x224e   :  { %v13062_v10 = vcombine.low %v13047_v54, %v13054_v0  ;;  %v13115_v43 = vrot.slane %v13100_v32, %v17134_v14 }
0x224f   :  { %v13121_v1 = vsel %vm881_vm1, %v12999_v50, 0.0  ;;  %v13038_v47 = vcombine.low %v13030_v28, %v13037_v33  ;;  %v13108_v20 = vrot.slane %v13101_v57, %v17134_v14 }
0x2250   :  { %13122 = vadd.xlane.f32.xlu1 %v13121_v1  ;;  %v13069_v24 = vrot.slane %v13062_v10, %v17134_v14 }
0x2251   :  { %v13124_v27 = vsel %vm881_vm1, %v13038_v47, 0.0  ;;  %v13116_v22 = vcombine.low %v13108_v20, %v13115_v43 }
0x2252   :  { %13125 = vadd.xlane.f32.xlu0 %v13124_v27  ;;  %v13077_v52 = vcombine.low %v13069_v24, %v13076_v51 }
0x2253   :  { %v13130_v63 = vsel %vm881_vm1, %v13116_v22, 0.0 }
0x2254   :  { %v13127_v46 = vsel %vm881_vm1, %v13077_v52, 0.0  ;;  %13131 = vadd.xlane.f32.xlu1 %v13130_v63 }
0x2256   :  { %13128 = vadd.xlane.f32.xlu0 %v13127_v46 }
0x22dd   :  { %v13123_v49 = vpop.xlane.xlu1 %13122 }
0x22de   :  { %v13133_v58 = vmul.f32 0.03125, %v13123_v49 }
0x22df   :  { %v13126_v12 = vpop.xlane.xlu0 %13125 }
0x22e0   :  { %v13144_v29 = vrot.slane %v13133_v58, %v17258_v15  ;;  %v13148_v19 = vrot.slane %v13133_v58, %v17261_v16  ;;  %v13152_v26 = vrot.slane %v13133_v58, %v17264_v17  ;;  %v13156_v41 = vrot.slane %v13133_v58, %v17267_v18 }
0x22e1   :  { %v13160_v6 = vrot.slane %v13133_v58, %v17270_v23  ;;  %v13134_v42 = vmul.f32 0.03125, %v13126_v12  ;;  %v13132_v2 = vpop.xlane.xlu1 %13131 }
0x22e2   :  { %v20228_v37 = vsub.f32 %v20097_v11, %v13144_v29  ;;  %v20231_v31 = vsub.f32 %v20100_v9, %v13148_v19  ;;  %v20234_v25 = vsub.f32 %v20106_v40, %v13152_v26  ;;  %v20241_v48 = vsub.f32 %v20109_v53, %v13156_v41 }
0x22e3   :  { %v13164_v35 = vrot.slane %v13134_v42, %v17258_v15  ;;  %v13168_v54 = vrot.slane %v13134_v42, %v17261_v16  ;;  %v13172_v62 = vrot.slane %v13134_v42, %v17264_v17  ;;  %v13176_v0 = vrot.slane %v13134_v42, %v17267_v18  ;;  %v13129_v30 = vpop.xlane.xlu0 %13128 }
0x22e4   :  { %v13180_v32 = vrot.slane %v13134_v42, %v17270_v23  ;;  %v13135_v9 = vmul.f32 0.03125, %v13129_v30  ;;  %v13136_v50 = vmul.f32 0.03125, %v13132_v2  ;;  %v20254_v10 = vsub.f32 %v20124_v8, %v13160_v6 }
0x22e5   :  { %v20245_v40 = vsub.f32 %v20112_v55, %v13164_v35  ;;  %v20248_v28 = vsub.f32 %v20117_v21, %v13168_v54  ;;  %v20251_v33 = vsub.f32 %v20120_v45, %v13172_v62  ;;  %v20261_v24 = vsub.f32 %v20138_v60, %v13176_v0 }
0x22e6   :  { %v13184_v57 = vrot.slane %v13135_v9, %v17258_v15  ;;  %v13188_v53 = vrot.slane %v13135_v9, %v17261_v16  ;;  %v13192_v1 = vrot.slane %v13135_v9, %v17264_v17  ;;  %v13196_v47 = vrot.slane %v13135_v9, %v17267_v18 }
0x22e7   :  { %v13204_v21 = vrot.slane %v13136_v50, %v17258_v15  ;;  %v13208_v51 = vrot.slane %v13136_v50, %v17261_v16  ;;  %v13212_v45 = vrot.slane %v13136_v50, %v17264_v17  ;;  %v13200_v8 = vrot.slane %v13135_v9, %v17270_v23 }
0x22e8   :  { %v20268_v20 = vsub.f32 %v20143_v61, %v13184_v57  ;;  %v20271_v43 = vsub.f32 %v20153_v3, %v13188_v53  ;;  %v20274_v27 = vsub.f32 %v20184_v56, %v13192_v1  ;;  %v20277_v60 = vsub.f32 %v20147_v4, %v13196_v47 }
0x22e9   :  { %v13216_v52 = vrot.slane %v13136_v50, %v17267_v18  ;;  %v13220_v22 = vrot.slane %v13136_v50, %v17270_v23  ;;  %v20282_v46 = vsub.f32 %v20157_v5, %v13204_v21  ;;  %v20285_v63 = vsub.f32 %v20161_v38, %v13208_v51 }
0x22ea   :  { %v13261_v3 = vmul.f32 %v20228_v37, %v20228_v37  ;;  %v13262_v56 = vmul.f32 %v20231_v31, %v20231_v31  ;;  %v13263_v4 = vmul.f32 %v20234_v25, %v20234_v25  ;;  %v20294_v49 = vsub.f32 %v20168_v44, %v13212_v45 }
0x22eb   :  { %v13264_v58 = vmul.f32 %v20241_v48, %v20241_v48  ;;  %v13265_v12 = vmul.f32 %v20254_v10, %v20254_v10  ;;  %v20301_v38 = vsub.f32 %v20173_v13, %v13180_v32  ;;  %v13266_v19 = vmul.f32 %v20245_v40, %v20245_v40 }
0x22ec   :  { %v13301_v29 = vcombine.low %v13261_v3, %v13262_v56  ;;  %v13267_v26 = vmul.f32 %v20248_v28, %v20248_v28  ;;  %v13268_v44 = vmul.f32 %v20251_v33, %v20251_v33  ;;  %v13269_v42 = vmul.f32 %v20261_v24, %v20261_v24 }
0x22ed   :  { %v13302_v41 = vcombine.low %v13263_v4, %v13264_v58  ;;  %v13323_v6 = vrot.slane %v13265_v12, %v17134_v14  ;;  %v13270_v13 = vmul.f32 %v20301_v38, %v20301_v38  ;;  %v20316_v54 = vsub.f32 %v20190_v59, %v13200_v8 }
0x22ee   :  { %v13309_v2 = vrot.slane %v13301_v29, %v17134_v14  ;;  %v13340_v35 = vcombine.low %v13266_v19, %v13267_v26  ;;  %v13271_v62 = vmul.f32 %v20268_v20, %v20268_v20  ;;  %v20321_v0 = vsub.f32 %v20176_v7, %v13216_v52 }
0x22ef   :  { %v13316_v30 = vrot.slane %v13302_v41, %v17134_v14  ;;  %v13338_v32 = vrot.slane %v13323_v6, %v17134_v14  ;;  %v13341_v9 = vcombine.low %v13268_v44, %v13269_v42  ;;  %v13272_v57 = vmul.f32 %v20271_v43, %v20271_v43 }
0x22f0   :  { %v13348_v50 = vrot.slane %v13340_v35, %v17134_v14  ;;  %v13273_v59 = vmul.f32 %v20274_v27, %v20274_v27  ;;  %v13274_v53 = vmul.f32 %v20277_v60, %v20277_v60  ;;  %v13362_v47 = vrot.slane %v13270_v13, %v17134_v14 }
0x22f1   :  { %v13324_v1 = vcombine.low %v13309_v2, %v13316_v30  ;;  %v13355_v7 = vrot.slane %v13341_v9, %v17134_v14  ;;  %v13275_v21 = vmul.f32 %v20316_v54, %v20316_v54  ;;  %v13379_v51 = vcombine.low %v13271_v62, %v13272_v57 }
0x22f2   :  { %v13380_v45 = vcombine.low %v13273_v59, %v13274_v53  ;;  %v20337_v8 = vsub.f32 %v20201_v39, %v13220_v22  ;;  %v13276_v52 = vmul.f32 %v20282_v46, %v20282_v46  ;;  %v13277_v58 = vmul.f32 %v20285_v63, %v20285_v63 }
0x22f3   :  { %v13331_v3 = vrot.slane %v13324_v1, %v17134_v14  ;;  %v13363_v56 = vcombine.low %v13348_v50, %v13355_v7  ;;  %v13401_v4 = vrot.slane %v13275_v21, %v17134_v14  ;;  %v13387_v12 = vrot.slane %v13379_v51, %v17134_v14 }
0x22f4   :  { %v13394_v29 = vrot.slane %v13380_v45, %v17134_v14  ;;  %v13278_v19 = vmul.f32 %v20294_v49, %v20294_v49  ;;  %v13279_v39 = vmul.f32 %v20321_v0, %v20321_v0  ;;  %v13377_v44 = vrot.slane %v13362_v47, %v17134_v14  ;;  %v15193_v45 = vld [vmem:[%s20829_s14 + $0x20] sm:$0xff] }
0x22f5   :  { %v13339_v22 = vcombine.low %v13331_v3, %v13338_v32  ;;  %v13370_v26 = vrot.slane %v13363_v56, %v17134_v14  ;;  %v13280_v41 = vmul.f32 %v20337_v8, %v20337_v8  ;;  %v13418_v42 = vcombine.low %v13276_v52, %v13277_v58  ;;  %v15194_v52 = vld [vmem:[%s20829_s14 + $0x28] sm:$0xff]  ;;  %v15195_v3 = vld [vmem:[%s20829_s14 + $0x30] sm:$0xff] }
0x22f6   :  { %v13402_v6 = vcombine.low %v13387_v12, %v13394_v29  ;;  %v13419_v13 = vcombine.low %v13278_v19, %v13279_v39  ;;  %v13416_v62 = vrot.slane %v13401_v4, %v17134_v14  ;;  %v16279_v56 = vpack.c.bf16 %v15194_v52, %v15193_v45  ;;  %v15196_v4 = vld [vmem:[%s20829_s14 + $0x38] sm:$0xff]  ;;  %v15191_v29 = vld [vmem:[%s20827_s12 + $0x1] ss:$0 sm:$0xff] }
0x22f7   :  { %v13461_v2 = vsel %vm881_vm1, %v13339_v22, 0.0  ;;  %v13378_v35 = vcombine.low %v13370_v26, %v13377_v44  ;;  %v13426_v32 = vrot.slane %v13418_v42, %v17134_v14  ;;  %v13440_v50 = vrot.slane %v13280_v41, %v17134_v14  ;;  %v15192_v22 = vld [vmem:[%s20828_s13 + $0x1] ss:$0 sm:$0xff] }
0x22f8   :  { %13462 = vadd.xlane.f32.xlu0 %v13461_v2  ;;  %v13409_v30 = vrot.slane %v13402_v6, %v17134_v14  ;;  %v13433_v9 = vrot.slane %v13419_v13, %v17134_v14  ;;  %16280 = vmatpush3.bf16.msra.mxu1 %v16279_v56  ;;  %v16282_v58 = vpack.c.bf16 %v15196_v4, %v15195_v3 }
0x22f9   :  { %v13464_v57 = vsel %vm881_vm1, %v13378_v35, 0.0  ;;  %v13455_v47 = vrot.slane %v13440_v50, %v17134_v14  ;;  %16281 = vmatprep.subr.bf16.mxu1 %v20906_v36  ;;  %v13621_v41 = vrot.slane %v15191_v29, %v17134_v14  ;;  %v13690_v13 = vrot.slane %v15192_v22, %v17134_v14 }
0x22fa   :  { %13465 = vadd.xlane.f32.xlu1 %v13464_v57  ;;  %v13417_v59 = vcombine.low %v13409_v30, %v13416_v62  ;;  %v13441_v53 = vcombine.low %v13426_v32, %v13433_v9  ;;  %v13614_v35 = vcombine.high %v15191_v29, %v15191_v29  ;;  %v13683_v9 = vcombine.high %v15192_v22, %v15192_v22 }
0x22fb   :  { %v13629_v62 = vcombine.high %v13621_v41, %v13621_v41  ;;  %v13698_v50 = vcombine.high %v13690_v13, %v13690_v13 }
0x22fc   :  { %v13467_v1 = vsel %vm881_vm1, %v13417_v59, 0.0  ;;  %v13448_v7 = vrot.slane %v13441_v53, %v17134_v14  ;;  %16283 = vmatpush3.bf16.msra.mxu1 %v16282_v58  ;;  %v13628_v59 = vrot.slane %v13614_v35, %v17134_v14  ;;  %v20390_v53 = vrot.slane %v13621_v41, %v17134_v14 }
0x22fd   :  { %13468 = vadd.xlane.f32.xlu0 %v13467_v1  ;;  %16308 = vmatprep.subr.bf16.mxu1 %v20906_v36  ;;  %v20393_v1 = vrot.slane %v13629_v62, %v17134_v14 }
0x22fe   :  { %v13456_v21 = vcombine.low %v13448_v7, %v13455_v47  ;;  %v13697_v47 = vrot.slane %v13683_v9, %v17134_v14  ;;  %v20403_v52 = vrot.slane %v13628_v59, %v17134_v14  ;;  %v20407_v3 = vcombine.high %v20390_v53, %v20390_v53 }
0x22ff   :  { %v20411_v56 = vcombine.high %v20393_v1, %v20393_v1 }
0x2300   :  { %v13470_v51 = vsel %vm881_vm1, %v13456_v21, 0.0  ;;  %v20397_v21 = vrot.slane %v13690_v13, %v17134_v14  ;;  %v20419_v22 = vrot.slane %v13697_v47, %v17134_v14 }
0x2301   :  { %13471 = vadd.xlane.f32.xlu1 %v13470_v51  ;;  %v20400_v51 = vrot.slane %v13698_v50, %v17134_v14 }
0x2385   :  { %v13463_v12 = vpop.xlane.xlu0 %13462 }
0x2386   :  { %v13473_v19 = vmul.f32 0.03125, %v13463_v12 }
0x2387   :  { %v13466_v39 = vpop.xlane.xlu1 %13465 }
0x2388   :  { %v13477_v26 = vadd.f32 1e-05, %v13473_v19  ;;  %v13474_v44 = vmul.f32 0.03125, %v13466_v39 }
0x238a   :  { %16576 = vrsqrt.f32 %v13477_v26  ;;  %v13478_v6 = vadd.f32 1e-05, %v13474_v44  ;;  %v13469_v42 = vpop.xlane.xlu0 %13468  ;;  %v20423_v26 = vcombine.high %v20397_v21, %v20397_v21  ;;  %v20427_v44 = vcombine.high %v20400_v51, %v20400_v51 }
0x238b   :  { %v13475_v2 = vmul.f32 0.03125, %v13469_v42 }
0x238c   :  { %16578 = vrsqrt.f32 %v13478_v6 }
0x238d   :  { %v13479_v30 = vadd.f32 1e-05, %v13475_v2 }
0x238e   :  { %v13472_v32 = vpop.xlane.xlu1 %13471 }
0x238f   :  { %v13476_v57 = vmul.f32 0.03125, %v13472_v32  ;;  %16580 = vrsqrt.f32 %v13479_v30 }
0x2391   :  { %v13480_v7 = vadd.f32 1e-05, %v13476_v57 }
0x2393   :  { %16582 = vrsqrt.f32 %v13480_v7 }
0x2394   :  { %v16577_v45 = vpop.eup %16576 }
0x2395   :  { %v13492_v4 = vrot.slane %v16577_v45, %v17258_v15  ;;  %v13496_v58 = vrot.slane %v16577_v45, %v17261_v16  ;;  %v13500_v12 = vrot.slane %v16577_v45, %v17264_v17  ;;  %v13504_v29 = vrot.slane %v16577_v45, %v17267_v18 }
0x2396   :  { %v16579_v19 = vpop.eup %16578  ;;  %v13508_v39 = vrot.slane %v16577_v45, %v17270_v23 }
0x2397   :  { %v13512_v41 = vrot.slane %v16579_v19, %v17258_v15  ;;  %v13516_v6 = vrot.slane %v16579_v19, %v17261_v16  ;;  %v13520_v42 = vrot.slane %v16579_v19, %v17264_v17  ;;  %v13589_v13 = vmul.f32 %v13492_v4, %v20228_v37 }
0x2398   :  { %v13590_v2 = vmul.f32 %v13496_v58, %v20231_v31  ;;  %v13591_v35 = vmul.f32 %v13500_v12, %v20234_v25  ;;  %v13592_v62 = vmul.f32 %v13504_v29, %v20241_v48  ;;  %v13593_v30 = vmul.f32 %v13508_v39, %v20254_v10 }
0x2399   :  { %v13594_v32 = vmul.f32 %v13512_v41, %v20245_v40  ;;  %v13595_v9 = vmul.f32 %v13516_v6, %v20248_v28  ;;  %v13596_v50 = vmul.f32 %v13520_v42, %v20251_v33  ;;  %v13658_v57 = vmul.f32 %v20390_v53, %v13589_v13  ;;  %v16581_v7 = vpop.eup %16580 }
0x239a   :  { %v13659_v59 = vmul.f32 %v20393_v1, %v13590_v2  ;;  %v13660_v37 = vmul.f32 %v20407_v3, %v13591_v35  ;;  %v13661_v31 = vmul.f32 %v20411_v56, %v13592_v62  ;;  %v13662_v25 = vmul.f32 %v20403_v52, %v13593_v30 }
0x239b   :  { %v13663_v48 = vmul.f32 %v20390_v53, %v13594_v32  ;;  %v13664_v10 = vmul.f32 %v20393_v1, %v13595_v9  ;;  %v13665_v40 = vmul.f32 %v20407_v3, %v13596_v50  ;;  %v13727_v28 = vadd.f32 %v20397_v21, %v13658_v57 }
0x239c   :  { %v13728_v33 = vadd.f32 %v20400_v51, %v13659_v59  ;;  %v13729_v47 = vadd.f32 %v20423_v26, %v13660_v37  ;;  %v13730_v45 = vadd.f32 %v20427_v44, %v13661_v31  ;;  %v13731_v4 = vadd.f32 %v20419_v22, %v13662_v25 }
0x239d   :  { %v13732_v58 = vadd.f32 %v20397_v21, %v13663_v48  ;;  %v13733_v12 = vadd.f32 %v20400_v51, %v13664_v10  ;;  %v13734_v29 = vadd.f32 %v20423_v26, %v13665_v40  ;;  %v13524_v39 = vrot.slane %v16579_v19, %v17267_v18  ;;  %v20457_v41 = vpop.eup %16582 }
0x239e   :  { %v13772_v6 = vcombine.low %v13727_v28, %v13728_v33  ;;  %v13773_v42 = vcombine.low %v13729_v47, %v13730_v45  ;;  %v13528_v13 = vrot.slane %v16579_v19, %v17270_v23  ;;  %v13532_v2 = vrot.slane %v16581_v7, %v17258_v15 }
0x239f   :  { %v13774_v35 = vcombine.low %v13731_v4, %v13732_v58  ;;  %v13775_v62 = vcombine.low %v13733_v12, %v13734_v29  ;;  %v13536_v30 = vrot.slane %v16581_v7, %v17261_v16  ;;  %v13540_v32 = vrot.slane %v16581_v7, %v17264_v17 }
0x23a0   :  { %v13782_v9 = vrot.slane %v13772_v6, %v17134_v14  ;;  %v13789_v50 = vrot.slane %v13773_v42, %v17134_v14  ;;  %v13544_v57 = vrot.slane %v16581_v7, %v17267_v18  ;;  %v13548_v59 = vrot.slane %v16581_v7, %v17270_v23 }
0x23a1   :  { %v13796_v37 = vrot.slane %v13774_v35, %v17134_v14  ;;  %v13803_v19 = vrot.slane %v13775_v62, %v17134_v14  ;;  %v13552_v31 = vrot.slane %v20457_v41, %v17258_v15  ;;  %v13597_v25 = vmul.f32 %v13524_v39, %v20261_v24 }
0x23a2   :  { %v13804_v48 = vcombine.low %v13782_v9, %v13789_v50  ;;  %v13598_v10 = vmul.f32 %v13528_v13, %v20301_v38  ;;  %v13599_v40 = vmul.f32 %v13532_v2, %v20268_v20  ;;  %v13600_v28 = vmul.f32 %v13536_v30, %v20271_v43 }
0x23a3   :  { %v13805_v33 = vcombine.low %v13796_v37, %v13803_v19  ;;  %v13601_v47 = vmul.f32 %v13540_v32, %v20274_v27  ;;  %v13602_v7 = vmul.f32 %v13544_v57, %v20277_v60  ;;  %v13603_v45 = vmul.f32 %v13548_v59, %v20316_v54 }
0x23a4   :  { %v13812_v4 = vrot.slane %v13804_v48, %v17134_v14  ;;  %v13604_v15 = vmul.f32 %v13552_v31, %v20282_v46  ;;  %v13666_v24 = vmul.f32 %v20411_v56, %v13597_v25  ;;  %v13667_v58 = vmul.f32 %v20403_v52, %v13598_v10 }
0x23a5   :  { %v13819_v38 = vrot.slane %v13805_v33, %v17134_v14  ;;  %v13668_v20 = vmul.f32 %v20390_v53, %v13599_v40  ;;  %v13669_v43 = vmul.f32 %v20393_v1, %v13600_v28  ;;  %v13670_v27 = vmul.f32 %v20407_v3, %v13601_v47 }
0x23a6   :  { %v13671_v60 = vmul.f32 %v20411_v56, %v13602_v7  ;;  %v13672_v54 = vmul.f32 %v20403_v52, %v13603_v45  ;;  %v13673_v12 = vmul.f32 %v20390_v53, %v13604_v15  ;;  %v13735_v46 = vadd.f32 %v20427_v44, %v13666_v24  ;;  %v15224_v15 = vld [vmem:[%s20831_s16 + $0x90] sm:$0xff]  ;;  %v15225_v24 = vld [vmem:[%s20831_s16 + $0x98] sm:$0xff] }
0x23a7   :  { %v13820_v29 = vcombine.low %v13812_v4, %v13819_v38  ;;  %v13736_v39 = vadd.f32 %v20419_v22, %v13667_v58  ;;  %v13737_v6 = vadd.f32 %v20397_v21, %v13668_v20  ;;  %v13738_v42 = vadd.f32 %v20400_v51, %v13669_v43  ;;  %v15226_v38 = vld [vmem:[%s20831_s16 + $0xa0] sm:$0xff]  ;;  %v15227_v20 = vld [vmem:[%s20831_s16 + $0xa8] sm:$0xff] }
0x23a8   :  { %v13739_v13 = vadd.f32 %v20423_v26, %v13670_v27  ;;  %v13740_v2 = vadd.f32 %v20427_v44, %v13671_v60  ;;  %v13741_v35 = vadd.f32 %v20419_v22, %v13672_v54  ;;  %v13742_v62 = vadd.f32 %v20397_v21, %v13673_v12  ;;  %v15228_v27 = vld [vmem:[%s20831_s16 + $0xb0] sm:$0xff]  ;;  %v15229_v60 = vld [vmem:[%s20831_s16 + $0xb8] sm:$0xff]  ;;  %v15230_v12 = vld [vmem:[%s20831_s16 + $0xc0] sm:$0xff] }
0x23a9   :  { %16032 = vmatmul.mubr.msk.f32.vlgmr.msra.gmra.mrb[88].mxu1 %vm2463_vm3, %v13820_v29  ;;  %v13821_v53 = vcombine.low %v13735_v46, %v13736_v39  ;;  %v13822_v30 = vcombine.low %v13737_v6, %v13738_v42  ;;  %v13556_v32 = vrot.slane %v20457_v41, %v17261_v16  ;;  %v13560_v9 = vrot.slane %v20457_v41, %v17264_v17  ;;  %v15231_v46 = vld [vmem:[%s20831_s16 + $0xc8] sm:$0xff]  ;;  %v15232_v39 = vld [vmem:[%s20831_s16 + $0xd0] sm:$0xff]  ;;  %v15233_v6 = vld [vmem:[%s20831_s16 + $0xd8] sm:$0xff] }
0x23aa   :  { %16034 = vmatprep.mubr.msk.f32.mxu1 %vm16711_vm2, %v20907_v34  ;;  %v13823_v50 = vcombine.low %v13739_v13, %v13740_v2  ;;  %v13824_v57 = vcombine.low %v13741_v35, %v13742_v62  ;;  %v13564_v59 = vrot.slane %v20457_v41, %v17267_v18  ;;  %v13568_v21 = vrot.slane %v20457_v41, %v17270_v23  ;;  %v15234_v13 = vld [vmem:[%s20831_s16 + $0xe0] sm:$0xff]  ;;  %v15235_v2 = vld [vmem:[%s20831_s16 + $0xe8] sm:$0xff]  ;;  %v15236_v62 = vld [vmem:[%s20831_s16 + $0xf0] sm:$0xff] }
0x23ab   :  { %v13831_v37 = vrot.slane %v13821_v53, %v17134_v14  ;;  %v13838_v19 = vrot.slane %v13822_v30, %v17134_v14  ;;  %v13605_v16 = vmul.f32 %v13556_v32, %v20285_v63  ;;  %v13606_v31 = vmul.f32 %v13560_v9, %v20294_v49  ;;  %v15237_v53 = vld [vmem:[%s20831_s16 + $0xf8] sm:$0xff]  ;;  %v15201_v32 = vld [vmem:[%s20830_s15 + $0x1] ss:$0 sm:$0xff] }
0x23ac   :  { %v13845_v17 = vrot.slane %v13823_v50, %v17134_v14  ;;  %v13852_v25 = vrot.slane %v13824_v57, %v17134_v14  ;;  %v13607_v48 = vmul.f32 %v13564_v59, %v20321_v0  ;;  %v13608_v10 = vmul.f32 %v13568_v21, %v20337_v8 }
0x23ad   :  { %v13853_v18 = vcombine.low %v13831_v37, %v13838_v19  ;;  %v13674_v40 = vmul.f32 %v20393_v1, %v13605_v16  ;;  %v13675_v23 = vmul.f32 %v20407_v3, %v13606_v31  ;;  %v16288_v58 = vpack.c.bf16 %v15225_v24, %v15224_v15 }
0x23ae   :  { %v13854_v41 = vcombine.low %v13845_v17, %v13852_v25  ;;  %v13676_v28 = vmul.f32 %v20411_v56, %v13607_v48  ;;  %v13677_v63 = vmul.f32 %v20403_v52, %v13608_v10  ;;  %v16291_v43 = vpack.c.bf16 %v15227_v20, %v15226_v38 }
0x23af   :  { %v13743_v49 = vadd.f32 %v20400_v51, %v13674_v40  ;;  %v13744_v33 = vadd.f32 %v20423_v26, %v13675_v23  ;;  %v13861_v47 = vrot.slane %v13853_v18, %v17134_v14  ;;  %v15223_v26 = vld [vmem:[%s20831_s16 + $0x88] sm:$0xff]  ;;  %v16294_v54 = vpack.c.bf16 %v15229_v60, %v15228_v27 }
0x23b0   :  { %v13868_v0 = vrot.slane %v13854_v41, %v17134_v14  ;;  %v13745_v8 = vadd.f32 %v20427_v44, %v13676_v28  ;;  %v13746_v7 = vadd.f32 %v20419_v22, %v13677_v63  ;;  %v15222_v22 = vld [vmem:[%s20831_s16 + $0x80] sm:$0xff]  ;;  %v16297_v29 = vpack.c.bf16 %v15231_v46, %v15230_v12 }
0x23b1   :  { %v13870_v1 = vcombine.low %v13743_v49, %v13744_v33  ;;  %v16285_v44 = vpack.c.bf16 %v15223_v26, %v15222_v22  ;;  %v16300_v42 = vpack.c.bf16 %v15233_v6, %v15232_v39  ;;  %v16303_v35 = vpack.c.bf16 %v15235_v2, %v15234_v13 }
0x23b2   :  { %v13869_v45 = vcombine.low %v13861_v47, %v13868_v0  ;;  %v13871_v3 = vcombine.low %v13745_v8, %v13746_v7  ;;  %v16306_v30 = vpack.c.bf16 %v15237_v53, %v15236_v62  ;;  %v14139_v9 = vrot.slane %v15201_v32, %v17134_v14 }
0x23b3   :  { %v13878_v4 = vrot.slane %v13870_v1, %v17134_v14  ;;  %16286 = vmatpush3.bf16.msra.mxu0 %v16285_v44  ;;  %v14132_v50 = vcombine.high %v15201_v32, %v15201_v32 }
0x23b4   :  { %16035 = vmatmul.mubr.msk.f32.gmra.mrb[90].mxu1 %vm2463_vm3, %v13869_v45  ;;  %v13885_v52 = vrot.slane %v13871_v3, %v17134_v14  ;;  %16287 = vmatprep.subr.bf16.mxu0 %v20906_v36  ;;  %v14147_v57 = vcombine.high %v14139_v9, %v14139_v9  ;;  %v20596_v37 = vrot.slane %v14139_v9, %v17134_v14 }
0x23b5   :  { %16037 = vmatprep.mubr.msk.f32.mxu1 %vm16711_vm2, %v20907_v34  ;;  %v14146_v21 = vrot.slane %v14132_v50, %v17134_v14 }
0x23b6   :  { %v13886_v51 = vcombine.low %v13878_v4, %v13885_v52  ;;  %v20599_v19 = vrot.slane %v14147_v57, %v17134_v14  ;;  %v20609_v40 = vcombine.high %v20596_v37, %v20596_v37 }
0x23b7   :  { %16289 = vmatpush3.bf16.msra.mxu0 %v16288_v58  ;;  %v20605_v18 = vrot.slane %v14146_v21, %v17134_v14 }
0x23b8   :  { %v13893_v56 = vrot.slane %v13886_v51, %v17134_v14  ;;  %16290 = vmatprep.subr.bf16.mxu0 %v20906_v36  ;;  %v20613_v23 = vcombine.high %v20599_v19, %v20599_v19 }
0x23ba   :  { %16038 = vmatmul.mubr.msk.f32.gmra.mrb[92].mxu1 %vm2463_vm3, %v13893_v56 }
0x23bb   :  { %16089 = vmatprep.mubr.msk.f32.mxu1 %vm16711_vm2, %v20907_v34  ;;  %16292 = vmatpush3.bf16.msra.mxu0 %v16291_v43 }
0x23bc   :  { %16293 = vmatprep.subr.bf16.mxu0 %v20906_v36 }
0x23bf   :  { %16295 = vmatpush3.bf16.msra.mxu0 %v16294_v54 }
0x23c0   :  { %16296 = vmatprep.subr.bf16.mxu0 %v20906_v36 }
0x23c3   :  { %16298 = vmatpush3.bf16.msra.mxu0 %v16297_v29 }
0x23c4   :  { %16299 = vmatprep.subr.bf16.mxu0 %v20906_v36 }
0x23c7   :  { %16301 = vmatpush3.bf16.msra.mxu0 %v16300_v42 }
0x23c8   :  { %16302 = vmatprep.subr.bf16.mxu0 %v20906_v36 }
0x23cb   :  { %16304 = vmatpush3.bf16.msra.mxu0 %v16303_v35 }
0x23cc   :  { %16305 = vmatprep.subr.bf16.mxu0 %v20906_v36 }
0x23cf   :  { %16307 = vmatpush3.bf16.msra.mxu0 %v16306_v30 }
0x247c   :  { %v13966_v59 = vpop.f32.mrb[88].mxu1 }
0x247d   :  { %v13983_v16 = vcombine.high %v13966_v59, %v13966_v59  ;;  %v13990_v31 = vrot.slane %v13966_v59, %v17134_v14  ;;  %v16033_v17 = vpop.f32.mrb[89].mxu1 }
0x247f   :  { %v13997_v25 = vrot.slane %v13983_v16, %v17134_v14  ;;  %v13998_v48 = vcombine.high %v13990_v31, %v13990_v31  ;;  %v14006_v10 = vrot.slane %v13990_v31, %v17134_v14 }
0x2481   :  { %v13999_v41 = vcombine.high %v13997_v25, %v13997_v25  ;;  %v14013_v28 = vrot.slane %v13997_v25, %v17134_v14  ;;  %v14020_v63 = vrot.slane %v13998_v48, %v17134_v14  ;;  %v14028_v49 = vcombine.high %v14006_v10, %v14006_v10 }
0x2482   :  { %v20618_v33 = vadd.f32 %v20596_v37, %v14006_v10 }
0x2483   :  { %v14027_v47 = vrot.slane %v13999_v41, %v17134_v14  ;;  %v14029_v0 = vcombine.high %v14013_v28, %v14013_v28  ;;  %v14030_v8 = vcombine.high %v14020_v63, %v14020_v63  ;;  %v20622_v7 = vadd.f32 %v20599_v19, %v14020_v63 }
0x2484   :  { %v20625_v1 = vadd.f32 %v20609_v40, %v14028_v49  ;;  %v20628_v45 = vadd.f32 %v20605_v18, %v14013_v28  ;;  %v15202_v3 = vmul.f32 -1.702, %v20618_v33 }
0x2485   :  { %v14031_v4 = vcombine.high %v14027_v47, %v14027_v47  ;;  %v20632_v52 = vadd.f32 %v20613_v23, %v14030_v8  ;;  %v20635_v51 = vadd.f32 %v20596_v37, %v14027_v47  ;;  %v20638_v56 = vadd.f32 %v20599_v19, %v14029_v0 }
0x2486   :  { %v15203_v22 = vmul.f32 -1.702, %v20622_v7  ;;  %v15204_v26 = vmul.f32 -1.702, %v20625_v1  ;;  %v15206_v44 = vmul.f32 -1.702, %v20628_v45 }
0x2487   :  { %v20644_v15 = vadd.f32 %v20609_v40, %v14031_v4  ;;  %v15205_v24 = vmul.f32 -1.702, %v20632_v52  ;;  %v15207_v58 = vmul.f32 -1.702, %v20635_v51  ;;  %v15208_v38 = vmul.f32 -1.702, %v20638_v56 }
0x2488   :  { %v14236_v20 = vmul.f32 1.442695, %v15202_v3  ;;  %v14238_v43 = vmul.f32 1.442695, %v15203_v22  ;;  %v14240_v27 = vmul.f32 1.442695, %v15204_v26 }
0x2489   :  { %v15209_v60 = vmul.f32 -1.702, %v20644_v15  ;;  %v14242_v54 = vmul.f32 1.442695, %v15205_v24  ;;  %v14244_v12 = vmul.f32 1.442695, %v15206_v44 }
0x248a   :  { %16584 = vpow2.f32 %v14236_v20  ;;  %v13971_v46 = vpop.f32.mrb[90].mxu1  ;;  %v14246_v29 = vmul.f32 1.442695, %v15207_v58  ;;  %v14248_v13 = vmul.f32 1.442695, %v15208_v38 }
0x248b   :  { %16586 = vpow2.f32 %v14238_v43  ;;  %v14032_v39 = vcombine.high %v13971_v46, %v13971_v46  ;;  %v14039_v6 = vrot.slane %v13971_v46, %v17134_v14  ;;  %v16036_v42 = vpop.f32.mrb[91].mxu1  ;;  %v14250_v2 = vmul.f32 1.442695, %v15209_v60 }
0x248c   :  { %16588 = vpow2.f32 %v14240_v27 }
0x248d   :  { %16590 = vpow2.f32 %v14242_v54  ;;  %v14046_v35 = vrot.slane %v14032_v39, %v17134_v14  ;;  %v14047_v62 = vcombine.high %v14039_v6, %v14039_v6  ;;  %v14055_v53 = vrot.slane %v14039_v6, %v17134_v14  ;;  %v13976_v30 = vpop.f32.mrb[92].mxu1 }
0x248e   :  { %16592 = vpow2.f32 %v14244_v12  ;;  %v14087_v32 = vrot.slane %v13976_v30, %v17134_v14  ;;  %v16039_v9 = vpop.f32.mrb[93].mxu1 }
0x248f   :  { %16594 = vpow2.f32 %v14246_v29  ;;  %v14048_v50 = vcombine.high %v14046_v35, %v14046_v35  ;;  %v14062_v57 = vrot.slane %v14046_v35, %v17134_v14  ;;  %v14069_v59 = vrot.slane %v14047_v62, %v17134_v14 }
0x2490   :  { %16596 = vpow2.f32 %v14248_v13  ;;  %v14077_v21 = vcombine.high %v14055_v53, %v14055_v53  ;;  %v20658_v17 = vadd.f32 %v20613_v23, %v14055_v53  ;;  %v14088_v41 = vcombine.high %v14087_v32, %v14087_v32 }
0x2491   :  { %16598 = vpow2.f32 %v14250_v2  ;;  %v14076_v16 = vrot.slane %v14048_v50, %v17134_v14  ;;  %v14079_v31 = vcombine.high %v14069_v59, %v14069_v59  ;;  %v14078_v25 = vcombine.high %v14062_v57, %v14062_v57 }
0x2492   :  { %v20661_v48 = vadd.f32 %v20605_v18, %v14069_v59  ;;  %v20664_v10 = vadd.f32 %v20596_v37, %v14077_v21  ;;  %v20667_v49 = vadd.f32 %v20609_v40, %v14062_v57  ;;  %v15210_v4 = vmul.f32 -1.702, %v20658_v17 }
0x2493   :  { %v14080_v63 = vcombine.high %v14076_v16, %v14076_v16  ;;  %v20670_v8 = vadd.f32 %v20599_v19, %v14079_v31  ;;  %v20673_v3 = vadd.f32 %v20613_v23, %v14076_v16  ;;  %v20677_v44 = vadd.f32 %v20605_v18, %v14078_v25 }
0x2494   :  { %v16585_v28 = vpop.eup %16584  ;;  %v15211_v24 = vmul.f32 -1.702, %v20661_v48  ;;  %v15212_v58 = vmul.f32 -1.702, %v20664_v10  ;;  %v14095_v43 = vrot.slane %v14087_v32, %v17134_v14  ;;  %v14102_v27 = vrot.slane %v14088_v41, %v17134_v14 }
0x2495   :  { %v16587_v47 = vpop.eup %16586  ;;  %v14276_v0 = vadd.f32 1.0, %v16585_v28  ;;  %v20684_v12 = vadd.f32 %v20596_v37, %v14080_v63  ;;  %v15214_v46 = vmul.f32 -1.702, %v20667_v49  ;;  %v15213_v6 = vmul.f32 -1.702, %v20670_v8 }
0x2496   :  { %v16589_v22 = vpop.eup %16588  ;;  %v14277_v26 = vadd.f32 1.0, %v16587_v47  ;;  %v15215_v42 = vmul.f32 -1.702, %v20673_v3  ;;  %v14252_v35 = vmul.f32 1.442695, %v15210_v4  ;;  %v14103_v32 = vcombine.high %v14095_v43, %v14095_v43 }
0x2497   :  { %v16591_v38 = vpop.eup %16590  ;;  %v14278_v20 = vadd.f32 1.0, %v16589_v22  ;;  %16600 = vrcp.f32 %v14276_v0  ;;  %v14254_v62 = vmul.f32 1.442695, %v15211_v24  ;;  %v14104_v37 = vcombine.high %v14102_v27, %v14102_v27 }
0x2498   :  { %v16593_v60 = vpop.eup %16592  ;;  %v14279_v54 = vadd.f32 1.0, %v16591_v38  ;;  %16602 = vrcp.f32 %v14277_v26  ;;  %v20690_v50 = vadd.f32 %v20599_v19, %v14095_v43  ;;  %v20693_v57 = vadd.f32 %v20609_v40, %v14102_v27 }
0x2499   :  { %v16595_v29 = vpop.eup %16594  ;;  %v14280_v39 = vadd.f32 1.0, %v16593_v60  ;;  %16604 = vrcp.f32 %v14278_v20  ;;  %v15216_v59 = vmul.f32 -1.702, %v20677_v44  ;;  %v14256_v21 = vmul.f32 1.442695, %v15212_v58 }
0x249a   :  { %v16597_v13 = vpop.eup %16596  ;;  %v14281_v2 = vadd.f32 1.0, %v16595_v29  ;;  %16606 = vrcp.f32 %v14279_v54  ;;  %v20697_v16 = vadd.f32 %v20613_v23, %v14103_v32  ;;  %v15217_v31 = vmul.f32 -1.702, %v20684_v12 }
0x249b   :  { %v16599_v53 = vpop.eup %16598  ;;  %v14282_v30 = vadd.f32 1.0, %v16597_v13  ;;  %16608 = vrcp.f32 %v14280_v39  ;;  %v14258_v25 = vmul.f32 1.442695, %v15213_v6  ;;  %v20701_v41 = vadd.f32 %v20605_v18, %v14104_v37 }
0x249c   :  { %v14283_v9 = vadd.f32 1.0, %v16599_v53  ;;  %16610 = vrcp.f32 %v14281_v2  ;;  %v14260_v19 = vmul.f32 1.442695, %v15214_v46  ;;  %v15218_v28 = vmul.f32 -1.702, %v20690_v50 }
0x249d   :  { %16612 = vrcp.f32 %v14282_v30  ;;  %v14262_v40 = vmul.f32 1.442695, %v15215_v42  ;;  %v15219_v63 = vmul.f32 -1.702, %v20693_v57  ;;  %v14264_v0 = vmul.f32 1.442695, %v15216_v59 }
0x249e   :  { %16614 = vrcp.f32 %v14283_v9  ;;  %v15220_v23 = vmul.f32 -1.702, %v20697_v16  ;;  %v14266_v22 = vmul.f32 1.442695, %v15217_v31  ;;  %v15221_v26 = vmul.f32 -1.702, %v20701_v41 }
0x249f   :  { %16616 = vpow2.f32 %v14252_v35  ;;  %v14268_v58 = vmul.f32 1.442695, %v15218_v28  ;;  %v14270_v43 = vmul.f32 1.442695, %v15219_v63 }
0x24a0   :  { %16618 = vpow2.f32 %v14254_v62  ;;  %v14272_v46 = vmul.f32 1.442695, %v15220_v23  ;;  %v14274_v6 = vmul.f32 1.442695, %v15221_v26 }
0x24a1   :  { %v16601_v47 = vpop.eup %16600  ;;  %16620 = vpow2.f32 %v14256_v21 }
0x24a2   :  { %v16603_v4 = vpop.eup %16602  ;;  %16622 = vpow2.f32 %v14258_v25  ;;  %v14336_v20 = vmul.f32 %v16601_v47, %v20618_v33 }
0x24a3   :  { %v16605_v18 = vpop.eup %16604  ;;  %v14337_v24 = vmul.f32 %v16603_v4, %v20622_v7  ;;  %16624 = vpow2.f32 %v14260_v19 }
0x24a4   :  { %v16607_v38 = vpop.eup %16606  ;;  %16626 = vpow2.f32 %v14262_v40  ;;  %v14338_v60 = vmul.f32 %v16605_v18, %v20625_v1 }
0x24a5   :  { %v16609_v27 = vpop.eup %16608  ;;  %v14339_v54 = vmul.f32 %v16607_v38, %v20632_v52  ;;  %16628 = vpow2.f32 %v14264_v0  ;;  %v14393_v39 = vcombine.low %v14336_v20, %v14337_v24 }
0x24a6   :  { %v16611_v29 = vpop.eup %16610  ;;  %16630 = vpow2.f32 %v14266_v22  ;;  %v14340_v7 = vmul.f32 %v16609_v27, %v20628_v45 }
0x24a7   :  { %v16613_v42 = vpop.eup %16612  ;;  %v14341_v13 = vmul.f32 %v16611_v29, %v20635_v51  ;;  %v14394_v2 = vcombine.low %v14338_v60, %v14339_v54  ;;  %16632 = vpow2.f32 %v14268_v58  ;;  %v14403_v51 = vrot.slane %v14393_v39, %v17134_v14 }
0x24a8   :  { %v16615_v33 = vpop.eup %16614  ;;  %v14342_v35 = vmul.f32 %v16613_v42, %v20638_v56  ;;  %16634 = vpow2.f32 %v14270_v43 }
0x24a9   :  { %v16617_v1 = vpop.eup %16616  ;;  %v14343_v52 = vmul.f32 %v16615_v33, %v20644_v15  ;;  %v14395_v62 = vcombine.low %v14340_v7, %v14341_v13  ;;  %v14410_v53 = vrot.slane %v14394_v2, %v17134_v14  ;;  %16636 = vpow2.f32 %v14272_v46 }
0x24aa   :  { %v16619_v30 = vpop.eup %16618  ;;  %v14284_v32 = vadd.f32 1.0, %v16617_v1  ;;  %16638 = vpow2.f32 %v14274_v6 }
0x24ab   :  { %v16621_v37 = vpop.eup %16620  ;;  %v14396_v45 = vcombine.low %v14342_v35, %v14343_v52  ;;  %v14285_v9 = vadd.f32 1.0, %v16619_v30  ;;  %v14417_v21 = vrot.slane %v14395_v62, %v17134_v14  ;;  %v14425_v25 = vcombine.low %v14403_v51, %v14410_v53 }
0x24ac   :  { %v16623_v59 = vpop.eup %16622  ;;  %v14286_v56 = vadd.f32 1.0, %v16621_v37  ;;  %16640 = vrcp.f32 %v14284_v32 }
0x24ad   :  { %v16625_v31 = vpop.eup %16624  ;;  %v14424_v15 = vrot.slane %v14396_v45, %v17134_v14  ;;  %v14287_v19 = vadd.f32 1.0, %v16623_v59  ;;  %16642 = vrcp.f32 %v14285_v9  ;;  %v14433_v18 = vrot.slane %v14425_v25, %v17134_v14 }
0x24ae   :  { %v16627_v28 = vpop.eup %16626  ;;  %v14288_v40 = vadd.f32 1.0, %v16625_v31  ;;  %16644 = vrcp.f32 %v14286_v56 }
0x24af   :  { %v16629_v63 = vpop.eup %16628  ;;  %v14426_v47 = vcombine.low %v14417_v21, %v14424_v15  ;;  %v14289_v0 = vadd.f32 1.0, %v16627_v28  ;;  %16646 = vrcp.f32 %v14287_v19 }
0x24b0   :  { %v16631_v23 = vpop.eup %16630  ;;  %v14290_v4 = vadd.f32 1.0, %v16629_v63  ;;  %16648 = vrcp.f32 %v14288_v40 }
0x24b1   :  { %v16633_v22 = vpop.eup %16632  ;;  %v14291_v26 = vadd.f32 1.0, %v16631_v23  ;;  %16650 = vrcp.f32 %v14289_v0  ;;  %v14440_v24 = vrot.slane %v14426_v47, %v17134_v14 }
0x24b2   :  { %v16635_v58 = vpop.eup %16634  ;;  %16652 = vrcp.f32 %v14290_v4  ;;  %v14292_v38 = vadd.f32 1.0, %v16633_v22 }
0x24b3   :  { %v16637_v20 = vpop.eup %16636  ;;  %16654 = vrcp.f32 %v14291_v26  ;;  %v14293_v43 = vadd.f32 1.0, %v16635_v58  ;;  %v14441_v27 = vcombine.low %v14433_v18, %v14440_v24 }
0x24b4   :  { %v16639_v60 = vpop.eup %16638  ;;  %v14294_v54 = vadd.f32 1.0, %v16637_v20  ;;  %16656 = vrcp.f32 %v14292_v38 }
0x24b5   :  { %v14295_v46 = vadd.f32 1.0, %v16639_v60  ;;  %16658 = vrcp.f32 %v14293_v43  ;;  %16073 = vmatmul.mubr.f32.vlgmr.msra.gmra.mrb[100].mxu0 %v14441_v27 }
0x24b6   :  { %v16641_v29 = vpop.eup %16640  ;;  %16660 = vrcp.f32 %v14294_v54  ;;  %16075 = vmatprep.mubr.msk.f32.mxu0 %vm16711_vm2, %v20907_v34 }
0x24b7   :  { %v16643_v39 = vpop.eup %16642  ;;  %16662 = vrcp.f32 %v14295_v46  ;;  %v14344_v13 = vmul.f32 %v16641_v29, %v20658_v17 }
0x24b8   :  { %v16645_v6 = vpop.eup %16644  ;;  %v14345_v42 = vmul.f32 %v16643_v39, %v20661_v48 }
0x24b9   :  { %v16647_v7 = vpop.eup %16646  ;;  %v14346_v33 = vmul.f32 %v16645_v6, %v20664_v10 }
0x24ba   :  { %v16649_v2 = vpop.eup %16648  ;;  %v14347_v35 = vmul.f32 %v16647_v7, %v20670_v8  ;;  %v14442_v52 = vcombine.low %v14344_v13, %v14345_v42 }
0x24bb   :  { %v16651_v1 = vpop.eup %16650  ;;  %v14348_v53 = vmul.f32 %v16649_v2, %v20667_v49 }
0x24bc   :  { %v16653_v62 = vpop.eup %16652  ;;  %v14349_v30 = vmul.f32 %v16651_v1, %v20673_v3  ;;  %v14443_v32 = vcombine.low %v14346_v33, %v14347_v35  ;;  %v14452_v8 = vrot.slane %v14442_v52, %v17134_v14 }
0x24bd   :  { %v16655_v37 = vpop.eup %16654  ;;  %v14350_v48 = vmul.f32 %v16653_v62, %v20677_v44 }
0x24be   :  { %v16657_v45 = vpop.eup %16656  ;;  %v14351_v51 = vmul.f32 %v16655_v37, %v20684_v12  ;;  %v14444_v17 = vcombine.low %v14348_v53, %v14349_v30  ;;  %v14459_v9 = vrot.slane %v14443_v32, %v17134_v14 }
0x24bf   :  { %v16659_v10 = vpop.eup %16658  ;;  %v14352_v21 = vmul.f32 %v16657_v45, %v20690_v50 }
0x24c0   :  { %v16661_v59 = vpop.eup %16660  ;;  %v14353_v49 = vmul.f32 %v16659_v10, %v20693_v57  ;;  %v14445_v56 = vcombine.low %v14350_v48, %v14351_v51  ;;  %v14466_v31 = vrot.slane %v14444_v17, %v17134_v14  ;;  %v14474_v15 = vcombine.low %v14452_v8, %v14459_v9 }
0x24c1   :  { %v16663_v3 = vpop.eup %16662  ;;  %v14354_v44 = vmul.f32 %v16661_v59, %v20697_v16 }
0x24c2   :  { %v14355_v12 = vmul.f32 %v16663_v3, %v20701_v41  ;;  %v14491_v25 = vcombine.low %v14352_v21, %v14353_v49  ;;  %v14473_v19 = vrot.slane %v14445_v56, %v17134_v14  ;;  %v14482_v63 = vrot.slane %v14474_v15, %v17134_v14  ;;  %v15239_v41 = vld [vmem:[%s20832_s17 + $0x1] ss:$0 sm:$0xff] }
0x24c3   :  { %v14682_v4 = vrot.slane %v15239_v41, %v17134_v14 }
0x24c4   :  { %v14475_v28 = vcombine.low %v14466_v31, %v14473_v19  ;;  %v14492_v40 = vcombine.low %v14354_v44, %v14355_v12  ;;  %v14499_v57 = vrot.slane %v14491_v25, %v17134_v14 }
0x24c6   :  { %v14489_v50 = vrot.slane %v14475_v28, %v17134_v14  ;;  %v14506_v47 = vrot.slane %v14492_v40, %v17134_v14 }
0x24c8   :  { %v14490_v0 = vcombine.low %v14482_v63, %v14489_v50  ;;  %v14507_v23 = vcombine.low %v14499_v57, %v14506_v47  ;;  %v14758_v63 = vld [vmem:[%s20835_s20] sm:$0xff]  ;;  %v14759_v50 = vld [vmem:[%s20835_s20 + $0x8] sm:$0xff]  ;;  %v14760_v47 = vld [vmem:[%s20835_s20 + $0x10] sm:$0xff] }
0x24c9   :  { %v16309_v57 = vpack.c.bf16 %v14759_v50, %v14758_v63 }
0x24ca   :  { %16076 = vmatmul.mubr.f32.gmra.mrb[102].mxu0 %v14490_v0  ;;  %v14514_v16 = vrot.slane %v14507_v23, %v17134_v14  ;;  %v14761_v0 = vld [vmem:[%s20835_s20 + $0x18] sm:$0xff] }
0x24cb   :  { %16078 = vmatprep.mubr.msk.f32.mxu0 %vm16711_vm2, %v20907_v34  ;;  %v14689_v34 = vrot.slane %v14682_v4, %v17134_v14  ;;  %16310 = vmatpush3.bf16.msra.mxu1 %v16309_v57  ;;  %v16312_v23 = vpack.c.bf16 %v14761_v0, %v14760_v47 }
0x24cc   :  { %16311 = vmatprep.subr.bf16.mxu1 %v20906_v36 }
0x24ce   :  { %16079 = vmatmul.mubr.f32.gmra.mrb[104].mxu0 %v14514_v16 }
0x24cf   :  { %16313 = vmatpush3.bf16.msra.mxu1 %v16312_v23 }
0x2588   :  { %v14584_v22 = vpop.f32.mrb[100].mxu0 }
0x2589   :  { %v14599_v26 = vcombine.high %v14584_v22, %v14584_v22  ;;  %v14606_v18 = vrot.slane %v14584_v22, %v17134_v14  ;;  %v16074_v24 = vpop.f32.mrb[101].mxu0 }
0x258b   :  { %v14613_v58 = vrot.slane %v14599_v26, %v17134_v14  ;;  %v14621_v38 = vrot.slane %v14606_v18, %v17134_v14 }
0x258d   :  { %v14614_v20 = vcombine.high %v14613_v58, %v14613_v58  ;;  %v14665_v43 = vadd.f32 %v14621_v38, %v20097_v11 }
0x258f   :  { %v14628_v27 = vrot.slane %v14614_v20, %v17134_v14  ;;  %v14691_v60 = vadd.f32 %v14689_v34, %v14665_v43 }
0x2591   :  { %v14698_v54 = vsel %vm14697_vm10, %v14691_v60, 0.0  ;;  %v14666_v46 = vadd.f32 %v14628_v27, %v20112_v55 }
0x2592   :  { %14699 = vadd.xlane.f32.xlu0 %v14698_v54 }
0x2593   :  { %v14692_v29 = vadd.f32 %v14689_v34, %v14666_v46 }
0x2595   :  { %v14701_v39 = vsel %vm14697_vm10, %v14692_v29, 0.0 }
0x2596   :  { %14702 = vadd.xlane.f32.xlu1 %v14701_v39 }
0x259d   :  { %v14589_v6 = vpop.f32.mrb[102].mxu0 }
0x259e   :  { %v14629_v42 = vcombine.high %v14589_v6, %v14589_v6  ;;  %v14636_v7 = vrot.slane %v14589_v6, %v17134_v14  ;;  %v16077_v13 = vpop.f32.mrb[103].mxu0 }
0x259f   :  { %v14696_v13 = vld [vmem:[%s20834_s19] sm:$0x1] }
0x25a0   :  { %v14643_v11 = vrot.slane %v14629_v42, %v17134_v14  ;;  %v14651_v2 = vrot.slane %v14636_v7, %v17134_v14 }
0x25a1   :  { %v14594_v33 = vpop.f32.mrb[104].mxu0 }
0x25a2   :  { %v14644_v35 = vcombine.high %v14643_v11, %v14643_v11  ;;  %v14659_v1 = vcombine.high %v14651_v2, %v14651_v2  ;;  %v16080_v52 = vpop.f32.mrb[105].mxu0 }
0x25a4   :  { %v14658_v55 = vrot.slane %v14644_v35, %v17134_v14  ;;  %v14667_v62 = vadd.f32 %v14659_v1, %v20143_v61 }
0x25a6   :  { %v14660_v53 = vcombine.high %v14658_v55, %v14658_v55  ;;  %v14693_v30 = vadd.f32 %v14689_v34, %v14667_v62 }
0x25a8   :  { %v14704_v32 = vsel %vm14697_vm10, %v14693_v30, 0.0  ;;  %v14668_v37 = vadd.f32 %v14660_v53, %v20157_v5 }
0x25a9   :  { %14705 = vadd.xlane.f32.xlu0 %v14704_v32 }
0x25aa   :  { %v14694_v45 = vadd.f32 %v14689_v34, %v14668_v37 }
0x25ac   :  { %v14707_v48 = vsel %vm14697_vm10, %v14694_v45, 0.0 }
0x25ad   :  { %14708 = vadd.xlane.f32.xlu1 %v14707_v48 }
0x261f   :  { %v14700_v51 = vpop.xlane.xlu0 %14699 }
0x2620   :  { %v14710_v17 = vmul.f32 0.03125, %v14700_v51 }
0x2622   :  { %v14714_v9 = vsub.f32 %v14691_v60, %v14710_v17 }
0x2623   :  { %v14703_v10 = vpop.xlane.xlu1 %14702 }
0x2624   :  { %v14711_v8 = vmul.f32 0.03125, %v14703_v10  ;;  %v14718_v59 = vmul.f32 %v14714_v9, %v14714_v9 }
0x2626   :  { %v14715_v21 = vsub.f32 %v14692_v29, %v14711_v8  ;;  %v14722_v61 = vsel %vm14697_vm10, %v14718_v59, 0.0  ;;  %v14695_v29 = vld [vmem:[%s20833_s18] sm:$0x1]  ;;  %s16726_s18 = smov [#allocation2]  }
0x2627   :  { %14723 = vadd.xlane.f32.xlu0 %v14722_v61  ;;  %s14985_s19 = sshll.u32 %s16726_s18, 4  ;;  %s14986_s19 = int_to_ptr.vmem [resolvable:$true] %s14985_s19 }
0x2628   :  { %v14719_v49 = vmul.f32 %v14715_v21, %v14715_v21  ;;  %s16684_s25 = scalar_lea.vmem %s14986_s19, 16  ;;  %s16688_s29 = scalar_lea.vmem %s14986_s19, 32 }
0x2629   :  { %p16685_p0 = scmp.ne.s32.totalorder %s14986_s19, %s16684_s25  ;;  %p16689_p1 = scmp.lt.s32.totalorder %s14986_s19, %s14986_s19 }
0x262a   :  { %v14725_v56 = vsel %vm14697_vm10, %v14719_v49, 0.0  ;;  %p16690_p2 = scmp.lt.s32.totalorder %s16688_s29, %s16684_s25 }
0x262b   :  { %14726 = vadd.xlane.f32.xlu1 %v14725_v56 }
0x262c   :  { %p16691_p3 = por %p16690_p2, %p16689_p1 }
0x262e   :  { %p16692_p4 = pnand %p16691_p3, %p16685_p0 }
0x2636   :  { %v14706_v5 = vpop.xlane.xlu0 %14705 }
0x2637   :  { %v14712_v3 = vmul.f32 0.03125, %v14706_v5 }
0x2639   :  { %v14716_v31 = vsub.f32 %v14693_v30, %v14712_v3 }
0x263a   :  { %v14709_v15 = vpop.xlane.xlu1 %14708 }
0x263b   :  { %v14713_v44 = vmul.f32 0.03125, %v14709_v15  ;;  %v14720_v12 = vmul.f32 %v14716_v31, %v14716_v31 }
0x263d   :  { %v14717_v25 = vsub.f32 %v14694_v45, %v14713_v44  ;;  %v14728_v19 = vsel %vm14697_vm10, %v14720_v12, 0.0 }
0x263e   :  { %14729 = vadd.xlane.f32.xlu0 %v14728_v19 }
0x263f   :  { %v14721_v28 = vmul.f32 %v14717_v25, %v14717_v25 }
0x2641   :  { %v14731_v40 = vsel %vm14697_vm10, %v14721_v28, 0.0 }
0x2642   :  { %14732 = vadd.xlane.f32.xlu1 %v14731_v40 }
0x26b4   :  { %v14724_v41 = vpop.xlane.xlu0 %14723 }
0x26b5   :  { %v14734_v22 = vmul.f32 0.03125, %v14724_v41 }
0x26b7   :  { %v14738_v18 = vadd.f32 1e-05, %v14734_v22 }
0x26b8   :  { %v14727_v16 = vpop.xlane.xlu1 %14726 }
0x26b9   :  { %v14735_v4 = vmul.f32 0.03125, %v14727_v16 }
0x26bb   :  { %v14739_v26 = vadd.f32 1e-05, %v14735_v4 }
0x26bd   :  { %16664 = vrsqrt.f32 %v14739_v26 }
0x26be   :  { %16666 = vrsqrt.f32 %v14738_v18 }
0x26c7   :  { %v16665_v27 = vpop.eup %16664 }
0x26c8   :  { %v16667_v60 = vpop.eup %16666  ;;  %v14747_v36 = vmul.f32 %v16665_v27, %v14715_v21 }
0x26c9   :  { %v14746_v54 = vmul.f32 %v16667_v60, %v14714_v9 }
0x26ca   :  { %v14751_v39 = vmul.f32 %v14747_v36, %v14695_v29 }
0x26cb   :  { %v14730_v24 = vpop.xlane.xlu0 %14729  ;;  %v14750_v42 = vmul.f32 %v14746_v54, %v14695_v29 }
0x26cc   :  { %v14736_v58 = vmul.f32 0.03125, %v14730_v24  ;;  %v14755_v11 = vadd.f32 %v14751_v39, %v14696_v13 }
0x26cd   :  { %v14754_v35 = vadd.f32 %v14750_v42, %v14696_v13 }
0x26ce   :  { %v14740_v38 = vadd.f32 1e-05, %v14736_v58 }
0x26cf   :  { %v14733_v34 = vpop.xlane.xlu1 %14732  ;;  %v14766_v52 = vcombine.low %v14754_v35, %v14755_v11 }
0x26d0   :  { %16668 = vrsqrt.f32 %v14740_v38  ;;  %v14737_v20 = vmul.f32 0.03125, %v14733_v34 }
0x26d1   :  { %v14774_v30 = vrot.slane %v14766_v52, %v17134_v14 }
0x26d2   :  { %v14741_v43 = vadd.f32 1e-05, %v14737_v20 }
0x26d4   :  { %16670 = vrsqrt.f32 %v14741_v43 }
0x26da   :  { %v16669_v46 = vpop.eup %16668 }
0x26db   :  { %v14748_v6 = vmul.f32 %v16669_v46, %v14716_v31 }
0x26dd   :  { %v14752_v2 = vmul.f32 %v14748_v6, %v14695_v29 }
0x26de   :  { %v16671_v7 = vpop.eup %16670 }
0x26df   :  { %v14749_v33 = vmul.f32 %v16671_v7, %v14717_v25  ;;  %v14756_v55 = vadd.f32 %v14752_v2, %v14696_v13 }
0x26e1   :  { %v14753_v1 = vmul.f32 %v14749_v33, %v14695_v29 }
0x26e3   :  { %v14757_v62 = vadd.f32 %v14753_v1, %v14696_v13 }
0x26e5   :  { %v14767_v53 = vcombine.low %v14756_v55, %v14757_v62 }
0x26e7   :  { %v14781_v32 = vrot.slane %v14767_v53, %v17134_v14 }
0x26e9   :  { %v14782_v37 = vcombine.low %v14774_v30, %v14781_v32 }
0x26eb   :  { %v14789_v45 = vrot.slane %v14782_v37, %v17134_v14 }
0x26ed   :  { %16090 = vmatmul.mubr.msk.f32.vlgmr.msra.gmra.mrb[94].mxu1 %vm2463_vm3, %v14789_v45 }
0x27c0   :  { %v14858_v48 = vpop.f32.mrb[94].mxu1 }
0x27c1   :  { %v14869_v51 = vrot.slane %v14858_v48, %v17134_v14  ;;  %v16091_v17 = vpop.f32.mrb[95].mxu1 }
0x27c3   :  { %v14870_v9 = vcombine.high %v14869_v51, %v14869_v51  ;;  %v14877_v10 = vrot.slane %v14869_v51, %v17134_v14 }
0x27c5   :  { %v14884_v8 = vrot.slane %v14870_v9, %v17134_v14  ;;  %v14885_v61 = vcombine.high %v14877_v10, %v14877_v10  ;;  %v14900_v5 = vmul.f32 %v14877_v10, %v14877_v10 }
0x27c7   :  { %v14901_v59 = vmul.f32 %v14884_v8, %v14884_v8  ;;  %v14886_v21 = vcombine.high %v14884_v8, %v14884_v8  ;;  %v14924_v31 = vmul.f32 %v14885_v61, %v14885_v61  ;;  %v14902_v15 = vsel %vm14893_vm11, %v14900_v5, 0.0 }
0x27c8   :  { %v14891_v14 = vmul.f32 %v14885_v61, %v14877_v10 }
0x27c9   :  { %v14905_v49 = vsel %vm14893_vm11, %v14901_v59, 0.0  ;;  %v14925_v56 = vmul.f32 %v14886_v21, %v14886_v21  ;;  %v14892_v44 = vmul.f32 %v14886_v21, %v14884_v8  ;;  %v14926_v12 = vsel %vm14893_vm11, %v14924_v31, 0.0 }
0x27ca   :  { %14906 = vadd.xlane.f32.xlu0 %v14905_v49  ;;  %v14894_v19 = vsel %vm14893_vm11, %v14891_v14, 0.0 }
0x27cb   :  { %v14929_v3 = vsel %vm14893_vm11, %v14925_v56, 0.0  ;;  %v14897_v25 = vsel %vm14893_vm11, %v14892_v44, 0.0 }
0x27cc   :  { %14930 = vadd.xlane.f32.xlu1 %v14929_v3 }
0x27ce   :  { %14903 = vadd.xlane.f32.xlu0 %v14902_v15 }
0x27d0   :  { %14927 = vadd.xlane.f32.xlu1 %v14926_v12 }
0x27d2   :  { %14898 = vadd.xlane.f32.xlu0 %v14897_v25 }
0x27d4   :  { %14895 = vadd.xlane.f32.xlu1 %v14894_v19 }
0x2857   :  { %v14907_v28 = vpop.xlane.xlu0 %14906 }
0x2858   :  { %16672 = vrsqrt.f32 %v14907_v28  ;;  %vm14917_vm12 = vcmp.eq.f32.partialorder %v14907_v28, inf  ;;  %v14920_v23 = vand.u32 2147483648, %v14907_v28  ;;  %vm14919_vm13 = vcmp.eq.f32.partialorder %v14907_v28, 0.0 }
0x2859   :  { %v14931_v40 = vpop.xlane.xlu1 %14930 }
0x285a   :  { %16674 = vrsqrt.f32 %v14931_v40  ;;  %vm14941_vm14 = vcmp.eq.f32.partialorder %v14931_v40, inf  ;;  %v14944_v26 = vand.u32 2147483648, %v14931_v40  ;;  %vm14943_vm15 = vcmp.eq.f32.partialorder %v14931_v40, 0.0 }
0x285b   :  { %v14904_v63 = vpop.xlane.xlu0 %14903 }
0x285c   :  { %16676 = vrsqrt.f32 %v14904_v63  ;;  %vm14910_vm0 = vcmp.eq.f32.partialorder %v14904_v63, inf  ;;  %vm14912_vm1 = vcmp.eq.f32.partialorder %v14904_v63, 0.0  ;;  %v14913_v34 = vand.u32 2147483648, %v14904_v63 }
0x285d   :  { %v14928_v50 = vpop.xlane.xlu1 %14927 }
0x285e   :  { %16678 = vrsqrt.f32 %v14928_v50  ;;  %vm14934_vm2 = vcmp.eq.f32.partialorder %v14928_v50, inf  ;;  %v14937_v54 = vand.u32 2147483648, %v14928_v50  ;;  %vm14936_vm3 = vcmp.eq.f32.partialorder %v14928_v50, 0.0 }
0x285f   :  { %v14899_v11 = vpop.xlane.xlu0 %14898 }
0x2861   :  { %v14896_v1 = vpop.xlane.xlu1 %14895 }
0x2862   :  { %v16673_v57 = vpop.eup %16672 }
0x2863   :  { %v14916_v47 = vmul.f32 %v16673_v57, %v14907_v28 }
0x2864   :  { %v16675_v0 = vpop.eup %16674 }
0x2865   :  { %v14918_v16 = vsel %vm14917_vm12, %v14907_v28, %v14916_v47  ;;  %v14940_v41 = vmul.f32 %v16675_v0, %v14931_v40 }
0x2866   :  { %v16677_v4 = vpop.eup %16676  ;;  %v14921_v22 = vsel %vm14919_vm13, %v14920_v23, %v14918_v16 }
0x2867   :  { %v14942_v18 = vsel %vm14941_vm14, %v14931_v40, %v14940_v41  ;;  %v14909_v24 = vmul.f32 %v16677_v4, %v14904_v63  ;;  %v14923_v27 = vmax.f32 %v14921_v22, 1e-08 }
0x2868   :  { %v16679_v58 = vpop.eup %16678  ;;  %v14945_v38 = vsel %vm14943_vm15, %v14944_v26, %v14942_v18 }
0x2869   :  { %v14911_v20 = vsel %vm14910_vm0, %v14904_v63, %v14909_v24  ;;  %v14933_v43 = vmul.f32 %v16679_v58, %v14928_v50  ;;  %v14947_v60 = vmax.f32 %v14945_v38, 1e-08 }
0x286a   :  { %v14914_v36 = vsel %vm14912_vm1, %v14913_v34, %v14911_v20 }
0x286b   :  { %v14935_v46 = vsel %vm14934_vm2, %v14928_v50, %v14933_v43  ;;  %v14949_v29 = vmul.f32 %v14947_v60, %v14923_v27  ;;  %v14922_v6 = vmax.f32 %v14914_v36, 1e-08 }
0x286c   :  { %v14938_v39 = vsel %vm14936_vm3, %v14937_v54, %v14935_v46 }
0x286d   :  { %16680 = vrcp.f32 %v14949_v29  ;;  %v14946_v42 = vmax.f32 %v14938_v39, 1e-08 }
0x286f   :  { %v14948_v7 = vmul.f32 %v14946_v42, %v14922_v6 }
0x2871   :  { %16682 = vrcp.f32 %v14948_v7 }
0x2877   :  { %v16681_v13 = vpop.eup %16680 }
0x2878   :  { %v14953_v2 = vmul.f32 %v16681_v13, %v14899_v11 }
0x287a   :  { %v14955_v33 = vsub.f32 1.0, %v14953_v2 }
0x287b   :  { %v16683_v35 = vpop.eup %16682 }
0x287c   :  { %v14952_v52 = vmul.f32 %v16683_v35, %v14896_v1  ;;  %v14958_v55 = vrot.slane %v14955_v33, 7 }
0x287e   :  { %v14954_v62 = vsub.f32 1.0, %v14952_v52 }
0x2880   :  { %v14960_v53 = vsel %vm14959_vm4, %v14958_v55, %v14954_v62 }
0x2881   :  { %v14963_v30 = vsel %vm14962_vm5, %v14960_v53, 0.0 }
0x2882   :  { %14964 = vadd.xlane.f32.xlu0 %v14963_v30 }
0x290f   :  { %v14965_v32 = vpop.xlane.xlu0 %14964 }
0x2910   :  { %v14966_v37 = vrot.slane %v14965_v32, 4 }
0x2912   :  { %v14967_v45 = vadd.f32 %v14966_v37, %v14965_v32 }
0x2914   :  { %v14968_v48 = vrot.slane %v14967_v45, 2 }
0x2916   :  { %v14969_v51 = vadd.f32 %v14968_v48, %v14967_v45 }
0x2918   :  { %v14970_v17 = vrot.slane %v14969_v51, 1 }
0x291a   :  { %v14971_v9 = vadd.f32 %v14970_v17, %v14969_v51 }
0x291c   :  { %16314 = vpush %v14971_v9 }
0x294d   :  { %s16315_s4 = spop %16314 }
0x294e   :  { %s14975_s30 = smul.f32 0.5, %s16315_s4 }
0x2950   :  { %v14976_v10 = vstv %s14975_s30 }
0x2951   :  { %14978 = vst.msk [vmem:[#allocation2] sm:$0x1] %vm14977_vm6, %v14976_v10 }
0x2952   :  { %16695 = shalt.err (!%p16692_p4)
}
0x2953   :  { %s16696_s14 = scalar_lea.hbm %s20836_s21, 16 }
0x2954   :  { %p16697_p5 = scmp.ne.s32.totalorder %s20836_s21, %s16696_s14  ;;  %p16700_p6 = scmp.lt.u32.totalorder %s16696_s14, %s20836_s21 }
0x2956   :  { %p16702_p7 = pnand %p16700_p6, %p16697_p5 }
0x2958   :  { %16705 = shalt.err (!%p16702_p7)
}
0x2959   :  { %14988 = dma.vmem_to_hbm [thread:$0]  %s14986_s19, 16, %s20836_s21, [#allocation3]  }
0x295a   :  { %16706 = dma.done.wait [#allocation3], 16  }
0x295b   :  { %16707 = vsyncadd [#allocation3], 4294967280 }
0x295c   :  { %14992 = vsyncpa [#allocation3], 1 }

</bundles_post_ra>
